<compile_context>
chip_gen: v6e
topology: v6e:2x2x1
jax: 0.10.0
libtpu: 0.0.40
codegen_flags: <defaults>
</compile_context>

<pallas_src>
import functools

import jax
import jax.numpy as jnp
from jax.experimental import pallas as pl
from jax.experimental.pallas import tpu as pltpu

C_PAD = 128  # lane-dense channel padding


def round_up(x, m):
    return (x + m - 1) // m * m


# ----------------------------- Pallas kernels ------------------------------

def _matmul_kernel(a_ref, w_ref, b_ref, o_ref, *, apply_relu):
    # One M-tile: out = [relu](A @ W + b), bf16 inputs, f32 accumulation.
    acc = jnp.dot(a_ref[...], w_ref[...], preferred_element_type=jnp.float32)
    acc = acc + b_ref[...]                      # (1, N) bias broadcasts over rows
    if apply_relu:
        acc = jnp.maximum(acc, 0.0)
    o_ref[...] = acc.astype(o_ref.dtype)


def matmul_bias(a, w, b2, *, apply_relu, tile_m=512):
    """a: [M, K] float, w: [K, N] bf16 (N % 128 == 0), b2: [1, N] f32 -> [M, N] f32.

    Tiled over rows of A with a parallel grid; K and N kept as full blocks
    (K <= 2048 here, so no accumulator is needed).
    """
    M, K = a.shape
    K2, N = w.shape
    assert K == K2 and N % 128 == 0

    tm = min(tile_m, round_up(M, 16))           # multiple of 16 for bf16 sublanes
    m_pad = round_up(M, tm)

    a = a.astype(jnp.bfloat16)
    if m_pad != M:
        a = jnp.pad(a, ((0, m_pad - M), (0, 0)))

    grid = (m_pad // tm,)
    flops = 2 * m_pad * K * N
    bytes_accessed = m_pad * K * 2 + K * N * 2 + m_pad * N * 4 + N * 4

    out = pl.pallas_call(
        functools.partial(_matmul_kernel, apply_relu=apply_relu),
        out_shape=jax.ShapeDtypeStruct((m_pad, N), jnp.float32),
        grid=grid,
        in_specs=[
            pl.BlockSpec((tm, K), lambda i: (i, 0)),   # A: tiled over M
            pl.BlockSpec((K, N), lambda i: (0, 0)),    # W: resident
            pl.BlockSpec((1, N), lambda i: (0, 0)),    # bias
        ],
        out_specs=pl.BlockSpec((tm, N), lambda i: (i, 0)),
        compiler_params=pltpu.CompilerParams(
            dimension_semantics=("parallel",),
            vmem_limit_bytes=32 * 1024 * 1024,
        ),
        cost_estimate=pl.CostEstimate(
            flops=flops, transcendentals=0, bytes_accessed=bytes_accessed),
    )(a, w, b2)

    if m_pad != M:
        out = out[:M]
    return out


def _maxpool2x2_kernel(x_ref, o_ref):
    # x_ref: [1, H, W, C]; o_ref: [1, H//2, W//2, C].  C = 128 lanes (dense).
    _, H, W, _ = x_ref.shape
    for oy in range(H // 2):
        # pool along H: elementwise max of two full image rows
        r = jnp.maximum(x_ref[0, 2 * oy], x_ref[0, 2 * oy + 1])        # [W, C]
        # pool along W: max of adjacent sublane pairs (small static unroll)
        for ox in range(W // 2):
            lo = r[2 * ox: 2 * ox + 1]                                  # [1, C]
            hi = r[2 * ox + 1: 2 * ox + 2]                              # [1, C]
            o_ref[0, oy, ox: ox + 1, :] = jnp.maximum(lo, hi)


def maxpool_2x2(x):
    """x: [B, H, W, C] NHWC (C = 128) -> [B, H//2, W//2, C], one fused kernel."""
    B, H, W, C = x.shape
    return pl.pallas_call(
        _maxpool2x2_kernel,
        out_shape=jax.ShapeDtypeStruct((B, H // 2, W // 2, C), x.dtype),
        grid=(B,),
        in_specs=[pl.BlockSpec((1, H, W, C), lambda b: (b, 0, 0, 0))],
        out_specs=pl.BlockSpec((1, H // 2, W // 2, C), lambda b: (b, 0, 0, 0)),
        compiler_params=pltpu.CompilerParams(
            dimension_semantics=("parallel",),
            vmem_limit_bytes=32 * 1024 * 1024,
        ),
    )(x)


# ------------------------------ JAX glue -----------------------------------

def im2col(x, kh, kw):
    """x: [B, H, W, C] -> [B, OH, OW, C*kh*kw], flattened in (C, kh, kw) order
    (matches PyTorch conv-weight flattening)."""
    B, H, W, C = x.shape
    oh, ow = H - kh + 1, W - kw + 1
    cols = []
    for i in range(kh):
        for j in range(kw):
            cols.append(x[:, i:i + oh, j:j + ow, :])
    p = jnp.stack(cols, axis=-1)                 # [B, oh, ow, C, kh*kw]
    return p.reshape(B, oh, ow, C * kh * kw)


def prepare_params(p, num_classes):
    """One-time weight prep: transpose, pad output channels to 128 lanes,
    pre-permute fc1 into NHWC-flattened order, cast matmul operands to bf16."""
    f32 = jnp.float32

    def pad_last(x, target):
        pad = target - x.shape[-1]
        return jnp.pad(x, [(0, 0)] * (x.ndim - 1) + [(0, pad)]) if pad else x

    # conv1: [20,1,5,5] -> [25, 128]
    w1 = pad_last(p["w1"].astype(f32).reshape(20, 25).T, C_PAD).astype(jnp.bfloat16)
    b1 = pad_last(p["b1"].astype(f32), C_PAD).reshape(1, C_PAD)
    # conv2: [50,20,5,5] -> [500, 128]
    w2 = pad_last(p["w2"].astype(f32).reshape(50, 500).T, C_PAD).astype(jnp.bfloat16)
    b2 = pad_last(p["b2"].astype(f32), C_PAD).reshape(1, C_PAD)
    # fc1: [500, 800] -> permuted to NHWC-flattened input order, padded -> [2048, 512]
    wfc1 = p["wfc1"].astype(f32).T.reshape(50, 4, 4, 500)        # [c, h, w, n]
    wfc1 = jnp.transpose(wfc1, (1, 2, 0, 3))                     # [h, w, c, n]
    wfc1 = jnp.pad(wfc1, ((0, 0), (0, 0), (0, C_PAD - 50), (0, 512 - 500)))
    wfc1 = wfc1.reshape(4 * 4 * C_PAD, 512).astype(jnp.bfloat16)
    bfc1 = jnp.pad(p["bfc1"].astype(f32), (0, 512 - 500)).reshape(1, 512)
    # fc2: [nc, 500] -> [512, 128]
    n2 = round_up(num_classes, 128)
    wfc2 = jnp.pad(p["wfc2"].astype(f32).T,
                   ((0, 512 - 500), (0, n2 - num_classes))).astype(jnp.bfloat16)
    bfc2 = jnp.pad(p["bfc2"].astype(f32), (0, n2 - num_classes)).reshape(1, n2)

    return dict(w1=w1, b1=b1, w2=w2, b2=b2,
                wfc1=wfc1, bfc1=bfc1, wfc2=wfc2, bfc2=bfc2)


def cnn_forward(x_nchw, p, num_classes):
    B = x_nchw.shape[0]
    x = jnp.transpose(x_nchw, (0, 2, 3, 1))                          # [B,28,28,1]

    # conv1 + relu (padded to 128 output channels)
    a1 = im2col(x, 5, 5).reshape(B * 24 * 24, 25)
    y1 = matmul_bias(a1, p["w1"], p["b1"], apply_relu=True)          # [B*576,128]
    y1 = maxpool_2x2(y1.reshape(B, 24, 24, C_PAD))                   # [B,12,12,128]

    # conv2 + relu (real input channels are the first 20; padded ones are 0)
    a2 = im2col(y1[..., :20], 5, 5).reshape(B * 8 * 8, 500)
    y2 = matmul_bias(a2, p["w2"], p["b2"], apply_relu=True)          # [B*64,128]
    y2 = maxpool_2x2(y2.reshape(B, 8, 8, C_PAD))                     # [B,4,4,128]

    # fc1 / fc2 — fc1 weight is pre-permuted to NHWC-flattened order, so the
    # PyTorch (C,H,W) view is matched without any activation transpose.
    f = y2.reshape(B, 4 * 4 * C_PAD)                                 # [B,2048]
    h = matmul_bias(f, p["wfc1"], p["bfc1"], apply_relu=True)        # [B,512]
    o = matmul_bias(h, p["wfc2"], p["bfc2"], apply_relu=False)       # [B,128]
    return o[:, :num_classes]


# ----------------------- pure-JAX reference (for check) --------------------

def cnn_forward_ref(x_nchw, params):
    x = jnp.transpose(x_nchw, (0, 2, 3, 1))

    def conv(x, w, b):
        Cout, Cin, KH, KW = w.shape
        B, H, W, C = x.shape
        oh, ow = H - KH + 1, W - KW + 1
        a = im2col(x, KH, KW).reshape(B * oh * ow, Cin * KH * KW)
        out = a @ w.reshape(Cout, -1).T + b
        return jnp.maximum(out, 0.0).reshape(B, oh, ow, Cout)

    def pool(x):
        return jnp.maximum(
            jnp.maximum(x[:, 0::2, 0::2, :], x[:, 0::2, 1::2, :]),
            jnp.maximum(x[:, 1::2, 0::2, :], x[:, 1::2, 1::2, :]))

    x = pool(conv(x, params["w1"], params["b1"]))
    x = pool(conv(x, params["w2"], params["b2"]))
    B = x.shape[0]
    x = jnp.transpose(x, (0, 3, 1, 2)).reshape(B, 4 * 4 * 50)
    x = jnp.maximum(x @ params["wfc1"].T + params["bfc1"], 0.0)
    return x @ params["wfc2"].T + params["bfc2"]


# --------------------------------- main -------------------------------------

def init_params(key, num_classes):
    ks = jax.random.split(key, 8)

    def u(k, shape, fan_in):
        bound = 1.0 / (fan_in ** 0.5)
        return jax.random.uniform(k, shape, jnp.float32, -bound, bound)

    return {
        "w1": u(ks[0], (20, 1, 5, 5), 1 * 5 * 5),
        "b1": u(ks[1], (20,), 1 * 5 * 5),
        "w2": u(ks[2], (50, 20, 5, 5), 20 * 5 * 5),
        "b2": u(ks[3], (50,), 20 * 5 * 5),
        "wfc1": u(ks[4], (500, 4 * 4 * 50), 4 * 4 * 50),
        "bfc1": u(ks[5], (500,), 4 * 4 * 50),
        "wfc2": u(ks[6], (num_classes, 500), 500),
        "bfc2": u(ks[7], (num_classes,), 500),
    }


if __name__ == "__main__":
    num_classes = 10
    batch = 2
    key = jax.random.PRNGKey(0)
    k_params, k_x = jax.random.split(key)
    raw_params = init_params(k_params, num_classes)
    params = prepare_params(raw_params, num_classes)       # one-time weight prep
    # Spatial size 28 is dictated by the module (28 -> 24 -> 12 -> 8 -> 4 = 4*4*50).
    x = jax.random.normal(k_x, (batch, 1, 28, 28), dtype=jnp.float32)

    fwd = jax.jit(lambda xx, pp: cnn_forward(xx, pp, num_classes))
    out = jax.block_until_ready(fwd(x, params))
    assert out.shape == (batch, num_classes), out.shape

    ref = jax.block_until_ready(cnn_forward_ref(x, raw_params))
    max_err = float(jnp.max(jnp.abs(out - ref)))
    assert jnp.allclose(out, ref, atol=3e-2, rtol=3e-2), max_err

    print("KERNEL_OK")
</pallas_src>

<mosaic_0001>
module attributes {stable_mosaic.version = 11 : i64} {
  func.func @_matmul_kernel(%arg0: i32, %arg1: memref<512x25xbf16, #tpu.memory_space<vmem>>, %arg2: memref<25x128xbf16, #tpu.memory_space<vmem>>, %arg3: memref<1x128xf32, #tpu.memory_space<vmem>>, %arg4: memref<512x128xf32, #tpu.memory_space<vmem>>) attributes {dimension_semantics = [#tpu.dimension_semantics<parallel>], iteration_bounds = array<i64: 3>, scalar_prefetch = 0 : i64, scratch_operands = 0 : i64, tpu.core_type = #tpu.core_type<tc>, window_params = [{transform_indices = @transform_0, window_bounds = array<i64: 512, 25>}, {pipeline_mode = #tpu.pipeline_mode<synchronous>, transform_indices = @transform_1, window_bounds = array<i64: 25, 128>}, {pipeline_mode = #tpu.pipeline_mode<synchronous>, transform_indices = @transform_2, window_bounds = array<i64: 1, 128>}, {transform_indices = @transform_3, window_bounds = array<i64: 512, 128>}]} {
    %c0 = arith.constant 0 : index
    %c0_0 = arith.constant 0 : index
    %0 = vector.load %arg1[%c0, %c0_0] : memref<512x25xbf16, #tpu.memory_space<vmem>>, vector<512x25xbf16>
    %c0_1 = arith.constant 0 : index
    %c0_2 = arith.constant 0 : index
    %1 = vector.load %arg2[%c0_1, %c0_2] : memref<25x128xbf16, #tpu.memory_space<vmem>>, vector<25x128xbf16>
    %cst = arith.constant dense<0.000000e+00> : vector<512x128xf32>
    %2 = tpu.matmul %0, %1, %cst {dimension_numbers = #tpu.dot_dimension_numbers<[1], [0], [0], [1], [0, 0, 1, 1], [], []>} : vector<512x25xbf16>, vector<25x128xbf16>, vector<512x128xf32> -> vector<512x128xf32>
    %c0_3 = arith.constant 0 : index
    %c0_4 = arith.constant 0 : index
    %3 = vector.load %arg3[%c0_3, %c0_4] : memref<1x128xf32, #tpu.memory_space<vmem>>, vector<1x128xf32>
    %4 = vector.broadcast %3 : vector<1x128xf32> to vector<512x128xf32>
    %5 = arith.addf %2, %4 : vector<512x128xf32>
    %cst_5 = arith.constant 0.000000e+00 : f32
    %6 = vector.broadcast %cst_5 : f32 to vector<512x128xf32>
    %7 = arith.maximumf %5, %6 : vector<512x128xf32>
    %c0_6 = arith.constant 0 : index
    %c0_7 = arith.constant 0 : index
    %8 = vector.load %arg4[%c0_6, %c0_7] : memref<512x128xf32, #tpu.memory_space<vmem>>, vector<512x128xf32>
    tpu.vector_store %arg4[%c0_6, %c0_7], %7 {strides = array<i32>} : memref<512x128xf32, #tpu.memory_space<vmem>>, vector<512x128xf32>,
    return
  }
  func.func @transform_0(%arg0: i32) -> (i32, i32) {
    %c0_i32 = arith.constant 0 : i32
    %c0_i32_0 = arith.constant 0 : i32
    return %arg0, %c0_i32 : i32, i32
  }
  func.func @transform_1(%arg0: i32) -> (i32, i32) {
    %c0_i32 = arith.constant 0 : i32
    %c0_i32_0 = arith.constant 0 : i32
    %c0_i32_1 = arith.constant 0 : i32
    return %c0_i32, %c0_i32_0 : i32, i32
  }
  func.func @transform_2(%arg0: i32) -> (i32, i32) {
    %c0_i32 = arith.constant 0 : i32
    %c0_i32_0 = arith.constant 0 : i32
    %c0_i32_1 = arith.constant 0 : i32
    return %c0_i32, %c0_i32_0 : i32, i32
  }
  func.func @transform_3(%arg0: i32) -> (i32, i32) {
    %c0_i32 = arith.constant 0 : i32
    %c0_i32_0 = arith.constant 0 : i32
    return %arg0, %c0_i32 : i32, i32
  }
}

module attributes {stable_mosaic.version = 11 : i64} {
  func.func @_maxpool2x2_kernel(%arg0: i32, %arg1: memref<1x24x24x128xf32, #tpu.memory_space<vmem>>, %arg2: memref<1x12x12x128xf32, #tpu.memory_space<vmem>>) attributes {dimension_semantics = [#tpu.dimension_semantics<parallel>], iteration_bounds = array<i64: 2>, scalar_prefetch = 0 : i64, scratch_operands = 0 : i64, tpu.core_type = #tpu.core_type<tc>, window_params = [{transform_indices = @transform_0, window_bounds = array<i64: 1, 24, 24, 128>}, {transform_indices = @transform_1, window_bounds = array<i64: 1, 12, 12, 128>}]} {
    %c0 = arith.constant 0 : index
    %c0_0 = arith.constant 0 : index
    %c0_1 = arith.constant 0 : index
    %c0_2 = arith.constant 0 : index
    %0 = vector.load %arg1[%c0, %c0_0, %c0_1, %c0_2] : memref<1x24x24x128xf32, #tpu.memory_space<vmem>>, vector<1x1x24x128xf32>
    %1 = vector.shape_cast %0 : vector<1x1x24x128xf32> to vector<24x128xf32>
    %c0_3 = arith.constant 0 : index
    %c1 = arith.constant 1 : index
    %c0_4 = arith.constant 0 : index
    %c0_5 = arith.constant 0 : index
    %2 = vector.load %arg1[%c0_3, %c1, %c0_4, %c0_5] : memref<1x24x24x128xf32, #tpu.memory_space<vmem>>, vector<1x1x24x128xf32>
    %3 = vector.shape_cast %2 : vector<1x1x24x128xf32> to vector<24x128xf32>
    %4 = arith.maximumf %1, %3 : vector<24x128xf32>
    %5 = vector.extract_strided_slice %4 {offsets = [0, 0], sizes = [1, 128], strides = [1, 1]} : vector<24x128xf32> to vector<1x128xf32>
    %6 = vector.extract_strided_slice %4 {offsets = [1, 0], sizes = [1, 128], strides = [1, 1]} : vector<24x128xf32> to vector<1x128xf32>
    %7 = arith.maximumf %5, %6 : vector<1x128xf32>
    %c0_6 = arith.constant 0 : index
    %c0_7 = arith.constant 0 : index
    %c0_8 = arith.constant 0 : index
    %c0_9 = arith.constant 0 : index
    %8 = vector.load %arg2[%c0_6, %c0_7, %c0_8, %c0_9] : memref<1x12x12x128xf32, #tpu.memory_space<vmem>>, vector<1x1x1x128xf32>
    %9 = vector.shape_cast %8 : vector<1x1x1x128xf32> to vector<1x128xf32>
    %10 = vector.shape_cast %7 : vector<1x128xf32> to vector<1x1x1x128xf32>
    tpu.vector_store %arg2[%c0_6, %c0_7, %c0_8, %c0_9], %10 {strides = array<i32>} : memref<1x12x12x128xf32, #tpu.memory_space<vmem>>, vector<1x1x1x128xf32>,
    %11 = vector.extract_strided_slice %4 {offsets = [2, 0], sizes = [1, 128], strides = [1, 1]} : vector<24x128xf32> to vector<1x128xf32>
    %12 = vector.extract_strided_slice %4 {offsets = [3, 0], sizes = [1, 128], strides = [1, 1]} : vector<24x128xf32> to vector<1x128xf32>
    %13 = arith.maximumf %11, %12 : vector<1x128xf32>
    %c0_10 = arith.constant 0 : index
    %c0_11 = arith.constant 0 : index
    %c1_12 = arith.constant 1 : index
    %c0_13 = arith.constant 0 : index
    %14 = vector.load %arg2[%c0_10, %c0_11, %c1_12, %c0_13] : memref<1x12x12x128xf32, #tpu.memory_space<vmem>>, vector<1x1x1x128xf32>
    %15 = vector.shape_cast %14 : vector<1x1x1x128xf32> to vector<1x128xf32>
    %16 = vector.shape_cast %13 : vector<1x128xf32> to vector<1x1x1x128xf32>
    tpu.vector_store %arg2[%c0_10, %c0_11, %c1_12, %c0_13], %16 {strides = array<i32>} : memref<1x12x12x128xf32, #tpu.memory_space<vmem>>, vector<1x1x1x128xf32>,
    %17 = vector.extract_strided_slice %4 {offsets = [4, 0], sizes = [1, 128], strides = [1, 1]} : vector<24x128xf32> to vector<1x128xf32>
    %18 = vector.extract_strided_slice %4 {offsets = [5, 0], sizes = [1, 128], strides = [1, 1]} : vector<24x128xf32> to vector<1x128xf32>
    %19 = arith.maximumf %17, %18 : vector<1x128xf32>
    %c0_14 = arith.constant 0 : index
    %c0_15 = arith.constant 0 : index
    %c2 = arith.constant 2 : index
    %c0_16 = arith.constant 0 : index
    %20 = vector.load %arg2[%c0_14, %c0_15, %c2, %c0_16] : memref<1x12x12x128xf32, #tpu.memory_space<vmem>>, vector<1x1x1x128xf32>
    %21 = vector.shape_cast %20 : vector<1x1x1x128xf32> to vector<1x128xf32>
    %22 = vector.shape_cast %19 : vector<1x128xf32> to vector<1x1x1x128xf32>
    tpu.vector_store %arg2[%c0_14, %c0_15, %c2, %c0_16], %22 {strides = array<i32>} : memref<1x12x12x128xf32, #tpu.memory_space<vmem>>, vector<1x1x1x128xf32>,
    %23 = vector.extract_strided_slice %4 {offsets = [6, 0], sizes = [1, 128], strides = [1, 1]} : vector<24x128xf32> to vector<1x128xf32>
    %24 = vector.extract_strided_slice %4 {offsets = [7, 0], sizes = [1, 128], strides = [1, 1]} : vector<24x128xf32> to vector<1x128xf32>
    %25 = arith.maximumf %23, %24 : vector<1x128xf32>
    %c0_17 = arith.constant 0 : index
    %c0_18 = arith.constant 0 : index
    %c3 = arith.constant 3 : index
    %c0_19 = arith.constant 0 : index
    %26 = vector.load %arg2[%c0_17, %c0_18, %c3, %c0_19] : memref<1x12x12x128xf32, #tpu.memory_space<vmem>>, vector<1x1x1x128xf32>
    %27 = vector.shape_cast %26 : vector<1x1x1x128xf32> to vector<1x128xf32>
    %28 = vector.shape_cast %25 : vector<1x128xf32> to vector<1x1x1x128xf32>
    tpu.vector_store %arg2[%c0_17, %c0_18, %c3, %c0_19], %28 {strides = array<i32>} : memref<1x12x12x128xf32, #tpu.memory_space<vmem>>, vector<1x1x1x128xf32>,
    %29 = vector.extract_strided_slice %4 {offsets = [8, 0], sizes = [1, 128], strides = [1, 1]} : vector<24x128xf32> to vector<1x128xf32>
    %30 = vector.extract_strided_slice %4 {offsets = [9, 0], sizes = [1, 128], strides = [1, 1]} : vector<24x128xf32> to vector<1x128xf32>
    %31 = arith.maximumf %29, %30 : vector<1x128xf32>
    %c0_20 = arith.constant 0 : index
    %c0_21 = arith.constant 0 : index
    %c4 = arith.constant 4 : index
    %c0_22 = arith.constant 0 : index
    %32 = vector.load %arg2[%c0_20, %c0_21, %c4, %c0_22] : memref<1x12x12x128xf32, #tpu.memory_space<vmem>>, vector<1x1x1x128xf32>
    %33 = vector.shape_cast %32 : vector<1x1x1x128xf32> to vector<1x128xf32>
    %34 = vector.shape_cast %31 : vector<1x128xf32> to vector<1x1x1x128xf32>
    tpu.vector_store %arg2[%c0_20, %c0_21, %c4, %c0_22], %34 {strides = array<i32>} : memref<1x12x12x128xf32, #tpu.memory_space<vmem>>, vector<1x1x1x128xf32>,
    %35 = vector.extract_strided_slice %4 {offsets = [10, 0], sizes = [1, 128], strides = [1, 1]} : vector<24x128xf32> to vector<1x128xf32>
    %36 = vector.extract_strided_slice %4 {offsets = [11, 0], sizes = [1, 128], strides = [1, 1]} : vector<24x128xf32> to vector<1x128xf32>
    %37 = arith.maximumf %35, %36 : vector<1x128xf32>
    %c0_23 = arith.constant 0 : index
    %c0_24 = arith.constant 0 : index
    %c5 = arith.constant 5 : index
    %c0_25 = arith.constant 0 : index
    %38 = vector.load %arg2[%c0_23, %c0_24, %c5, %c0_25] : memref<1x12x12x128xf32, #tpu.memory_space<vmem>>, vector<1x1x1x128xf32>
    %39 = vector.shape_cast %38 : vector<1x1x1x128xf32> to vector<1x128xf32>
    %40 = vector.shape_cast %37 : vector<1x128xf32> to vector<1x1x1x128xf32>
    tpu.vector_store %arg2[%c0_23, %c0_24, %c5, %c0_25], %40 {strides = array<i32>} : memref<1x12x12x128xf32, #tpu.memory_space<vmem>>, vector<1x1x1x128xf32>,
    %41 = vector.extract_strided_slice %4 {offsets = [12, 0], sizes = [1, 128], strides = [1, 1]} : vector<24x128xf32> to vector<1x128xf32>
    %42 = vector.extract_strided_slice %4 {offsets = [13, 0], sizes = [1, 128], strides = [1, 1]} : vector<24x128xf32> to vector<1x128xf32>
    %43 = arith.maximumf %41, %42 : vector<1x128xf32>
    %c0_26 = arith.constant 0 : index
    %c0_27 = arith.constant 0 : index
    %c6 = arith.constant 6 : index
    %c0_28 = arith.constant 0 : index
    %44 = vector.load %arg2[%c0_26, %c0_27, %c6, %c0_28] : memref<1x12x12x128xf32, #tpu.memory_space<vmem>>, vector<1x1x1x128xf32>
    %45 = vector.shape_cast %44 : vector<1x1x1x128xf32> to vector<1x128xf32>
    %46 = vector.shape_cast %43 : vector<1x128xf32> to vector<1x1x1x128xf32>
    tpu.vector_store %arg2[%c0_26, %c0_27, %c6, %c0_28], %46 {strides = array<i32>} : memref<1x12x12x128xf32, #tpu.memory_space<vmem>>, vector<1x1x1x128xf32>,
    %47 = vector.extract_strided_slice %4 {offsets = [14, 0], sizes = [1, 128], strides = [1, 1]} : vector<24x128xf32> to vector<1x128xf32>
    %48 = vector.extract_strided_slice %4 {offsets = [15, 0], sizes = [1, 128], strides = [1, 1]} : vector<24x128xf32> to vector<1x128xf32>
    %49 = arith.maximumf %47, %48 : vector<1x128xf32>
    %c0_29 = arith.constant 0 : index
    %c0_30 = arith.constant 0 : index
    %c7 = arith.constant 7 : index
    %c0_31 = arith.constant 0 : index
    %50 = vector.load %arg2[%c0_29, %c0_30, %c7, %c0_31] : memref<1x12x12x128xf32, #tpu.memory_space<vmem>>, vector<1x1x1x128xf32>
    %51 = vector.shape_cast %50 : vector<1x1x1x128xf32> to vector<1x128xf32>
    %52 = vector.shape_cast %49 : vector<1x128xf32> to vector<1x1x1x128xf32>
    tpu.vector_store %arg2[%c0_29, %c0_30, %c7, %c0_31], %52 {strides = array<i32>} : memref<1x12x12x128xf32, #tpu.memory_space<vmem>>, vector<1x1x1x128xf32>,
    %53 = vector.extract_strided_slice %4 {offsets = [16, 0], sizes = [1, 128], strides = [1, 1]} : vector<24x128xf32> to vector<1x128xf32>
    %54 = vector.extract_strided_slice %4 {offsets = [17, 0], sizes = [1, 128], strides = [1, 1]} : vector<24x128xf32> to vector<1x128xf32>
    %55 = arith.maximumf %53, %54 : vector<1x128xf32>
    %c0_32 = arith.constant 0 : index
    %c0_33 = arith.constant 0 : index
    %c8 = arith.constant 8 : index
    %c0_34 = arith.constant 0 : index
    %56 = vector.load %arg2[%c0_32, %c0_33, %c8, %c0_34] : memref<1x12x12x128xf32, #tpu.memory_space<vmem>>, vector<1x1x1x128xf32>
    %57 = vector.shape_cast %56 : vector<1x1x1x128xf32> to vector<1x128xf32>
    %58 = vector.shape_cast %55 : vector<1x128xf32> to vector<1x1x1x128xf32>
    tpu.vector_store %arg2[%c0_32, %c0_33, %c8, %c0_34], %58 {strides = array<i32>} : memref<1x12x12x128xf32, #tpu.memory_space<vmem>>, vector<1x1x1x128xf32>,
    %59 = vector.extract_strided_slice %4 {offsets = [18, 0], sizes = [1, 128], strides = [1, 1]} : vector<24x128xf32> to vector<1x128xf32>
    %60 = vector.extract_strided_slice %4 {offsets = [19, 0], sizes = [1, 128], strides = [1, 1]} : vector<24x128xf32> to vector<1x128xf32>
    %61 = arith.maximumf %59, %60 : vector<1x128xf32>
    %c0_35 = arith.constant 0 : index
    %c0_36 = arith.constant 0 : index
    %c9 = arith.constant 9 : index
    %c0_37 = arith.constant 0 : index
    %62 = vector.load %arg2[%c0_35, %c0_36, %c9, %c0_37] : memref<1x12x12x128xf32, #tpu.memory_space<vmem>>, vector<1x1x1x128xf32>
    %63 = vector.shape_cast %62 : vector<1x1x1x128xf32> to vector<1x128xf32>
    %64 = vector.shape_cast %61 : vector<1x128xf32> to vector<1x1x1x128xf32>
    tpu.vector_store %arg2[%c0_35, %c0_36, %c9, %c0_37], %64 {strides = array<i32>} : memref<1x12x12x128xf32, #tpu.memory_space<vmem>>, vector<1x1x1x128xf32>,
    %65 = vector.extract_strided_slice %4 {offsets = [20, 0], sizes = [1, 128], strides = [1, 1]} : vector<24x128xf32> to vector<1x128xf32>
    %66 = vector.extract_strided_slice %4 {offsets = [21, 0], sizes = [1, 128], strides = [1, 1]} : vector<24x128xf32> to vector<1x128xf32>
    %67 = arith.maximumf %65, %66 : vector<1x128xf32>
    %c0_38 = arith.constant 0 : index
    %c0_39 = arith.constant 0 : index
    %c10 = arith.constant 10 : index
    %c0_40 = arith.constant 0 : index
    %68 = vector.load %arg2[%c0_38, %c0_39, %c10, %c0_40] : memref<1x12x12x128xf32, #tpu.memory_space<vmem>>, vector<1x1x1x128xf32>
    %69 = vector.shape_cast %68 : vector<1x1x1x128xf32> to vector<1x128xf32>
    %70 = vector.shape_cast %67 : vector<1x128xf32> to vector<1x1x1x128xf32>
    tpu.vector_store %arg2[%c0_38, %c0_39, %c10, %c0_40], %70 {strides = array<i32>} : memref<1x12x12x128xf32, #tpu.memory_space<vmem>>, vector<1x1x1x128xf32>,
    %71 = vector.extract_strided_slice %4 {offsets = [22, 0], sizes = [1, 128], strides = [1, 1]} : vector<24x128xf32> to vector<1x128xf32>
    %72 = vector.extract_strided_slice %4 {offsets = [23, 0], sizes = [1, 128], strides = [1, 1]} : vector<24x128xf32> to vector<1x128xf32>
    %73 = arith.maximumf %71, %72 : vector<1x128xf32>
    %c0_41 = arith.constant 0 : index
    %c0_42 = arith.constant 0 : index
    %c11 = arith.constant 11 : index
    %c0_43 = arith.constant 0 : index
    %74 = vector.load %arg2[%c0_41, %c0_42, %c11, %c0_43] : memref<1x12x12x128xf32, #tpu.memory_space<vmem>>, vector<1x1x1x128xf32>
    %75 = vector.shape_cast %74 : vector<1x1x1x128xf32> to vector<1x128xf32>
    %76 = vector.shape_cast %73 : vector<1x128xf32> to vector<1x1x1x128xf32>
    tpu.vector_store %arg2[%c0_41, %c0_42, %c11, %c0_43], %76 {strides = array<i32>} : memref<1x12x12x128xf32, #tpu.memory_space<vmem>>, vector<1x1x1x128xf32>,
    %c0_44 = arith.constant 0 : index
    %c2_45 = arith.constant 2 : index
    %c0_46 = arith.constant 0 : index
    %c0_47 = arith.constant 0 : index
    %77 = vector.load %arg1[%c0_44, %c2_45, %c0_46, %c0_47] : memref<1x24x24x128xf32, #tpu.memory_space<vmem>>, vector<1x1x24x128xf32>
    %78 = vector.shape_cast %77 : vector<1x1x24x128xf32> to vector<24x128xf32>
    %c0_48 = arith.constant 0 : index
    %c3_49 = arith.constant 3 : index
    %c0_50 = arith.constant 0 : index
    %c0_51 = arith.constant 0 : index
    %79 = vector.load %arg1[%c0_48, %c3_49, %c0_50, %c0_51] : memref<1x24x24x128xf32, #tpu.memory_space<vmem>>, vector<1x1x24x128xf32>
    %80 = vector.shape_cast %79 : vector<1x1x24x128xf32> to vector<24x128xf32>
    %81 = arith.maximumf %78, %80 : vector<24x128xf32>
    %82 = vector.extract_strided_slice %81 {offsets = [0, 0], sizes = [1, 128], strides = [1, 1]} : vector<24x128xf32> to vector<1x128xf32>
    %83 = vector.extract_strided_slice %81 {offsets = [1, 0], sizes = [1, 128], strides = [1, 1]} : vector<24x128xf32> to vector<1x128xf32>
    %84 = arith.maximumf %82, %83 : vector<1x128xf32>
    %c0_52 = arith.constant 0 : index
    %c1_53 = arith.constant 1 : index
    %c0_54 = arith.constant 0 : index
    %c0_55 = arith.constant 0 : index
    %85 = vector.load %arg2[%c0_52, %c1_53, %c0_54, %c0_55] : memref<1x12x12x128xf32, #tpu.memory_space<vmem>>, vector<1x1x1x128xf32>
    %86 = vector.shape_cast %85 : vector<1x1x1x128xf32> to vector<1x128xf32>
    %87 = vector.shape_cast %84 : vector<1x128xf32> to vector<1x1x1x128xf32>
    tpu.vector_store %arg2[%c0_52, %c1_53, %c0_54, %c0_55], %87 {strides = array<i32>} : memref<1x12x12x128xf32, #tpu.memory_space<vmem>>, vector<1x1x1x128xf32>,
    %88 = vector.extract_strided_slice %81 {offsets = [2, 0], sizes = [1, 128], strides = [1, 1]} : vector<24x128xf32> to vector<1x128xf32>
    %89 = vector.extract_strided_slice %81 {offsets = [3, 0], sizes = [1, 128], strides = [1, 1]} : vector<24x128xf32> to vector<1x128xf32>
    %90 = arith.maximumf %88, %89 : vector<1x128xf32>
    %c0_56 = arith.constant 0 : index
    %c1_57 = arith.constant 1 : index
    %c1_58 = arith.constant 1 : index
    %c0_59 = arith.constant 0 : index
    %91 = vector.load %arg2[%c0_56, %c1_57, %c1_58, %c0_59] : memref<1x12x12x128xf32, #tpu.memory_space<vmem>>, vector<1x1x1x128xf32>
    %92 = vector.shape_cast %91 : vector<1x1x1x128xf32> to vector<1x128xf32>
    %93 = vector.shape_cast %90 : vector<1x128xf32> to vector<1x1x1x128xf32>
    tpu.vector_store %arg2[%c0_56, %c1_57, %c1_58, %c0_59], %93 {strides = array<i32>} : memref<1x12x12x128xf32, #tpu.memory_space<vmem>>, vector<1x1x1x128xf32>,
    %94 = vector.extract_strided_slice %81 {offsets = [4, 0], sizes = [1, 128], strides = [1, 1]} : vector<24x128xf32> to vector<1x128xf32>
    %95 = vector.extract_strided_slice %81 {offsets = [5, 0], sizes = [1, 128], strides = [1, 1]} : vector<24x128xf32> to vector<1x128xf32>
    %96 = arith.maximumf %94, %95 : vector<1x128xf32>
    %c0_60 = arith.constant 0 : index
    %c1_61 = arith.constant 1 : index
    %c2_62 = arith.constant 2 : index
    %c0_63 = arith.constant 0 : index
    %97 = vector.load %arg2[%c0_60, %c1_61, %c2_62, %c0_63] : memref<1x12x12x128xf32, #tpu.memory_space<vmem>>, vector<1x1x1x128xf32>
    %98 = vector.shape_cast %97 : vector<1x1x1x128xf32> to vector<1x128xf32>
    %99 = vector.shape_cast %96 : vector<1x128xf32> to vector<1x1x1x128xf32>
    tpu.vector_store %arg2[%c0_60, %c1_61, %c2_62, %c0_63], %99 {strides = array<i32>} : memref<1x12x12x128xf32, #tpu.memory_space<vmem>>, vector<1x1x1x128xf32>,
    %100 = vector.extract_strided_slice %81 {offsets = [6, 0], sizes = [1, 128], strides = [1, 1]} : vector<24x128xf32> to vector<1x128xf32>
    %101 = vector.extract_strided_slice %81 {offsets = [7, 0], sizes = [1, 128], strides = [1, 1]} : vector<24x128xf32> to vector<1x128xf32>
    %102 = arith.maximumf %100, %101 : vector<1x128xf32>
    %c0_64 = arith.constant 0 : index
    %c1_65 = arith.constant 1 : index
    %c3_66 = arith.constant 3 : index
    %c0_67 = arith.constant 0 : index
    %103 = vector.load %arg2[%c0_64, %c1_65, %c3_66, %c0_67] : memref<1x12x12x128xf32, #tpu.memory_space<vmem>>, vector<1x1x1x128xf32>
    %104 = vector.shape_cast %103 : vector<1x1x1x128xf32> to vector<1x128xf32>
    %105 = vector.shape_cast %102 : vector<1x128xf32> to vector<1x1x1x128xf32>
    tpu.vector_store %arg2[%c0_64, %c1_65, %c3_66, %c0_67], %105 {strides = array<i32>} : memref<1x12x12x128xf32, #tpu.memory_space<vmem>>, vector<1x1x1x128xf32>,
    %106 = vector.extract_strided_slice %81 {offsets = [8, 0], sizes = [1, 128], strides = [1, 1]} : vector<24x128xf32> to vector<1x128xf32>
    %107 = vector.extract_strided_slice %81 {offsets = [9, 0], sizes = [1, 128], strides = [1, 1]} : vector<24x128xf32> to vector<1x128xf32>
    %108 = arith.maximumf %106, %107 : vector<1x128xf32>
    %c0_68 = arith.constant 0 : index
    %c1_69 = arith.constant 1 : index
    %c4_70 = arith.constant 4 : index
    %c0_71 = arith.constant 0 : index
    %109 = vector.load %arg2[%c0_68, %c1_69, %c4_70, %c0_71] : memref<1x12x12x128xf32, #tpu.memory_space<vmem>>, vector<1x1x1x128xf32>
    %110 = vector.shape_cast %109 : vector<1x1x1x128xf32> to vector<1x128xf32>
    %111 = vector.shape_cast %108 : vector<1x128xf32> to vector<1x1x1x128xf32>
    tpu.vector_store %arg2[%c0_68, %c1_69, %c4_70, %c0_71], %111 {strides = array<i32>} : memref<1x12x12x128xf32, #tpu.memory_space<vmem>>, vector<1x1x1x128xf32>,
    %112 = vector.extract_strided_slice %81 {offsets = [10, 0], sizes = [1, 128], strides = [1, 1]} : vector<24x128xf32> to vector<1x128xf32>
    %113 = vector.extract_strided_slice %81 {offsets = [11, 0], sizes = [1, 128], strides = [1, 1]} : vector<24x128xf32> to vector<1x128xf32>
    %114 = arith.maximumf %112, %113 : vector<1x128xf32>
    %c0_72 = arith.constant 0 : index
    %c1_73 = arith.constant 1 : index
    %c5_74 = arith.constant 5 : index
    %c0_75 = arith.constant 0 : index
    %115 = vector.load %arg2[%c0_72, %c1_73, %c5_74, %c0_75] : memref<1x12x12x128xf32, #tpu.memory_space<vmem>>, vector<1x1x1x128xf32>
    %116 = vector.shape_cast %115 : vector<1x1x1x128xf32> to vector<1x128xf32>
    %117 = vector.shape_cast %114 : vector<1x128xf32> to vector<1x1x1x128xf32>
    tpu.vector_store %arg2[%c0_72, %c1_73, %c5_74, %c0_75], %117 {strides = array<i32>} : memref<1x12x12x128xf32, #tpu.memory_space<vmem>>, vector<1x1x1x128xf32>,
    %118 = vector.extract_strided_slice %81 {offsets = [12, 0], sizes = [1, 128], strides = [1, 1]} : vector<24x128xf32> to vector<1x128xf32>
    %119 = vector.extract_strided_slice %81 {offsets = [13, 0], sizes = [1, 128], strides = [1, 1]} : vector<24x128xf32> to vector<1x128xf32>
    %120 = arith.maximumf %118, %119 : vector<1x128xf32>
    %c0_76 = arith.constant 0 : index
    %c1_77 = arith.constant 1 : index
    %c6_78 = arith.constant 6 : index
    %c0_79 = arith.constant 0 : index
    %121 = vector.load %arg2[%c0_76, %c1_77, %c6_78, %c0_79] : memref<1x12x12x128xf32, #tpu.memory_space<vmem>>, vector<1x1x1x128xf32>
    %122 = vector.shape_cast %121 : vector<1x1x1x128xf32> to vector<1x128xf32>
    %123 = vector.shape_cast %120 : vector<1x128xf32> to vector<1x1x1x128xf32>
    tpu.vector_store %arg2[%c0_76, %c1_77, %c6_78, %c0_79], %123 {strides = array<i32>} : memref<1x12x12x128xf32, #tpu.memory_space<vmem>>, vector<1x1x1x128xf32>,
    %124 = vector.extract_strided_slice %81 {offsets = [14, 0], sizes = [1, 128], strides = [1, 1]} : vector<24x128xf32> to vector<1x128xf32>
    %125 = vector.extract_strided_slice %81 {offsets = [15, 0], sizes = [1, 128], strides = [1, 1]} : vector<24x128xf32> to vector<1x128xf32>
    %126 = arith.maximumf %124, %125 : vector<1x128xf32>
    %c0_80 = arith.constant 0 : index
    %c1_81 = arith.constant 1 : index
    %c7_82 = arith.constant 7 : index
    %c0_83 = arith.constant 0 : index
    %127 = vector.load %arg2[%c0_80, %c1_81, %c7_82, %c0_83] : memref<1x12x12x128xf32, #tpu.memory_space<vmem>>, vector<1x1x1x128xf32>
    %128 = vector.shape_cast %127 : vector<1x1x1x128xf32> to vector<1x128xf32>
    %129 = vector.shape_cast %126 : vector<1x128xf32> to vector<1x1x1x128xf32>
    tpu.vector_store %arg2[%c0_80, %c1_81, %c7_82, %c0_83], %129 {strides = array<i32>} : memref<1x12x12x128xf32, #tpu.memory_space<vmem>>, vector<1x1x1x128xf32>,
    %130 = vector.extract_strided_slice %81 {offsets = [16, 0], sizes = [1, 128], strides = [1, 1]} : vector<24x128xf32> to vector<1x128xf32>
    %131 = vector.extract_strided_slice %81 {offsets = [17, 0], sizes = [1, 128], strides = [1, 1]} : vector<24x128xf32> to vector<1x128xf32>
    %132 = arith.maximumf %130, %131 : vector<1x128xf32>
    %c0_84 = arith.constant 0 : index
    %c1_85 = arith.constant 1 : index
    %c8_86 = arith.constant 8 : index
    %c0_87 = arith.constant 0 : index
    %133 = vector.load %arg2[%c0_84, %c1_85, %c8_86, %c0_87] : memref<1x12x12x128xf32, #tpu.memory_space<vmem>>, vector<1x1x1x128xf32>
    %134 = vector.shape_cast %133 : vector<1x1x1x128xf32> to vector<1x128xf32>
    %135 = vector.shape_cast %132 : vector<1x128xf32> to vector<1x1x1x128xf32>
    tpu.vector_store %arg2[%c0_84, %c1_85, %c8_86, %c0_87], %135 {strides = array<i32>} : memref<1x12x12x128xf32, #tpu.memory_space<vmem>>, vector<1x1x1x128xf32>,
    %136 = vector.extract_strided_slice %81 {offsets = [18, 0], sizes = [1, 128], strides = [1, 1]} : vector<24x128xf32> to vector<1x128xf32>
    %137 = vector.extract_strided_slice %81 {offsets = [19, 0], sizes = [1, 128], strides = [1, 1]} : vector<24x128xf32> to vector<1x128xf32>
    %138 = arith.maximumf %136, %137 : vector<1x128xf32>
    %c0_88 = arith.constant 0 : index
    %c1_89 = arith.constant 1 : index
    %c9_90 = arith.constant 9 : index
    %c0_91 = arith.constant 0 : index
    %139 = vector.load %arg2[%c0_88, %c1_89, %c9_90, %c0_91] : memref<1x12x12x128xf32, #tpu.memory_space<vmem>>, vector<1x1x1x128xf32>
    %140 = vector.shape_cast %139 : vector<1x1x1x128xf32> to vector<1x128xf32>
    %141 = vector.shape_cast %138 : vector<1x128xf32> to vector<1x1x1x128xf32>
    tpu.vector_store %arg2[%c0_88, %c1_89, %c9_90, %c0_91], %141 {strides = array<i32>} : memref<1x12x12x128xf32, #tpu.memory_space<vmem>>, vector<1x1x1x128xf32>,
    %142 = vector.extract_strided_slice %81 {offsets = [20, 0], sizes = [1, 128], strides = [1, 1]} : vector<24x128xf32> to vector<1x128xf32>
    %143 = vector.extract_strided_slice %81 {offsets = [21, 0], sizes = [1, 128], strides = [1, 1]} : vector<24x128xf32> to vector<1x128xf32>
    %144 = arith.maximumf %142, %143 : vector<1x128xf32>
    %c0_92 = arith.constant 0 : index
    %c1_93 = arith.constant 1 : index
    %c10_94 = arith.constant 10 : index
    %c0_95 = arith.constant 0 : index
    %145 = vector.load %arg2[%c0_92, %c1_93, %c10_94, %c0_95] : memref<1x12x12x128xf32, #tpu.memory_space<vmem>>, vector<1x1x1x128xf32>
    %146 = vector.shape_cast %145 : vector<1x1x1x128xf32> to vector<1x128xf32>
    %147 = vector.shape_cast %144 : vector<1x128xf32> to vector<1x1x1x128xf32>
    tpu.vector_store %arg2[%c0_92, %c1_93, %c10_94, %c0_95], %147 {strides = array<i32>} : memref<1x12x12x128xf32, #tpu.memory_space<vmem>>, vector<1x1x1x128xf32>,
    %148 = vector.extract_strided_slice %81 {offsets = [22, 0], sizes = [1, 128], strides = [1, 1]} : vector<24x128xf32> to vector<1x128xf32>
    %149 = vector.extract_strided_slice %81 {offsets = [23, 0], sizes = [1, 128], strides = [1, 1]} : vector<24x128xf32> to vector<1x128xf32>
    %150 = arith.maximumf %148, %149 : vector<1x128xf32>
    %c0_96 = arith.constant 0 : index
    %c1_97 = arith.constant 1 : index
    %c11_98 = arith.constant 11 : index
    %c0_99 = arith.constant 0 : index
    %151 = vector.load %arg2[%c0_96, %c1_97, %c11_98, %c0_99] : memref<1x12x12x128xf32, #tpu.memory_space<vmem>>, vector<1x1x1x128xf32>
    %152 = vector.shape_cast %151 : vector<1x1x1x128xf32> to vector<1x128xf32>
    %153 = vector.shape_cast %150 : vector<1x128xf32> to vector<1x1x1x128xf32>
    tpu.vector_store %arg2[%c0_96, %c1_97, %c11_98, %c0_99], %153 {strides = array<i32>} : memref<1x12x12x128xf32, #tpu.memory_space<vmem>>, vector<1x1x1x128xf32>,
    %c0_100 = arith.constant 0 : index
    %c4_101 = arith.constant 4 : index
    %c0_102 = arith.constant 0 : index
    %c0_103 = arith.constant 0 : index
    %154 = vector.load %arg1[%c0_100, %c4_101, %c0_102, %c0_103] : memref<1x24x24x128xf32, #tpu.memory_space<vmem>>, vector<1x1x24x128xf32>
    %155 = vector.shape_cast %154 : vector<1x1x24x128xf32> to vector<24x128xf32>
    %c0_104 = arith.constant 0 : index
    %c5_105 = arith.constant 5 : index
    %c0_106 = arith.constant 0 : index
    %c0_107 = arith.constant 0 : index
    %156 = vector.load %arg1[%c0_104, %c5_105, %c0_106, %c0_107] : memref<1x24x24x128xf32, #tpu.memory_space<vmem>>, vector<1x1x24x128xf32>
    %157 = vector.shape_cast %156 : vector<1x1x24x128xf32> to vector<24x128xf32>
    %158 = arith.maximumf %155, %157 : vector<24x128xf32>
    %159 = vector.extract_strided_slice %158 {offsets = [0, 0], sizes = [1, 128], strides = [1, 1]} : vector<24x128xf32> to vector<1x128xf32>
    %160 = vector.extract_strided_slice %158 {offsets = [1, 0], sizes = [1, 128], strides = [1, 1]} : vector<24x128xf32> to vector<1x128xf32>
    %161 = arith.maximumf %159, %160 : vector<1x128xf32>
    %c0_108 = arith.constant 0 : index
    %c2_109 = arith.constant 2 : index
    %c0_110 = arith.constant 0 : index
    %c0_111 = arith.constant 0 : index
    %162 = vector.load %arg2[%c0_108, %c2_109, %c0_110, %c0_111] : memref<1x12x12x128xf32, #tpu.memory_space<vmem>>, vector<1x1x1x128xf32>
    %163 = vector.shape_cast %162 : vector<1x1x1x128xf32> to vector<1x128xf32>
    %164 = vector.shape_cast %161 : vector<1x128xf32> to vector<1x1x1x128xf32>
    tpu.vector_store %arg2[%c0_108, %c2_109, %c0_110, %c0_111], %164 {strides = array<i32>} : memref<1x12x12x128xf32, #tpu.memory_space<vmem>>, vector<1x1x1x128xf32>,
    %165 = vector.extract_strided_slice %158 {offsets = [2, 0], sizes = [1, 128], strides = [1, 1]} : vector<24x128xf32> to vector<1x128xf32>
    %166 = vector.extract_strided_slice %158 {offsets = [3, 0], sizes = [1, 128], strides = [1, 1]} : vector<24x128xf32> to vector<1x128xf32>
    %167 = arith.maximumf %165, %166 : vector<1x128xf32>
    %c0_112 = arith.constant 0 : index
    %c2_113 = arith.constant 2 : index
    %c1_114 = arith.constant 1 : index
    %c0_115 = arith.constant 0 : index
    %168 = vector.load %arg2[%c0_112, %c2_113, %c1_114, %c0_115] : memref<1x12x12x128xf32, #tpu.memory_space<vmem>>, vector<1x1x1x128xf32>
    %169 = vector.shape_cast %168 : vector<1x1x1x128xf32> to vector<1x128xf32>
    %170 = vector.shape_cast %167 : vector<1x128xf32> to vector<1x1x1x128xf32>
    tpu.vector_store %arg2[%c0_112, %c2_113, %c1_114, %c0_115], %170 {strides = array<i32>} : memref<1x12x12x128xf32, #tpu.memory_space<vmem>>, vector<1x1x1x128xf32>,
    %171 = vector.extract_strided_slice %158 {offsets = [4, 0], sizes = [1, 128], strides = [1, 1]} : vector<24x128xf32> to vector<1x128xf32>
    %172 = vector.extract_strided_slice %158 {offsets = [5, 0], sizes = [1, 128], strides = [1, 1]} : vector<24x128xf32> to vector<1x128xf32>
    %173 = arith.maximumf %171, %172 : vector<1x128xf32>
    %c0_116 = arith.constant 0 : index
    %c2_117 = arith.constant 2 : index
    %c2_118 = arith.constant 2 : index
    %c0_119 = arith.constant 0 : index
    %174 = vector.load %arg2[%c0_116, %c2_117, %c2_118, %c0_119] : memref<1x12x12x128xf32, #tpu.memory_space<vmem>>, vector<1x1x1x128xf32>
    %175 = vector.shape_cast %174 : vector<1x1x1x128xf32> to vector<1x128xf32>
    %176 = vector.shape_cast %173 : vector<1x128xf32> to vector<1x1x1x128xf32>
    tpu.vector_store %arg2[%c0_116, %c2_117, %c2_118, %c0_119], %176 {strides = array<i32>} : memref<1x12x12x128xf32, #tpu.memory_space<vmem>>, vector<1x1x1x128xf32>,
    %177 = vector.extract_strided_slice %158 {offsets = [6, 0], sizes = [1, 128], strides = [1, 1]} : vector<24x128xf32> to vector<1x128xf32>
    %178 = vector.extract_strided_slice %158 {offsets = [7, 0], sizes = [1, 128], strides = [1, 1]} : vector<24x128xf32> to vector<1x128xf32>
    %179 = arith.maximumf %177, %178 : vector<1x128xf32>
    %c0_120 = arith.constant 0 : index
    %c2_121 = arith.constant 2 : index
    %c3_122 = arith.constant 3 : index
    %c0_123 = arith.constant 0 : index
    %180 = vector.load %arg2[%c0_120, %c2_121, %c3_122, %c0_123] : memref<1x12x12x128xf32, #tpu.memory_space<vmem>>, vector<1x1x1x128xf32>
    %181 = vector.shape_cast %180 : vector<1x1x1x128xf32> to vector<1x128xf32>
    %182 = vector.shape_cast %179 : vector<1x128xf32> to vector<1x1x1x128xf32>
    tpu.vector_store %arg2[%c0_120, %c2_121, %c3_122, %c0_123], %182 {strides = array<i32>} : memref<1x12x12x128xf32, #tpu.memory_space<vmem>>, vector<1x1x1x128xf32>,
    %183 = vector.extract_strided_slice %158 {offsets = [8, 0], sizes = [1, 128], strides = [1, 1]} : vector<24x128xf32> to vector<1x128xf32>
    %184 = vector.extract_strided_slice %158 {offsets = [9, 0], sizes = [1, 128], strides = [1, 1]} : vector<24x128xf32> to vector<1x128xf32>
    %185 = arith.maximumf %183, %184 : vector<1x128xf32>
    %c0_124 = arith.constant 0 : index
    %c2_125 = arith.constant 2 : index
    %c4_126 = arith.constant 4 : index
    %c0_127 = arith.constant 0 : index
    %186 = vector.load %arg2[%c0_124, %c2_125, %c4_126, %c0_127] : memref<1x12x12x128xf32, #tpu.memory_space<vmem>>, vector<1x1x1x128xf32>
    %187 = vector.shape_cast %186 : vector<1x1x1x128xf32> to vector<1x128xf32>
    %188 = vector.shape_cast %185 : vector<1x128xf32> to vector<1x1x1x128xf32>
    tpu.vector_store %arg2[%c0_124, %c2_125, %c4_126, %c0_127], %188 {strides = array<i32>} : memref<1x12x12x128xf32, #tpu.memory_space<vmem>>, vector<1x1x1x128xf32>,
    %189 = vector.extract_strided_slice %158 {offsets = [10, 0], sizes = [1, 128], strides = [1, 1]} : vector<24x128xf32> to vector<1x128xf32>
    %190 = vector.extract_strided_slice %158 {offsets = [11, 0], sizes = [1, 128], strides = [1, 1]} : vector<24x128xf32> to vector<1x128xf32>
    %191 = arith.maximumf %189, %190 : vector<1x128xf32>
    %c0_128 = arith.constant 0 : index
    %c2_129 = arith.constant 2 : index
    %c5_130 = arith.constant 5 : index
    %c0_131 = arith.constant 0 : index
    %192 = vector.load %arg2[%c0_128, %c2_129, %c5_130, %c0_131] : memref<1x12x12x128xf32, #tpu.memory_space<vmem>>, vector<1x1x1x128xf32>
    %193 = vector.shape_cast %192 : vector<1x1x1x128xf32> to vector<1x128xf32>
    %194 = vector.shape_cast %191 : vector<1x128xf32> to vector<1x1x1x128xf32>
    tpu.vector_store %arg2[%c0_128, %c2_129, %c5_130, %c0_131], %194 {strides = array<i32>} : memref<1x12x12x128xf32, #tpu.memory_space<vmem>>, vector<1x1x1x128xf32>,
    %195 = vector.extract_strided_slice %158 {offsets = [12, 0], sizes = [1, 128], strides = [1, 1]} : vector<24x128xf32> to vector<1x128xf32>
    %196 = vector.extract_strided_slice %158 {offsets = [13, 0], sizes = [1, 128], strides = [1, 1]} : vector<24x128xf32> to vector<1x128xf32>
    %197 = arith.maximumf %195, %196 : vector<1x128xf32>
    %c0_132 = arith.constant 0 : index
    %c2_133 = arith.constant 2 : index
    %c6_134 = arith.constant 6 : index
    %c0_135 = arith.constant 0 : index
    %198 = vector.load %arg2[%c0_132, %c2_133, %c6_134, %c0_135] : memref<1x12x12x128xf32, #tpu.memory_space<vmem>>, vector<1x1x1x128xf32>
    %199 = vector.shape_cast %198 : vector<1x1x1x128xf32> to vector<1x128xf32>
    %200 = vector.shape_cast %197 : vector<1x128xf32> to vector<1x1x1x128xf32>
    tpu.vector_store %arg2[%c0_132, %c2_133, %c6_134, %c0_135], %200 {strides = array<i32>} : memref<1x12x12x128xf32, #tpu.memory_space<vmem>>, vector<1x1x1x128xf32>,
    %201 = vector.extract_strided_slice %158 {offsets = [14, 0], sizes = [1, 128], strides = [1, 1]} : vector<24x128xf32> to vector<1x128xf32>
    %202 = vector.extract_strided_slice %158 {offsets = [15, 0], sizes = [1, 128], strides = [1, 1]} : vector<24x128xf32> to vector<1x128xf32>
    %203 = arith.maximumf %201, %202 : vector<1x128xf32>
    %c0_136 = arith.constant 0 : index
    %c2_137 = arith.constant 2 : index
    %c7_138 = arith.constant 7 : index
    %c0_139 = arith.constant 0 : index
    %204 = vector.load %arg2[%c0_136, %c2_137, %c7_138, %c0_139] : memref<1x12x12x128xf32, #tpu.memory_space<vmem>>, vector<1x1x1x128xf32>
    %205 = vector.shape_cast %204 : vector<1x1x1x128xf32> to vector<1x128xf32>
    %206 = vector.shape_cast %203 : vector<1x128xf32> to vector<1x1x1x128xf32>
    tpu.vector_store %arg2[%c0_136, %c2_137, %c7_138, %c0_139], %206 {strides = array<i32>} : memref<1x12x12x128xf32, #tpu.memory_space<vmem>>, vector<1x1x1x128xf32>,
    %207 = vector.extract_strided_slice %158 {offsets = [16, 0], sizes = [1, 128], strides = [1, 1]} : vector<24x128xf32> to vector<1x128xf32>
    %208 = vector.extract_strided_slice %158 {offsets = [17, 0], sizes = [1, 128], strides = [1, 1]} : vector<24x128xf32> to vector<1x128xf32>
    %209 = arith.maximumf %207, %208 : vector<1x128xf32>
    %c0_140 = arith.constant 0 : index
    %c2_141 = arith.constant 2 : index
    %c8_142 = arith.constant 8 : index
    %c0_143 = arith.constant 0 : index
    %210 = vector.load %arg2[%c0_140, %c2_141, %c8_142, %c0_143] : memref<1x12x12x128xf32, #tpu.memory_space<vmem>>, vector<1x1x1x128xf32>
    %211 = vector.shape_cast %210 : vector<1x1x1x128xf32> to vector<1x128xf32>
    %212 = vector.shape_cast %209 : vector<1x128xf32> to vector<1x1x1x128xf32>
    tpu.vector_store %arg2[%c0_140, %c2_141, %c8_142, %c0_143], %212 {strides = array<i32>} : memref<1x12x12x128xf32, #tpu.memory_space<vmem>>, vector<1x1x1x128xf32>,
    %213 = vector.extract_strided_slice %158 {offsets = [18, 0], sizes = [1, 128], strides = [1, 1]} : vector<24x128xf32> to vector<1x128xf32>
    %214 = vector.extract_strided_slice %158 {offsets = [19, 0], sizes = [1, 128], strides = [1, 1]} : vector<24x128xf32> to vector<1x128xf32>
    %215 = arith.maximumf %213, %214 : vector<1x128xf32>
    %c0_144 = arith.constant 0 : index
    %c2_145 = arith.constant 2 : index
    %c9_146 = arith.constant 9 : index
    %c0_147 = arith.constant 0 : index
    %216 = vector.load %arg2[%c0_144, %c2_145, %c9_146, %c0_147] : memref<1x12x12x128xf32, #tpu.memory_space<vmem>>, vector<1x1x1x128xf32>
    %217 = vector.shape_cast %216 : vector<1x1x1x128xf32> to vector<1x128xf32>
    %218 = vector.shape_cast %215 : vector<1x128xf32> to vector<1x1x1x128xf32>
    tpu.vector_store %arg2[%c0_144, %c2_145, %c9_146, %c0_147], %218 {strides = array<i32>} : memref<1x12x12x128xf32, #tpu.memory_space<vmem>>, vector<1x1x1x128xf32>,
    %219 = vector.extract_strided_slice %158 {offsets = [20, 0], sizes = [1, 128], strides = [1, 1]} : vector<24x128xf32> to vector<1x128xf32>
    %220 = vector.extract_strided_slice %158 {offsets = [21, 0], sizes = [1, 128], strides = [1, 1]} : vector<24x128xf32> to vector<1x128xf32>
    %221 = arith.maximumf %219, %220 : vector<1x128xf32>
    %c0_148 = arith.constant 0 : index
    %c2_149 = arith.constant 2 : index
    %c10_150 = arith.constant 10 : index
    %c0_151 = arith.constant 0 : index
    %222 = vector.load %arg2[%c0_148, %c2_149, %c10_150, %c0_151] : memref<1x12x12x128xf32, #tpu.memory_space<vmem>>, vector<1x1x1x128xf32>
    %223 = vector.shape_cast %222 : vector<1x1x1x128xf32> to vector<1x128xf32>
    %224 = vector.shape_cast %221 : vector<1x128xf32> to vector<1x1x1x128xf32>
    tpu.vector_store %arg2[%c0_148, %c2_149, %c10_150, %c0_151], %224 {strides = array<i32>} : memref<1x12x12x128xf32, #tpu.memory_space<vmem>>, vector<1x1x1x128xf32>,
    %225 = vector.extract_strided_slice %158 {offsets = [22, 0], sizes = [1, 128], strides = [1, 1]} : vector<24x128xf32> to vector<1x128xf32>
    %226 = vector.extract_strided_slice %158 {offsets = [23, 0], sizes = [1, 128], strides = [1, 1]} : vector<24x128xf32> to vector<1x128xf32>
    %227 = arith.maximumf %225, %226 : vector<1x128xf32>
    %c0_152 = arith.constant 0 : index
    %c2_153 = arith.constant 2 : index
    %c11_154 = arith.constant 11 : index
    %c0_155 = arith.constant 0 : index
    %228 = vector.load %arg2[%c0_152, %c2_153, %c11_154, %c0_155] : memref<1x12x12x128xf32, #tpu.memory_space<vmem>>, vector<1x1x1x128xf32>
    %229 = vector.shape_cast %228 : vector<1x1x1x128xf32> to vector<1x128xf32>
    %230 = vector.shape_cast %227 : vector<1x128xf32> to vector<1x1x1x128xf32>
    tpu.vector_store %arg2[%c0_152, %c2_153, %c11_154, %c0_155], %230 {strides = array<i32>} : memref<1x12x12x128xf32, #tpu.memory_space<vmem>>, vector<1x1x1x128xf32>,
    %c0_156 = arith.constant 0 : index
    %c6_157 = arith.constant 6 : index
    %c0_158 = arith.constant 0 : index
    %c0_159 = arith.constant 0 : index
    %231 = vector.load %arg1[%c0_156, %c6_157, %c0_158, %c0_159] : memref<1x24x24x128xf32, #tpu.memory_space<vmem>>, vector<1x1x24x128xf32>
    %232 = vector.shape_cast %231 : vector<1x1x24x128xf32> to vector<24x128xf32>
    %c0_160 = arith.constant 0 : index
    %c7_161 = arith.constant 7 : index
    %c0_162 = arith.constant 0 : index
    %c0_163 = arith.constant 0 : index
    %233 = vector.load %arg1[%c0_160, %c7_161, %c0_162, %c0_163] : memref<1x24x24x128xf32, #tpu.memory_space<vmem>>, vector<1x1x24x128xf32>
    %234 = vector.shape_cast %233 : vector<1x1x24x128xf32> to vector<24x128xf32>
    %235 = arith.maximumf %232, %234 : vector<24x128xf32>
    %236 = vector.extract_strided_slice %235 {offsets = [0, 0], sizes = [1, 128], strides = [1, 1]} : vector<24x128xf32> to vector<1x128xf32>
    %237 = vector.extract_strided_slice %235 {offsets = [1, 0], sizes = [1, 128], strides = [1, 1]} : vector<24x128xf32> to vector<1x128xf32>
    %238 = arith.maximumf %236, %237 : vector<1x128xf32>
    %c0_164 = arith.constant 0 : index
    %c3_165 = arith.constant 3 : index
    %c0_166 = arith.constant 0 : index
    %c0_167 = arith.constant 0 : index
    %239 = vector.load %arg2[%c0_164, %c3_165, %c0_166, %c0_167] : memref<1x12x12x128xf32, #tpu.memory_space<vmem>>, vector<1x1x1x128xf32>
    %240 = vector.shape_cast %239 : vector<1x1x1x128xf32> to vector<1x128xf32>
    %241 = vector.shape_cast %238 : vector<1x128xf32> to vector<1x1x1x128xf32>
    tpu.vector_store %arg2[%c0_164, %c3_165, %c0_166, %c0_167], %241 {strides = array<i32>} : memref<1x12x12x128xf32, #tpu.memory_space<vmem>>, vector<1x1x1x128xf32>,
    %242 = vector.extract_strided_slice %235 {offsets = [2, 0], sizes = [1, 128], strides = [1, 1]} : vector<24x128xf32> to vector<1x128xf32>
    %243 = vector.extract_strided_slice %235 {offsets = [3, 0], sizes = [1, 128], strides = [1, 1]} : vector<24x128xf32> to vector<1x128xf32>
    %244 = arith.maximumf %242, %243 : vector<1x128xf32>
    %c0_168 = arith.constant 0 : index
    %c3_169 = arith.constant 3 : index
    %c1_170 = arith.constant 1 : index
    %c0_171 = arith.constant 0 : index
    %245 = vector.load %arg2[%c0_168, %c3_169, %c1_170, %c0_171] : memref<1x12x12x128xf32, #tpu.memory_space<vmem>>, vector<1x1x1x128xf32>
    %246 = vector.shape_cast %245 : vector<1x1x1x128xf32> to vector<1x128xf32>
    %247 = vector.shape_cast %244 : vector<1x128xf32> to vector<1x1x1x128xf32>
    tpu.vector_store %arg2[%c0_168, %c3_169, %c1_170, %c0_171], %247 {strides = array<i32>} : memref<1x12x12x128xf32, #tpu.memory_space<vmem>>, vector<1x1x1x128xf32>,
    %248 = vector.extract_strided_slice %235 {offsets = [4, 0], sizes = [1, 128], strides = [1, 1]} : vector<24x128xf32> to vector<1x128xf32>
    %249 = vector.extract_strided_slice %235 {offsets = [5, 0], sizes = [1, 128], strides = [1, 1]} : vector<24x128xf32> to vector<1x128xf32>
    %250 = arith.maximumf %248, %249 : vector<1x128xf32>
    %c0_172 = arith.constant 0 : index
    %c3_173 = arith.constant 3 : index
    %c2_174 = arith.constant 2 : index
    %c0_175 = arith.constant 0 : index
    %251 = vector.load %arg2[%c0_172, %c3_173, %c2_174, %c0_175] : memref<1x12x12x128xf32, #tpu.memory_space<vmem>>, vector<1x1x1x128xf32>
    %252 = vector.shape_cast %251 : vector<1x1x1x128xf32> to vector<1x128xf32>
    %253 = vector.shape_cast %250 : vector<1x128xf32> to vector<1x1x1x128xf32>
    tpu.vector_store %arg2[%c0_172, %c3_173, %c2_174, %c0_175], %253 {strides = array<i32>} : memref<1x12x12x128xf32, #tpu.memory_space<vmem>>, vector<1x1x1x128xf32>,
    %254 = vector.extract_strided_slice %235 {offsets = [6, 0], sizes = [1, 128], strides = [1, 1]} : vector<24x128xf32> to vector<1x128xf32>
    %255 = vector.extract_strided_slice %235 {offsets = [7, 0], sizes = [1, 128], strides = [1, 1]} : vector<24x128xf32> to vector<1x128xf32>
    %256 = arith.maximumf %254, %255 : vector<1x128xf32>
    %c0_176 = arith.constant 0 : index
    %c3_177 = arith.constant 3 : index
    %c3_178 = arith.constant 3 : index
    %c0_179 = arith.constant 0 : index
    %257 = vector.load %arg2[%c0_176, %c3_177, %c3_178, %c0_179] : memref<1x12x12x128xf32, #tpu.memory_space<vmem>>, vector<1x1x1x128xf32>
    %258 = vector.shape_cast %257 : vector<1x1x1x128xf32> to vector<1x128xf32>
    %259 = vector.shape_cast %256 : vector<1x128xf32> to vector<1x1x1x128xf32>
    tpu.vector_store %arg2[%c0_176, %c3_177, %c3_178, %c0_179], %259 {strides = array<i32>} : memref<1x12x12x128xf32, #tpu.memory_space<vmem>>, vector<1x1x1x128xf32>,
    %260 = vector.extract_strided_slice %235 {offsets = [8, 0], sizes = [1, 128], strides = [1, 1]} : vector<24x128xf32> to vector<1x128xf32>
    %261 = vector.extract_strided_slice %235 {offsets = [9, 0], sizes = [1, 128], strides = [1, 1]} : vector<24x128xf32> to vector<1x128xf32>
    %262 = arith.maximumf %260, %261 : vector<1x128xf32>
    %c0_180 = arith.constant 0 : index
    %c3_181 = arith.constant 3 : index
    %c4_182 = arith.constant 4 : index
    %c0_183 = arith.constant 0 : index
    %263 = vector.load %arg2[%c0_180, %c3_181, %c4_182, %c0_183] : memref<1x12x12x128xf32, #tpu.memory_space<vmem>>, vector<1x1x1x128xf32>
    %264 = vector.shape_cast %263 : vector<1x1x1x128xf32> to vector<1x128xf32>
    %265 = vector.shape_cast %262 : vector<1x128xf32> to vector<1x1x1x128xf32>
    tpu.vector_store %arg2[%c0_180, %c3_181, %c4_182, %c0_183], %265 {strides = array<i32>} : memref<1x12x12x128xf32, #tpu.memory_space<vmem>>, vector<1x1x1x128xf32>,
    %266 = vector.extract_strided_slice %235 {offsets = [10, 0], sizes = [1, 128], strides = [1, 1]} : vector<24x128xf32> to vector<1x128xf32>
    %267 = vector.extract_strided_slice %235 {offsets = [11, 0], sizes = [1, 128], strides = [1, 1]} : vector<24x128xf32> to vector<1x128xf32>
    %268 = arith.maximumf %266, %267 : vector<1x128xf32>
    %c0_184 = arith.constant 0 : index
    %c3_185 = arith.constant 3 : index
    %c5_186 = arith.constant 5 : index
    %c0_187 = arith.constant 0 : index
    %269 = vector.load %arg2[%c0_184, %c3_185, %c5_186, %c0_187] : memref<1x12x12x128xf32, #tpu.memory_space<vmem>>, vector<1x1x1x128xf32>
    %270 = vector.shape_cast %269 : vector<1x1x1x128xf32> to vector<1x128xf32>
    %271 = vector.shape_cast %268 : vector<1x128xf32> to vector<1x1x1x128xf32>
    tpu.vector_store %arg2[%c0_184, %c3_185, %c5_186, %c0_187], %271 {strides = array<i32>} : memref<1x12x12x128xf32, #tpu.memory_space<vmem>>, vector<1x1x1x128xf32>,
    %272 = vector.extract_strided_slice %235 {offsets = [12, 0], sizes = [1, 128], strides = [1, 1]} : vector<24x128xf32> to vector<1x128xf32>
    %273 = vector.extract_strided_slice %235 {offsets = [13, 0], sizes = [1, 128], strides = [1, 1]} : vector<24x128xf32> to vector<1x128xf32>
    %274 = arith.maximumf %272, %273 : vector<1x128xf32>
    %c0_188 = arith.constant 0 : index
    %c3_189 = arith.constant 3 : index
    %c6_190 = arith.constant 6 : index
    %c0_191 = arith.constant 0 : index
    %275 = vector.load %arg2[%c0_188, %c3_189, %c6_190, %c0_191] : memref<1x12x12x128xf32, #tpu.memory_space<vmem>>, vector<1x1x1x128xf32>
    %276 = vector.shape_cast %275 : vector<1x1x1x128xf32> to vector<1x128xf32>
    %277 = vector.shape_cast %274 : vector<1x128xf32> to vector<1x1x1x128xf32>
    tpu.vector_store %arg2[%c0_188, %c3_189, %c6_190, %c0_191], %277 {strides = array<i32>} : memref<1x12x12x128xf32, #tpu.memory_space<vmem>>, vector<1x1x1x128xf32>,
    %278 = vector.extract_strided_slice %235 {offsets = [14, 0], sizes = [1, 128], strides = [1, 1]} : vector<24x128xf32> to vector<1x128xf32>
    %279 = vector.extract_strided_slice %235 {offsets = [15, 0], sizes = [1, 128], strides = [1, 1]} : vector<24x128xf32> to vector<1x128xf32>
    %280 = arith.maximumf %278, %279 : vector<1x128xf32>
    %c0_192 = arith.constant 0 : index
    %c3_193 = arith.constant 3 : index
    %c7_194 = arith.constant 7 : index
    %c0_195 = arith.constant 0 : index
    %281 = vector.load %arg2[%c0_192, %c3_193, %c7_194, %c0_195] : memref<1x12x12x128xf32, #tpu.memory_space<vmem>>, vector<1x1x1x128xf32>
    %282 = vector.shape_cast %281 : vector<1x1x1x128xf32> to vector<1x128xf32>
    %283 = vector.shape_cast %280 : vector<1x128xf32> to vector<1x1x1x128xf32>
    tpu.vector_store %arg2[%c0_192, %c3_193, %c7_194, %c0_195], %283 {strides = array<i32>} : memref<1x12x12x128xf32, #tpu.memory_space<vmem>>, vector<1x1x1x128xf32>,
    %284 = vector.extract_strided_slice %235 {offsets = [16, 0], sizes = [1, 128], strides = [1, 1]} : vector<24x128xf32> to vector<1x128xf32>
    %285 = vector.extract_strided_slice %235 {offsets = [17, 0], sizes = [1, 128], strides = [1, 1]} : vector<24x128xf32> to vector<1x128xf32>
    %286 = arith.maximumf %284, %285 : vector<1x128xf32>
    %c0_196 = arith.constant 0 : index
    %c3_197 = arith.constant 3 : index
    %c8_198 = arith.constant 8 : index
    %c0_199 = arith.constant 0 : index
    %287 = vector.load %arg2[%c0_196, %c3_197, %c8_198, %c0_199] : memref<1x12x12x128xf32, #tpu.memory_space<vmem>>, vector<1x1x1x128xf32>
    %288 = vector.shape_cast %287 : vector<1x1x1x128xf32> to vector<1x128xf32>
    %289 = vector.shape_cast %286 : vector<1x128xf32> to vector<1x1x1x128xf32>
    tpu.vector_store %arg2[%c0_196, %c3_197, %c8_198, %c0_199], %289 {strides = array<i32>} : memref<1x12x12x128xf32, #tpu.memory_space<vmem>>, vector<1x1x1x128xf32>,
    %290 = vector.extract_strided_slice %235 {offsets = [18, 0], sizes = [1, 128], strides = [1, 1]} : vector<24x128xf32> to vector<1x128xf32>
    %291 = vector.extract_strided_slice %235 {offsets = [19, 0], sizes = [1, 128], strides = [1, 1]} : vector<24x128xf32> to vector<1x128xf32>
    %292 = arith.maximumf %290, %291 : vector<1x128xf32>
    %c0_200 = arith.constant 0 : index
    %c3_201 = arith.constant 3 : index
    %c9_202 = arith.constant 9 : index
    %c0_203 = arith.constant 0 : index
    %293 = vector.load %arg2[%c0_200, %c3_201, %c9_202, %c0_203] : memref<1x12x12x128xf32, #tpu.memory_space<vmem>>, vector<1x1x1x128xf32>
    %294 = vector.shape_cast %293 : vector<1x1x1x128xf32> to vector<1x128xf32>
    %295 = vector.shape_cast %292 : vector<1x128xf32> to vector<1x1x1x128xf32>
    tpu.vector_store %arg2[%c0_200, %c3_201, %c9_202, %c0_203], %295 {strides = array<i32>} : memref<1x12x12x128xf32, #tpu.memory_space<vmem>>, vector<1x1x1x128xf32>,
    %296 = vector.extract_strided_slice %235 {offsets = [20, 0], sizes = [1, 128], strides = [1, 1]} : vector<24x128xf32> to vector<1x128xf32>
    %297 = vector.extract_strided_slice %235 {offsets = [21, 0], sizes = [1, 128], strides = [1, 1]} : vector<24x128xf32> to vector<1x128xf32>
    %298 = arith.maximumf %296, %297 : vector<1x128xf32>
    %c0_204 = arith.constant 0 : index
    %c3_205 = arith.constant 3 : index
    %c10_206 = arith.constant 10 : index
    %c0_207 = arith.constant 0 : index
    %299 = vector.load %arg2[%c0_204, %c3_205, %c10_206, %c0_207] : memref<1x12x12x128xf32, #tpu.memory_space<vmem>>, vector<1x1x1x128xf32>
    %300 = vector.shape_cast %299 : vector<1x1x1x128xf32> to vector<1x128xf32>
    %301 = vector.shape_cast %298 : vector<1x128xf32> to vector<1x1x1x128xf32>
    tpu.vector_store %arg2[%c0_204, %c3_205, %c10_206, %c0_207], %301 {strides = array<i32>} : memref<1x12x12x128xf32, #tpu.memory_space<vmem>>, vector<1x1x1x128xf32>,
    %302 = vector.extract_strided_slice %235 {offsets = [22, 0], sizes = [1, 128], strides = [1, 1]} : vector<24x128xf32> to vector<1x128xf32>
    %303 = vector.extract_strided_slice %235 {offsets = [23, 0], sizes = [1, 128], strides = [1, 1]} : vector<24x128xf32> to vector<1x128xf32>
    %304 = arith.maximumf %302, %303 : vector<1x128xf32>
    %c0_208 = arith.constant 0 : index
    %c3_209 = arith.constant 3 : index
    %c11_210 = arith.constant 11 : index
    %c0_211 = arith.constant 0 : index
    %305 = vector.load %arg2[%c0_208, %c3_209, %c11_210, %c0_211] : memref<1x12x12x128xf32, #tpu.memory_space<vmem>>, vector<1x1x1x128xf32>
    %306 = vector.shape_cast %305 : vector<1x1x1x128xf32> to vector<1x128xf32>
    %307 = vector.shape_cast %304 : vector<1x128xf32> to vector<1x1x1x128xf32>
    tpu.vector_store %arg2[%c0_208, %c3_209, %c11_210, %c0_211], %307 {strides = array<i32>} : memref<1x12x12x128xf32, #tpu.memory_space<vmem>>, vector<1x1x1x128xf32>,
    %c0_212 = arith.constant 0 : index
    %c8_213 = arith.constant 8 : index
    %c0_214 = arith.constant 0 : index
    %c0_215 = arith.constant 0 : index
    %308 = vector.load %arg1[%c0_212, %c8_213, %c0_214, %c0_215] : memref<1x24x24x128xf32, #tpu.memory_space<vmem>>, vector<1x1x24x128xf32>
    %309 = vector.shape_cast %308 : vector<1x1x24x128xf32> to vector<24x128xf32>
    %c0_216 = arith.constant 0 : index
    %c9_217 = arith.constant 9 : index
    %c0_218 = arith.constant 0 : index
    %c0_219 = arith.constant 0 : index
    %310 = vector.load %arg1[%c0_216, %c9_217, %c0_218, %c0_219] : memref<1x24x24x128xf32, #tpu.memory_space<vmem>>, vector<1x1x24x128xf32>
    %311 = vector.shape_cast %310 : vector<1x1x24x128xf32> to vector<24x128xf32>
    %312 = arith.maximumf %309, %311 : vector<24x128xf32>
    %313 = vector.extract_strided_slice %312 {offsets = [0, 0], sizes = [1, 128], strides = [1, 1]} : vector<24x128xf32> to vector<1x128xf32>
    %314 = vector.extract_strided_slice %312 {offsets = [1, 0], sizes = [1, 128], strides = [1, 1]} : vector<24x128xf32> to vector<1x128xf32>
    %315 = arith.maximumf %313, %314 : vector<1x128xf32>
    %c0_220 = arith.constant 0 : index
    %c4_221 = arith.constant 4 : index
    %c0_222 = arith.constant 0 : index
    %c0_223 = arith.constant 0 : index
    %316 = vector.load %arg2[%c0_220, %c4_221, %c0_222, %c0_223] : memref<1x12x12x128xf32, #tpu.memory_space<vmem>>, vector<1x1x1x128xf32>
    %317 = vector.shape_cast %316 : vector<1x1x1x128xf32> to vector<1x128xf32>
    %318 = vector.shape_cast %315 : vector<1x128xf32> to vector<1x1x1x128xf32>
    tpu.vector_store %arg2[%c0_220, %c4_221, %c0_222, %c0_223], %318 {strides = array<i32>} : memref<1x12x12x128xf32, #tpu.memory_space<vmem>>, vector<1x1x1x128xf32>,
    %319 = vector.extract_strided_slice %312 {offsets = [2, 0], sizes = [1, 128], strides = [1, 1]} : vector<24x128xf32> to vector<1x128xf32>
    %320 = vector.extract_strided_slice %312 {offsets = [3, 0], sizes = [1, 128], strides = [1, 1]} : vector<24x128xf32> to vector<1x128xf32>
    %321 = arith.maximumf %319, %320 : vector<1x128xf32>
    %c0_224 = arith.constant 0 : index
    %c4_225 = arith.constant 4 : index
    %c1_226 = arith.constant 1 : index
    %c0_227 = arith.constant 0 : index
    %322 = vector.load %arg2[%c0_224, %c4_225, %c1_226, %c0_227] : memref<1x12x12x128xf32, #tpu.memory_space<vmem>>, vector<1x1x1x128xf32>
    %323 = vector.shape_cast %322 : vector<1x1x1x128xf32> to vector<1x128xf32>
    %324 = vector.shape_cast %321 : vector<1x128xf32> to vector<1x1x1x128xf32>
    tpu.vector_store %arg2[%c0_224, %c4_225, %c1_226, %c0_227], %324 {strides = array<i32>} : memref<1x12x12x128xf32, #tpu.memory_space<vmem>>, vector<1x1x1x128xf32>,
    %325 = vector.extract_strided_slice %312 {offsets = [4, 0], sizes = [1, 128], strides = [1, 1]} : vector<24x128xf32> to vector<1x128xf32>
    %326 = vector.extract_strided_slice %312 {offsets = [5, 0], sizes = [1, 128], strides = [1, 1]} : vector<24x128xf32> to vector<1x128xf32>
    %327 = arith.maximumf %325, %326 : vector<1x128xf32>
    %c0_228 = arith.constant 0 : index
    %c4_229 = arith.constant 4 : index
    %c2_230 = arith.constant 2 : index
    %c0_231 = arith.constant 0 : index
    %328 = vector.load %arg2[%c0_228, %c4_229, %c2_230, %c0_231] : memref<1x12x12x128xf32, #tpu.memory_space<vmem>>, vector<1x1x1x128xf32>
    %329 = vector.shape_cast %328 : vector<1x1x1x128xf32> to vector<1x128xf32>
    %330 = vector.shape_cast %327 : vector<1x128xf32> to vector<1x1x1x128xf32>
    tpu.vector_store %arg2[%c0_228, %c4_229, %c2_230, %c0_231], %330 {strides = array<i32>} : memref<1x12x12x128xf32, #tpu.memory_space<vmem>>, vector<1x1x1x128xf32>,
    %331 = vector.extract_strided_slice %312 {offsets = [6, 0], sizes = [1, 128], strides = [1, 1]} : vector<24x128xf32> to vector<1x128xf32>
    %332 = vector.extract_strided_slice %312 {offsets = [7, 0], sizes = [1, 128], strides = [1, 1]} : vector<24x128xf32> to vector<1x128xf32>
    %333 = arith.maximumf %331, %332 : vector<1x128xf32>
    %c0_232 = arith.constant 0 : index
    %c4_233 = arith.constant 4 : index
    %c3_234 = arith.constant 3 : index
    %c0_235 = arith.constant 0 : index
    %334 = vector.load %arg2[%c0_232, %c4_233, %c3_234, %c0_235] : memref<1x12x12x128xf32, #tpu.memory_space<vmem>>, vector<1x1x1x128xf32>
    %335 = vector.shape_cast %334 : vector<1x1x1x128xf32> to vector<1x128xf32>
    %336 = vector.shape_cast %333 : vector<1x128xf32> to vector<1x1x1x128xf32>
    tpu.vector_store %arg2[%c0_232, %c4_233, %c3_234, %c0_235], %336 {strides = array<i32>} : memref<1x12x12x128xf32, #tpu.memory_space<vmem>>, vector<1x1x1x128xf32>,
    %337 = vector.extract_strided_slice %312 {offsets = [8, 0], sizes = [1, 128], strides = [1, 1]} : vector<24x128xf32> to vector<1x128xf32>
    %338 = vector.extract_strided_slice %312 {offsets = [9, 0], sizes = [1, 128], strides = [1, 1]} : vector<24x128xf32> to vector<1x128xf32>
    %339 = arith.maximumf %337, %338 : vector<1x128xf32>
    %c0_236 = arith.constant 0 : index
    %c4_237 = arith.constant 4 : index
    %c4_238 = arith.constant 4 : index
    %c0_239 = arith.constant 0 : index
    %340 = vector.load %arg2[%c0_236, %c4_237, %c4_238, %c0_239] : memref<1x12x12x128xf32, #tpu.memory_space<vmem>>, vector<1x1x1x128xf32>
    %341 = vector.shape_cast %340 : vector<1x1x1x128xf32> to vector<1x128xf32>
    %342 = vector.shape_cast %339 : vector<1x128xf32> to vector<1x1x1x128xf32>
    tpu.vector_store %arg2[%c0_236, %c4_237, %c4_238, %c0_239], %342 {strides = array<i32>} : memref<1x12x12x128xf32, #tpu.memory_space<vmem>>, vector<1x1x1x128xf32>,
    %343 = vector.extract_strided_slice %312 {offsets = [10, 0], sizes = [1, 128], strides = [1, 1]} : vector<24x128xf32> to vector<1x128xf32>
    %344 = vector.extract_strided_slice %312 {offsets = [11, 0], sizes = [1, 128], strides = [1, 1]} : vector<24x128xf32> to vector<1x128xf32>
    %345 = arith.maximumf %343, %344 : vector<1x128xf32>
    %c0_240 = arith.constant 0 : index
    %c4_241 = arith.constant 4 : index
    %c5_242 = arith.constant 5 : index
    %c0_243 = arith.constant 0 : index
    %346 = vector.load %arg2[%c0_240, %c4_241, %c5_242, %c0_243] : memref<1x12x12x128xf32, #tpu.memory_space<vmem>>, vector<1x1x1x128xf32>
    %347 = vector.shape_cast %346 : vector<1x1x1x128xf32> to vector<1x128xf32>
    %348 = vector.shape_cast %345 : vector<1x128xf32> to vector<1x1x1x128xf32>
    tpu.vector_store %arg2[%c0_240, %c4_241, %c5_242, %c0_243], %348 {strides = array<i32>} : memref<1x12x12x128xf32, #tpu.memory_space<vmem>>, vector<1x1x1x128xf32>,
    %349 = vector.extract_strided_slice %312 {offsets = [12, 0], sizes = [1, 128], strides = [1, 1]} : vector<24x128xf32> to vector<1x128xf32>
    %350 = vector.extract_strided_slice %312 {offsets = [13, 0], sizes = [1, 128], strides = [1, 1]} : vector<24x128xf32> to vector<1x128xf32>
    %351 = arith.maximumf %349, %350 : vector<1x128xf32>
    %c0_244 = arith.constant 0 : index
    %c4_245 = arith.constant 4 : index
    %c6_246 = arith.constant 6 : index
    %c0_247 = arith.constant 0 : index
    %352 = vector.load %arg2[%c0_244, %c4_245, %c6_246, %c0_247] : memref<1x12x12x128xf32, #tpu.memory_space<vmem>>, vector<1x1x1x128xf32>
    %353 = vector.shape_cast %352 : vector<1x1x1x128xf32> to vector<1x128xf32>
    %354 = vector.shape_cast %351 : vector<1x128xf32> to vector<1x1x1x128xf32>
    tpu.vector_store %arg2[%c0_244, %c4_245, %c6_246, %c0_247], %354 {strides = array<i32>} : memref<1x12x12x128xf32, #tpu.memory_space<vmem>>, vector<1x1x1x128xf32>,
    %355 = vector.extract_strided_slice %312 {offsets = [14, 0], sizes = [1, 128], strides = [1, 1]} : vector<24x128xf32> to vector<1x128xf32>
    %356 = vector.extract_strided_slice %312 {offsets = [15, 0], sizes = [1, 128], strides = [1, 1]} : vector<24x128xf32> to vector<1x128xf32>
    %357 = arith.maximumf %355, %356 : vector<1x128xf32>
    %c0_248 = arith.constant 0 : index
    %c4_249 = arith.constant 4 : index
    %c7_250 = arith.constant 7 : index
    %c0_251 = arith.constant 0 : index
    %358 = vector.load %arg2[%c0_248, %c4_249, %c7_250, %c0_251] : memref<1x12x12x128xf32, #tpu.memory_space<vmem>>, vector<1x1x1x128xf32>
    %359 = vector.shape_cast %358 : vector<1x1x1x128xf32> to vector<1x128xf32>
    %360 = vector.shape_cast %357 : vector<1x128xf32> to vector<1x1x1x128xf32>
    tpu.vector_store %arg2[%c0_248, %c4_249, %c7_250, %c0_251], %360 {strides = array<i32>} : memref<1x12x12x128xf32, #tpu.memory_space<vmem>>, vector<1x1x1x128xf32>,
    %361 = vector.extract_strided_slice %312 {offsets = [16, 0], sizes = [1, 128], strides = [1, 1]} : vector<24x128xf32> to vector<1x128xf32>
    %362 = vector.extract_strided_slice %312 {offsets = [17, 0], sizes = [1, 128], strides = [1, 1]} : vector<24x128xf32> to vector<1x128xf32>
    %363 = arith.maximumf %361, %362 : vector<1x128xf32>
    %c0_252 = arith.constant 0 : index
    %c4_253 = arith.constant 4 : index
    %c8_254 = arith.constant 8 : index
    %c0_255 = arith.constant 0 : index
    %364 = vector.load %arg2[%c0_252, %c4_253, %c8_254, %c0_255] : memref<1x12x12x128xf32, #tpu.memory_space<vmem>>, vector<1x1x1x128xf32>
    %365 = vector.shape_cast %364 : vector<1x1x1x128xf32> to vector<1x128xf32>
    %366 = vector.shape_cast %363 : vector<1x128xf32> to vector<1x1x1x128xf32>
    tpu.vector_store %arg2[%c0_252, %c4_253, %c8_254, %c0_255], %366 {strides = array<i32>} : memref<1x12x12x128xf32, #tpu.memory_space<vmem>>, vector<1x1x1x128xf32>,
    %367 = vector.extract_strided_slice %312 {offsets = [18, 0], sizes = [1, 128], strides = [1, 1]} : vector<24x128xf32> to vector<1x128xf32>
    %368 = vector.extract_strided_slice %312 {offsets = [19, 0], sizes = [1, 128], strides = [1, 1]} : vector<24x128xf32> to vector<1x128xf32>
    %369 = arith.maximumf %367, %368 : vector<1x128xf32>
    %c0_256 = arith.constant 0 : index
    %c4_257 = arith.constant 4 : index
    %c9_258 = arith.constant 9 : index
    %c0_259 = arith.constant 0 : index
    %370 = vector.load %arg2[%c0_256, %c4_257, %c9_258, %c0_259] : memref<1x12x12x128xf32, #tpu.memory_space<vmem>>, vector<1x1x1x128xf32>
    %371 = vector.shape_cast %370 : vector<1x1x1x128xf32> to vector<1x128xf32>
    %372 = vector.shape_cast %369 : vector<1x128xf32> to vector<1x1x1x128xf32>
    tpu.vector_store %arg2[%c0_256, %c4_257, %c9_258, %c0_259], %372 {strides = array<i32>} : memref<1x12x12x128xf32, #tpu.memory_space<vmem>>, vector<1x1x1x128xf32>,
    %373 = vector.extract_strided_slice %312 {offsets = [20, 0], sizes = [1, 128], strides = [1, 1]} : vector<24x128xf32> to vector<1x128xf32>
    %374 = vector.extract_strided_slice %312 {offsets = [21, 0], sizes = [1, 128], strides = [1, 1]} : vector<24x128xf32> to vector<1x128xf32>
    %375 = arith.maximumf %373, %374 : vector<1x128xf32>
    %c0_260 = arith.constant 0 : index
    %c4_261 = arith.constant 4 : index
    %c10_262 = arith.constant 10 : index
    %c0_263 = arith.constant 0 : index
    %376 = vector.load %arg2[%c0_260, %c4_261, %c10_262, %c0_263] : memref<1x12x12x128xf32, #tpu.memory_space<vmem>>, vector<1x1x1x128xf32>
    %377 = vector.shape_cast %376 : vector<1x1x1x128xf32> to vector<1x128xf32>
    %378 = vector.shape_cast %375 : vector<1x128xf32> to vector<1x1x1x128xf32>
    tpu.vector_store %arg2[%c0_260, %c4_261, %c10_262, %c0_263], %378 {strides = array<i32>} : memref<1x12x12x128xf32, #tpu.memory_space<vmem>>, vector<1x1x1x128xf32>,
    %379 = vector.extract_strided_slice %312 {offsets = [22, 0], sizes = [1, 128], strides = [1, 1]} : vector<24x128xf32> to vector<1x128xf32>
    %380 = vector.extract_strided_slice %312 {offsets = [23, 0], sizes = [1, 128], strides = [1, 1]} : vector<24x128xf32> to vector<1x128xf32>
    %381 = arith.maximumf %379, %380 : vector<1x128xf32>
    %c0_264 = arith.constant 0 : index
    %c4_265 = arith.constant 4 : index
    %c11_266 = arith.constant 11 : index
    %c0_267 = arith.constant 0 : index
    %382 = vector.load %arg2[%c0_264, %c4_265, %c11_266, %c0_267] : memref<1x12x12x128xf32, #tpu.memory_space<vmem>>, vector<1x1x1x128xf32>
    %383 = vector.shape_cast %382 : vector<1x1x1x128xf32> to vector<1x128xf32>
    %384 = vector.shape_cast %381 : vector<1x128xf32> to vector<1x1x1x128xf32>
    tpu.vector_store %arg2[%c0_264, %c4_265, %c11_266, %c0_267], %384 {strides = array<i32>} : memref<1x12x12x128xf32, #tpu.memory_space<vmem>>, vector<1x1x1x128xf32>,
    %c0_268 = arith.constant 0 : index
    %c10_269 = arith.constant 10 : index
    %c0_270 = arith.constant 0 : index
    %c0_271 = arith.constant 0 : index
    %385 = vector.load %arg1[%c0_268, %c10_269, %c0_270, %c0_271] : memref<1x24x24x128xf32, #tpu.memory_space<vmem>>, vector<1x1x24x128xf32>
    %386 = vector.shape_cast %385 : vector<1x1x24x128xf32> to vector<24x128xf32>
    %c0_272 = arith.constant 0 : index
    %c11_273 = arith.constant 11 : index
    %c0_274 = arith.constant 0 : index
    %c0_275 = arith.constant 0 : index
    %387 = vector.load %arg1[%c0_272, %c11_273, %c0_274, %c0_275] : memref<1x24x24x128xf32, #tpu.memory_space<vmem>>, vector<1x1x24x128xf32>
    %388 = vector.shape_cast %387 : vector<1x1x24x128xf32> to vector<24x128xf32>
    %389 = arith.maximumf %386, %388 : vector<24x128xf32>
    %390 = vector.extract_strided_slice %389 {offsets = [0, 0], sizes = [1, 128], strides = [1, 1]} : vector<24x128xf32> to vector<1x128xf32>
    %391 = vector.extract_strided_slice %389 {offsets = [1, 0], sizes = [1, 128], strides = [1, 1]} : vector<24x128xf32> to vector<1x128xf32>
    %392 = arith.maximumf %390, %391 : vector<1x128xf32>
    %c0_276 = arith.constant 0 : index
    %c5_277 = arith.constant 5 : index
    %c0_278 = arith.constant 0 : index
    %c0_279 = arith.constant 0 : index
    %393 = vector.load %arg2[%c0_276, %c5_277, %c0_278, %c0_279] : memref<1x12x12x128xf32, #tpu.memory_space<vmem>>, vector<1x1x1x128xf32>
    %394 = vector.shape_cast %393 : vector<1x1x1x128xf32> to vector<1x128xf32>
    %395 = vector.shape_cast %392 : vector<1x128xf32> to vector<1x1x1x128xf32>
    tpu.vector_store %arg2[%c0_276, %c5_277, %c0_278, %c0_279], %395 {strides = array<i32>} : memref<1x12x12x128xf32, #tpu.memory_space<vmem>>, vector<1x1x1x128xf32>,
    %396 = vector.extract_strided_slice %389 {offsets = [2, 0], sizes = [1, 128], strides = [1, 1]} : vector<24x128xf32> to vector<1x128xf32>
    %397 = vector.extract_strided_slice %389 {offsets = [3, 0], sizes = [1, 128], strides = [1, 1]} : vector<24x128xf32> to vector<1x128xf32>
    %398 = arith.maximumf %396, %397 : vector<1x128xf32>
    %c0_280 = arith.constant 0 : index
    %c5_281 = arith.constant 5 : index
    %c1_282 = arith.constant 1 : index
    %c0_283 = arith.constant 0 : index
    %399 = vector.load %arg2[%c0_280, %c5_281, %c1_282, %c0_283] : memref<1x12x12x128xf32, #tpu.memory_space<vmem>>, vector<1x1x1x128xf32>
    %400 = vector.shape_cast %399 : vector<1x1x1x128xf32> to vector<1x128xf32>
    %401 = vector.shape_cast %398 : vector<1x128xf32> to vector<1x1x1x128xf32>
    tpu.vector_store %arg2[%c0_280, %c5_281, %c1_282, %c0_283], %401 {strides = array<i32>} : memref<1x12x12x128xf32, #tpu.memory_space<vmem>>, vector<1x1x1x128xf32>,
    %402 = vector.extract_strided_slice %389 {offsets = [4, 0], sizes = [1, 128], strides = [1, 1]} : vector<24x128xf32> to vector<1x128xf32>
    %403 = vector.extract_strided_slice %389 {offsets = [5, 0], sizes = [1, 128], strides = [1, 1]} : vector<24x128xf32> to vector<1x128xf32>
    %404 = arith.maximumf %402, %403 : vector<1x128xf32>
    %c0_284 = arith.constant 0 : index
    %c5_285 = arith.constant 5 : index
    %c2_286 = arith.constant 2 : index
    %c0_287 = arith.constant 0 : index
    %405 = vector.load %arg2[%c0_284, %c5_285, %c2_286, %c0_287] : memref<1x12x12x128xf32, #tpu.memory_space<vmem>>, vector<1x1x1x128xf32>
    %406 = vector.shape_cast %405 : vector<1x1x1x128xf32> to vector<1x128xf32>
    %407 = vector.shape_cast %404 : vector<1x128xf32> to vector<1x1x1x128xf32>
    tpu.vector_store %arg2[%c0_284, %c5_285, %c2_286, %c0_287], %407 {strides = array<i32>} : memref<1x12x12x128xf32, #tpu.memory_space<vmem>>, vector<1x1x1x128xf32>,
    %408 = vector.extract_strided_slice %389 {offsets = [6, 0], sizes = [1, 128], strides = [1, 1]} : vector<24x128xf32> to vector<1x128xf32>
    %409 = vector.extract_strided_slice %389 {offsets = [7, 0], sizes = [1, 128], strides = [1, 1]} : vector<24x128xf32> to vector<1x128xf32>
    %410 = arith.maximumf %408, %409 : vector<1x128xf32>
    %c0_288 = arith.constant 0 : index
    %c5_289 = arith.constant 5 : index
    %c3_290 = arith.constant 3 : index
    %c0_291 = arith.constant 0 : index
    %411 = vector.load %arg2[%c0_288, %c5_289, %c3_290, %c0_291] : memref<1x12x12x128xf32, #tpu.memory_space<vmem>>, vector<1x1x1x128xf32>
    %412 = vector.shape_cast %411 : vector<1x1x1x128xf32> to vector<1x128xf32>
    %413 = vector.shape_cast %410 : vector<1x128xf32> to vector<1x1x1x128xf32>
    tpu.vector_store %arg2[%c0_288, %c5_289, %c3_290, %c0_291], %413 {strides = array<i32>} : memref<1x12x12x128xf32, #tpu.memory_space<vmem>>, vector<1x1x1x128xf32>,
    %414 = vector.extract_strided_slice %389 {offsets = [8, 0], sizes = [1, 128], strides = [1, 1]} : vector<24x128xf32> to vector<1x128xf32>
    %415 = vector.extract_strided_slice %389 {offsets = [9, 0], sizes = [1, 128], strides = [1, 1]} : vector<24x128xf32> to vector<1x128xf32>
    %416 = arith.maximumf %414, %415 : vector<1x128xf32>
    %c0_292 = arith.constant 0 : index
    %c5_293 = arith.constant 5 : index
    %c4_294 = arith.constant 4 : index
    %c0_295 = arith.constant 0 : index
    %417 = vector.load %arg2[%c0_292, %c5_293, %c4_294, %c0_295] : memref<1x12x12x128xf32, #tpu.memory_space<vmem>>, vector<1x1x1x128xf32>
    %418 = vector.shape_cast %417 : vector<1x1x1x128xf32> to vector<1x128xf32>
    %419 = vector.shape_cast %416 : vector<1x128xf32> to vector<1x1x1x128xf32>
    tpu.vector_store %arg2[%c0_292, %c5_293, %c4_294, %c0_295], %419 {strides = array<i32>} : memref<1x12x12x128xf32, #tpu.memory_space<vmem>>, vector<1x1x1x128xf32>,
    %420 = vector.extract_strided_slice %389 {offsets = [10, 0], sizes = [1, 128], strides = [1, 1]} : vector<24x128xf32> to vector<1x128xf32>
    %421 = vector.extract_strided_slice %389 {offsets = [11, 0], sizes = [1, 128], strides = [1, 1]} : vector<24x128xf32> to vector<1x128xf32>
    %422 = arith.maximumf %420, %421 : vector<1x128xf32>
    %c0_296 = arith.constant 0 : index
    %c5_297 = arith.constant 5 : index
    %c5_298 = arith.constant 5 : index
    %c0_299 = arith.constant 0 : index
    %423 = vector.load %arg2[%c0_296, %c5_297, %c5_298, %c0_299] : memref<1x12x12x128xf32, #tpu.memory_space<vmem>>, vector<1x1x1x128xf32>
    %424 = vector.shape_cast %423 : vector<1x1x1x128xf32> to vector<1x128xf32>
    %425 = vector.shape_cast %422 : vector<1x128xf32> to vector<1x1x1x128xf32>
    tpu.vector_store %arg2[%c0_296, %c5_297, %c5_298, %c0_299], %425 {strides = array<i32>} : memref<1x12x12x128xf32, #tpu.memory_space<vmem>>, vector<1x1x1x128xf32>,
    %426 = vector.extract_strided_slice %389 {offsets = [12, 0], sizes = [1, 128], strides = [1, 1]} : vector<24x128xf32> to vector<1x128xf32>
    %427 = vector.extract_strided_slice %389 {offsets = [13, 0], sizes = [1, 128], strides = [1, 1]} : vector<24x128xf32> to vector<1x128xf32>
    %428 = arith.maximumf %426, %427 : vector<1x128xf32>
    %c0_300 = arith.constant 0 : index
    %c5_301 = arith.constant 5 : index
    %c6_302 = arith.constant 6 : index
    %c0_303 = arith.constant 0 : index
    %429 = vector.load %arg2[%c0_300, %c5_301, %c6_302, %c0_303] : memref<1x12x12x128xf32, #tpu.memory_space<vmem>>, vector<1x1x1x128xf32>
    %430 = vector.shape_cast %429 : vector<1x1x1x128xf32> to vector<1x128xf32>
    %431 = vector.shape_cast %428 : vector<1x128xf32> to vector<1x1x1x128xf32>
    tpu.vector_store %arg2[%c0_300, %c5_301, %c6_302, %c0_303], %431 {strides = array<i32>} : memref<1x12x12x128xf32, #tpu.memory_space<vmem>>, vector<1x1x1x128xf32>,
    %432 = vector.extract_strided_slice %389 {offsets = [14, 0], sizes = [1, 128], strides = [1, 1]} : vector<24x128xf32> to vector<1x128xf32>
    %433 = vector.extract_strided_slice %389 {offsets = [15, 0], sizes = [1, 128], strides = [1, 1]} : vector<24x128xf32> to vector<1x128xf32>
    %434 = arith.maximumf %432, %433 : vector<1x128xf32>
    %c0_304 = arith.constant 0 : index
    %c5_305 = arith.constant 5 : index
    %c7_306 = arith.constant 7 : index
    %c0_307 = arith.constant 0 : index
    %435 = vector.load %arg2[%c0_304, %c5_305, %c7_306, %c0_307] : memref<1x12x12x128xf32, #tpu.memory_space<vmem>>, vector<1x1x1x128xf32>
    %436 = vector.shape_cast %435 : vector<1x1x1x128xf32> to vector<1x128xf32>
    %437 = vector.shape_cast %434 : vector<1x128xf32> to vector<1x1x1x128xf32>
    tpu.vector_store %arg2[%c0_304, %c5_305, %c7_306, %c0_307], %437 {strides = array<i32>} : memref<1x12x12x128xf32, #tpu.memory_space<vmem>>, vector<1x1x1x128xf32>,
    %438 = vector.extract_strided_slice %389 {offsets = [16, 0], sizes = [1, 128], strides = [1, 1]} : vector<24x128xf32> to vector<1x128xf32>
    %439 = vector.extract_strided_slice %389 {offsets = [17, 0], sizes = [1, 128], strides = [1, 1]} : vector<24x128xf32> to vector<1x128xf32>
    %440 = arith.maximumf %438, %439 : vector<1x128xf32>
    %c0_308 = arith.constant 0 : index
    %c5_309 = arith.constant 5 : index
    %c8_310 = arith.constant 8 : index
    %c0_311 = arith.constant 0 : index
    %441 = vector.load %arg2[%c0_308, %c5_309, %c8_310, %c0_311] : memref<1x12x12x128xf32, #tpu.memory_space<vmem>>, vector<1x1x1x128xf32>
    %442 = vector.shape_cast %441 : vector<1x1x1x128xf32> to vector<1x128xf32>
    %443 = vector.shape_cast %440 : vector<1x128xf32> to vector<1x1x1x128xf32>
    tpu.vector_store %arg2[%c0_308, %c5_309, %c8_310, %c0_311], %443 {strides = array<i32>} : memref<1x12x12x128xf32, #tpu.memory_space<vmem>>, vector<1x1x1x128xf32>,
    %444 = vector.extract_strided_slice %389 {offsets = [18, 0], sizes = [1, 128], strides = [1, 1]} : vector<24x128xf32> to vector<1x128xf32>
    %445 = vector.extract_strided_slice %389 {offsets = [19, 0], sizes = [1, 128], strides = [1, 1]} : vector<24x128xf32> to vector<1x128xf32>
    %446 = arith.maximumf %444, %445 : vector<1x128xf32>
    %c0_312 = arith.constant 0 : index
    %c5_313 = arith.constant 5 : index
    %c9_314 = arith.constant 9 : index
    %c0_315 = arith.constant 0 : index
    %447 = vector.load %arg2[%c0_312, %c5_313, %c9_314, %c0_315] : memref<1x12x12x128xf32, #tpu.memory_space<vmem>>, vector<1x1x1x128xf32>
    %448 = vector.shape_cast %447 : vector<1x1x1x128xf32> to vector<1x128xf32>
    %449 = vector.shape_cast %446 : vector<1x128xf32> to vector<1x1x1x128xf32>
    tpu.vector_store %arg2[%c0_312, %c5_313, %c9_314, %c0_315], %449 {strides = array<i32>} : memref<1x12x12x128xf32, #tpu.memory_space<vmem>>, vector<1x1x1x128xf32>,
    %450 = vector.extract_strided_slice %389 {offsets = [20, 0], sizes = [1, 128], strides = [1, 1]} : vector<24x128xf32> to vector<1x128xf32>
    %451 = vector.extract_strided_slice %389 {offsets = [21, 0], sizes = [1, 128], strides = [1, 1]} : vector<24x128xf32> to vector<1x128xf32>
    %452 = arith.maximumf %450, %451 : vector<1x128xf32>
    %c0_316 = arith.constant 0 : index
    %c5_317 = arith.constant 5 : index
    %c10_318 = arith.constant 10 : index
    %c0_319 = arith.constant 0 : index
    %453 = vector.load %arg2[%c0_316, %c5_317, %c10_318, %c0_319] : memref<1x12x12x128xf32, #tpu.memory_space<vmem>>, vector<1x1x1x128xf32>
    %454 = vector.shape_cast %453 : vector<1x1x1x128xf32> to vector<1x128xf32>
    %455 = vector.shape_cast %452 : vector<1x128xf32> to vector<1x1x1x128xf32>
    tpu.vector_store %arg2[%c0_316, %c5_317, %c10_318, %c0_319], %455 {strides = array<i32>} : memref<1x12x12x128xf32, #tpu.memory_space<vmem>>, vector<1x1x1x128xf32>,
    %456 = vector.extract_strided_slice %389 {offsets = [22, 0], sizes = [1, 128], strides = [1, 1]} : vector<24x128xf32> to vector<1x128xf32>
    %457 = vector.extract_strided_slice %389 {offsets = [23, 0], sizes = [1, 128], strides = [1, 1]} : vector<24x128xf32> to vector<1x128xf32>
    %458 = arith.maximumf %456, %457 : vector<1x128xf32>
    %c0_320 = arith.constant 0 : index
    %c5_321 = arith.constant 5 : index
    %c11_322 = arith.constant 11 : index
    %c0_323 = arith.constant 0 : index
    %459 = vector.load %arg2[%c0_320, %c5_321, %c11_322, %c0_323] : memref<1x12x12x128xf32, #tpu.memory_space<vmem>>, vector<1x1x1x128xf32>
    %460 = vector.shape_cast %459 : vector<1x1x1x128xf32> to vector<1x128xf32>
    %461 = vector.shape_cast %458 : vector<1x128xf32> to vector<1x1x1x128xf32>
    tpu.vector_store %arg2[%c0_320, %c5_321, %c11_322, %c0_323], %461 {strides = array<i32>} : memref<1x12x12x128xf32, #tpu.memory_space<vmem>>, vector<1x1x1x128xf32>,
    %c0_324 = arith.constant 0 : index
    %c12 = arith.constant 12 : index
    %c0_325 = arith.constant 0 : index
    %c0_326 = arith.constant 0 : index
    %462 = vector.load %arg1[%c0_324, %c12, %c0_325, %c0_326] : memref<1x24x24x128xf32, #tpu.memory_space<vmem>>, vector<1x1x24x128xf32>
    %463 = vector.shape_cast %462 : vector<1x1x24x128xf32> to vector<24x128xf32>
    %c0_327 = arith.constant 0 : index
    %c13 = arith.constant 13 : index
    %c0_328 = arith.constant 0 : index
    %c0_329 = arith.constant 0 : index
    %464 = vector.load %arg1[%c0_327, %c13, %c0_328, %c0_329] : memref<1x24x24x128xf32, #tpu.memory_space<vmem>>, vector<1x1x24x128xf32>
    %465 = vector.shape_cast %464 : vector<1x1x24x128xf32> to vector<24x128xf32>
    %466 = arith.maximumf %463, %465 : vector<24x128xf32>
    %467 = vector.extract_strided_slice %466 {offsets = [0, 0], sizes = [1, 128], strides = [1, 1]} : vector<24x128xf32> to vector<1x128xf32>
    %468 = vector.extract_strided_slice %466 {offsets = [1, 0], sizes = [1, 128], strides = [1, 1]} : vector<24x128xf32> to vector<1x128xf32>
    %469 = arith.maximumf %467, %468 : vector<1x128xf32>
    %c0_330 = arith.constant 0 : index
    %c6_331 = arith.constant 6 : index
    %c0_332 = arith.constant 0 : index
    %c0_333 = arith.constant 0 : index
    %470 = vector.load %arg2[%c0_330, %c6_331, %c0_332, %c0_333] : memref<1x12x12x128xf32, #tpu.memory_space<vmem>>, vector<1x1x1x128xf32>
    %471 = vector.shape_cast %470 : vector<1x1x1x128xf32> to vector<1x128xf32>
    %472 = vector.shape_cast %469 : vector<1x128xf32> to vector<1x1x1x128xf32>
    tpu.vector_store %arg2[%c0_330, %c6_331, %c0_332, %c0_333], %472 {strides = array<i32>} : memref<1x12x12x128xf32, #tpu.memory_space<vmem>>, vector<1x1x1x128xf32>,
    %473 = vector.extract_strided_slice %466 {offsets = [2, 0], sizes = [1, 128], strides = [1, 1]} : vector<24x128xf32> to vector<1x128xf32>
    %474 = vector.extract_strided_slice %466 {offsets = [3, 0], sizes = [1, 128], strides = [1, 1]} : vector<24x128xf32> to vector<1x128xf32>
    %475 = arith.maximumf %473, %474 : vector<1x128xf32>
    %c0_334 = arith.constant 0 : index
    %c6_335 = arith.constant 6 : index
    %c1_336 = arith.constant 1 : index
    %c0_337 = arith.constant 0 : index
    %476 = vector.load %arg2[%c0_334, %c6_335, %c1_336, %c0_337] : memref<1x12x12x128xf32, #tpu.memory_space<vmem>>, vector<1x1x1x128xf32>
    %477 = vector.shape_cast %476 : vector<1x1x1x128xf32> to vector<1x128xf32>
    %478 = vector.shape_cast %475 : vector<1x128xf32> to vector<1x1x1x128xf32>
    tpu.vector_store %arg2[%c0_334, %c6_335, %c1_336, %c0_337], %478 {strides = array<i32>} : memref<1x12x12x128xf32, #tpu.memory_space<vmem>>, vector<1x1x1x128xf32>,
    %479 = vector.extract_strided_slice %466 {offsets = [4, 0], sizes = [1, 128], strides = [1, 1]} : vector<24x128xf32> to vector<1x128xf32>
    %480 = vector.extract_strided_slice %466 {offsets = [5, 0], sizes = [1, 128], strides = [1, 1]} : vector<24x128xf32> to vector<1x128xf32>
    %481 = arith.maximumf %479, %480 : vector<1x128xf32>
    %c0_338 = arith.constant 0 : index
    %c6_339 = arith.constant 6 : index
    %c2_340 = arith.constant 2 : index
    %c0_341 = arith.constant 0 : index
    %482 = vector.load %arg2[%c0_338, %c6_339, %c2_340, %c0_341] : memref<1x12x12x128xf32, #tpu.memory_space<vmem>>, vector<1x1x1x128xf32>
    %483 = vector.shape_cast %482 : vector<1x1x1x128xf32> to vector<1x128xf32>
    %484 = vector.shape_cast %481 : vector<1x128xf32> to vector<1x1x1x128xf32>
    tpu.vector_store %arg2[%c0_338, %c6_339, %c2_340, %c0_341], %484 {strides = array<i32>} : memref<1x12x12x128xf32, #tpu.memory_space<vmem>>, vector<1x1x1x128xf32>,
    %485 = vector.extract_strided_slice %466 {offsets = [6, 0], sizes = [1, 128], strides = [1, 1]} : vector<24x128xf32> to vector<1x128xf32>
    %486 = vector.extract_strided_slice %466 {offsets = [7, 0], sizes = [1, 128], strides = [1, 1]} : vector<24x128xf32> to vector<1x128xf32>
    %487 = arith.maximumf %485, %486 : vector<1x128xf32>
    %c0_342 = arith.constant 0 : index
    %c6_343 = arith.constant 6 : index
    %c3_344 = arith.constant 3 : index
    %c0_345 = arith.constant 0 : index
    %488 = vector.load %arg2[%c0_342, %c6_343, %c3_344, %c0_345] : memref<1x12x12x128xf32, #tpu.memory_space<vmem>>, vector<1x1x1x128xf32>
    %489 = vector.shape_cast %488 : vector<1x1x1x128xf32> to vector<1x128xf32>
    %490 = vector.shape_cast %487 : vector<1x128xf32> to vector<1x1x1x128xf32>
    tpu.vector_store %arg2[%c0_342, %c6_343, %c3_344, %c0_345], %490 {strides = array<i32>} : memref<1x12x12x128xf32, #tpu.memory_space<vmem>>, vector<1x1x1x128xf32>,
    %491 = vector.extract_strided_slice %466 {offsets = [8, 0], sizes = [1, 128], strides = [1, 1]} : vector<24x128xf32> to vector<1x128xf32>
    %492 = vector.extract_strided_slice %466 {offsets = [9, 0], sizes = [1, 128], strides = [1, 1]} : vector<24x128xf32> to vector<1x128xf32>
    %493 = arith.maximumf %491, %492 : vector<1x128xf32>
    %c0_346 = arith.constant 0 : index
    %c6_347 = arith.constant 6 : index
    %c4_348 = arith.constant 4 : index
    %c0_349 = arith.constant 0 : index
    %494 = vector.load %arg2[%c0_346, %c6_347, %c4_348, %c0_349] : memref<1x12x12x128xf32, #tpu.memory_space<vmem>>, vector<1x1x1x128xf32>
    %495 = vector.shape_cast %494 : vector<1x1x1x128xf32> to vector<1x128xf32>
    %496 = vector.shape_cast %493 : vector<1x128xf32> to vector<1x1x1x128xf32>
    tpu.vector_store %arg2[%c0_346, %c6_347, %c4_348, %c0_349], %496 {strides = array<i32>} : memref<1x12x12x128xf32, #tpu.memory_space<vmem>>, vector<1x1x1x128xf32>,
    %497 = vector.extract_strided_slice %466 {offsets = [10, 0], sizes = [1, 128], strides = [1, 1]} : vector<24x128xf32> to vector<1x128xf32>
    %498 = vector.extract_strided_slice %466 {offsets = [11, 0], sizes = [1, 128], strides = [1, 1]} : vector<24x128xf32> to vector<1x128xf32>
    %499 = arith.maximumf %497, %498 : vector<1x128xf32>
    %c0_350 = arith.constant 0 : index
    %c6_351 = arith.constant 6 : index
    %c5_352 = arith.constant 5 : index
    %c0_353 = arith.constant 0 : index
    %500 = vector.load %arg2[%c0_350, %c6_351, %c5_352, %c0_353] : memref<1x12x12x128xf32, #tpu.memory_space<vmem>>, vector<1x1x1x128xf32>
    %501 = vector.shape_cast %500 : vector<1x1x1x128xf32> to vector<1x128xf32>
    %502 = vector.shape_cast %499 : vector<1x128xf32> to vector<1x1x1x128xf32>
    tpu.vector_store %arg2[%c0_350, %c6_351, %c5_352, %c0_353], %502 {strides = array<i32>} : memref<1x12x12x128xf32, #tpu.memory_space<vmem>>, vector<1x1x1x128xf32>,
    %503 = vector.extract_strided_slice %466 {offsets = [12, 0], sizes = [1, 128], strides = [1, 1]} : vector<24x128xf32> to vector<1x128xf32>
    %504 = vector.extract_strided_slice %466 {offsets = [13, 0], sizes = [1, 128], strides = [1, 1]} : vector<24x128xf32> to vector<1x128xf32>
    %505 = arith.maximumf %503, %504 : vector<1x128xf32>
    %c0_354 = arith.constant 0 : index
    %c6_355 = arith.constant 6 : index
    %c6_356 = arith.constant 6 : index
    %c0_357 = arith.constant 0 : index
    %506 = vector.load %arg2[%c0_354, %c6_355, %c6_356, %c0_357] : memref<1x12x12x128xf32, #tpu.memory_space<vmem>>, vector<1x1x1x128xf32>
    %507 = vector.shape_cast %506 : vector<1x1x1x128xf32> to vector<1x128xf32>
    %508 = vector.shape_cast %505 : vector<1x128xf32> to vector<1x1x1x128xf32>
    tpu.vector_store %arg2[%c0_354, %c6_355, %c6_356, %c0_357], %508 {strides = array<i32>} : memref<1x12x12x128xf32, #tpu.memory_space<vmem>>, vector<1x1x1x128xf32>,
    %509 = vector.extract_strided_slice %466 {offsets = [14, 0], sizes = [1, 128], strides = [1, 1]} : vector<24x128xf32> to vector<1x128xf32>
    %510 = vector.extract_strided_slice %466 {offsets = [15, 0], sizes = [1, 128], strides = [1, 1]} : vector<24x128xf32> to vector<1x128xf32>
    %511 = arith.maximumf %509, %510 : vector<1x128xf32>
    %c0_358 = arith.constant 0 : index
    %c6_359 = arith.constant 6 : index
    %c7_360 = arith.constant 7 : index
    %c0_361 = arith.constant 0 : index
    %512 = vector.load %arg2[%c0_358, %c6_359, %c7_360, %c0_361] : memref<1x12x12x128xf32, #tpu.memory_space<vmem>>, vector<1x1x1x128xf32>
    %513 = vector.shape_cast %512 : vector<1x1x1x128xf32> to vector<1x128xf32>
    %514 = vector.shape_cast %511 : vector<1x128xf32> to vector<1x1x1x128xf32>
    tpu.vector_store %arg2[%c0_358, %c6_359, %c7_360, %c0_361], %514 {strides = array<i32>} : memref<1x12x12x128xf32, #tpu.memory_space<vmem>>, vector<1x1x1x128xf32>,
    %515 = vector.extract_strided_slice %466 {offsets = [16, 0], sizes = [1, 128], strides = [1, 1]} : vector<24x128xf32> to vector<1x128xf32>
    %516 = vector.extract_strided_slice %466 {offsets = [17, 0], sizes = [1, 128], strides = [1, 1]} : vector<24x128xf32> to vector<1x128xf32>
    %517 = arith.maximumf %515, %516 : vector<1x128xf32>
    %c0_362 = arith.constant 0 : index
    %c6_363 = arith.constant 6 : index
    %c8_364 = arith.constant 8 : index
    %c0_365 = arith.constant 0 : index
    %518 = vector.load %arg2[%c0_362, %c6_363, %c8_364, %c0_365] : memref<1x12x12x128xf32, #tpu.memory_space<vmem>>, vector<1x1x1x128xf32>
    %519 = vector.shape_cast %518 : vector<1x1x1x128xf32> to vector<1x128xf32>
    %520 = vector.shape_cast %517 : vector<1x128xf32> to vector<1x1x1x128xf32>
    tpu.vector_store %arg2[%c0_362, %c6_363, %c8_364, %c0_365], %520 {strides = array<i32>} : memref<1x12x12x128xf32, #tpu.memory_space<vmem>>, vector<1x1x1x128xf32>,
    %521 = vector.extract_strided_slice %466 {offsets = [18, 0], sizes = [1, 128], strides = [1, 1]} : vector<24x128xf32> to vector<1x128xf32>
    %522 = vector.extract_strided_slice %466 {offsets = [19, 0], sizes = [1, 128], strides = [1, 1]} : vector<24x128xf32> to vector<1x128xf32>
    %523 = arith.maximumf %521, %522 : vector<1x128xf32>
    %c0_366 = arith.constant 0 : index
    %c6_367 = arith.constant 6 : index
    %c9_368 = arith.constant 9 : index
    %c0_369 = arith.constant 0 : index
    %524 = vector.load %arg2[%c0_366, %c6_367, %c9_368, %c0_369] : memref<1x12x12x128xf32, #tpu.memory_space<vmem>>, vector<1x1x1x128xf32>
    %525 = vector.shape_cast %524 : vector<1x1x1x128xf32> to vector<1x128xf32>
    %526 = vector.shape_cast %523 : vector<1x128xf32> to vector<1x1x1x128xf32>
    tpu.vector_store %arg2[%c0_366, %c6_367, %c9_368, %c0_369], %526 {strides = array<i32>} : memref<1x12x12x128xf32, #tpu.memory_space<vmem>>, vector<1x1x1x128xf32>,
    %527 = vector.extract_strided_slice %466 {offsets = [20, 0], sizes = [1, 128], strides = [1, 1]} : vector<24x128xf32> to vector<1x128xf32>
    %528 = vector.extract_strided_slice %466 {offsets = [21, 0], sizes = [1, 128], strides = [1, 1]} : vector<24x128xf32> to vector<1x128xf32>
    %529 = arith.maximumf %527, %528 : vector<1x128xf32>
    %c0_370 = arith.constant 0 : index
    %c6_371 = arith.constant 6 : index
    %c10_372 = arith.constant 10 : index
    %c0_373 = arith.constant 0 : index
    %530 = vector.load %arg2[%c0_370, %c6_371, %c10_372, %c0_373] : memref<1x12x12x128xf32, #tpu.memory_space<vmem>>, vector<1x1x1x128xf32>
    %531 = vector.shape_cast %530 : vector<1x1x1x128xf32> to vector<1x128xf32>
    %532 = vector.shape_cast %529 : vector<1x128xf32> to vector<1x1x1x128xf32>
    tpu.vector_store %arg2[%c0_370, %c6_371, %c10_372, %c0_373], %532 {strides = array<i32>} : memref<1x12x12x128xf32, #tpu.memory_space<vmem>>, vector<1x1x1x128xf32>,
    %533 = vector.extract_strided_slice %466 {offsets = [22, 0], sizes = [1, 128], strides = [1, 1]} : vector<24x128xf32> to vector<1x128xf32>
    %534 = vector.extract_strided_slice %466 {offsets = [23, 0], sizes = [1, 128], strides = [1, 1]} : vector<24x128xf32> to vector<1x128xf32>
    %535 = arith.maximumf %533, %534 : vector<1x128xf32>
    %c0_374 = arith.constant 0 : index
    %c6_375 = arith.constant 6 : index
    %c11_376 = arith.constant 11 : index
    %c0_377 = arith.constant 0 : index
    %536 = vector.load %arg2[%c0_374, %c6_375, %c11_376, %c0_377] : memref<1x12x12x128xf32, #tpu.memory_space<vmem>>, vector<1x1x1x128xf32>
    %537 = vector.shape_cast %536 : vector<1x1x1x128xf32> to vector<1x128xf32>
    %538 = vector.shape_cast %535 : vector<1x128xf32> to vector<1x1x1x128xf32>
    tpu.vector_store %arg2[%c0_374, %c6_375, %c11_376, %c0_377], %538 {strides = array<i32>} : memref<1x12x12x128xf32, #tpu.memory_space<vmem>>, vector<1x1x1x128xf32>,
    %c0_378 = arith.constant 0 : index
    %c14 = arith.constant 14 : index
    %c0_379 = arith.constant 0 : index
    %c0_380 = arith.constant 0 : index
    %539 = vector.load %arg1[%c0_378, %c14, %c0_379, %c0_380] : memref<1x24x24x128xf32, #tpu.memory_space<vmem>>, vector<1x1x24x128xf32>
    %540 = vector.shape_cast %539 : vector<1x1x24x128xf32> to vector<24x128xf32>
    %c0_381 = arith.constant 0 : index
    %c15 = arith.constant 15 : index
    %c0_382 = arith.constant 0 : index
    %c0_383 = arith.constant 0 : index
    %541 = vector.load %arg1[%c0_381, %c15, %c0_382, %c0_383] : memref<1x24x24x128xf32, #tpu.memory_space<vmem>>, vector<1x1x24x128xf32>
    %542 = vector.shape_cast %541 : vector<1x1x24x128xf32> to vector<24x128xf32>
    %543 = arith.maximumf %540, %542 : vector<24x128xf32>
    %544 = vector.extract_strided_slice %543 {offsets = [0, 0], sizes = [1, 128], strides = [1, 1]} : vector<24x128xf32> to vector<1x128xf32>
    %545 = vector.extract_strided_slice %543 {offsets = [1, 0], sizes = [1, 128], strides = [1, 1]} : vector<24x128xf32> to vector<1x128xf32>
    %546 = arith.maximumf %544, %545 : vector<1x128xf32>
    %c0_384 = arith.constant 0 : index
    %c7_385 = arith.constant 7 : index
    %c0_386 = arith.constant 0 : index
    %c0_387 = arith.constant 0 : index
    %547 = vector.load %arg2[%c0_384, %c7_385, %c0_386, %c0_387] : memref<1x12x12x128xf32, #tpu.memory_space<vmem>>, vector<1x1x1x128xf32>
    %548 = vector.shape_cast %547 : vector<1x1x1x128xf32> to vector<1x128xf32>
    %549 = vector.shape_cast %546 : vector<1x128xf32> to vector<1x1x1x128xf32>
    tpu.vector_store %arg2[%c0_384, %c7_385, %c0_386, %c0_387], %549 {strides = array<i32>} : memref<1x12x12x128xf32, #tpu.memory_space<vmem>>, vector<1x1x1x128xf32>,
    %550 = vector.extract_strided_slice %543 {offsets = [2, 0], sizes = [1, 128], strides = [1, 1]} : vector<24x128xf32> to vector<1x128xf32>
    %551 = vector.extract_strided_slice %543 {offsets = [3, 0], sizes = [1, 128], strides = [1, 1]} : vector<24x128xf32> to vector<1x128xf32>
    %552 = arith.maximumf %550, %551 : vector<1x128xf32>
    %c0_388 = arith.constant 0 : index
    %c7_389 = arith.constant 7 : index
    %c1_390 = arith.constant 1 : index
    %c0_391 = arith.constant 0 : index
    %553 = vector.load %arg2[%c0_388, %c7_389, %c1_390, %c0_391] : memref<1x12x12x128xf32, #tpu.memory_space<vmem>>, vector<1x1x1x128xf32>
    %554 = vector.shape_cast %553 : vector<1x1x1x128xf32> to vector<1x128xf32>
    %555 = vector.shape_cast %552 : vector<1x128xf32> to vector<1x1x1x128xf32>
    tpu.vector_store %arg2[%c0_388, %c7_389, %c1_390, %c0_391], %555 {strides = array<i32>} : memref<1x12x12x128xf32, #tpu.memory_space<vmem>>, vector<1x1x1x128xf32>,
    %556 = vector.extract_strided_slice %543 {offsets = [4, 0], sizes = [1, 128], strides = [1, 1]} : vector<24x128xf32> to vector<1x128xf32>
    %557 = vector.extract_strided_slice %543 {offsets = [5, 0], sizes = [1, 128], strides = [1, 1]} : vector<24x128xf32> to vector<1x128xf32>
    %558 = arith.maximumf %556, %557 : vector<1x128xf32>
    %c0_392 = arith.constant 0 : index
    %c7_393 = arith.constant 7 : index
    %c2_394 = arith.constant 2 : index
    %c0_395 = arith.constant 0 : index
    %559 = vector.load %arg2[%c0_392, %c7_393, %c2_394, %c0_395] : memref<1x12x12x128xf32, #tpu.memory_space<vmem>>, vector<1x1x1x128xf32>
    %560 = vector.shape_cast %559 : vector<1x1x1x128xf32> to vector<1x128xf32>
    %561 = vector.shape_cast %558 : vector<1x128xf32> to vector<1x1x1x128xf32>
    tpu.vector_store %arg2[%c0_392, %c7_393, %c2_394, %c0_395], %561 {strides = array<i32>} : memref<1x12x12x128xf32, #tpu.memory_space<vmem>>, vector<1x1x1x128xf32>,
    %562 = vector.extract_strided_slice %543 {offsets = [6, 0], sizes = [1, 128], strides = [1, 1]} : vector<24x128xf32> to vector<1x128xf32>
    %563 = vector.extract_strided_slice %543 {offsets = [7, 0], sizes = [1, 128], strides = [1, 1]} : vector<24x128xf32> to vector<1x128xf32>
    %564 = arith.maximumf %562, %563 : vector<1x128xf32>
    %c0_396 = arith.constant 0 : index
    %c7_397 = arith.constant 7 : index
    %c3_398 = arith.constant 3 : index
    %c0_399 = arith.constant 0 : index
    %565 = vector.load %arg2[%c0_396, %c7_397, %c3_398, %c0_399] : memref<1x12x12x128xf32, #tpu.memory_space<vmem>>, vector<1x1x1x128xf32>
    %566 = vector.shape_cast %565 : vector<1x1x1x128xf32> to vector<1x128xf32>
    %567 = vector.shape_cast %564 : vector<1x128xf32> to vector<1x1x1x128xf32>
    tpu.vector_store %arg2[%c0_396, %c7_397, %c3_398, %c0_399], %567 {strides = array<i32>} : memref<1x12x12x128xf32, #tpu.memory_space<vmem>>, vector<1x1x1x128xf32>,
    %568 = vector.extract_strided_slice %543 {offsets = [8, 0], sizes = [1, 128], strides = [1, 1]} : vector<24x128xf32> to vector<1x128xf32>
    %569 = vector.extract_strided_slice %543 {offsets = [9, 0], sizes = [1, 128], strides = [1, 1]} : vector<24x128xf32> to vector<1x128xf32>
    %570 = arith.maximumf %568, %569 : vector<1x128xf32>
    %c0_400 = arith.constant 0 : index
    %c7_401 = arith.constant 7 : index
    %c4_402 = arith.constant 4 : index
    %c0_403 = arith.constant 0 : index
    %571 = vector.load %arg2[%c0_400, %c7_401, %c4_402, %c0_403] : memref<1x12x12x128xf32, #tpu.memory_space<vmem>>, vector<1x1x1x128xf32>
    %572 = vector.shape_cast %571 : vector<1x1x1x128xf32> to vector<1x128xf32>
    %573 = vector.shape_cast %570 : vector<1x128xf32> to vector<1x1x1x128xf32>
    tpu.vector_store %arg2[%c0_400, %c7_401, %c4_402, %c0_403], %573 {strides = array<i32>} : memref<1x12x12x128xf32, #tpu.memory_space<vmem>>, vector<1x1x1x128xf32>,
    %574 = vector.extract_strided_slice %543 {offsets = [10, 0], sizes = [1, 128], strides = [1, 1]} : vector<24x128xf32> to vector<1x128xf32>
    %575 = vector.extract_strided_slice %543 {offsets = [11, 0], sizes = [1, 128], strides = [1, 1]} : vector<24x128xf32> to vector<1x128xf32>
    %576 = arith.maximumf %574, %575 : vector<1x128xf32>
    %c0_404 = arith.constant 0 : index
    %c7_405 = arith.constant 7 : index
    %c5_406 = arith.constant 5 : index
    %c0_407 = arith.constant 0 : index
    %577 = vector.load %arg2[%c0_404, %c7_405, %c5_406, %c0_407] : memref<1x12x12x128xf32, #tpu.memory_space<vmem>>, vector<1x1x1x128xf32>
    %578 = vector.shape_cast %577 : vector<1x1x1x128xf32> to vector<1x128xf32>
    %579 = vector.shape_cast %576 : vector<1x128xf32> to vector<1x1x1x128xf32>
    tpu.vector_store %arg2[%c0_404, %c7_405, %c5_406, %c0_407], %579 {strides = array<i32>} : memref<1x12x12x128xf32, #tpu.memory_space<vmem>>, vector<1x1x1x128xf32>,
    %580 = vector.extract_strided_slice %543 {offsets = [12, 0], sizes = [1, 128], strides = [1, 1]} : vector<24x128xf32> to vector<1x128xf32>
    %581 = vector.extract_strided_slice %543 {offsets = [13, 0], sizes = [1, 128], strides = [1, 1]} : vector<24x128xf32> to vector<1x128xf32>
    %582 = arith.maximumf %580, %581 : vector<1x128xf32>
    %c0_408 = arith.constant 0 : index
    %c7_409 = arith.constant 7 : index
    %c6_410 = arith.constant 6 : index
    %c0_411 = arith.constant 0 : index
    %583 = vector.load %arg2[%c0_408, %c7_409, %c6_410, %c0_411] : memref<1x12x12x128xf32, #tpu.memory_space<vmem>>, vector<1x1x1x128xf32>
    %584 = vector.shape_cast %583 : vector<1x1x1x128xf32> to vector<1x128xf32>
    %585 = vector.shape_cast %582 : vector<1x128xf32> to vector<1x1x1x128xf32>
    tpu.vector_store %arg2[%c0_408, %c7_409, %c6_410, %c0_411], %585 {strides = array<i32>} : memref<1x12x12x128xf32, #tpu.memory_space<vmem>>, vector<1x1x1x128xf32>,
    %586 = vector.extract_strided_slice %543 {offsets = [14, 0], sizes = [1, 128], strides = [1, 1]} : vector<24x128xf32> to vector<1x128xf32>
    %587 = vector.extract_strided_slice %543 {offsets = [15, 0], sizes = [1, 128], strides = [1, 1]} : vector<24x128xf32> to vector<1x128xf32>
    %588 = arith.maximumf %586, %587 : vector<1x128xf32>
    %c0_412 = arith.constant 0 : index
    %c7_413 = arith.constant 7 : index
    %c7_414 = arith.constant 7 : index
    %c0_415 = arith.constant 0 : index
    %589 = vector.load %arg2[%c0_412, %c7_413, %c7_414, %c0_415] : memref<1x12x12x128xf32, #tpu.memory_space<vmem>>, vector<1x1x1x128xf32>
    %590 = vector.shape_cast %589 : vector<1x1x1x128xf32> to vector<1x128xf32>
    %591 = vector.shape_cast %588 : vector<1x128xf32> to vector<1x1x1x128xf32>
    tpu.vector_store %arg2[%c0_412, %c7_413, %c7_414, %c0_415], %591 {strides = array<i32>} : memref<1x12x12x128xf32, #tpu.memory_space<vmem>>, vector<1x1x1x128xf32>,
    %592 = vector.extract_strided_slice %543 {offsets = [16, 0], sizes = [1, 128], strides = [1, 1]} : vector<24x128xf32> to vector<1x128xf32>
    %593 = vector.extract_strided_slice %543 {offsets = [17, 0], sizes = [1, 128], strides = [1, 1]} : vector<24x128xf32> to vector<1x128xf32>
    %594 = arith.maximumf %592, %593 : vector<1x128xf32>
    %c0_416 = arith.constant 0 : index
    %c7_417 = arith.constant 7 : index
    %c8_418 = arith.constant 8 : index
    %c0_419 = arith.constant 0 : index
    %595 = vector.load %arg2[%c0_416, %c7_417, %c8_418, %c0_419] : memref<1x12x12x128xf32, #tpu.memory_space<vmem>>, vector<1x1x1x128xf32>
    %596 = vector.shape_cast %595 : vector<1x1x1x128xf32> to vector<1x128xf32>
    %597 = vector.shape_cast %594 : vector<1x128xf32> to vector<1x1x1x128xf32>
    tpu.vector_store %arg2[%c0_416, %c7_417, %c8_418, %c0_419], %597 {strides = array<i32>} : memref<1x12x12x128xf32, #tpu.memory_space<vmem>>, vector<1x1x1x128xf32>,
    %598 = vector.extract_strided_slice %543 {offsets = [18, 0], sizes = [1, 128], strides = [1, 1]} : vector<24x128xf32> to vector<1x128xf32>
    %599 = vector.extract_strided_slice %543 {offsets = [19, 0], sizes = [1, 128], strides = [1, 1]} : vector<24x128xf32> to vector<1x128xf32>
    %600 = arith.maximumf %598, %599 : vector<1x128xf32>
    %c0_420 = arith.constant 0 : index
    %c7_421 = arith.constant 7 : index
    %c9_422 = arith.constant 9 : index
    %c0_423 = arith.constant 0 : index
    %601 = vector.load %arg2[%c0_420, %c7_421, %c9_422, %c0_423] : memref<1x12x12x128xf32, #tpu.memory_space<vmem>>, vector<1x1x1x128xf32>
    %602 = vector.shape_cast %601 : vector<1x1x1x128xf32> to vector<1x128xf32>
    %603 = vector.shape_cast %600 : vector<1x128xf32> to vector<1x1x1x128xf32>
    tpu.vector_store %arg2[%c0_420, %c7_421, %c9_422, %c0_423], %603 {strides = array<i32>} : memref<1x12x12x128xf32, #tpu.memory_space<vmem>>, vector<1x1x1x128xf32>,
    %604 = vector.extract_strided_slice %543 {offsets = [20, 0], sizes = [1, 128], strides = [1, 1]} : vector<24x128xf32> to vector<1x128xf32>
    %605 = vector.extract_strided_slice %543 {offsets = [21, 0], sizes = [1, 128], strides = [1, 1]} : vector<24x128xf32> to vector<1x128xf32>
    %606 = arith.maximumf %604, %605 : vector<1x128xf32>
    %c0_424 = arith.constant 0 : index
    %c7_425 = arith.constant 7 : index
    %c10_426 = arith.constant 10 : index
    %c0_427 = arith.constant 0 : index
    %607 = vector.load %arg2[%c0_424, %c7_425, %c10_426, %c0_427] : memref<1x12x12x128xf32, #tpu.memory_space<vmem>>, vector<1x1x1x128xf32>
    %608 = vector.shape_cast %607 : vector<1x1x1x128xf32> to vector<1x128xf32>
    %609 = vector.shape_cast %606 : vector<1x128xf32> to vector<1x1x1x128xf32>
    tpu.vector_store %arg2[%c0_424, %c7_425, %c10_426, %c0_427], %609 {strides = array<i32>} : memref<1x12x12x128xf32, #tpu.memory_space<vmem>>, vector<1x1x1x128xf32>,
    %610 = vector.extract_strided_slice %543 {offsets = [22, 0], sizes = [1, 128], strides = [1, 1]} : vector<24x128xf32> to vector<1x128xf32>
    %611 = vector.extract_strided_slice %543 {offsets = [23, 0], sizes = [1, 128], strides = [1, 1]} : vector<24x128xf32> to vector<1x128xf32>
    %612 = arith.maximumf %610, %611 : vector<1x128xf32>
    %c0_428 = arith.constant 0 : index
    %c7_429 = arith.constant 7 : index
    %c11_430 = arith.constant 11 : index
    %c0_431 = arith.constant 0 : index
    %613 = vector.load %arg2[%c0_428, %c7_429, %c11_430, %c0_431] : memref<1x12x12x128xf32, #tpu.memory_space<vmem>>, vector<1x1x1x128xf32>
    %614 = vector.shape_cast %613 : vector<1x1x1x128xf32> to vector<1x128xf32>
    %615 = vector.shape_cast %612 : vector<1x128xf32> to vector<1x1x1x128xf32>
    tpu.vector_store %arg2[%c0_428, %c7_429, %c11_430, %c0_431], %615 {strides = array<i32>} : memref<1x12x12x128xf32, #tpu.memory_space<vmem>>, vector<1x1x1x128xf32>,
    %c0_432 = arith.constant 0 : index
    %c16 = arith.constant 16 : index
    %c0_433 = arith.constant 0 : index
    %c0_434 = arith.constant 0 : index
    %616 = vector.load %arg1[%c0_432, %c16, %c0_433, %c0_434] : memref<1x24x24x128xf32, #tpu.memory_space<vmem>>, vector<1x1x24x128xf32>
    %617 = vector.shape_cast %616 : vector<1x1x24x128xf32> to vector<24x128xf32>
    %c0_435 = arith.constant 0 : index
    %c17 = arith.constant 17 : index
    %c0_436 = arith.constant 0 : index
    %c0_437 = arith.constant 0 : index
    %618 = vector.load %arg1[%c0_435, %c17, %c0_436, %c0_437] : memref<1x24x24x128xf32, #tpu.memory_space<vmem>>, vector<1x1x24x128xf32>
    %619 = vector.shape_cast %618 : vector<1x1x24x128xf32> to vector<24x128xf32>
    %620 = arith.maximumf %617, %619 : vector<24x128xf32>
    %621 = vector.extract_strided_slice %620 {offsets = [0, 0], sizes = [1, 128], strides = [1, 1]} : vector<24x128xf32> to vector<1x128xf32>
    %622 = vector.extract_strided_slice %620 {offsets = [1, 0], sizes = [1, 128], strides = [1, 1]} : vector<24x128xf32> to vector<1x128xf32>
    %623 = arith.maximumf %621, %622 : vector<1x128xf32>
    %c0_438 = arith.constant 0 : index
    %c8_439 = arith.constant 8 : index
    %c0_440 = arith.constant 0 : index
    %c0_441 = arith.constant 0 : index
    %624 = vector.load %arg2[%c0_438, %c8_439, %c0_440, %c0_441] : memref<1x12x12x128xf32, #tpu.memory_space<vmem>>, vector<1x1x1x128xf32>
    %625 = vector.shape_cast %624 : vector<1x1x1x128xf32> to vector<1x128xf32>
    %626 = vector.shape_cast %623 : vector<1x128xf32> to vector<1x1x1x128xf32>
    tpu.vector_store %arg2[%c0_438, %c8_439, %c0_440, %c0_441], %626 {strides = array<i32>} : memref<1x12x12x128xf32, #tpu.memory_space<vmem>>, vector<1x1x1x128xf32>,
    %627 = vector.extract_strided_slice %620 {offsets = [2, 0], sizes = [1, 128], strides = [1, 1]} : vector<24x128xf32> to vector<1x128xf32>
    %628 = vector.extract_strided_slice %620 {offsets = [3, 0], sizes = [1, 128], strides = [1, 1]} : vector<24x128xf32> to vector<1x128xf32>
    %629 = arith.maximumf %627, %628 : vector<1x128xf32>
    %c0_442 = arith.constant 0 : index
    %c8_443 = arith.constant 8 : index
    %c1_444 = arith.constant 1 : index
    %c0_445 = arith.constant 0 : index
    %630 = vector.load %arg2[%c0_442, %c8_443, %c1_444, %c0_445] : memref<1x12x12x128xf32, #tpu.memory_space<vmem>>, vector<1x1x1x128xf32>
    %631 = vector.shape_cast %630 : vector<1x1x1x128xf32> to vector<1x128xf32>
    %632 = vector.shape_cast %629 : vector<1x128xf32> to vector<1x1x1x128xf32>
    tpu.vector_store %arg2[%c0_442, %c8_443, %c1_444, %c0_445], %632 {strides = array<i32>} : memref<1x12x12x128xf32, #tpu.memory_space<vmem>>, vector<1x1x1x128xf32>,
    %633 = vector.extract_strided_slice %620 {offsets = [4, 0], sizes = [1, 128], strides = [1, 1]} : vector<24x128xf32> to vector<1x128xf32>
    %634 = vector.extract_strided_slice %620 {offsets = [5, 0], sizes = [1, 128], strides = [1, 1]} : vector<24x128xf32> to vector<1x128xf32>
    %635 = arith.maximumf %633, %634 : vector<1x128xf32>
    %c0_446 = arith.constant 0 : index
    %c8_447 = arith.constant 8 : index
    %c2_448 = arith.constant 2 : index
    %c0_449 = arith.constant 0 : index
    %636 = vector.load %arg2[%c0_446, %c8_447, %c2_448, %c0_449] : memref<1x12x12x128xf32, #tpu.memory_space<vmem>>, vector<1x1x1x128xf32>
    %637 = vector.shape_cast %636 : vector<1x1x1x128xf32> to vector<1x128xf32>
    %638 = vector.shape_cast %635 : vector<1x128xf32> to vector<1x1x1x128xf32>
    tpu.vector_store %arg2[%c0_446, %c8_447, %c2_448, %c0_449], %638 {strides = array<i32>} : memref<1x12x12x128xf32, #tpu.memory_space<vmem>>, vector<1x1x1x128xf32>,
    %639 = vector.extract_strided_slice %620 {offsets = [6, 0], sizes = [1, 128], strides = [1, 1]} : vector<24x128xf32> to vector<1x128xf32>
    %640 = vector.extract_strided_slice %620 {offsets = [7, 0], sizes = [1, 128], strides = [1, 1]} : vector<24x128xf32> to vector<1x128xf32>
    %641 = arith.maximumf %639, %640 : vector<1x128xf32>
    %c0_450 = arith.constant 0 : index
    %c8_451 = arith.constant 8 : index
    %c3_452 = arith.constant 3 : index
    %c0_453 = arith.constant 0 : index
    %642 = vector.load %arg2[%c0_450, %c8_451, %c3_452, %c0_453] : memref<1x12x12x128xf32, #tpu.memory_space<vmem>>, vector<1x1x1x128xf32>
    %643 = vector.shape_cast %642 : vector<1x1x1x128xf32> to vector<1x128xf32>
    %644 = vector.shape_cast %641 : vector<1x128xf32> to vector<1x1x1x128xf32>
    tpu.vector_store %arg2[%c0_450, %c8_451, %c3_452, %c0_453], %644 {strides = array<i32>} : memref<1x12x12x128xf32, #tpu.memory_space<vmem>>, vector<1x1x1x128xf32>,
    %645 = vector.extract_strided_slice %620 {offsets = [8, 0], sizes = [1, 128], strides = [1, 1]} : vector<24x128xf32> to vector<1x128xf32>
    %646 = vector.extract_strided_slice %620 {offsets = [9, 0], sizes = [1, 128], strides = [1, 1]} : vector<24x128xf32> to vector<1x128xf32>
    %647 = arith.maximumf %645, %646 : vector<1x128xf32>
    %c0_454 = arith.constant 0 : index
    %c8_455 = arith.constant 8 : index
    %c4_456 = arith.constant 4 : index
    %c0_457 = arith.constant 0 : index
    %648 = vector.load %arg2[%c0_454, %c8_455, %c4_456, %c0_457] : memref<1x12x12x128xf32, #tpu.memory_space<vmem>>, vector<1x1x1x128xf32>
    %649 = vector.shape_cast %648 : vector<1x1x1x128xf32> to vector<1x128xf32>
    %650 = vector.shape_cast %647 : vector<1x128xf32> to vector<1x1x1x128xf32>
    tpu.vector_store %arg2[%c0_454, %c8_455, %c4_456, %c0_457], %650 {strides = array<i32>} : memref<1x12x12x128xf32, #tpu.memory_space<vmem>>, vector<1x1x1x128xf32>,
    %651 = vector.extract_strided_slice %620 {offsets = [10, 0], sizes = [1, 128], strides = [1, 1]} : vector<24x128xf32> to vector<1x128xf32>
    %652 = vector.extract_strided_slice %620 {offsets = [11, 0], sizes = [1, 128], strides = [1, 1]} : vector<24x128xf32> to vector<1x128xf32>
    %653 = arith.maximumf %651, %652 : vector<1x128xf32>
    %c0_458 = arith.constant 0 : index
    %c8_459 = arith.constant 8 : index
    %c5_460 = arith.constant 5 : index
    %c0_461 = arith.constant 0 : index
    %654 = vector.load %arg2[%c0_458, %c8_459, %c5_460, %c0_461] : memref<1x12x12x128xf32, #tpu.memory_space<vmem>>, vector<1x1x1x128xf32>
    %655 = vector.shape_cast %654 : vector<1x1x1x128xf32> to vector<1x128xf32>
    %656 = vector.shape_cast %653 : vector<1x128xf32> to vector<1x1x1x128xf32>
    tpu.vector_store %arg2[%c0_458, %c8_459, %c5_460, %c0_461], %656 {strides = array<i32>} : memref<1x12x12x128xf32, #tpu.memory_space<vmem>>, vector<1x1x1x128xf32>,
    %657 = vector.extract_strided_slice %620 {offsets = [12, 0], sizes = [1, 128], strides = [1, 1]} : vector<24x128xf32> to vector<1x128xf32>
    %658 = vector.extract_strided_slice %620 {offsets = [13, 0], sizes = [1, 128], strides = [1, 1]} : vector<24x128xf32> to vector<1x128xf32>
    %659 = arith.maximumf %657, %658 : vector<1x128xf32>
    %c0_462 = arith.constant 0 : index
    %c8_463 = arith.constant 8 : index
    %c6_464 = arith.constant 6 : index
    %c0_465 = arith.constant 0 : index
    %660 = vector.load %arg2[%c0_462, %c8_463, %c6_464, %c0_465] : memref<1x12x12x128xf32, #tpu.memory_space<vmem>>, vector<1x1x1x128xf32>
    %661 = vector.shape_cast %660 : vector<1x1x1x128xf32> to vector<1x128xf32>
    %662 = vector.shape_cast %659 : vector<1x128xf32> to vector<1x1x1x128xf32>
    tpu.vector_store %arg2[%c0_462, %c8_463, %c6_464, %c0_465], %662 {strides = array<i32>} : memref<1x12x12x128xf32, #tpu.memory_space<vmem>>, vector<1x1x1x128xf32>,
    %663 = vector.extract_strided_slice %620 {offsets = [14, 0], sizes = [1, 128], strides = [1, 1]} : vector<24x128xf32> to vector<1x128xf32>
    %664 = vector.extract_strided_slice %620 {offsets = [15, 0], sizes = [1, 128], strides = [1, 1]} : vector<24x128xf32> to vector<1x128xf32>
    %665 = arith.maximumf %663, %664 : vector<1x128xf32>
    %c0_466 = arith.constant 0 : index
    %c8_467 = arith.constant 8 : index
    %c7_468 = arith.constant 7 : index
    %c0_469 = arith.constant 0 : index
    %666 = vector.load %arg2[%c0_466, %c8_467, %c7_468, %c0_469] : memref<1x12x12x128xf32, #tpu.memory_space<vmem>>, vector<1x1x1x128xf32>
    %667 = vector.shape_cast %666 : vector<1x1x1x128xf32> to vector<1x128xf32>
    %668 = vector.shape_cast %665 : vector<1x128xf32> to vector<1x1x1x128xf32>
    tpu.vector_store %arg2[%c0_466, %c8_467, %c7_468, %c0_469], %668 {strides = array<i32>} : memref<1x12x12x128xf32, #tpu.memory_space<vmem>>, vector<1x1x1x128xf32>,
    %669 = vector.extract_strided_slice %620 {offsets = [16, 0], sizes = [1, 128], strides = [1, 1]} : vector<24x128xf32> to vector<1x128xf32>
    %670 = vector.extract_strided_slice %620 {offsets = [17, 0], sizes = [1, 128], strides = [1, 1]} : vector<24x128xf32> to vector<1x128xf32>
    %671 = arith.maximumf %669, %670 : vector<1x128xf32>
    %c0_470 = arith.constant 0 : index
    %c8_471 = arith.constant 8 : index
    %c8_472 = arith.constant 8 : index
    %c0_473 = arith.constant 0 : index
    %672 = vector.load %arg2[%c0_470, %c8_471, %c8_472, %c0_473] : memref<1x12x12x128xf32, #tpu.memory_space<vmem>>, vector<1x1x1x128xf32>
    %673 = vector.shape_cast %672 : vector<1x1x1x128xf32> to vector<1x128xf32>
    %674 = vector.shape_cast %671 : vector<1x128xf32> to vector<1x1x1x128xf32>
    tpu.vector_store %arg2[%c0_470, %c8_471, %c8_472, %c0_473], %674 {strides = array<i32>} : memref<1x12x12x128xf32, #tpu.memory_space<vmem>>, vector<1x1x1x128xf32>,
    %675 = vector.extract_strided_slice %620 {offsets = [18, 0], sizes = [1, 128], strides = [1, 1]} : vector<24x128xf32> to vector<1x128xf32>
    %676 = vector.extract_strided_slice %620 {offsets = [19, 0], sizes = [1, 128], strides = [1, 1]} : vector<24x128xf32> to vector<1x128xf32>
    %677 = arith.maximumf %675, %676 : vector<1x128xf32>
    %c0_474 = arith.constant 0 : index
    %c8_475 = arith.constant 8 : index
    %c9_476 = arith.constant 9 : index
    %c0_477 = arith.constant 0 : index
    %678 = vector.load %arg2[%c0_474, %c8_475, %c9_476, %c0_477] : memref<1x12x12x128xf32, #tpu.memory_space<vmem>>, vector<1x1x1x128xf32>
    %679 = vector.shape_cast %678 : vector<1x1x1x128xf32> to vector<1x128xf32>
    %680 = vector.shape_cast %677 : vector<1x128xf32> to vector<1x1x1x128xf32>
    tpu.vector_store %arg2[%c0_474, %c8_475, %c9_476, %c0_477], %680 {strides = array<i32>} : memref<1x12x12x128xf32, #tpu.memory_space<vmem>>, vector<1x1x1x128xf32>,
    %681 = vector.extract_strided_slice %620 {offsets = [20, 0], sizes = [1, 128], strides = [1, 1]} : vector<24x128xf32> to vector<1x128xf32>
    %682 = vector.extract_strided_slice %620 {offsets = [21, 0], sizes = [1, 128], strides = [1, 1]} : vector<24x128xf32> to vector<1x128xf32>
    %683 = arith.maximumf %681, %682 : vector<1x128xf32>
    %c0_478 = arith.constant 0 : index
    %c8_479 = arith.constant 8 : index
    %c10_480 = arith.constant 10 : index
    %c0_481 = arith.constant 0 : index
    %684 = vector.load %arg2[%c0_478, %c8_479, %c10_480, %c0_481] : memref<1x12x12x128xf32, #tpu.memory_space<vmem>>, vector<1x1x1x128xf32>
    %685 = vector.shape_cast %684 : vector<1x1x1x128xf32> to vector<1x128xf32>
    %686 = vector.shape_cast %683 : vector<1x128xf32> to vector<1x1x1x128xf32>
    tpu.vector_store %arg2[%c0_478, %c8_479, %c10_480, %c0_481], %686 {strides = array<i32>} : memref<1x12x12x128xf32, #tpu.memory_space<vmem>>, vector<1x1x1x128xf32>,
    %687 = vector.extract_strided_slice %620 {offsets = [22, 0], sizes = [1, 128], strides = [1, 1]} : vector<24x128xf32> to vector<1x128xf32>
    %688 = vector.extract_strided_slice %620 {offsets = [23, 0], sizes = [1, 128], strides = [1, 1]} : vector<24x128xf32> to vector<1x128xf32>
    %689 = arith.maximumf %687, %688 : vector<1x128xf32>
    %c0_482 = arith.constant 0 : index
    %c8_483 = arith.constant 8 : index
    %c11_484 = arith.constant 11 : index
    %c0_485 = arith.constant 0 : index
    %690 = vector.load %arg2[%c0_482, %c8_483, %c11_484, %c0_485] : memref<1x12x12x128xf32, #tpu.memory_space<vmem>>, vector<1x1x1x128xf32>
    %691 = vector.shape_cast %690 : vector<1x1x1x128xf32> to vector<1x128xf32>
    %692 = vector.shape_cast %689 : vector<1x128xf32> to vector<1x1x1x128xf32>
    tpu.vector_store %arg2[%c0_482, %c8_483, %c11_484, %c0_485], %692 {strides = array<i32>} : memref<1x12x12x128xf32, #tpu.memory_space<vmem>>, vector<1x1x1x128xf32>,
    %c0_486 = arith.constant 0 : index
    %c18 = arith.constant 18 : index
    %c0_487 = arith.constant 0 : index
    %c0_488 = arith.constant 0 : index
    %693 = vector.load %arg1[%c0_486, %c18, %c0_487, %c0_488] : memref<1x24x24x128xf32, #tpu.memory_space<vmem>>, vector<1x1x24x128xf32>
    %694 = vector.shape_cast %693 : vector<1x1x24x128xf32> to vector<24x128xf32>
    %c0_489 = arith.constant 0 : index
    %c19 = arith.constant 19 : index
    %c0_490 = arith.constant 0 : index
    %c0_491 = arith.constant 0 : index
    %695 = vector.load %arg1[%c0_489, %c19, %c0_490, %c0_491] : memref<1x24x24x128xf32, #tpu.memory_space<vmem>>, vector<1x1x24x128xf32>
    %696 = vector.shape_cast %695 : vector<1x1x24x128xf32> to vector<24x128xf32>
    %697 = arith.maximumf %694, %696 : vector<24x128xf32>
    %698 = vector.extract_strided_slice %697 {offsets = [0, 0], sizes = [1, 128], strides = [1, 1]} : vector<24x128xf32> to vector<1x128xf32>
    %699 = vector.extract_strided_slice %697 {offsets = [1, 0], sizes = [1, 128], strides = [1, 1]} : vector<24x128xf32> to vector<1x128xf32>
    %700 = arith.maximumf %698, %699 : vector<1x128xf32>
    %c0_492 = arith.constant 0 : index
    %c9_493 = arith.constant 9 : index
    %c0_494 = arith.constant 0 : index
    %c0_495 = arith.constant 0 : index
    %701 = vector.load %arg2[%c0_492, %c9_493, %c0_494, %c0_495] : memref<1x12x12x128xf32, #tpu.memory_space<vmem>>, vector<1x1x1x128xf32>
    %702 = vector.shape_cast %701 : vector<1x1x1x128xf32> to vector<1x128xf32>
    %703 = vector.shape_cast %700 : vector<1x128xf32> to vector<1x1x1x128xf32>
    tpu.vector_store %arg2[%c0_492, %c9_493, %c0_494, %c0_495], %703 {strides = array<i32>} : memref<1x12x12x128xf32, #tpu.memory_space<vmem>>, vector<1x1x1x128xf32>,
    %704 = vector.extract_strided_slice %697 {offsets = [2, 0], sizes = [1, 128], strides = [1, 1]} : vector<24x128xf32> to vector<1x128xf32>
    %705 = vector.extract_strided_slice %697 {offsets = [3, 0], sizes = [1, 128], strides = [1, 1]} : vector<24x128xf32> to vector<1x128xf32>
    %706 = arith.maximumf %704, %705 : vector<1x128xf32>
    %c0_496 = arith.constant 0 : index
    %c9_497 = arith.constant 9 : index
    %c1_498 = arith.constant 1 : index
    %c0_499 = arith.constant 0 : index
    %707 = vector.load %arg2[%c0_496, %c9_497, %c1_498, %c0_499] : memref<1x12x12x128xf32, #tpu.memory_space<vmem>>, vector<1x1x1x128xf32>
    %708 = vector.shape_cast %707 : vector<1x1x1x128xf32> to vector<1x128xf32>
    %709 = vector.shape_cast %706 : vector<1x128xf32> to vector<1x1x1x128xf32>
    tpu.vector_store %arg2[%c0_496, %c9_497, %c1_498, %c0_499], %709 {strides = array<i32>} : memref<1x12x12x128xf32, #tpu.memory_space<vmem>>, vector<1x1x1x128xf32>,
    %710 = vector.extract_strided_slice %697 {offsets = [4, 0], sizes = [1, 128], strides = [1, 1]} : vector<24x128xf32> to vector<1x128xf32>
    %711 = vector.extract_strided_slice %697 {offsets = [5, 0], sizes = [1, 128], strides = [1, 1]} : vector<24x128xf32> to vector<1x128xf32>
    %712 = arith.maximumf %710, %711 : vector<1x128xf32>
    %c0_500 = arith.constant 0 : index
    %c9_501 = arith.constant 9 : index
    %c2_502 = arith.constant 2 : index
    %c0_503 = arith.constant 0 : index
    %713 = vector.load %arg2[%c0_500, %c9_501, %c2_502, %c0_503] : memref<1x12x12x128xf32, #tpu.memory_space<vmem>>, vector<1x1x1x128xf32>
    %714 = vector.shape_cast %713 : vector<1x1x1x128xf32> to vector<1x128xf32>
    %715 = vector.shape_cast %712 : vector<1x128xf32> to vector<1x1x1x128xf32>
    tpu.vector_store %arg2[%c0_500, %c9_501, %c2_502, %c0_503], %715 {strides = array<i32>} : memref<1x12x12x128xf32, #tpu.memory_space<vmem>>, vector<1x1x1x128xf32>,
    %716 = vector.extract_strided_slice %697 {offsets = [6, 0], sizes = [1, 128], strides = [1, 1]} : vector<24x128xf32> to vector<1x128xf32>
    %717 = vector.extract_strided_slice %697 {offsets = [7, 0], sizes = [1, 128], strides = [1, 1]} : vector<24x128xf32> to vector<1x128xf32>
    %718 = arith.maximumf %716, %717 : vector<1x128xf32>
    %c0_504 = arith.constant 0 : index
    %c9_505 = arith.constant 9 : index
    %c3_506 = arith.constant 3 : index
    %c0_507 = arith.constant 0 : index
    %719 = vector.load %arg2[%c0_504, %c9_505, %c3_506, %c0_507] : memref<1x12x12x128xf32, #tpu.memory_space<vmem>>, vector<1x1x1x128xf32>
    %720 = vector.shape_cast %719 : vector<1x1x1x128xf32> to vector<1x128xf32>
    %721 = vector.shape_cast %718 : vector<1x128xf32> to vector<1x1x1x128xf32>
    tpu.vector_store %arg2[%c0_504, %c9_505, %c3_506, %c0_507], %721 {strides = array<i32>} : memref<1x12x12x128xf32, #tpu.memory_space<vmem>>, vector<1x1x1x128xf32>,
    %722 = vector.extract_strided_slice %697 {offsets = [8, 0], sizes = [1, 128], strides = [1, 1]} : vector<24x128xf32> to vector<1x128xf32>
    %723 = vector.extract_strided_slice %697 {offsets = [9, 0], sizes = [1, 128], strides = [1, 1]} : vector<24x128xf32> to vector<1x128xf32>
    %724 = arith.maximumf %722, %723 : vector<1x128xf32>
    %c0_508 = arith.constant 0 : index
    %c9_509 = arith.constant 9 : index
    %c4_510 = arith.constant 4 : index
    %c0_511 = arith.constant 0 : index
    %725 = vector.load %arg2[%c0_508, %c9_509, %c4_510, %c0_511] : memref<1x12x12x128xf32, #tpu.memory_space<vmem>>, vector<1x1x1x128xf32>
    %726 = vector.shape_cast %725 : vector<1x1x1x128xf32> to vector<1x128xf32>
    %727 = vector.shape_cast %724 : vector<1x128xf32> to vector<1x1x1x128xf32>
    tpu.vector_store %arg2[%c0_508, %c9_509, %c4_510, %c0_511], %727 {strides = array<i32>} : memref<1x12x12x128xf32, #tpu.memory_space<vmem>>, vector<1x1x1x128xf32>,
    %728 = vector.extract_strided_slice %697 {offsets = [10, 0], sizes = [1, 128], strides = [1, 1]} : vector<24x128xf32> to vector<1x128xf32>
    %729 = vector.extract_strided_slice %697 {offsets = [11, 0], sizes = [1, 128], strides = [1, 1]} : vector<24x128xf32> to vector<1x128xf32>
    %730 = arith.maximumf %728, %729 : vector<1x128xf32>
    %c0_512 = arith.constant 0 : index
    %c9_513 = arith.constant 9 : index
    %c5_514 = arith.constant 5 : index
    %c0_515 = arith.constant 0 : index
    %731 = vector.load %arg2[%c0_512, %c9_513, %c5_514, %c0_515] : memref<1x12x12x128xf32, #tpu.memory_space<vmem>>, vector<1x1x1x128xf32>
    %732 = vector.shape_cast %731 : vector<1x1x1x128xf32> to vector<1x128xf32>
    %733 = vector.shape_cast %730 : vector<1x128xf32> to vector<1x1x1x128xf32>
    tpu.vector_store %arg2[%c0_512, %c9_513, %c5_514, %c0_515], %733 {strides = array<i32>} : memref<1x12x12x128xf32, #tpu.memory_space<vmem>>, vector<1x1x1x128xf32>,
    %734 = vector.extract_strided_slice %697 {offsets = [12, 0], sizes = [1, 128], strides = [1, 1]} : vector<24x128xf32> to vector<1x128xf32>
    %735 = vector.extract_strided_slice %697 {offsets = [13, 0], sizes = [1, 128], strides = [1, 1]} : vector<24x128xf32> to vector<1x128xf32>
    %736 = arith.maximumf %734, %735 : vector<1x128xf32>
    %c0_516 = arith.constant 0 : index
    %c9_517 = arith.constant 9 : index
    %c6_518 = arith.constant 6 : index
    %c0_519 = arith.constant 0 : index
    %737 = vector.load %arg2[%c0_516, %c9_517, %c6_518, %c0_519] : memref<1x12x12x128xf32, #tpu.memory_space<vmem>>, vector<1x1x1x128xf32>
    %738 = vector.shape_cast %737 : vector<1x1x1x128xf32> to vector<1x128xf32>
    %739 = vector.shape_cast %736 : vector<1x128xf32> to vector<1x1x1x128xf32>
    tpu.vector_store %arg2[%c0_516, %c9_517, %c6_518, %c0_519], %739 {strides = array<i32>} : memref<1x12x12x128xf32, #tpu.memory_space<vmem>>, vector<1x1x1x128xf32>,
    %740 = vector.extract_strided_slice %697 {offsets = [14, 0], sizes = [1, 128], strides = [1, 1]} : vector<24x128xf32> to vector<1x128xf32>
    %741 = vector.extract_strided_slice %697 {offsets = [15, 0], sizes = [1, 128], strides = [1, 1]} : vector<24x128xf32> to vector<1x128xf32>
    %742 = arith.maximumf %740, %741 : vector<1x128xf32>
    %c0_520 = arith.constant 0 : index
    %c9_521 = arith.constant 9 : index
    %c7_522 = arith.constant 7 : index
    %c0_523 = arith.constant 0 : index
    %743 = vector.load %arg2[%c0_520, %c9_521, %c7_522, %c0_523] : memref<1x12x12x128xf32, #tpu.memory_space<vmem>>, vector<1x1x1x128xf32>
    %744 = vector.shape_cast %743 : vector<1x1x1x128xf32> to vector<1x128xf32>
    %745 = vector.shape_cast %742 : vector<1x128xf32> to vector<1x1x1x128xf32>
    tpu.vector_store %arg2[%c0_520, %c9_521, %c7_522, %c0_523], %745 {strides = array<i32>} : memref<1x12x12x128xf32, #tpu.memory_space<vmem>>, vector<1x1x1x128xf32>,
    %746 = vector.extract_strided_slice %697 {offsets = [16, 0], sizes = [1, 128], strides = [1, 1]} : vector<24x128xf32> to vector<1x128xf32>
    %747 = vector.extract_strided_slice %697 {offsets = [17, 0], sizes = [1, 128], strides = [1, 1]} : vector<24x128xf32> to vector<1x128xf32>
    %748 = arith.maximumf %746, %747 : vector<1x128xf32>
    %c0_524 = arith.constant 0 : index
    %c9_525 = arith.constant 9 : index
    %c8_526 = arith.constant 8 : index
    %c0_527 = arith.constant 0 : index
    %749 = vector.load %arg2[%c0_524, %c9_525, %c8_526, %c0_527] : memref<1x12x12x128xf32, #tpu.memory_space<vmem>>, vector<1x1x1x128xf32>
    %750 = vector.shape_cast %749 : vector<1x1x1x128xf32> to vector<1x128xf32>
    %751 = vector.shape_cast %748 : vector<1x128xf32> to vector<1x1x1x128xf32>
    tpu.vector_store %arg2[%c0_524, %c9_525, %c8_526, %c0_527], %751 {strides = array<i32>} : memref<1x12x12x128xf32, #tpu.memory_space<vmem>>, vector<1x1x1x128xf32>,
    %752 = vector.extract_strided_slice %697 {offsets = [18, 0], sizes = [1, 128], strides = [1, 1]} : vector<24x128xf32> to vector<1x128xf32>
    %753 = vector.extract_strided_slice %697 {offsets = [19, 0], sizes = [1, 128], strides = [1, 1]} : vector<24x128xf32> to vector<1x128xf32>
    %754 = arith.maximumf %752, %753 : vector<1x128xf32>
    %c0_528 = arith.constant 0 : index
    %c9_529 = arith.constant 9 : index
    %c9_530 = arith.constant 9 : index
    %c0_531 = arith.constant 0 : index
    %755 = vector.load %arg2[%c0_528, %c9_529, %c9_530, %c0_531] : memref<1x12x12x128xf32, #tpu.memory_space<vmem>>, vector<1x1x1x128xf32>
    %756 = vector.shape_cast %755 : vector<1x1x1x128xf32> to vector<1x128xf32>
    %757 = vector.shape_cast %754 : vector<1x128xf32> to vector<1x1x1x128xf32>
    tpu.vector_store %arg2[%c0_528, %c9_529, %c9_530, %c0_531], %757 {strides = array<i32>} : memref<1x12x12x128xf32, #tpu.memory_space<vmem>>, vector<1x1x1x128xf32>,
    %758 = vector.extract_strided_slice %697 {offsets = [20, 0], sizes = [1, 128], strides = [1, 1]} : vector<24x128xf32> to vector<1x128xf32>
    %759 = vector.extract_strided_slice %697 {offsets = [21, 0], sizes = [1, 128], strides = [1, 1]} : vector<24x128xf32> to vector<1x128xf32>
    %760 = arith.maximumf %758, %759 : vector<1x128xf32>
    %c0_532 = arith.constant 0 : index
    %c9_533 = arith.constant 9 : index
    %c10_534 = arith.constant 10 : index
    %c0_535 = arith.constant 0 : index
    %761 = vector.load %arg2[%c0_532, %c9_533, %c10_534, %c0_535] : memref<1x12x12x128xf32, #tpu.memory_space<vmem>>, vector<1x1x1x128xf32>
    %762 = vector.shape_cast %761 : vector<1x1x1x128xf32> to vector<1x128xf32>
    %763 = vector.shape_cast %760 : vector<1x128xf32> to vector<1x1x1x128xf32>
    tpu.vector_store %arg2[%c0_532, %c9_533, %c10_534, %c0_535], %763 {strides = array<i32>} : memref<1x12x12x128xf32, #tpu.memory_space<vmem>>, vector<1x1x1x128xf32>,
    %764 = vector.extract_strided_slice %697 {offsets = [22, 0], sizes = [1, 128], strides = [1, 1]} : vector<24x128xf32> to vector<1x128xf32>
    %765 = vector.extract_strided_slice %697 {offsets = [23, 0], sizes = [1, 128], strides = [1, 1]} : vector<24x128xf32> to vector<1x128xf32>
    %766 = arith.maximumf %764, %765 : vector<1x128xf32>
    %c0_536 = arith.constant 0 : index
    %c9_537 = arith.constant 9 : index
    %c11_538 = arith.constant 11 : index
    %c0_539 = arith.constant 0 : index
    %767 = vector.load %arg2[%c0_536, %c9_537, %c11_538, %c0_539] : memref<1x12x12x128xf32, #tpu.memory_space<vmem>>, vector<1x1x1x128xf32>
    %768 = vector.shape_cast %767 : vector<1x1x1x128xf32> to vector<1x128xf32>
    %769 = vector.shape_cast %766 : vector<1x128xf32> to vector<1x1x1x128xf32>
    tpu.vector_store %arg2[%c0_536, %c9_537, %c11_538, %c0_539], %769 {strides = array<i32>} : memref<1x12x12x128xf32, #tpu.memory_space<vmem>>, vector<1x1x1x128xf32>,
    %c0_540 = arith.constant 0 : index
    %c20 = arith.constant 20 : index
    %c0_541 = arith.constant 0 : index
    %c0_542 = arith.constant 0 : index
    %770 = vector.load %arg1[%c0_540, %c20, %c0_541, %c0_542] : memref<1x24x24x128xf32, #tpu.memory_space<vmem>>, vector<1x1x24x128xf32>
    %771 = vector.shape_cast %770 : vector<1x1x24x128xf32> to vector<24x128xf32>
    %c0_543 = arith.constant 0 : index
    %c21 = arith.constant 21 : index
    %c0_544 = arith.constant 0 : index
    %c0_545 = arith.constant 0 : index
    %772 = vector.load %arg1[%c0_543, %c21, %c0_544, %c0_545] : memref<1x24x24x128xf32, #tpu.memory_space<vmem>>, vector<1x1x24x128xf32>
    %773 = vector.shape_cast %772 : vector<1x1x24x128xf32> to vector<24x128xf32>
    %774 = arith.maximumf %771, %773 : vector<24x128xf32>
    %775 = vector.extract_strided_slice %774 {offsets = [0, 0], sizes = [1, 128], strides = [1, 1]} : vector<24x128xf32> to vector<1x128xf32>
    %776 = vector.extract_strided_slice %774 {offsets = [1, 0], sizes = [1, 128], strides = [1, 1]} : vector<24x128xf32> to vector<1x128xf32>
    %777 = arith.maximumf %775, %776 : vector<1x128xf32>
    %c0_546 = arith.constant 0 : index
    %c10_547 = arith.constant 10 : index
    %c0_548 = arith.constant 0 : index
    %c0_549 = arith.constant 0 : index
    %778 = vector.load %arg2[%c0_546, %c10_547, %c0_548, %c0_549] : memref<1x12x12x128xf32, #tpu.memory_space<vmem>>, vector<1x1x1x128xf32>
    %779 = vector.shape_cast %778 : vector<1x1x1x128xf32> to vector<1x128xf32>
    %780 = vector.shape_cast %777 : vector<1x128xf32> to vector<1x1x1x128xf32>
    tpu.vector_store %arg2[%c0_546, %c10_547, %c0_548, %c0_549], %780 {strides = array<i32>} : memref<1x12x12x128xf32, #tpu.memory_space<vmem>>, vector<1x1x1x128xf32>,
    %781 = vector.extract_strided_slice %774 {offsets = [2, 0], sizes = [1, 128], strides = [1, 1]} : vector<24x128xf32> to vector<1x128xf32>
    %782 = vector.extract_strided_slice %774 {offsets = [3, 0], sizes = [1, 128], strides = [1, 1]} : vector<24x128xf32> to vector<1x128xf32>
    %783 = arith.maximumf %781, %782 : vector<1x128xf32>
    %c0_550 = arith.constant 0 : index
    %c10_551 = arith.constant 10 : index
    %c1_552 = arith.constant 1 : index
    %c0_553 = arith.constant 0 : index
    %784 = vector.load %arg2[%c0_550, %c10_551, %c1_552, %c0_553] : memref<1x12x12x128xf32, #tpu.memory_space<vmem>>, vector<1x1x1x128xf32>
    %785 = vector.shape_cast %784 : vector<1x1x1x128xf32> to vector<1x128xf32>
    %786 = vector.shape_cast %783 : vector<1x128xf32> to vector<1x1x1x128xf32>
    tpu.vector_store %arg2[%c0_550, %c10_551, %c1_552, %c0_553], %786 {strides = array<i32>} : memref<1x12x12x128xf32, #tpu.memory_space<vmem>>, vector<1x1x1x128xf32>,
    %787 = vector.extract_strided_slice %774 {offsets = [4, 0], sizes = [1, 128], strides = [1, 1]} : vector<24x128xf32> to vector<1x128xf32>
    %788 = vector.extract_strided_slice %774 {offsets = [5, 0], sizes = [1, 128], strides = [1, 1]} : vector<24x128xf32> to vector<1x128xf32>
    %789 = arith.maximumf %787, %788 : vector<1x128xf32>
    %c0_554 = arith.constant 0 : index
    %c10_555 = arith.constant 10 : index
    %c2_556 = arith.constant 2 : index
    %c0_557 = arith.constant 0 : index
    %790 = vector.load %arg2[%c0_554, %c10_555, %c2_556, %c0_557] : memref<1x12x12x128xf32, #tpu.memory_space<vmem>>, vector<1x1x1x128xf32>
    %791 = vector.shape_cast %790 : vector<1x1x1x128xf32> to vector<1x128xf32>
    %792 = vector.shape_cast %789 : vector<1x128xf32> to vector<1x1x1x128xf32>
    tpu.vector_store %arg2[%c0_554, %c10_555, %c2_556, %c0_557], %792 {strides = array<i32>} : memref<1x12x12x128xf32, #tpu.memory_space<vmem>>, vector<1x1x1x128xf32>,
    %793 = vector.extract_strided_slice %774 {offsets = [6, 0], sizes = [1, 128], strides = [1, 1]} : vector<24x128xf32> to vector<1x128xf32>
    %794 = vector.extract_strided_slice %774 {offsets = [7, 0], sizes = [1, 128], strides = [1, 1]} : vector<24x128xf32> to vector<1x128xf32>
    %795 = arith.maximumf %793, %794 : vector<1x128xf32>
    %c0_558 = arith.constant 0 : index
    %c10_559 = arith.constant 10 : index
    %c3_560 = arith.constant 3 : index
    %c0_561 = arith.constant 0 : index
    %796 = vector.load %arg2[%c0_558, %c10_559, %c3_560, %c0_561] : memref<1x12x12x128xf32, #tpu.memory_space<vmem>>, vector<1x1x1x128xf32>
    %797 = vector.shape_cast %796 : vector<1x1x1x128xf32> to vector<1x128xf32>
    %798 = vector.shape_cast %795 : vector<1x128xf32> to vector<1x1x1x128xf32>
    tpu.vector_store %arg2[%c0_558, %c10_559, %c3_560, %c0_561], %798 {strides = array<i32>} : memref<1x12x12x128xf32, #tpu.memory_space<vmem>>, vector<1x1x1x128xf32>,
    %799 = vector.extract_strided_slice %774 {offsets = [8, 0], sizes = [1, 128], strides = [1, 1]} : vector<24x128xf32> to vector<1x128xf32>
    %800 = vector.extract_strided_slice %774 {offsets = [9, 0], sizes = [1, 128], strides = [1, 1]} : vector<24x128xf32> to vector<1x128xf32>
    %801 = arith.maximumf %799, %800 : vector<1x128xf32>
    %c0_562 = arith.constant 0 : index
    %c10_563 = arith.constant 10 : index
    %c4_564 = arith.constant 4 : index
    %c0_565 = arith.constant 0 : index
    %802 = vector.load %arg2[%c0_562, %c10_563, %c4_564, %c0_565] : memref<1x12x12x128xf32, #tpu.memory_space<vmem>>, vector<1x1x1x128xf32>
    %803 = vector.shape_cast %802 : vector<1x1x1x128xf32> to vector<1x128xf32>
    %804 = vector.shape_cast %801 : vector<1x128xf32> to vector<1x1x1x128xf32>
    tpu.vector_store %arg2[%c0_562, %c10_563, %c4_564, %c0_565], %804 {strides = array<i32>} : memref<1x12x12x128xf32, #tpu.memory_space<vmem>>, vector<1x1x1x128xf32>,
    %805 = vector.extract_strided_slice %774 {offsets = [10, 0], sizes = [1, 128], strides = [1, 1]} : vector<24x128xf32> to vector<1x128xf32>
    %806 = vector.extract_strided_slice %774 {offsets = [11, 0], sizes = [1, 128], strides = [1, 1]} : vector<24x128xf32> to vector<1x128xf32>
    %807 = arith.maximumf %805, %806 : vector<1x128xf32>
    %c0_566 = arith.constant 0 : index
    %c10_567 = arith.constant 10 : index
    %c5_568 = arith.constant 5 : index
    %c0_569 = arith.constant 0 : index
    %808 = vector.load %arg2[%c0_566, %c10_567, %c5_568, %c0_569] : memref<1x12x12x128xf32, #tpu.memory_space<vmem>>, vector<1x1x1x128xf32>
    %809 = vector.shape_cast %808 : vector<1x1x1x128xf32> to vector<1x128xf32>
    %810 = vector.shape_cast %807 : vector<1x128xf32> to vector<1x1x1x128xf32>
    tpu.vector_store %arg2[%c0_566, %c10_567, %c5_568, %c0_569], %810 {strides = array<i32>} : memref<1x12x12x128xf32, #tpu.memory_space<vmem>>, vector<1x1x1x128xf32>,
    %811 = vector.extract_strided_slice %774 {offsets = [12, 0], sizes = [1, 128], strides = [1, 1]} : vector<24x128xf32> to vector<1x128xf32>
    %812 = vector.extract_strided_slice %774 {offsets = [13, 0], sizes = [1, 128], strides = [1, 1]} : vector<24x128xf32> to vector<1x128xf32>
    %813 = arith.maximumf %811, %812 : vector<1x128xf32>
    %c0_570 = arith.constant 0 : index
    %c10_571 = arith.constant 10 : index
    %c6_572 = arith.constant 6 : index
    %c0_573 = arith.constant 0 : index
    %814 = vector.load %arg2[%c0_570, %c10_571, %c6_572, %c0_573] : memref<1x12x12x128xf32, #tpu.memory_space<vmem>>, vector<1x1x1x128xf32>
    %815 = vector.shape_cast %814 : vector<1x1x1x128xf32> to vector<1x128xf32>
    %816 = vector.shape_cast %813 : vector<1x128xf32> to vector<1x1x1x128xf32>
    tpu.vector_store %arg2[%c0_570, %c10_571, %c6_572, %c0_573], %816 {strides = array<i32>} : memref<1x12x12x128xf32, #tpu.memory_space<vmem>>, vector<1x1x1x128xf32>,
    %817 = vector.extract_strided_slice %774 {offsets = [14, 0], sizes = [1, 128], strides = [1, 1]} : vector<24x128xf32> to vector<1x128xf32>
    %818 = vector.extract_strided_slice %774 {offsets = [15, 0], sizes = [1, 128], strides = [1, 1]} : vector<24x128xf32> to vector<1x128xf32>
    %819 = arith.maximumf %817, %818 : vector<1x128xf32>
    %c0_574 = arith.constant 0 : index
    %c10_575 = arith.constant 10 : index
    %c7_576 = arith.constant 7 : index
    %c0_577 = arith.constant 0 : index
    %820 = vector.load %arg2[%c0_574, %c10_575, %c7_576, %c0_577] : memref<1x12x12x128xf32, #tpu.memory_space<vmem>>, vector<1x1x1x128xf32>
    %821 = vector.shape_cast %820 : vector<1x1x1x128xf32> to vector<1x128xf32>
    %822 = vector.shape_cast %819 : vector<1x128xf32> to vector<1x1x1x128xf32>
    tpu.vector_store %arg2[%c0_574, %c10_575, %c7_576, %c0_577], %822 {strides = array<i32>} : memref<1x12x12x128xf32, #tpu.memory_space<vmem>>, vector<1x1x1x128xf32>,
    %823 = vector.extract_strided_slice %774 {offsets = [16, 0], sizes = [1, 128], strides = [1, 1]} : vector<24x128xf32> to vector<1x128xf32>
    %824 = vector.extract_strided_slice %774 {offsets = [17, 0], sizes = [1, 128], strides = [1, 1]} : vector<24x128xf32> to vector<1x128xf32>
    %825 = arith.maximumf %823, %824 : vector<1x128xf32>
    %c0_578 = arith.constant 0 : index
    %c10_579 = arith.constant 10 : index
    %c8_580 = arith.constant 8 : index
    %c0_581 = arith.constant 0 : index
    %826 = vector.load %arg2[%c0_578, %c10_579, %c8_580, %c0_581] : memref<1x12x12x128xf32, #tpu.memory_space<vmem>>, vector<1x1x1x128xf32>
    %827 = vector.shape_cast %826 : vector<1x1x1x128xf32> to vector<1x128xf32>
    %828 = vector.shape_cast %825 : vector<1x128xf32> to vector<1x1x1x128xf32>
    tpu.vector_store %arg2[%c0_578, %c10_579, %c8_580, %c0_581], %828 {strides = array<i32>} : memref<1x12x12x128xf32, #tpu.memory_space<vmem>>, vector<1x1x1x128xf32>,
    %829 = vector.extract_strided_slice %774 {offsets = [18, 0], sizes = [1, 128], strides = [1, 1]} : vector<24x128xf32> to vector<1x128xf32>
    %830 = vector.extract_strided_slice %774 {offsets = [19, 0], sizes = [1, 128], strides = [1, 1]} : vector<24x128xf32> to vector<1x128xf32>
    %831 = arith.maximumf %829, %830 : vector<1x128xf32>
    %c0_582 = arith.constant 0 : index
    %c10_583 = arith.constant 10 : index
    %c9_584 = arith.constant 9 : index
    %c0_585 = arith.constant 0 : index
    %832 = vector.load %arg2[%c0_582, %c10_583, %c9_584, %c0_585] : memref<1x12x12x128xf32, #tpu.memory_space<vmem>>, vector<1x1x1x128xf32>
    %833 = vector.shape_cast %832 : vector<1x1x1x128xf32> to vector<1x128xf32>
    %834 = vector.shape_cast %831 : vector<1x128xf32> to vector<1x1x1x128xf32>
    tpu.vector_store %arg2[%c0_582, %c10_583, %c9_584, %c0_585], %834 {strides = array<i32>} : memref<1x12x12x128xf32, #tpu.memory_space<vmem>>, vector<1x1x1x128xf32>,
    %835 = vector.extract_strided_slice %774 {offsets = [20, 0], sizes = [1, 128], strides = [1, 1]} : vector<24x128xf32> to vector<1x128xf32>
    %836 = vector.extract_strided_slice %774 {offsets = [21, 0], sizes = [1, 128], strides = [1, 1]} : vector<24x128xf32> to vector<1x128xf32>
    %837 = arith.maximumf %835, %836 : vector<1x128xf32>
    %c0_586 = arith.constant 0 : index
    %c10_587 = arith.constant 10 : index
    %c10_588 = arith.constant 10 : index
    %c0_589 = arith.constant 0 : index
    %838 = vector.load %arg2[%c0_586, %c10_587, %c10_588, %c0_589] : memref<1x12x12x128xf32, #tpu.memory_space<vmem>>, vector<1x1x1x128xf32>
    %839 = vector.shape_cast %838 : vector<1x1x1x128xf32> to vector<1x128xf32>
    %840 = vector.shape_cast %837 : vector<1x128xf32> to vector<1x1x1x128xf32>
    tpu.vector_store %arg2[%c0_586, %c10_587, %c10_588, %c0_589], %840 {strides = array<i32>} : memref<1x12x12x128xf32, #tpu.memory_space<vmem>>, vector<1x1x1x128xf32>,
    %841 = vector.extract_strided_slice %774 {offsets = [22, 0], sizes = [1, 128], strides = [1, 1]} : vector<24x128xf32> to vector<1x128xf32>
    %842 = vector.extract_strided_slice %774 {offsets = [23, 0], sizes = [1, 128], strides = [1, 1]} : vector<24x128xf32> to vector<1x128xf32>
    %843 = arith.maximumf %841, %842 : vector<1x128xf32>
    %c0_590 = arith.constant 0 : index
    %c10_591 = arith.constant 10 : index
    %c11_592 = arith.constant 11 : index
    %c0_593 = arith.constant 0 : index
    %844 = vector.load %arg2[%c0_590, %c10_591, %c11_592, %c0_593] : memref<1x12x12x128xf32, #tpu.memory_space<vmem>>, vector<1x1x1x128xf32>
    %845 = vector.shape_cast %844 : vector<1x1x1x128xf32> to vector<1x128xf32>
    %846 = vector.shape_cast %843 : vector<1x128xf32> to vector<1x1x1x128xf32>
    tpu.vector_store %arg2[%c0_590, %c10_591, %c11_592, %c0_593], %846 {strides = array<i32>} : memref<1x12x12x128xf32, #tpu.memory_space<vmem>>, vector<1x1x1x128xf32>,
    %c0_594 = arith.constant 0 : index
    %c22 = arith.constant 22 : index
    %c0_595 = arith.constant 0 : index
    %c0_596 = arith.constant 0 : index
    %847 = vector.load %arg1[%c0_594, %c22, %c0_595, %c0_596] : memref<1x24x24x128xf32, #tpu.memory_space<vmem>>, vector<1x1x24x128xf32>
    %848 = vector.shape_cast %847 : vector<1x1x24x128xf32> to vector<24x128xf32>
    %c0_597 = arith.constant 0 : index
    %c23 = arith.constant 23 : index
    %c0_598 = arith.constant 0 : index
    %c0_599 = arith.constant 0 : index
    %849 = vector.load %arg1[%c0_597, %c23, %c0_598, %c0_599] : memref<1x24x24x128xf32, #tpu.memory_space<vmem>>, vector<1x1x24x128xf32>
    %850 = vector.shape_cast %849 : vector<1x1x24x128xf32> to vector<24x128xf32>
    %851 = arith.maximumf %848, %850 : vector<24x128xf32>
    %852 = vector.extract_strided_slice %851 {offsets = [0, 0], sizes = [1, 128], strides = [1, 1]} : vector<24x128xf32> to vector<1x128xf32>
    %853 = vector.extract_strided_slice %851 {offsets = [1, 0], sizes = [1, 128], strides = [1, 1]} : vector<24x128xf32> to vector<1x128xf32>
    %854 = arith.maximumf %852, %853 : vector<1x128xf32>
    %c0_600 = arith.constant 0 : index
    %c11_601 = arith.constant 11 : index
    %c0_602 = arith.constant 0 : index
    %c0_603 = arith.constant 0 : index
    %855 = vector.load %arg2[%c0_600, %c11_601, %c0_602, %c0_603] : memref<1x12x12x128xf32, #tpu.memory_space<vmem>>, vector<1x1x1x128xf32>
    %856 = vector.shape_cast %855 : vector<1x1x1x128xf32> to vector<1x128xf32>
    %857 = vector.shape_cast %854 : vector<1x128xf32> to vector<1x1x1x128xf32>
    tpu.vector_store %arg2[%c0_600, %c11_601, %c0_602, %c0_603], %857 {strides = array<i32>} : memref<1x12x12x128xf32, #tpu.memory_space<vmem>>, vector<1x1x1x128xf32>,
    %858 = vector.extract_strided_slice %851 {offsets = [2, 0], sizes = [1, 128], strides = [1, 1]} : vector<24x128xf32> to vector<1x128xf32>
    %859 = vector.extract_strided_slice %851 {offsets = [3, 0], sizes = [1, 128], strides = [1, 1]} : vector<24x128xf32> to vector<1x128xf32>
    %860 = arith.maximumf %858, %859 : vector<1x128xf32>
    %c0_604 = arith.constant 0 : index
    %c11_605 = arith.constant 11 : index
    %c1_606 = arith.constant 1 : index
    %c0_607 = arith.constant 0 : index
    %861 = vector.load %arg2[%c0_604, %c11_605, %c1_606, %c0_607] : memref<1x12x12x128xf32, #tpu.memory_space<vmem>>, vector<1x1x1x128xf32>
    %862 = vector.shape_cast %861 : vector<1x1x1x128xf32> to vector<1x128xf32>
    %863 = vector.shape_cast %860 : vector<1x128xf32> to vector<1x1x1x128xf32>
    tpu.vector_store %arg2[%c0_604, %c11_605, %c1_606, %c0_607], %863 {strides = array<i32>} : memref<1x12x12x128xf32, #tpu.memory_space<vmem>>, vector<1x1x1x128xf32>,
    %864 = vector.extract_strided_slice %851 {offsets = [4, 0], sizes = [1, 128], strides = [1, 1]} : vector<24x128xf32> to vector<1x128xf32>
    %865 = vector.extract_strided_slice %851 {offsets = [5, 0], sizes = [1, 128], strides = [1, 1]} : vector<24x128xf32> to vector<1x128xf32>
    %866 = arith.maximumf %864, %865 : vector<1x128xf32>
    %c0_608 = arith.constant 0 : index
    %c11_609 = arith.constant 11 : index
    %c2_610 = arith.constant 2 : index
    %c0_611 = arith.constant 0 : index
    %867 = vector.load %arg2[%c0_608, %c11_609, %c2_610, %c0_611] : memref<1x12x12x128xf32, #tpu.memory_space<vmem>>, vector<1x1x1x128xf32>
    %868 = vector.shape_cast %867 : vector<1x1x1x128xf32> to vector<1x128xf32>
    %869 = vector.shape_cast %866 : vector<1x128xf32> to vector<1x1x1x128xf32>
    tpu.vector_store %arg2[%c0_608, %c11_609, %c2_610, %c0_611], %869 {strides = array<i32>} : memref<1x12x12x128xf32, #tpu.memory_space<vmem>>, vector<1x1x1x128xf32>,
    %870 = vector.extract_strided_slice %851 {offsets = [6, 0], sizes = [1, 128], strides = [1, 1]} : vector<24x128xf32> to vector<1x128xf32>
    %871 = vector.extract_strided_slice %851 {offsets = [7, 0], sizes = [1, 128], strides = [1, 1]} : vector<24x128xf32> to vector<1x128xf32>
    %872 = arith.maximumf %870, %871 : vector<1x128xf32>
    %c0_612 = arith.constant 0 : index
    %c11_613 = arith.constant 11 : index
    %c3_614 = arith.constant 3 : index
    %c0_615 = arith.constant 0 : index
    %873 = vector.load %arg2[%c0_612, %c11_613, %c3_614, %c0_615] : memref<1x12x12x128xf32, #tpu.memory_space<vmem>>, vector<1x1x1x128xf32>
    %874 = vector.shape_cast %873 : vector<1x1x1x128xf32> to vector<1x128xf32>
    %875 = vector.shape_cast %872 : vector<1x128xf32> to vector<1x1x1x128xf32>
    tpu.vector_store %arg2[%c0_612, %c11_613, %c3_614, %c0_615], %875 {strides = array<i32>} : memref<1x12x12x128xf32, #tpu.memory_space<vmem>>, vector<1x1x1x128xf32>,
    %876 = vector.extract_strided_slice %851 {offsets = [8, 0], sizes = [1, 128], strides = [1, 1]} : vector<24x128xf32> to vector<1x128xf32>
    %877 = vector.extract_strided_slice %851 {offsets = [9, 0], sizes = [1, 128], strides = [1, 1]} : vector<24x128xf32> to vector<1x128xf32>
    %878 = arith.maximumf %876, %877 : vector<1x128xf32>
    %c0_616 = arith.constant 0 : index
    %c11_617 = arith.constant 11 : index
    %c4_618 = arith.constant 4 : index
    %c0_619 = arith.constant 0 : index
    %879 = vector.load %arg2[%c0_616, %c11_617, %c4_618, %c0_619] : memref<1x12x12x128xf32, #tpu.memory_space<vmem>>, vector<1x1x1x128xf32>
    %880 = vector.shape_cast %879 : vector<1x1x1x128xf32> to vector<1x128xf32>
    %881 = vector.shape_cast %878 : vector<1x128xf32> to vector<1x1x1x128xf32>
    tpu.vector_store %arg2[%c0_616, %c11_617, %c4_618, %c0_619], %881 {strides = array<i32>} : memref<1x12x12x128xf32, #tpu.memory_space<vmem>>, vector<1x1x1x128xf32>,
    %882 = vector.extract_strided_slice %851 {offsets = [10, 0], sizes = [1, 128], strides = [1, 1]} : vector<24x128xf32> to vector<1x128xf32>
    %883 = vector.extract_strided_slice %851 {offsets = [11, 0], sizes = [1, 128], strides = [1, 1]} : vector<24x128xf32> to vector<1x128xf32>
    %884 = arith.maximumf %882, %883 : vector<1x128xf32>
    %c0_620 = arith.constant 0 : index
    %c11_621 = arith.constant 11 : index
    %c5_622 = arith.constant 5 : index
    %c0_623 = arith.constant 0 : index
    %885 = vector.load %arg2[%c0_620, %c11_621, %c5_622, %c0_623] : memref<1x12x12x128xf32, #tpu.memory_space<vmem>>, vector<1x1x1x128xf32>
    %886 = vector.shape_cast %885 : vector<1x1x1x128xf32> to vector<1x128xf32>
    %887 = vector.shape_cast %884 : vector<1x128xf32> to vector<1x1x1x128xf32>
    tpu.vector_store %arg2[%c0_620, %c11_621, %c5_622, %c0_623], %887 {strides = array<i32>} : memref<1x12x12x128xf32, #tpu.memory_space<vmem>>, vector<1x1x1x128xf32>,
    %888 = vector.extract_strided_slice %851 {offsets = [12, 0], sizes = [1, 128], strides = [1, 1]} : vector<24x128xf32> to vector<1x128xf32>
    %889 = vector.extract_strided_slice %851 {offsets = [13, 0], sizes = [1, 128], strides = [1, 1]} : vector<24x128xf32> to vector<1x128xf32>
    %890 = arith.maximumf %888, %889 : vector<1x128xf32>
    %c0_624 = arith.constant 0 : index
    %c11_625 = arith.constant 11 : index
    %c6_626 = arith.constant 6 : index
    %c0_627 = arith.constant 0 : index
    %891 = vector.load %arg2[%c0_624, %c11_625, %c6_626, %c0_627] : memref<1x12x12x128xf32, #tpu.memory_space<vmem>>, vector<1x1x1x128xf32>
    %892 = vector.shape_cast %891 : vector<1x1x1x128xf32> to vector<1x128xf32>
    %893 = vector.shape_cast %890 : vector<1x128xf32> to vector<1x1x1x128xf32>
    tpu.vector_store %arg2[%c0_624, %c11_625, %c6_626, %c0_627], %893 {strides = array<i32>} : memref<1x12x12x128xf32, #tpu.memory_space<vmem>>, vector<1x1x1x128xf32>,
    %894 = vector.extract_strided_slice %851 {offsets = [14, 0], sizes = [1, 128], strides = [1, 1]} : vector<24x128xf32> to vector<1x128xf32>
    %895 = vector.extract_strided_slice %851 {offsets = [15, 0], sizes = [1, 128], strides = [1, 1]} : vector<24x128xf32> to vector<1x128xf32>
    %896 = arith.maximumf %894, %895 : vector<1x128xf32>
    %c0_628 = arith.constant 0 : index
    %c11_629 = arith.constant 11 : index
    %c7_630 = arith.constant 7 : index
    %c0_631 = arith.constant 0 : index
    %897 = vector.load %arg2[%c0_628, %c11_629, %c7_630, %c0_631] : memref<1x12x12x128xf32, #tpu.memory_space<vmem>>, vector<1x1x1x128xf32>
    %898 = vector.shape_cast %897 : vector<1x1x1x128xf32> to vector<1x128xf32>
    %899 = vector.shape_cast %896 : vector<1x128xf32> to vector<1x1x1x128xf32>
    tpu.vector_store %arg2[%c0_628, %c11_629, %c7_630, %c0_631], %899 {strides = array<i32>} : memref<1x12x12x128xf32, #tpu.memory_space<vmem>>, vector<1x1x1x128xf32>,
    %900 = vector.extract_strided_slice %851 {offsets = [16, 0], sizes = [1, 128], strides = [1, 1]} : vector<24x128xf32> to vector<1x128xf32>
    %901 = vector.extract_strided_slice %851 {offsets = [17, 0], sizes = [1, 128], strides = [1, 1]} : vector<24x128xf32> to vector<1x128xf32>
    %902 = arith.maximumf %900, %901 : vector<1x128xf32>
    %c0_632 = arith.constant 0 : index
    %c11_633 = arith.constant 11 : index
    %c8_634 = arith.constant 8 : index
    %c0_635 = arith.constant 0 : index
    %903 = vector.load %arg2[%c0_632, %c11_633, %c8_634, %c0_635] : memref<1x12x12x128xf32, #tpu.memory_space<vmem>>, vector<1x1x1x128xf32>
    %904 = vector.shape_cast %903 : vector<1x1x1x128xf32> to vector<1x128xf32>
    %905 = vector.shape_cast %902 : vector<1x128xf32> to vector<1x1x1x128xf32>
    tpu.vector_store %arg2[%c0_632, %c11_633, %c8_634, %c0_635], %905 {strides = array<i32>} : memref<1x12x12x128xf32, #tpu.memory_space<vmem>>, vector<1x1x1x128xf32>,
    %906 = vector.extract_strided_slice %851 {offsets = [18, 0], sizes = [1, 128], strides = [1, 1]} : vector<24x128xf32> to vector<1x128xf32>
    %907 = vector.extract_strided_slice %851 {offsets = [19, 0], sizes = [1, 128], strides = [1, 1]} : vector<24x128xf32> to vector<1x128xf32>
    %908 = arith.maximumf %906, %907 : vector<1x128xf32>
    %c0_636 = arith.constant 0 : index
    %c11_637 = arith.constant 11 : index
    %c9_638 = arith.constant 9 : index
    %c0_639 = arith.constant 0 : index
    %909 = vector.load %arg2[%c0_636, %c11_637, %c9_638, %c0_639] : memref<1x12x12x128xf32, #tpu.memory_space<vmem>>, vector<1x1x1x128xf32>
    %910 = vector.shape_cast %909 : vector<1x1x1x128xf32> to vector<1x128xf32>
    %911 = vector.shape_cast %908 : vector<1x128xf32> to vector<1x1x1x128xf32>
    tpu.vector_store %arg2[%c0_636, %c11_637, %c9_638, %c0_639], %911 {strides = array<i32>} : memref<1x12x12x128xf32, #tpu.memory_space<vmem>>, vector<1x1x1x128xf32>,
    %912 = vector.extract_strided_slice %851 {offsets = [20, 0], sizes = [1, 128], strides = [1, 1]} : vector<24x128xf32> to vector<1x128xf32>
    %913 = vector.extract_strided_slice %851 {offsets = [21, 0], sizes = [1, 128], strides = [1, 1]} : vector<24x128xf32> to vector<1x128xf32>
    %914 = arith.maximumf %912, %913 : vector<1x128xf32>
    %c0_640 = arith.constant 0 : index
    %c11_641 = arith.constant 11 : index
    %c10_642 = arith.constant 10 : index
    %c0_643 = arith.constant 0 : index
    %915 = vector.load %arg2[%c0_640, %c11_641, %c10_642, %c0_643] : memref<1x12x12x128xf32, #tpu.memory_space<vmem>>, vector<1x1x1x128xf32>
    %916 = vector.shape_cast %915 : vector<1x1x1x128xf32> to vector<1x128xf32>
    %917 = vector.shape_cast %914 : vector<1x128xf32> to vector<1x1x1x128xf32>
    tpu.vector_store %arg2[%c0_640, %c11_641, %c10_642, %c0_643], %917 {strides = array<i32>} : memref<1x12x12x128xf32, #tpu.memory_space<vmem>>, vector<1x1x1x128xf32>,
    %918 = vector.extract_strided_slice %851 {offsets = [22, 0], sizes = [1, 128], strides = [1, 1]} : vector<24x128xf32> to vector<1x128xf32>
    %919 = vector.extract_strided_slice %851 {offsets = [23, 0], sizes = [1, 128], strides = [1, 1]} : vector<24x128xf32> to vector<1x128xf32>
    %920 = arith.maximumf %918, %919 : vector<1x128xf32>
    %c0_644 = arith.constant 0 : index
    %c11_645 = arith.constant 11 : index
    %c11_646 = arith.constant 11 : index
    %c0_647 = arith.constant 0 : index
    %921 = vector.load %arg2[%c0_644, %c11_645, %c11_646, %c0_647] : memref<1x12x12x128xf32, #tpu.memory_space<vmem>>, vector<1x1x1x128xf32>
    %922 = vector.shape_cast %921 : vector<1x1x1x128xf32> to vector<1x128xf32>
    %923 = vector.shape_cast %920 : vector<1x128xf32> to vector<1x1x1x128xf32>
    tpu.vector_store %arg2[%c0_644, %c11_645, %c11_646, %c0_647], %923 {strides = array<i32>} : memref<1x12x12x128xf32, #tpu.memory_space<vmem>>, vector<1x1x1x128xf32>,
    return
  }
  func.func @transform_0(%arg0: i32) -> (i32, i32, i32, i32) {
    %c0_i32 = arith.constant 0 : i32
    %c0_i32_0 = arith.constant 0 : i32
    %c0_i32_1 = arith.constant 0 : i32
    %c0_i32_2 = arith.constant 0 : i32
    return %arg0, %c0_i32, %c0_i32_0, %c0_i32_1 : i32, i32, i32, i32
  }
  func.func @transform_1(%arg0: i32) -> (i32, i32, i32, i32) {
    %c0_i32 = arith.constant 0 : i32
    %c0_i32_0 = arith.constant 0 : i32
    %c0_i32_1 = arith.constant 0 : i32
    %c0_i32_2 = arith.constant 0 : i32
    return %arg0, %c0_i32, %c0_i32_0, %c0_i32_1 : i32, i32, i32, i32
  }
}

module attributes {stable_mosaic.version = 11 : i64} {
  func.func @_matmul_kernel(%arg0: i32, %arg1: memref<128x500xbf16, #tpu.memory_space<vmem>>, %arg2: memref<500x128xbf16, #tpu.memory_space<vmem>>, %arg3: memref<1x128xf32, #tpu.memory_space<vmem>>, %arg4: memref<128x128xf32, #tpu.memory_space<vmem>>) attributes {dimension_semantics = [#tpu.dimension_semantics<parallel>], iteration_bounds = array<i64: 1>, scalar_prefetch = 0 : i64, scratch_operands = 0 : i64, tpu.core_type = #tpu.core_type<tc>, window_params = [{transform_indices = @transform_0, window_bounds = array<i64: 128, 500>}, {pipeline_mode = #tpu.pipeline_mode<synchronous>, transform_indices = @transform_1, window_bounds = array<i64: 500, 128>}, {pipeline_mode = #tpu.pipeline_mode<synchronous>, transform_indices = @transform_2, window_bounds = array<i64: 1, 128>}, {transform_indices = @transform_3, window_bounds = array<i64: 128, 128>}]} {
    %c0 = arith.constant 0 : index
    %c0_0 = arith.constant 0 : index
    %0 = vector.load %arg1[%c0, %c0_0] : memref<128x500xbf16, #tpu.memory_space<vmem>>, vector<128x500xbf16>
    %c0_1 = arith.constant 0 : index
    %c0_2 = arith.constant 0 : index
    %1 = vector.load %arg2[%c0_1, %c0_2] : memref<500x128xbf16, #tpu.memory_space<vmem>>, vector<500x128xbf16>
    %cst = arith.constant dense<0.000000e+00> : vector<128x128xf32>
    %2 = tpu.matmul %0, %1, %cst {dimension_numbers = #tpu.dot_dimension_numbers<[1], [0], [0], [1], [0, 0, 1, 1], [], []>} : vector<128x500xbf16>, vector<500x128xbf16>, vector<128x128xf32> -> vector<128x128xf32>
    %c0_3 = arith.constant 0 : index
    %c0_4 = arith.constant 0 : index
    %3 = vector.load %arg3[%c0_3, %c0_4] : memref<1x128xf32, #tpu.memory_space<vmem>>, vector<1x128xf32>
    %4 = vector.broadcast %3 : vector<1x128xf32> to vector<128x128xf32>
    %5 = arith.addf %2, %4 : vector<128x128xf32>
    %cst_5 = arith.constant 0.000000e+00 : f32
    %6 = vector.broadcast %cst_5 : f32 to vector<128x128xf32>
    %7 = arith.maximumf %5, %6 : vector<128x128xf32>
    %c0_6 = arith.constant 0 : index
    %c0_7 = arith.constant 0 : index
    %8 = vector.load %arg4[%c0_6, %c0_7] : memref<128x128xf32, #tpu.memory_space<vmem>>, vector<128x128xf32>
    tpu.vector_store %arg4[%c0_6, %c0_7], %7 {strides = array<i32>} : memref<128x128xf32, #tpu.memory_space<vmem>>, vector<128x128xf32>,
    return
  }
  func.func @transform_0(%arg0: i32) -> (i32, i32) {
    %c0_i32 = arith.constant 0 : i32
    %c0_i32_0 = arith.constant 0 : i32
    return %arg0, %c0_i32 : i32, i32
  }
  func.func @transform_1(%arg0: i32) -> (i32, i32) {
    %c0_i32 = arith.constant 0 : i32
    %c0_i32_0 = arith.constant 0 : i32
    %c0_i32_1 = arith.constant 0 : i32
    return %c0_i32, %c0_i32_0 : i32, i32
  }
  func.func @transform_2(%arg0: i32) -> (i32, i32) {
    %c0_i32 = arith.constant 0 : i32
    %c0_i32_0 = arith.constant 0 : i32
    %c0_i32_1 = arith.constant 0 : i32
    return %c0_i32, %c0_i32_0 : i32, i32
  }
  func.func @transform_3(%arg0: i32) -> (i32, i32) {
    %c0_i32 = arith.constant 0 : i32
    %c0_i32_0 = arith.constant 0 : i32
    return %arg0, %c0_i32 : i32, i32
  }
}

module attributes {stable_mosaic.version = 11 : i64} {
  func.func @_maxpool2x2_kernel(%arg0: i32, %arg1: memref<1x8x8x128xf32, #tpu.memory_space<vmem>>, %arg2: memref<1x4x4x128xf32, #tpu.memory_space<vmem>>) attributes {dimension_semantics = [#tpu.dimension_semantics<parallel>], iteration_bounds = array<i64: 2>, scalar_prefetch = 0 : i64, scratch_operands = 0 : i64, tpu.core_type = #tpu.core_type<tc>, window_params = [{transform_indices = @transform_0, window_bounds = array<i64: 1, 8, 8, 128>}, {transform_indices = @transform_1, window_bounds = array<i64: 1, 4, 4, 128>}]} {
    %c0 = arith.constant 0 : index
    %c0_0 = arith.constant 0 : index
    %c0_1 = arith.constant 0 : index
    %c0_2 = arith.constant 0 : index
    %0 = vector.load %arg1[%c0, %c0_0, %c0_1, %c0_2] : memref<1x8x8x128xf32, #tpu.memory_space<vmem>>, vector<1x1x8x128xf32>
    %1 = vector.shape_cast %0 : vector<1x1x8x128xf32> to vector<8x128xf32>
    %c0_3 = arith.constant 0 : index
    %c1 = arith.constant 1 : index
    %c0_4 = arith.constant 0 : index
    %c0_5 = arith.constant 0 : index
    %2 = vector.load %arg1[%c0_3, %c1, %c0_4, %c0_5] : memref<1x8x8x128xf32, #tpu.memory_space<vmem>>, vector<1x1x8x128xf32>
    %3 = vector.shape_cast %2 : vector<1x1x8x128xf32> to vector<8x128xf32>
    %4 = arith.maximumf %1, %3 : vector<8x128xf32>
    %5 = vector.extract_strided_slice %4 {offsets = [0, 0], sizes = [1, 128], strides = [1, 1]} : vector<8x128xf32> to vector<1x128xf32>
    %6 = vector.extract_strided_slice %4 {offsets = [1, 0], sizes = [1, 128], strides = [1, 1]} : vector<8x128xf32> to vector<1x128xf32>
    %7 = arith.maximumf %5, %6 : vector<1x128xf32>
    %c0_6 = arith.constant 0 : index
    %c0_7 = arith.constant 0 : index
    %c0_8 = arith.constant 0 : index
    %c0_9 = arith.constant 0 : index
    %8 = vector.load %arg2[%c0_6, %c0_7, %c0_8, %c0_9] : memref<1x4x4x128xf32, #tpu.memory_space<vmem>>, vector<1x1x1x128xf32>
    %9 = vector.shape_cast %8 : vector<1x1x1x128xf32> to vector<1x128xf32>
    %10 = vector.shape_cast %7 : vector<1x128xf32> to vector<1x1x1x128xf32>
    tpu.vector_store %arg2[%c0_6, %c0_7, %c0_8, %c0_9], %10 {strides = array<i32>} : memref<1x4x4x128xf32, #tpu.memory_space<vmem>>, vector<1x1x1x128xf32>,
    %11 = vector.extract_strided_slice %4 {offsets = [2, 0], sizes = [1, 128], strides = [1, 1]} : vector<8x128xf32> to vector<1x128xf32>
    %12 = vector.extract_strided_slice %4 {offsets = [3, 0], sizes = [1, 128], strides = [1, 1]} : vector<8x128xf32> to vector<1x128xf32>
    %13 = arith.maximumf %11, %12 : vector<1x128xf32>
    %c0_10 = arith.constant 0 : index
    %c0_11 = arith.constant 0 : index
    %c1_12 = arith.constant 1 : index
    %c0_13 = arith.constant 0 : index
    %14 = vector.load %arg2[%c0_10, %c0_11, %c1_12, %c0_13] : memref<1x4x4x128xf32, #tpu.memory_space<vmem>>, vector<1x1x1x128xf32>
    %15 = vector.shape_cast %14 : vector<1x1x1x128xf32> to vector<1x128xf32>
    %16 = vector.shape_cast %13 : vector<1x128xf32> to vector<1x1x1x128xf32>
    tpu.vector_store %arg2[%c0_10, %c0_11, %c1_12, %c0_13], %16 {strides = array<i32>} : memref<1x4x4x128xf32, #tpu.memory_space<vmem>>, vector<1x1x1x128xf32>,
    %17 = vector.extract_strided_slice %4 {offsets = [4, 0], sizes = [1, 128], strides = [1, 1]} : vector<8x128xf32> to vector<1x128xf32>
    %18 = vector.extract_strided_slice %4 {offsets = [5, 0], sizes = [1, 128], strides = [1, 1]} : vector<8x128xf32> to vector<1x128xf32>
    %19 = arith.maximumf %17, %18 : vector<1x128xf32>
    %c0_14 = arith.constant 0 : index
    %c0_15 = arith.constant 0 : index
    %c2 = arith.constant 2 : index
    %c0_16 = arith.constant 0 : index
    %20 = vector.load %arg2[%c0_14, %c0_15, %c2, %c0_16] : memref<1x4x4x128xf32, #tpu.memory_space<vmem>>, vector<1x1x1x128xf32>
    %21 = vector.shape_cast %20 : vector<1x1x1x128xf32> to vector<1x128xf32>
    %22 = vector.shape_cast %19 : vector<1x128xf32> to vector<1x1x1x128xf32>
    tpu.vector_store %arg2[%c0_14, %c0_15, %c2, %c0_16], %22 {strides = array<i32>} : memref<1x4x4x128xf32, #tpu.memory_space<vmem>>, vector<1x1x1x128xf32>,
    %23 = vector.extract_strided_slice %4 {offsets = [6, 0], sizes = [1, 128], strides = [1, 1]} : vector<8x128xf32> to vector<1x128xf32>
    %24 = vector.extract_strided_slice %4 {offsets = [7, 0], sizes = [1, 128], strides = [1, 1]} : vector<8x128xf32> to vector<1x128xf32>
    %25 = arith.maximumf %23, %24 : vector<1x128xf32>
    %c0_17 = arith.constant 0 : index
    %c0_18 = arith.constant 0 : index
    %c3 = arith.constant 3 : index
    %c0_19 = arith.constant 0 : index
    %26 = vector.load %arg2[%c0_17, %c0_18, %c3, %c0_19] : memref<1x4x4x128xf32, #tpu.memory_space<vmem>>, vector<1x1x1x128xf32>
    %27 = vector.shape_cast %26 : vector<1x1x1x128xf32> to vector<1x128xf32>
    %28 = vector.shape_cast %25 : vector<1x128xf32> to vector<1x1x1x128xf32>
    tpu.vector_store %arg2[%c0_17, %c0_18, %c3, %c0_19], %28 {strides = array<i32>} : memref<1x4x4x128xf32, #tpu.memory_space<vmem>>, vector<1x1x1x128xf32>,
    %c0_20 = arith.constant 0 : index
    %c2_21 = arith.constant 2 : index
    %c0_22 = arith.constant 0 : index
    %c0_23 = arith.constant 0 : index
    %29 = vector.load %arg1[%c0_20, %c2_21, %c0_22, %c0_23] : memref<1x8x8x128xf32, #tpu.memory_space<vmem>>, vector<1x1x8x128xf32>
    %30 = vector.shape_cast %29 : vector<1x1x8x128xf32> to vector<8x128xf32>
    %c0_24 = arith.constant 0 : index
    %c3_25 = arith.constant 3 : index
    %c0_26 = arith.constant 0 : index
    %c0_27 = arith.constant 0 : index
    %31 = vector.load %arg1[%c0_24, %c3_25, %c0_26, %c0_27] : memref<1x8x8x128xf32, #tpu.memory_space<vmem>>, vector<1x1x8x128xf32>
    %32 = vector.shape_cast %31 : vector<1x1x8x128xf32> to vector<8x128xf32>
    %33 = arith.maximumf %30, %32 : vector<8x128xf32>
    %34 = vector.extract_strided_slice %33 {offsets = [0, 0], sizes = [1, 128], strides = [1, 1]} : vector<8x128xf32> to vector<1x128xf32>
    %35 = vector.extract_strided_slice %33 {offsets = [1, 0], sizes = [1, 128], strides = [1, 1]} : vector<8x128xf32> to vector<1x128xf32>
    %36 = arith.maximumf %34, %35 : vector<1x128xf32>
    %c0_28 = arith.constant 0 : index
    %c1_29 = arith.constant 1 : index
    %c0_30 = arith.constant 0 : index
    %c0_31 = arith.constant 0 : index
    %37 = vector.load %arg2[%c0_28, %c1_29, %c0_30, %c0_31] : memref<1x4x4x128xf32, #tpu.memory_space<vmem>>, vector<1x1x1x128xf32>
    %38 = vector.shape_cast %37 : vector<1x1x1x128xf32> to vector<1x128xf32>
    %39 = vector.shape_cast %36 : vector<1x128xf32> to vector<1x1x1x128xf32>
    tpu.vector_store %arg2[%c0_28, %c1_29, %c0_30, %c0_31], %39 {strides = array<i32>} : memref<1x4x4x128xf32, #tpu.memory_space<vmem>>, vector<1x1x1x128xf32>,
    %40 = vector.extract_strided_slice %33 {offsets = [2, 0], sizes = [1, 128], strides = [1, 1]} : vector<8x128xf32> to vector<1x128xf32>
    %41 = vector.extract_strided_slice %33 {offsets = [3, 0], sizes = [1, 128], strides = [1, 1]} : vector<8x128xf32> to vector<1x128xf32>
    %42 = arith.maximumf %40, %41 : vector<1x128xf32>
    %c0_32 = arith.constant 0 : index
    %c1_33 = arith.constant 1 : index
    %c1_34 = arith.constant 1 : index
    %c0_35 = arith.constant 0 : index
    %43 = vector.load %arg2[%c0_32, %c1_33, %c1_34, %c0_35] : memref<1x4x4x128xf32, #tpu.memory_space<vmem>>, vector<1x1x1x128xf32>
    %44 = vector.shape_cast %43 : vector<1x1x1x128xf32> to vector<1x128xf32>
    %45 = vector.shape_cast %42 : vector<1x128xf32> to vector<1x1x1x128xf32>
    tpu.vector_store %arg2[%c0_32, %c1_33, %c1_34, %c0_35], %45 {strides = array<i32>} : memref<1x4x4x128xf32, #tpu.memory_space<vmem>>, vector<1x1x1x128xf32>,
    %46 = vector.extract_strided_slice %33 {offsets = [4, 0], sizes = [1, 128], strides = [1, 1]} : vector<8x128xf32> to vector<1x128xf32>
    %47 = vector.extract_strided_slice %33 {offsets = [5, 0], sizes = [1, 128], strides = [1, 1]} : vector<8x128xf32> to vector<1x128xf32>
    %48 = arith.maximumf %46, %47 : vector<1x128xf32>
    %c0_36 = arith.constant 0 : index
    %c1_37 = arith.constant 1 : index
    %c2_38 = arith.constant 2 : index
    %c0_39 = arith.constant 0 : index
    %49 = vector.load %arg2[%c0_36, %c1_37, %c2_38, %c0_39] : memref<1x4x4x128xf32, #tpu.memory_space<vmem>>, vector<1x1x1x128xf32>
    %50 = vector.shape_cast %49 : vector<1x1x1x128xf32> to vector<1x128xf32>
    %51 = vector.shape_cast %48 : vector<1x128xf32> to vector<1x1x1x128xf32>
    tpu.vector_store %arg2[%c0_36, %c1_37, %c2_38, %c0_39], %51 {strides = array<i32>} : memref<1x4x4x128xf32, #tpu.memory_space<vmem>>, vector<1x1x1x128xf32>,
    %52 = vector.extract_strided_slice %33 {offsets = [6, 0], sizes = [1, 128], strides = [1, 1]} : vector<8x128xf32> to vector<1x128xf32>
    %53 = vector.extract_strided_slice %33 {offsets = [7, 0], sizes = [1, 128], strides = [1, 1]} : vector<8x128xf32> to vector<1x128xf32>
    %54 = arith.maximumf %52, %53 : vector<1x128xf32>
    %c0_40 = arith.constant 0 : index
    %c1_41 = arith.constant 1 : index
    %c3_42 = arith.constant 3 : index
    %c0_43 = arith.constant 0 : index
    %55 = vector.load %arg2[%c0_40, %c1_41, %c3_42, %c0_43] : memref<1x4x4x128xf32, #tpu.memory_space<vmem>>, vector<1x1x1x128xf32>
    %56 = vector.shape_cast %55 : vector<1x1x1x128xf32> to vector<1x128xf32>
    %57 = vector.shape_cast %54 : vector<1x128xf32> to vector<1x1x1x128xf32>
    tpu.vector_store %arg2[%c0_40, %c1_41, %c3_42, %c0_43], %57 {strides = array<i32>} : memref<1x4x4x128xf32, #tpu.memory_space<vmem>>, vector<1x1x1x128xf32>,
    %c0_44 = arith.constant 0 : index
    %c4 = arith.constant 4 : index
    %c0_45 = arith.constant 0 : index
    %c0_46 = arith.constant 0 : index
    %58 = vector.load %arg1[%c0_44, %c4, %c0_45, %c0_46] : memref<1x8x8x128xf32, #tpu.memory_space<vmem>>, vector<1x1x8x128xf32>
    %59 = vector.shape_cast %58 : vector<1x1x8x128xf32> to vector<8x128xf32>
    %c0_47 = arith.constant 0 : index
    %c5 = arith.constant 5 : index
    %c0_48 = arith.constant 0 : index
    %c0_49 = arith.constant 0 : index
    %60 = vector.load %arg1[%c0_47, %c5, %c0_48, %c0_49] : memref<1x8x8x128xf32, #tpu.memory_space<vmem>>, vector<1x1x8x128xf32>
    %61 = vector.shape_cast %60 : vector<1x1x8x128xf32> to vector<8x128xf32>
    %62 = arith.maximumf %59, %61 : vector<8x128xf32>
    %63 = vector.extract_strided_slice %62 {offsets = [0, 0], sizes = [1, 128], strides = [1, 1]} : vector<8x128xf32> to vector<1x128xf32>
    %64 = vector.extract_strided_slice %62 {offsets = [1, 0], sizes = [1, 128], strides = [1, 1]} : vector<8x128xf32> to vector<1x128xf32>
    %65 = arith.maximumf %63, %64 : vector<1x128xf32>
    %c0_50 = arith.constant 0 : index
    %c2_51 = arith.constant 2 : index
    %c0_52 = arith.constant 0 : index
    %c0_53 = arith.constant 0 : index
    %66 = vector.load %arg2[%c0_50, %c2_51, %c0_52, %c0_53] : memref<1x4x4x128xf32, #tpu.memory_space<vmem>>, vector<1x1x1x128xf32>
    %67 = vector.shape_cast %66 : vector<1x1x1x128xf32> to vector<1x128xf32>
    %68 = vector.shape_cast %65 : vector<1x128xf32> to vector<1x1x1x128xf32>
    tpu.vector_store %arg2[%c0_50, %c2_51, %c0_52, %c0_53], %68 {strides = array<i32>} : memref<1x4x4x128xf32, #tpu.memory_space<vmem>>, vector<1x1x1x128xf32>,
    %69 = vector.extract_strided_slice %62 {offsets = [2, 0], sizes = [1, 128], strides = [1, 1]} : vector<8x128xf32> to vector<1x128xf32>
    %70 = vector.extract_strided_slice %62 {offsets = [3, 0], sizes = [1, 128], strides = [1, 1]} : vector<8x128xf32> to vector<1x128xf32>
    %71 = arith.maximumf %69, %70 : vector<1x128xf32>
    %c0_54 = arith.constant 0 : index
    %c2_55 = arith.constant 2 : index
    %c1_56 = arith.constant 1 : index
    %c0_57 = arith.constant 0 : index
    %72 = vector.load %arg2[%c0_54, %c2_55, %c1_56, %c0_57] : memref<1x4x4x128xf32, #tpu.memory_space<vmem>>, vector<1x1x1x128xf32>
    %73 = vector.shape_cast %72 : vector<1x1x1x128xf32> to vector<1x128xf32>
    %74 = vector.shape_cast %71 : vector<1x128xf32> to vector<1x1x1x128xf32>
    tpu.vector_store %arg2[%c0_54, %c2_55, %c1_56, %c0_57], %74 {strides = array<i32>} : memref<1x4x4x128xf32, #tpu.memory_space<vmem>>, vector<1x1x1x128xf32>,
    %75 = vector.extract_strided_slice %62 {offsets = [4, 0], sizes = [1, 128], strides = [1, 1]} : vector<8x128xf32> to vector<1x128xf32>
    %76 = vector.extract_strided_slice %62 {offsets = [5, 0], sizes = [1, 128], strides = [1, 1]} : vector<8x128xf32> to vector<1x128xf32>
    %77 = arith.maximumf %75, %76 : vector<1x128xf32>
    %c0_58 = arith.constant 0 : index
    %c2_59 = arith.constant 2 : index
    %c2_60 = arith.constant 2 : index
    %c0_61 = arith.constant 0 : index
    %78 = vector.load %arg2[%c0_58, %c2_59, %c2_60, %c0_61] : memref<1x4x4x128xf32, #tpu.memory_space<vmem>>, vector<1x1x1x128xf32>
    %79 = vector.shape_cast %78 : vector<1x1x1x128xf32> to vector<1x128xf32>
    %80 = vector.shape_cast %77 : vector<1x128xf32> to vector<1x1x1x128xf32>
    tpu.vector_store %arg2[%c0_58, %c2_59, %c2_60, %c0_61], %80 {strides = array<i32>} : memref<1x4x4x128xf32, #tpu.memory_space<vmem>>, vector<1x1x1x128xf32>,
    %81 = vector.extract_strided_slice %62 {offsets = [6, 0], sizes = [1, 128], strides = [1, 1]} : vector<8x128xf32> to vector<1x128xf32>
    %82 = vector.extract_strided_slice %62 {offsets = [7, 0], sizes = [1, 128], strides = [1, 1]} : vector<8x128xf32> to vector<1x128xf32>
    %83 = arith.maximumf %81, %82 : vector<1x128xf32>
    %c0_62 = arith.constant 0 : index
    %c2_63 = arith.constant 2 : index
    %c3_64 = arith.constant 3 : index
    %c0_65 = arith.constant 0 : index
    %84 = vector.load %arg2[%c0_62, %c2_63, %c3_64, %c0_65] : memref<1x4x4x128xf32, #tpu.memory_space<vmem>>, vector<1x1x1x128xf32>
    %85 = vector.shape_cast %84 : vector<1x1x1x128xf32> to vector<1x128xf32>
    %86 = vector.shape_cast %83 : vector<1x128xf32> to vector<1x1x1x128xf32>
    tpu.vector_store %arg2[%c0_62, %c2_63, %c3_64, %c0_65], %86 {strides = array<i32>} : memref<1x4x4x128xf32, #tpu.memory_space<vmem>>, vector<1x1x1x128xf32>,
    %c0_66 = arith.constant 0 : index
    %c6 = arith.constant 6 : index
    %c0_67 = arith.constant 0 : index
    %c0_68 = arith.constant 0 : index
    %87 = vector.load %arg1[%c0_66, %c6, %c0_67, %c0_68] : memref<1x8x8x128xf32, #tpu.memory_space<vmem>>, vector<1x1x8x128xf32>
    %88 = vector.shape_cast %87 : vector<1x1x8x128xf32> to vector<8x128xf32>
    %c0_69 = arith.constant 0 : index
    %c7 = arith.constant 7 : index
    %c0_70 = arith.constant 0 : index
    %c0_71 = arith.constant 0 : index
    %89 = vector.load %arg1[%c0_69, %c7, %c0_70, %c0_71] : memref<1x8x8x128xf32, #tpu.memory_space<vmem>>, vector<1x1x8x128xf32>
    %90 = vector.shape_cast %89 : vector<1x1x8x128xf32> to vector<8x128xf32>
    %91 = arith.maximumf %88, %90 : vector<8x128xf32>
    %92 = vector.extract_strided_slice %91 {offsets = [0, 0], sizes = [1, 128], strides = [1, 1]} : vector<8x128xf32> to vector<1x128xf32>
    %93 = vector.extract_strided_slice %91 {offsets = [1, 0], sizes = [1, 128], strides = [1, 1]} : vector<8x128xf32> to vector<1x128xf32>
    %94 = arith.maximumf %92, %93 : vector<1x128xf32>
    %c0_72 = arith.constant 0 : index
    %c3_73 = arith.constant 3 : index
    %c0_74 = arith.constant 0 : index
    %c0_75 = arith.constant 0 : index
    %95 = vector.load %arg2[%c0_72, %c3_73, %c0_74, %c0_75] : memref<1x4x4x128xf32, #tpu.memory_space<vmem>>, vector<1x1x1x128xf32>
    %96 = vector.shape_cast %95 : vector<1x1x1x128xf32> to vector<1x128xf32>
    %97 = vector.shape_cast %94 : vector<1x128xf32> to vector<1x1x1x128xf32>
    tpu.vector_store %arg2[%c0_72, %c3_73, %c0_74, %c0_75], %97 {strides = array<i32>} : memref<1x4x4x128xf32, #tpu.memory_space<vmem>>, vector<1x1x1x128xf32>,
    %98 = vector.extract_strided_slice %91 {offsets = [2, 0], sizes = [1, 128], strides = [1, 1]} : vector<8x128xf32> to vector<1x128xf32>
    %99 = vector.extract_strided_slice %91 {offsets = [3, 0], sizes = [1, 128], strides = [1, 1]} : vector<8x128xf32> to vector<1x128xf32>
    %100 = arith.maximumf %98, %99 : vector<1x128xf32>
    %c0_76 = arith.constant 0 : index
    %c3_77 = arith.constant 3 : index
    %c1_78 = arith.constant 1 : index
    %c0_79 = arith.constant 0 : index
    %101 = vector.load %arg2[%c0_76, %c3_77, %c1_78, %c0_79] : memref<1x4x4x128xf32, #tpu.memory_space<vmem>>, vector<1x1x1x128xf32>
    %102 = vector.shape_cast %101 : vector<1x1x1x128xf32> to vector<1x128xf32>
    %103 = vector.shape_cast %100 : vector<1x128xf32> to vector<1x1x1x128xf32>
    tpu.vector_store %arg2[%c0_76, %c3_77, %c1_78, %c0_79], %103 {strides = array<i32>} : memref<1x4x4x128xf32, #tpu.memory_space<vmem>>, vector<1x1x1x128xf32>,
    %104 = vector.extract_strided_slice %91 {offsets = [4, 0], sizes = [1, 128], strides = [1, 1]} : vector<8x128xf32> to vector<1x128xf32>
    %105 = vector.extract_strided_slice %91 {offsets = [5, 0], sizes = [1, 128], strides = [1, 1]} : vector<8x128xf32> to vector<1x128xf32>
    %106 = arith.maximumf %104, %105 : vector<1x128xf32>
    %c0_80 = arith.constant 0 : index
    %c3_81 = arith.constant 3 : index
    %c2_82 = arith.constant 2 : index
    %c0_83 = arith.constant 0 : index
    %107 = vector.load %arg2[%c0_80, %c3_81, %c2_82, %c0_83] : memref<1x4x4x128xf32, #tpu.memory_space<vmem>>, vector<1x1x1x128xf32>
    %108 = vector.shape_cast %107 : vector<1x1x1x128xf32> to vector<1x128xf32>
    %109 = vector.shape_cast %106 : vector<1x128xf32> to vector<1x1x1x128xf32>
    tpu.vector_store %arg2[%c0_80, %c3_81, %c2_82, %c0_83], %109 {strides = array<i32>} : memref<1x4x4x128xf32, #tpu.memory_space<vmem>>, vector<1x1x1x128xf32>,
    %110 = vector.extract_strided_slice %91 {offsets = [6, 0], sizes = [1, 128], strides = [1, 1]} : vector<8x128xf32> to vector<1x128xf32>
    %111 = vector.extract_strided_slice %91 {offsets = [7, 0], sizes = [1, 128], strides = [1, 1]} : vector<8x128xf32> to vector<1x128xf32>
    %112 = arith.maximumf %110, %111 : vector<1x128xf32>
    %c0_84 = arith.constant 0 : index
    %c3_85 = arith.constant 3 : index
    %c3_86 = arith.constant 3 : index
    %c0_87 = arith.constant 0 : index
    %113 = vector.load %arg2[%c0_84, %c3_85, %c3_86, %c0_87] : memref<1x4x4x128xf32, #tpu.memory_space<vmem>>, vector<1x1x1x128xf32>
    %114 = vector.shape_cast %113 : vector<1x1x1x128xf32> to vector<1x128xf32>
    %115 = vector.shape_cast %112 : vector<1x128xf32> to vector<1x1x1x128xf32>
    tpu.vector_store %arg2[%c0_84, %c3_85, %c3_86, %c0_87], %115 {strides = array<i32>} : memref<1x4x4x128xf32, #tpu.memory_space<vmem>>, vector<1x1x1x128xf32>,
    return
  }
  func.func @transform_0(%arg0: i32) -> (i32, i32, i32, i32) {
    %c0_i32 = arith.constant 0 : i32
    %c0_i32_0 = arith.constant 0 : i32
    %c0_i32_1 = arith.constant 0 : i32
    %c0_i32_2 = arith.constant 0 : i32
    return %arg0, %c0_i32, %c0_i32_0, %c0_i32_1 : i32, i32, i32, i32
  }
  func.func @transform_1(%arg0: i32) -> (i32, i32, i32, i32) {
    %c0_i32 = arith.constant 0 : i32
    %c0_i32_0 = arith.constant 0 : i32
    %c0_i32_1 = arith.constant 0 : i32
    %c0_i32_2 = arith.constant 0 : i32
    return %arg0, %c0_i32, %c0_i32_0, %c0_i32_1 : i32, i32, i32, i32
  }
}

module attributes {stable_mosaic.version = 11 : i64} {
  func.func @_matmul_kernel(%arg0: i32, %arg1: memref<16x2048xbf16, #tpu.memory_space<vmem>>, %arg2: memref<2048x512xbf16, #tpu.memory_space<vmem>>, %arg3: memref<1x512xf32, #tpu.memory_space<vmem>>, %arg4: memref<16x512xf32, #tpu.memory_space<vmem>>) attributes {dimension_semantics = [#tpu.dimension_semantics<parallel>], iteration_bounds = array<i64: 1>, scalar_prefetch = 0 : i64, scratch_operands = 0 : i64, tpu.core_type = #tpu.core_type<tc>, window_params = [{transform_indices = @transform_0, window_bounds = array<i64: 16, 2048>}, {pipeline_mode = #tpu.pipeline_mode<synchronous>, transform_indices = @transform_1, window_bounds = array<i64: 2048, 512>}, {pipeline_mode = #tpu.pipeline_mode<synchronous>, transform_indices = @transform_2, window_bounds = array<i64: 1, 512>}, {transform_indices = @transform_3, window_bounds = array<i64: 16, 512>}]} {
    %c0 = arith.constant 0 : index
    %c0_0 = arith.constant 0 : index
    %0 = vector.load %arg1[%c0, %c0_0] : memref<16x2048xbf16, #tpu.memory_space<vmem>>, vector<16x2048xbf16>
    %c0_1 = arith.constant 0 : index
    %c0_2 = arith.constant 0 : index
    %1 = vector.load %arg2[%c0_1, %c0_2] : memref<2048x512xbf16, #tpu.memory_space<vmem>>, vector<2048x512xbf16>
    %cst = arith.constant dense<0.000000e+00> : vector<16x512xf32>
    %2 = tpu.matmul %0, %1, %cst {dimension_numbers = #tpu.dot_dimension_numbers<[1], [0], [0], [1], [0, 0, 1, 1], [], []>} : vector<16x2048xbf16>, vector<2048x512xbf16>, vector<16x512xf32> -> vector<16x512xf32>
    %c0_3 = arith.constant 0 : index
    %c0_4 = arith.constant 0 : index
    %3 = vector.load %arg3[%c0_3, %c0_4] : memref<1x512xf32, #tpu.memory_space<vmem>>, vector<1x512xf32>
    %4 = vector.broadcast %3 : vector<1x512xf32> to vector<16x512xf32>
    %5 = arith.addf %2, %4 : vector<16x512xf32>
    %cst_5 = arith.constant 0.000000e+00 : f32
    %6 = vector.broadcast %cst_5 : f32 to vector<16x512xf32>
    %7 = arith.maximumf %5, %6 : vector<16x512xf32>
    %c0_6 = arith.constant 0 : index
    %c0_7 = arith.constant 0 : index
    %8 = vector.load %arg4[%c0_6, %c0_7] : memref<16x512xf32, #tpu.memory_space<vmem>>, vector<16x512xf32>
    tpu.vector_store %arg4[%c0_6, %c0_7], %7 {strides = array<i32>} : memref<16x512xf32, #tpu.memory_space<vmem>>, vector<16x512xf32>,
    return
  }
  func.func @transform_0(%arg0: i32) -> (i32, i32) {
    %c0_i32 = arith.constant 0 : i32
    %c0_i32_0 = arith.constant 0 : i32
    return %arg0, %c0_i32 : i32, i32
  }
  func.func @transform_1(%arg0: i32) -> (i32, i32) {
    %c0_i32 = arith.constant 0 : i32
    %c0_i32_0 = arith.constant 0 : i32
    %c0_i32_1 = arith.constant 0 : i32
    return %c0_i32, %c0_i32_0 : i32, i32
  }
  func.func @transform_2(%arg0: i32) -> (i32, i32) {
    %c0_i32 = arith.constant 0 : i32
    %c0_i32_0 = arith.constant 0 : i32
    %c0_i32_1 = arith.constant 0 : i32
    return %c0_i32, %c0_i32_0 : i32, i32
  }
  func.func @transform_3(%arg0: i32) -> (i32, i32) {
    %c0_i32 = arith.constant 0 : i32
    %c0_i32_0 = arith.constant 0 : i32
    return %arg0, %c0_i32 : i32, i32
  }
}

module attributes {stable_mosaic.version = 11 : i64} {
  func.func @_matmul_kernel(%arg0: i32, %arg1: memref<16x512xbf16, #tpu.memory_space<vmem>>, %arg2: memref<512x128xbf16, #tpu.memory_space<vmem>>, %arg3: memref<1x128xf32, #tpu.memory_space<vmem>>, %arg4: memref<16x128xf32, #tpu.memory_space<vmem>>) attributes {dimension_semantics = [#tpu.dimension_semantics<parallel>], iteration_bounds = array<i64: 1>, scalar_prefetch = 0 : i64, scratch_operands = 0 : i64, tpu.core_type = #tpu.core_type<tc>, window_params = [{transform_indices = @transform_0, window_bounds = array<i64: 16, 512>}, {pipeline_mode = #tpu.pipeline_mode<synchronous>, transform_indices = @transform_1, window_bounds = array<i64: 512, 128>}, {pipeline_mode = #tpu.pipeline_mode<synchronous>, transform_indices = @transform_2, window_bounds = array<i64: 1, 128>}, {transform_indices = @transform_3, window_bounds = array<i64: 16, 128>}]} {
    %c0 = arith.constant 0 : index
    %c0_0 = arith.constant 0 : index
    %0 = vector.load %arg1[%c0, %c0_0] : memref<16x512xbf16, #tpu.memory_space<vmem>>, vector<16x512xbf16>
    %c0_1 = arith.constant 0 : index
    %c0_2 = arith.constant 0 : index
    %1 = vector.load %arg2[%c0_1, %c0_2] : memref<512x128xbf16, #tpu.memory_space<vmem>>, vector<512x128xbf16>
    %cst = arith.constant dense<0.000000e+00> : vector<16x128xf32>
    %2 = tpu.matmul %0, %1, %cst {dimension_numbers = #tpu.dot_dimension_numbers<[1], [0], [0], [1], [0, 0, 1, 1], [], []>} : vector<16x512xbf16>, vector<512x128xbf16>, vector<16x128xf32> -> vector<16x128xf32>
    %c0_3 = arith.constant 0 : index
    %c0_4 = arith.constant 0 : index
    %3 = vector.load %arg3[%c0_3, %c0_4] : memref<1x128xf32, #tpu.memory_space<vmem>>, vector<1x128xf32>
    %4 = vector.broadcast %3 : vector<1x128xf32> to vector<16x128xf32>
    %5 = arith.addf %2, %4 : vector<16x128xf32>
    %c0_5 = arith.constant 0 : index
    %c0_6 = arith.constant 0 : index
    %6 = vector.load %arg4[%c0_5, %c0_6] : memref<16x128xf32, #tpu.memory_space<vmem>>, vector<16x128xf32>
    tpu.vector_store %arg4[%c0_5, %c0_6], %5 {strides = array<i32>} : memref<16x128xf32, #tpu.memory_space<vmem>>, vector<16x128xf32>,
    return
  }
  func.func @transform_0(%arg0: i32) -> (i32, i32) {
    %c0_i32 = arith.constant 0 : i32
    %c0_i32_0 = arith.constant 0 : i32
    return %arg0, %c0_i32 : i32, i32
  }
  func.func @transform_1(%arg0: i32) -> (i32, i32) {
    %c0_i32 = arith.constant 0 : i32
    %c0_i32_0 = arith.constant 0 : i32
    %c0_i32_1 = arith.constant 0 : i32
    return %c0_i32, %c0_i32_0 : i32, i32
  }
  func.func @transform_2(%arg0: i32) -> (i32, i32) {
    %c0_i32 = arith.constant 0 : i32
    %c0_i32_0 = arith.constant 0 : i32
    %c0_i32_1 = arith.constant 0 : i32
    return %c0_i32, %c0_i32_0 : i32, i32
  }
  func.func @transform_3(%arg0: i32) -> (i32, i32) {
    %c0_i32 = arith.constant 0 : i32
    %c0_i32_0 = arith.constant 0 : i32
    return %arg0, %c0_i32 : i32, i32
  }
}

</mosaic_0001>

<bundles_post_ra>
// kernel: _lambda_.6
= control target key start
LH: loop header
LB: loop body
LE: loop exit
PB: predicated region body
PF: predicated region fallthrough
CT: control target
= control target key end

     0   :  { %s1254_s12 = smov 0   ;;  %s1482_s0 = inlined_call_operand.vmem [shape: bf16[1536,25], index: 0, kind: input, shape index: {}]   ;;  %s1483_s1 = inlined_call_operand.vmem [shape: bf16[25,128], index: 1, kind: input, shape index: {}]   ;;  %s1484_s2 = inlined_call_operand.vmem [shape: f32[1,128], index: 2, kind: input, shape index: {}]   ;;  %s1485_s3 = inlined_call_operand.vmem [shape: f32[1536,128], index: 3, kind: output, shape index: {}]  }
   0x1 LB: > { %s998_s13 = sadd.s32 4294967295, %s1231_s12   ;;  %p1002_p0 = scmp.ge.s32.totalorder %s1231_s12, 1  ;;  %s1231_s12 = sphi %s1254_s12, %s13_s12  }
   0x2   : > { %p138_p1 = scmp.lt.s32.totalorder %s1231_s12, 4 }
   0x4   : > { %p139_p2 = pnand %p1002_p0, %p138_p1 }
   0x5   : > { %s1003_s16 = sshll.u32 (!%p139_p2), %s998_s13, 6 }
   0x6   : > { %142 = sbr.rel (%p139_p2) target bundleno = 284 (0x11c), region = 32  ;;  %p163_p3 = scmp.lt.s32.totalorder (!%p139_p2), %s1003_s16, 191 }
   0xb   : > { %v1191_v0 = vld [vmem:[%s1483_s1 + $0x8] sm:$0x1f]   ;;  %vm518_vm0 = vcmask 1043456   ;;  %vm519_vm1 = vcmask 1044480   ;;  %v1233_v1 = vmov 65535   ;;  %v1192_v5 = vld [vmem:[%s1483_s1] sm:$0xff]  }
   0xc   : > { %v520_v2 = vsel %vm518_vm0, 4294967295, %v1233_v1  ;;  %s1487_s16 = smov (!%p163_p3, %s1003_s16), 191  ;;  %vm421_vm2 = vcmask 203776   ;;  %v1343_v38 = vld [vmem:[%s1484_s2] ss:$0 sm:$0xff] }
   0xd   : > { %v521_v3 = vsel %vm519_vm1, %v520_v2, 0  ;;  %s1004_s19 = sshll.u32 %s1487_s16, 2  ;;  %s1006_s25 = sshll.u32 %s1487_s16, 3 }
   0xe   : > { %v523_v4 = vand.u32 %v1191_v0, %v521_v3  ;;  %s1274_s22 = scalar_lea.vmem %s1482_s0, %s1004_s19  ;;  %s1351_s28 = scalar_lea.vmem %s1485_s3, %s1006_s25 }
   0xf   : > { %v1193_v6 = vld [vmem:[%s1274_s22] sm:$0xff]   ;;  %v1195_v8 = vld [vmem:[%s1274_s22 + $0x8] sm:$0xff]   ;;  %v1197_v10 = vld [vmem:[%s1274_s22 + $0x10] sm:$0xff]  }
  0x10   : > { %1110 = vmatprep.subr.bf16.mxu0 %v523_v4  ;;  %1178 = vmatprep.subr.bf16.mxu1 %v523_v4  ;;  %v1194_v7 = vld [vmem:[%s1274_s22 + $0x80] sm:$0xff]   ;;  %v1196_v9 = vld [vmem:[%s1274_s22 + $0x88] sm:$0xff]   ;;  %v1198_v11 = vld [vmem:[%s1274_s22 + $0x90] sm:$0xff]  }
  0x11   : > { %1111 = vmatpush3.bf16.msra.mxu0 %v523_v4  ;;  %1180 = vmatpush3.bf16.msra.mxu1 %v523_v4  ;;  %v1199_v12 = vld [vmem:[%s1274_s22 + $0x18] sm:$0xff]   ;;  %v1201_v14 = vld [vmem:[%s1274_s22 + $0x20] sm:$0xff]   ;;  %v1203_v16 = vld [vmem:[%s1274_s22 + $0x28] sm:$0xff]  }
  0x12   : > { %1112 = vmatprep.subr.bf16.mxu0 %v1192_v5  ;;  %1179 = vmatprep.subr.bf16.mxu1 %v1192_v5  ;;  %v1200_v13 = vld [vmem:[%s1274_s22 + $0x98] sm:$0xff]   ;;  %v1202_v15 = vld [vmem:[%s1274_s22 + $0xa0] sm:$0xff]   ;;  %v1204_v17 = vld [vmem:[%s1274_s22 + $0xa8] sm:$0xff]  }
  0x13   : > { %1114 = vmatprep.mubr.msk.bf16.mxu0 %vm421_vm2, %v1193_v6  ;;  %1146 = vmatprep.mubr.msk.bf16.mxu1 %vm421_vm2, %v1194_v7  ;;  %v1205_v18 = vld [vmem:[%s1274_s22 + $0x30] sm:$0xff]   ;;  %v1207_v20 = vld [vmem:[%s1274_s22 + $0x38] sm:$0xff]   ;;  %v1209_v22 = vld [vmem:[%s1274_s22 + $0x40] sm:$0xff]  }
  0x14   : > { %v1206_v19 = vld [vmem:[%s1274_s22 + $0xb0] sm:$0xff]   ;;  %v1208_v21 = vld [vmem:[%s1274_s22 + $0xb8] sm:$0xff]   ;;  %v1210_v23 = vld [vmem:[%s1274_s22 + $0xc0] sm:$0xff]  }
  0x15   : > { %1113 = vmatpush3.bf16.msra.mxu0 %v1192_v5  ;;  %1181 = vmatpush3.bf16.msra.mxu1 %v1192_v5  ;;  %v1211_v24 = vld [vmem:[%s1274_s22 + $0x48] sm:$0xff]   ;;  %v1213_v26 = vld [vmem:[%s1274_s22 + $0x50] sm:$0xff]   ;;  %v1215_v28 = vld [vmem:[%s1274_s22 + $0x58] sm:$0xff]  }
  0x16   : > { %v1212_v25 = vld [vmem:[%s1274_s22 + $0xc8] sm:$0xff]   ;;  %v1214_v27 = vld [vmem:[%s1274_s22 + $0xd0] sm:$0xff]   ;;  %v1216_v29 = vld [vmem:[%s1274_s22 + $0xd8] sm:$0xff]  }
  0x17   : > { %v1217_v30 = vld [vmem:[%s1274_s22 + $0x60] sm:$0xff]   ;;  %v1219_v32 = vld [vmem:[%s1274_s22 + $0x68] sm:$0xff]   ;;  %v1221_v34 = vld [vmem:[%s1274_s22 + $0x70] sm:$0xff]  }
  0x18   : > { %1115 = vmatmul.mubr.msk.bf16.vlgmr.msra.gmra.mxu0 %vm421_vm2, %v1195_v8  ;;  %1147 = vmatmul.mubr.msk.bf16.vlgmr.msra.gmra.mxu1 %vm421_vm2, %v1196_v9  ;;  %v1218_v31 = vld [vmem:[%s1274_s22 + $0xe0] sm:$0xff]   ;;  %v1220_v33 = vld [vmem:[%s1274_s22 + $0xe8] sm:$0xff]   ;;  %v1222_v35 = vld [vmem:[%s1274_s22 + $0xf0] sm:$0xff]  }
  0x19   : > { %1118 = vmatprep.mubr.msk.bf16.mxu0 %vm421_vm2, %v1197_v10  ;;  %1150 = vmatprep.mubr.msk.bf16.mxu1 %vm421_vm2, %v1198_v11  ;;  %v1223_v36 = vld [vmem:[%s1274_s22 + $0x78] sm:$0xff]  }
  0x1a   : > { %v1224_v37 = vld [vmem:[%s1274_s22 + $0xf8] sm:$0xff]  }
  0x20   : > { %1119 = vmatmul.mubr.msk.bf16.gmra.mxu0 %vm421_vm2, %v1199_v12  ;;  %1151 = vmatmul.mubr.msk.bf16.gmra.mxu1 %vm421_vm2, %v1200_v13 }
  0x21   : > { %1122 = vmatprep.mubr.msk.bf16.mxu0 %vm421_vm2, %v1201_v14  ;;  %1154 = vmatprep.mubr.msk.bf16.mxu1 %vm421_vm2, %v1202_v15 }
  0x28   : > { %1123 = vmatmul.mubr.msk.bf16.gmra.mxu0 %vm421_vm2, %v1203_v16  ;;  %1155 = vmatmul.mubr.msk.bf16.gmra.mxu1 %vm421_vm2, %v1204_v17 }
  0x29   : > { %1126 = vmatprep.mubr.msk.bf16.mxu0 %vm421_vm2, %v1205_v18  ;;  %1158 = vmatprep.mubr.msk.bf16.mxu1 %vm421_vm2, %v1206_v19 }
  0x30   : > { %1127 = vmatmul.mubr.msk.bf16.gmra.mxu0 %vm421_vm2, %v1207_v20  ;;  %1159 = vmatmul.mubr.msk.bf16.gmra.mxu1 %vm421_vm2, %v1208_v21 }
  0x31   : > { %1130 = vmatprep.mubr.msk.bf16.mxu0 %vm421_vm2, %v1209_v22  ;;  %1162 = vmatprep.mubr.msk.bf16.mxu1 %vm421_vm2, %v1210_v23 }
  0x38   : > { %1131 = vmatmul.mubr.msk.bf16.gmra.mxu0 %vm421_vm2, %v1211_v24  ;;  %1163 = vmatmul.mubr.msk.bf16.gmra.mxu1 %vm421_vm2, %v1212_v25 }
  0x39   : > { %1134 = vmatprep.mubr.msk.bf16.mxu0 %vm421_vm2, %v1213_v26  ;;  %1166 = vmatprep.mubr.msk.bf16.mxu1 %vm421_vm2, %v1214_v27 }
  0x40   : > { %1135 = vmatmul.mubr.msk.bf16.gmra.mxu0 %vm421_vm2, %v1215_v28  ;;  %1167 = vmatmul.mubr.msk.bf16.gmra.mxu1 %vm421_vm2, %v1216_v29 }
  0x41   : > { %1138 = vmatprep.mubr.msk.bf16.mxu0 %vm421_vm2, %v1217_v30  ;;  %1170 = vmatprep.mubr.msk.bf16.mxu1 %vm421_vm2, %v1218_v31 }
  0x48   : > { %1139 = vmatmul.mubr.msk.bf16.gmra.mxu0 %vm421_vm2, %v1219_v32  ;;  %1171 = vmatmul.mubr.msk.bf16.gmra.mxu1 %vm421_vm2, %v1220_v33 }
  0x49   : > { %1142 = vmatprep.mubr.msk.bf16.mxu0 %vm421_vm2, %v1221_v34  ;;  %1174 = vmatprep.mubr.msk.bf16.mxu1 %vm421_vm2, %v1222_v35 }
  0x50   : > { %1143 = vmatmul.mubr.msk.bf16.gmra.mxu0 %vm421_vm2, %v1223_v36  ;;  %1175 = vmatmul.mubr.msk.bf16.gmra.mxu1 %vm421_vm2, %v1224_v37 }
  0xd8   : > { %v1116_v39 = vpop.f32.mrf.mxu0  ;;  %v1148_v40 = vpop.f32.mrf.mxu1 }
  0xd9   : > { %v568_v41 = vadd.f32 %v1116_v39, %v1343_v38  ;;  %v696_v42 = vadd.f32 %v1148_v40, %v1343_v38 }
  0xda   : > { %v559_v43 = vpop.f32.mrf.mxu0  ;;  %v687_v44 = vpop.f32.mrf.mxu1 }
  0xdb   : > { %v816_v45 = vmax.f32 %v568_v41, 0.0  ;;  %v848_v46 = vmax.f32 %v696_v42, 0.0  ;;  %v560_v47 = vadd.f32 %v1343_v38, %v559_v43  ;;  %v688_v48 = vadd.f32 %v1343_v38, %v687_v44 }
  0xdc   : > { %v1117_v49 = vpop.f32.mrf.mxu0  ;;  %v1149_v50 = vpop.f32.mrf.mxu1 }
  0xdd   : > { %880 = vst [vmem:[%s1351_s28 + $0x10] sm:$0xff] %v816_v45  ;;  %912 = vst [vmem:[%s1351_s28 + $0x110] sm:$0xff] %v848_v46  ;;  %v814_v51 = vmax.f32 %v560_v47, 0.0  ;;  %v846_v52 = vmax.f32 %v688_v48, 0.0  ;;  %v571_v53 = vadd.f32 %v1117_v49, %v1343_v38  ;;  %v699_v54 = vadd.f32 %v1149_v50, %v1343_v38 }
  0xde   : > { %v562_v55 = vpop.f32.mrf.mxu0  ;;  %v690_v56 = vpop.f32.mrf.mxu1 }
  0xdf   : > { %878 = vst [vmem:[%s1351_s28] sm:$0xff] %v814_v51  ;;  %910 = vst [vmem:[%s1351_s28 + $0x100] sm:$0xff] %v846_v52  ;;  %v817_v57 = vmax.f32 %v571_v53, 0.0  ;;  %v849_v58 = vmax.f32 %v699_v54, 0.0  ;;  %v563_v59 = vadd.f32 %v1343_v38, %v562_v55  ;;  %v691_v60 = vadd.f32 %v1343_v38, %v690_v56 }
  0xe0   : > { %v1120_v61 = vpop.f32.mrf.mxu0  ;;  %v1152_v62 = vpop.f32.mrf.mxu1 }
  0xe1   : > { %881 = vst [vmem:[%s1351_s28 + $0x18] sm:$0xff] %v817_v57  ;;  %913 = vst [vmem:[%s1351_s28 + $0x118] sm:$0xff] %v849_v58  ;;  %v815_v63 = vmax.f32 %v563_v59, 0.0  ;;  %v847_v0 = vmax.f32 %v691_v60, 0.0  ;;  %v584_v1 = vadd.f32 %v1120_v61, %v1343_v38  ;;  %v712_v2 = vadd.f32 %v1152_v62, %v1343_v38 }
  0xe2   : > { %v575_v3 = vpop.f32.mrf.mxu0  ;;  %v703_v4 = vpop.f32.mrf.mxu1 }
  0xe3   : > { %879 = vst [vmem:[%s1351_s28 + $0x8] sm:$0xff] %v815_v63  ;;  %911 = vst [vmem:[%s1351_s28 + $0x108] sm:$0xff] %v847_v0  ;;  %v820_v5 = vmax.f32 %v584_v1, 0.0  ;;  %v852_v6 = vmax.f32 %v712_v2, 0.0  ;;  %v576_v7 = vadd.f32 %v1343_v38, %v575_v3  ;;  %v704_v8 = vadd.f32 %v1343_v38, %v703_v4 }
  0xe4   : > { %v1121_v9 = vpop.f32.mrf.mxu0  ;;  %v1153_v10 = vpop.f32.mrf.mxu1 }
  0xe5   : > { %884 = vst [vmem:[%s1351_s28 + $0x30] sm:$0xff] %v820_v5  ;;  %916 = vst [vmem:[%s1351_s28 + $0x130] sm:$0xff] %v852_v6  ;;  %v818_v11 = vmax.f32 %v576_v7, 0.0  ;;  %v850_v12 = vmax.f32 %v704_v8, 0.0  ;;  %v587_v13 = vadd.f32 %v1121_v9, %v1343_v38  ;;  %v715_v14 = vadd.f32 %v1153_v10, %v1343_v38 }
  0xe6   : > { %v578_v15 = vpop.f32.mrf.mxu0  ;;  %v706_v16 = vpop.f32.mrf.mxu1 }
  0xe7   : > { %882 = vst [vmem:[%s1351_s28 + $0x20] sm:$0xff] %v818_v11  ;;  %914 = vst [vmem:[%s1351_s28 + $0x120] sm:$0xff] %v850_v12  ;;  %v821_v17 = vmax.f32 %v587_v13, 0.0  ;;  %v853_v18 = vmax.f32 %v715_v14, 0.0  ;;  %v579_v19 = vadd.f32 %v1343_v38, %v578_v15  ;;  %v707_v20 = vadd.f32 %v1343_v38, %v706_v16 }
  0xe8   : > { %v1124_v21 = vpop.f32.mrf.mxu0  ;;  %v1156_v22 = vpop.f32.mrf.mxu1 }
  0xe9   : > { %885 = vst [vmem:[%s1351_s28 + $0x38] sm:$0xff] %v821_v17  ;;  %917 = vst [vmem:[%s1351_s28 + $0x138] sm:$0xff] %v853_v18  ;;  %v819_v23 = vmax.f32 %v579_v19, 0.0  ;;  %v851_v24 = vmax.f32 %v707_v20, 0.0  ;;  %v600_v25 = vadd.f32 %v1124_v21, %v1343_v38  ;;  %v728_v26 = vadd.f32 %v1156_v22, %v1343_v38 }
  0xea   : > { %v591_v27 = vpop.f32.mrf.mxu0  ;;  %v719_v28 = vpop.f32.mrf.mxu1 }
  0xeb   : > { %883 = vst [vmem:[%s1351_s28 + $0x28] sm:$0xff] %v819_v23  ;;  %915 = vst [vmem:[%s1351_s28 + $0x128] sm:$0xff] %v851_v24  ;;  %v824_v29 = vmax.f32 %v600_v25, 0.0  ;;  %v856_v30 = vmax.f32 %v728_v26, 0.0  ;;  %v592_v31 = vadd.f32 %v1343_v38, %v591_v27  ;;  %v720_v32 = vadd.f32 %v1343_v38, %v719_v28 }
  0xec   : > { %v1125_v33 = vpop.f32.mrf.mxu0  ;;  %v1157_v34 = vpop.f32.mrf.mxu1 }
  0xed   : > { %888 = vst [vmem:[%s1351_s28 + $0x50] sm:$0xff] %v824_v29  ;;  %920 = vst [vmem:[%s1351_s28 + $0x150] sm:$0xff] %v856_v30  ;;  %v822_v35 = vmax.f32 %v592_v31, 0.0  ;;  %v854_v36 = vmax.f32 %v720_v32, 0.0  ;;  %v603_v37 = vadd.f32 %v1125_v33, %v1343_v38  ;;  %v731_v39 = vadd.f32 %v1157_v34, %v1343_v38 }
  0xee   : > { %v594_v40 = vpop.f32.mrf.mxu0  ;;  %v722_v41 = vpop.f32.mrf.mxu1 }
  0xef   : > { %886 = vst [vmem:[%s1351_s28 + $0x40] sm:$0xff] %v822_v35  ;;  %918 = vst [vmem:[%s1351_s28 + $0x140] sm:$0xff] %v854_v36  ;;  %v825_v42 = vmax.f32 %v603_v37, 0.0  ;;  %v857_v43 = vmax.f32 %v731_v39, 0.0  ;;  %v595_v44 = vadd.f32 %v1343_v38, %v594_v40  ;;  %v723_v45 = vadd.f32 %v1343_v38, %v722_v41 }
  0xf0   : > { %v1128_v46 = vpop.f32.mrf.mxu0  ;;  %v1160_v47 = vpop.f32.mrf.mxu1 }
  0xf1   : > { %889 = vst [vmem:[%s1351_s28 + $0x58] sm:$0xff] %v825_v42  ;;  %921 = vst [vmem:[%s1351_s28 + $0x158] sm:$0xff] %v857_v43  ;;  %v823_v48 = vmax.f32 %v595_v44, 0.0  ;;  %v855_v49 = vmax.f32 %v723_v45, 0.0  ;;  %v616_v50 = vadd.f32 %v1128_v46, %v1343_v38  ;;  %v744_v51 = vadd.f32 %v1160_v47, %v1343_v38 }
  0xf2   : > { %v607_v52 = vpop.f32.mrf.mxu0  ;;  %v735_v53 = vpop.f32.mrf.mxu1 }
  0xf3   : > { %887 = vst [vmem:[%s1351_s28 + $0x48] sm:$0xff] %v823_v48  ;;  %919 = vst [vmem:[%s1351_s28 + $0x148] sm:$0xff] %v855_v49  ;;  %v828_v54 = vmax.f32 %v616_v50, 0.0  ;;  %v860_v55 = vmax.f32 %v744_v51, 0.0  ;;  %v608_v56 = vadd.f32 %v1343_v38, %v607_v52  ;;  %v736_v57 = vadd.f32 %v1343_v38, %v735_v53 }
  0xf4   : > { %v1129_v58 = vpop.f32.mrf.mxu0  ;;  %v1161_v59 = vpop.f32.mrf.mxu1 }
  0xf5   : > { %892 = vst [vmem:[%s1351_s28 + $0x70] sm:$0xff] %v828_v54  ;;  %924 = vst [vmem:[%s1351_s28 + $0x170] sm:$0xff] %v860_v55  ;;  %v826_v60 = vmax.f32 %v608_v56, 0.0  ;;  %v858_v61 = vmax.f32 %v736_v57, 0.0  ;;  %v619_v62 = vadd.f32 %v1129_v58, %v1343_v38  ;;  %v747_v63 = vadd.f32 %v1161_v59, %v1343_v38 }
  0xf6   : > { %v610_v0 = vpop.f32.mrf.mxu0  ;;  %v738_v1 = vpop.f32.mrf.mxu1 }
  0xf7   : > { %890 = vst [vmem:[%s1351_s28 + $0x60] sm:$0xff] %v826_v60  ;;  %922 = vst [vmem:[%s1351_s28 + $0x160] sm:$0xff] %v858_v61  ;;  %v829_v2 = vmax.f32 %v619_v62, 0.0  ;;  %v861_v3 = vmax.f32 %v747_v63, 0.0  ;;  %v611_v4 = vadd.f32 %v1343_v38, %v610_v0  ;;  %v739_v5 = vadd.f32 %v1343_v38, %v738_v1 }
  0xf8   : > { %v1132_v6 = vpop.f32.mrf.mxu0  ;;  %v1164_v7 = vpop.f32.mrf.mxu1 }
  0xf9   : > { %893 = vst [vmem:[%s1351_s28 + $0x78] sm:$0xff] %v829_v2  ;;  %925 = vst [vmem:[%s1351_s28 + $0x178] sm:$0xff] %v861_v3  ;;  %v827_v8 = vmax.f32 %v611_v4, 0.0  ;;  %v859_v9 = vmax.f32 %v739_v5, 0.0  ;;  %v632_v10 = vadd.f32 %v1132_v6, %v1343_v38  ;;  %v760_v11 = vadd.f32 %v1164_v7, %v1343_v38 }
  0xfa   : > { %v623_v12 = vpop.f32.mrf.mxu0  ;;  %v751_v13 = vpop.f32.mrf.mxu1 }
  0xfb   : > { %891 = vst [vmem:[%s1351_s28 + $0x68] sm:$0xff] %v827_v8  ;;  %923 = vst [vmem:[%s1351_s28 + $0x168] sm:$0xff] %v859_v9  ;;  %v832_v14 = vmax.f32 %v632_v10, 0.0  ;;  %v864_v15 = vmax.f32 %v760_v11, 0.0  ;;  %v624_v16 = vadd.f32 %v1343_v38, %v623_v12  ;;  %v752_v17 = vadd.f32 %v1343_v38, %v751_v13 }
  0xfc   : > { %v1133_v18 = vpop.f32.mrf.mxu0  ;;  %v1165_v19 = vpop.f32.mrf.mxu1 }
  0xfd   : > { %896 = vst [vmem:[%s1351_s28 + $0x90] sm:$0xff] %v832_v14  ;;  %928 = vst [vmem:[%s1351_s28 + $0x190] sm:$0xff] %v864_v15  ;;  %v830_v20 = vmax.f32 %v624_v16, 0.0  ;;  %v862_v21 = vmax.f32 %v752_v17, 0.0  ;;  %v635_v22 = vadd.f32 %v1133_v18, %v1343_v38  ;;  %v763_v23 = vadd.f32 %v1165_v19, %v1343_v38 }
  0xfe   : > { %v626_v24 = vpop.f32.mrf.mxu0  ;;  %v754_v25 = vpop.f32.mrf.mxu1 }
  0xff   : > { %894 = vst [vmem:[%s1351_s28 + $0x80] sm:$0xff] %v830_v20  ;;  %926 = vst [vmem:[%s1351_s28 + $0x180] sm:$0xff] %v862_v21  ;;  %v833_v26 = vmax.f32 %v635_v22, 0.0  ;;  %v865_v27 = vmax.f32 %v763_v23, 0.0  ;;  %v627_v28 = vadd.f32 %v1343_v38, %v626_v24  ;;  %v755_v29 = vadd.f32 %v1343_v38, %v754_v25 }
 0x100   : > { %v1136_v30 = vpop.f32.mrf.mxu0  ;;  %v1168_v31 = vpop.f32.mrf.mxu1 }
 0x101   : > { %897 = vst [vmem:[%s1351_s28 + $0x98] sm:$0xff] %v833_v26  ;;  %929 = vst [vmem:[%s1351_s28 + $0x198] sm:$0xff] %v865_v27  ;;  %v831_v32 = vmax.f32 %v627_v28, 0.0  ;;  %v863_v33 = vmax.f32 %v755_v29, 0.0  ;;  %v648_v34 = vadd.f32 %v1136_v30, %v1343_v38  ;;  %v776_v35 = vadd.f32 %v1168_v31, %v1343_v38 }
 0x102   : > { %v639_v36 = vpop.f32.mrf.mxu0  ;;  %v767_v37 = vpop.f32.mrf.mxu1 }
 0x103   : > { %895 = vst [vmem:[%s1351_s28 + $0x88] sm:$0xff] %v831_v32  ;;  %927 = vst [vmem:[%s1351_s28 + $0x188] sm:$0xff] %v863_v33  ;;  %v836_v39 = vmax.f32 %v648_v34, 0.0  ;;  %v868_v40 = vmax.f32 %v776_v35, 0.0  ;;  %v640_v41 = vadd.f32 %v1343_v38, %v639_v36  ;;  %v768_v42 = vadd.f32 %v1343_v38, %v767_v37 }
 0x104   : > { %v1137_v43 = vpop.f32.mrf.mxu0  ;;  %v1169_v44 = vpop.f32.mrf.mxu1 }
 0x105   : > { %900 = vst [vmem:[%s1351_s28 + $0xb0] sm:$0xff] %v836_v39  ;;  %932 = vst [vmem:[%s1351_s28 + $0x1b0] sm:$0xff] %v868_v40  ;;  %v834_v45 = vmax.f32 %v640_v41, 0.0  ;;  %v866_v46 = vmax.f32 %v768_v42, 0.0  ;;  %v651_v47 = vadd.f32 %v1137_v43, %v1343_v38  ;;  %v779_v48 = vadd.f32 %v1169_v44, %v1343_v38 }
 0x106   : > { %v642_v49 = vpop.f32.mrf.mxu0  ;;  %v770_v50 = vpop.f32.mrf.mxu1 }
 0x107   : > { %898 = vst [vmem:[%s1351_s28 + $0xa0] sm:$0xff] %v834_v45  ;;  %930 = vst [vmem:[%s1351_s28 + $0x1a0] sm:$0xff] %v866_v46  ;;  %v837_v51 = vmax.f32 %v651_v47, 0.0  ;;  %v869_v52 = vmax.f32 %v779_v48, 0.0  ;;  %v643_v53 = vadd.f32 %v1343_v38, %v642_v49  ;;  %v771_v54 = vadd.f32 %v1343_v38, %v770_v50 }
 0x108   : > { %v1140_v55 = vpop.f32.mrf.mxu0  ;;  %v1172_v56 = vpop.f32.mrf.mxu1 }
 0x109   : > { %901 = vst [vmem:[%s1351_s28 + $0xb8] sm:$0xff] %v837_v51  ;;  %933 = vst [vmem:[%s1351_s28 + $0x1b8] sm:$0xff] %v869_v52  ;;  %v835_v57 = vmax.f32 %v643_v53, 0.0  ;;  %v867_v58 = vmax.f32 %v771_v54, 0.0  ;;  %v664_v59 = vadd.f32 %v1140_v55, %v1343_v38  ;;  %v792_v60 = vadd.f32 %v1172_v56, %v1343_v38 }
 0x10a   : > { %v655_v61 = vpop.f32.mrf.mxu0  ;;  %v783_v62 = vpop.f32.mrf.mxu1 }
 0x10b   : > { %899 = vst [vmem:[%s1351_s28 + $0xa8] sm:$0xff] %v835_v57  ;;  %931 = vst [vmem:[%s1351_s28 + $0x1a8] sm:$0xff] %v867_v58  ;;  %v840_v63 = vmax.f32 %v664_v59, 0.0  ;;  %v872_v0 = vmax.f32 %v792_v60, 0.0  ;;  %v656_v1 = vadd.f32 %v1343_v38, %v655_v61  ;;  %v784_v2 = vadd.f32 %v1343_v38, %v783_v62 }
 0x10c   : > { %v1141_v3 = vpop.f32.mrf.mxu0  ;;  %v1173_v4 = vpop.f32.mrf.mxu1 }
 0x10d   : > { %904 = vst [vmem:[%s1351_s28 + $0xd0] sm:$0xff] %v840_v63  ;;  %936 = vst [vmem:[%s1351_s28 + $0x1d0] sm:$0xff] %v872_v0  ;;  %v838_v5 = vmax.f32 %v656_v1, 0.0  ;;  %v870_v6 = vmax.f32 %v784_v2, 0.0  ;;  %v667_v7 = vadd.f32 %v1141_v3, %v1343_v38  ;;  %v795_v8 = vadd.f32 %v1173_v4, %v1343_v38 }
 0x10e   : > { %v658_v9 = vpop.f32.mrf.mxu0  ;;  %v786_v10 = vpop.f32.mrf.mxu1 }
 0x10f   : > { %902 = vst [vmem:[%s1351_s28 + $0xc0] sm:$0xff] %v838_v5  ;;  %934 = vst [vmem:[%s1351_s28 + $0x1c0] sm:$0xff] %v870_v6  ;;  %v841_v11 = vmax.f32 %v667_v7, 0.0  ;;  %v873_v12 = vmax.f32 %v795_v8, 0.0  ;;  %v659_v13 = vadd.f32 %v1343_v38, %v658_v9  ;;  %v787_v14 = vadd.f32 %v1343_v38, %v786_v10 }
 0x110   : > { %v1144_v15 = vpop.f32.mrf.mxu0  ;;  %v1176_v16 = vpop.f32.mrf.mxu1 }
 0x111   : > { %905 = vst [vmem:[%s1351_s28 + $0xd8] sm:$0xff] %v841_v11  ;;  %937 = vst [vmem:[%s1351_s28 + $0x1d8] sm:$0xff] %v873_v12  ;;  %v839_v17 = vmax.f32 %v659_v13, 0.0  ;;  %v871_v18 = vmax.f32 %v787_v14, 0.0  ;;  %v680_v19 = vadd.f32 %v1144_v15, %v1343_v38  ;;  %v808_v20 = vadd.f32 %v1176_v16, %v1343_v38 }
 0x112   : > { %v671_v21 = vpop.f32.mrf.mxu0  ;;  %v799_v22 = vpop.f32.mrf.mxu1 }
 0x113   : > { %903 = vst [vmem:[%s1351_s28 + $0xc8] sm:$0xff] %v839_v17  ;;  %935 = vst [vmem:[%s1351_s28 + $0x1c8] sm:$0xff] %v871_v18  ;;  %v844_v23 = vmax.f32 %v680_v19, 0.0  ;;  %v876_v24 = vmax.f32 %v808_v20, 0.0  ;;  %v672_v25 = vadd.f32 %v1343_v38, %v671_v21  ;;  %v800_v26 = vadd.f32 %v1343_v38, %v799_v22 }
 0x114   : > { %v1145_v27 = vpop.f32.mrf.mxu0  ;;  %v1177_v28 = vpop.f32.mrf.mxu1 }
 0x115   : > { %908 = vst [vmem:[%s1351_s28 + $0xf0] sm:$0xff] %v844_v23  ;;  %940 = vst [vmem:[%s1351_s28 + $0x1f0] sm:$0xff] %v876_v24  ;;  %v842_v29 = vmax.f32 %v672_v25, 0.0  ;;  %v874_v30 = vmax.f32 %v800_v26, 0.0  ;;  %v683_v31 = vadd.f32 %v1145_v27, %v1343_v38  ;;  %v811_v32 = vadd.f32 %v1177_v28, %v1343_v38 }
 0x116   : > { %v674_v33 = vpop.f32.mrf.mxu0  ;;  %v802_v34 = vpop.f32.mrf.mxu1 }
 0x117   : > { %906 = vst [vmem:[%s1351_s28 + $0xe0] sm:$0xff] %v842_v29  ;;  %938 = vst [vmem:[%s1351_s28 + $0x1e0] sm:$0xff] %v874_v30  ;;  %v845_v35 = vmax.f32 %v683_v31, 0.0  ;;  %v877_v36 = vmax.f32 %v811_v32, 0.0  ;;  %v675_v37 = vadd.f32 %v1343_v38, %v674_v33  ;;  %v803_v39 = vadd.f32 %v1343_v38, %v802_v34 }
 0x119   : > { %909 = vst [vmem:[%s1351_s28 + $0xf8] sm:$0xff] %v845_v35  ;;  %941 = vst [vmem:[%s1351_s28 + $0x1f8] sm:$0xff] %v877_v36  ;;  %v843_v40 = vmax.f32 %v675_v37, 0.0  ;;  %v875_v41 = vmax.f32 %v803_v39, 0.0 }
 0x11b   : > { %907 = vst [vmem:[%s1351_s28 + $0xe8] sm:$0xff] %v843_v40  ;;  %939 = vst [vmem:[%s1351_s28 + $0x1e8] sm:$0xff] %v875_v41 }
 0x11c PF: > { %s13_s12 = sadd.s32 1, %s1231_s12  }
 0x11d   : > { %p10_p4 = scmp.ge.s32.totalorder %s13_s12, 5  }
 0x11f   :  { %12 = sbr.rel (!%p10_p4) target bundleno = 1 (0x1), region = 62 }

// kernel: _lambda_.7
= control target key start
LH: loop header
LB: loop body
LE: loop exit
PB: predicated region body
PF: predicated region fallthrough
CT: control target
= control target key end

     0   :  { %s840_s6 = smov 0   ;;  %s1077_s0 = inlined_call_operand.vmem [shape: f32[2,24,24,128], index: 0, kind: input, shape index: {}]   ;;  %s1078_s1 = inlined_call_operand.vmem [shape: f32[2,12,12,128], index: 1, kind: output, shape index: {}]  }
   0x1 LB: > { %s602_s7 = sadd.s32 4294967295, %s828_s6   ;;  %p606_p0 = scmp.ge.s32.totalorder %s828_s6, 1  ;;  %s828_s6 = sphi %s840_s6, %s11_s6  }
   0x2   : > { %p87_p1 = scmp.lt.s32.totalorder %s828_s6, 3 }
   0x4   : > { %p88_p2 = pnand %p606_p0, %p87_p1 }
   0x5   : > { %p107_p3 = scmp.lt.s32.totalorder (!%p88_p2), %s602_s7, 1 }
   0x6   : > { %91 = sbr.rel (%p88_p2) target bundleno = 94 (0x5e), region = 24 }
   0xb   : > { %s1080_s7 = smov (!%p107_p3, %s602_s7), 1 }
   0xc   : > { %s812_s8 = smul.u32 576, %s1080_s7 }
   0xd   : > { %s813_s12 = smul.u32 192, %s1080_s7 }
   0xe   : > { %s851_s11 = scalar_lea.vmem %s1077_s0, %s812_s8 }
   0xf   : > { %v117_v0 = vld [vmem:[%s851_s11] sm:$0xff]  ;;  %v609_v1 = vld [vmem:[%s851_s11 + $0x18] sm:$0xff]  ;;  %v118_v2 = vld [vmem:[%s851_s11 + $0x8] sm:$0xff]  ;;  %s868_s15 = scalar_lea.vmem %s1078_s1, %s813_s12 }
  0x10   : > { %v124_v3 = vmax.f32 %v117_v0, %v609_v1  ;;  %v610_v4 = vld [vmem:[%s851_s11 + $0x20] sm:$0xff]  ;;  %v119_v5 = vld [vmem:[%s851_s11 + $0x10] sm:$0xff]  ;;  %v611_v6 = vld [vmem:[%s851_s11 + $0x28] sm:$0xff] }
  0x11   : > { %v125_v7 = vmax.f32 %v118_v2, %v610_v4  ;;  %v126_v8 = vmax.f32 %v119_v5, %v611_v6  ;;  %v612_v9 = vld [vmem:[%s851_s11 + $0x30] sm:$0xff]  ;;  %v615_v10 = vld [vmem:[%s851_s11 + $0x48] sm:$0xff]  ;;  %v613_v11 = vld [vmem:[%s851_s11 + $0x38] sm:$0xff] }
  0x12   : > { %v128_v12 = vrot.slane %v124_v3, 1  ;;  %v159_v13 = vmax.f32 %v612_v9, %v615_v10  ;;  %v616_v14 = vld [vmem:[%s851_s11 + $0x50] sm:$0xff]  ;;  %v614_v15 = vld [vmem:[%s851_s11 + $0x40] sm:$0xff]  ;;  %v617_v16 = vld [vmem:[%s851_s11 + $0x58] sm:$0xff] }
  0x13   : > { %v136_v17 = vrot.slane %v125_v7, 1  ;;  %v144_v18 = vrot.slane %v126_v8, 1  ;;  %v160_v19 = vmax.f32 %v613_v11, %v616_v14  ;;  %v161_v20 = vmax.f32 %v614_v15, %v617_v16  ;;  %v630_v21 = vld [vmem:[%s851_s11 + $0x60] sm:$0xff]  ;;  %v633_v22 = vld [vmem:[%s851_s11 + $0x78] sm:$0xff]  ;;  %v631_v23 = vld [vmem:[%s851_s11 + $0x68] sm:$0xff] }
  0x14   : > { %v130_v24 = vmax.f32 %v124_v3, %v128_v12  ;;  %v163_v25 = vrot.slane %v159_v13, 1  ;;  %v195_v26 = vmax.f32 %v630_v21, %v633_v22  ;;  %v634_v27 = vld [vmem:[%s851_s11 + $0x80] sm:$0xff]  ;;  %v632_v28 = vld [vmem:[%s851_s11 + $0x70] sm:$0xff]  ;;  %v635_v29 = vld [vmem:[%s851_s11 + $0x88] sm:$0xff] }
  0x15   : > { %v138_v30 = vmax.f32 %v125_v7, %v136_v17  ;;  %v146_v31 = vmax.f32 %v126_v8, %v144_v18  ;;  %v172_v32 = vrot.slane %v160_v19, 1  ;;  %v180_v33 = vrot.slane %v161_v20, 1  ;;  %v648_v34 = vld [vmem:[%s851_s11 + $0x90] sm:$0xff]  ;;  %v651_v35 = vld [vmem:[%s851_s11 + $0xa8] sm:$0xff]  ;;  %v649_v36 = vld [vmem:[%s851_s11 + $0x98] sm:$0xff] }
  0x16   : > { %131 = vst [vmem:[%s868_s15] sm:$0x1] %v130_v24  ;;  %132 = vst [vmem:[%s868_s15 - $0x1] sm:$0x4] %v130_v24  ;;  %v165_v37 = vmax.f32 %v159_v13, %v163_v25  ;;  %v199_v38 = vrot.slane %v195_v26, 1  ;;  %v196_v39 = vmax.f32 %v631_v23, %v634_v27  ;;  %v197_v40 = vmax.f32 %v632_v28, %v635_v29  ;;  %v652_v41 = vld [vmem:[%s851_s11 + $0xb0] sm:$0xff]  ;;  %v650_v42 = vld [vmem:[%s851_s11 + $0xa0] sm:$0xff] }
  0x17   : > { %133 = vst [vmem:[%s868_s15 - $0x2] sm:$0x10] %v130_v24  ;;  %134 = vst [vmem:[%s868_s15 - $0x3] sm:$0x40] %v130_v24  ;;  %v653_v43 = vld [vmem:[%s851_s11 + $0xb8] sm:$0xff]  ;;  %v174_v44 = vmax.f32 %v160_v19, %v172_v32  ;;  %v182_v45 = vmax.f32 %v161_v20, %v180_v33  ;;  %v231_v46 = vmax.f32 %v648_v34, %v651_v35  ;;  %v666_v48 = vld [vmem:[%s851_s11 + $0xc0] sm:$0xff] }
  0x18   : > { %139 = vst [vmem:[%s868_s15 + $0x4] sm:$0x1] %v138_v30  ;;  %140 = vst [vmem:[%s868_s15 + $0x3] sm:$0x4] %v138_v30  ;;  %v232_v47 = vmax.f32 %v649_v36, %v652_v41  ;;  %v669_v49 = vld [vmem:[%s851_s11 + $0xd8] sm:$0xff]  ;;  %v667_v50 = vld [vmem:[%s851_s11 + $0xc8] sm:$0xff]  ;;  %v201_v51 = vmax.f32 %v195_v26, %v199_v38  ;;  %v233_v54 = vmax.f32 %v650_v42, %v653_v43 }
  0x19   : > { %141 = vst [vmem:[%s868_s15 + $0x2] sm:$0x10] %v138_v30  ;;  %142 = vst [vmem:[%s868_s15 + $0x1] sm:$0x40] %v138_v30  ;;  %v208_v52 = vrot.slane %v196_v39, 1  ;;  %v216_v53 = vrot.slane %v197_v40, 1  ;;  %v267_v60 = vmax.f32 %v666_v48, %v669_v49 }
  0x1a   : > { %147 = vst [vmem:[%s868_s15 + $0x8] sm:$0x1] %v146_v31  ;;  %148 = vst [vmem:[%s868_s15 + $0x7] sm:$0x4] %v146_v31  ;;  %v670_v55 = vld [vmem:[%s851_s11 + $0xe0] sm:$0xff]  ;;  %v668_v56 = vld [vmem:[%s851_s11 + $0xd0] sm:$0xff] }
  0x1b   : > { %149 = vst [vmem:[%s868_s15 + $0x6] sm:$0x10] %v146_v31  ;;  %150 = vst [vmem:[%s868_s15 + $0x5] sm:$0x40] %v146_v31  ;;  %v671_v57 = vld [vmem:[%s851_s11 + $0xe8] sm:$0xff]  ;;  %v235_v58 = vrot.slane %v231_v46, 1  ;;  %v268_v61 = vmax.f32 %v667_v50, %v670_v55  ;;  %v210_v1 = vmax.f32 %v196_v39, %v208_v52  ;;  %v218_v2 = vmax.f32 %v197_v40, %v216_v53 }
  0x1c   : > { %618 = vst [vmem:[%s868_s15 + $0x10] sm:$0x1] %v165_v37  ;;  %619 = vst [vmem:[%s868_s15 + $0xf] sm:$0x4] %v165_v37  ;;  %v244_v59 = vrot.slane %v232_v47, 1  ;;  %v684_v62 = vld [vmem:[%s851_s11 + $0xf0] sm:$0xff]  ;;  %v269_v4 = vmax.f32 %v668_v56, %v671_v57 }
  0x1d   : > { %620 = vst [vmem:[%s868_s15 + $0xe] sm:$0x10] %v165_v37  ;;  %621 = vst [vmem:[%s868_s15 + $0xd] sm:$0x40] %v165_v37  ;;  %v687_v63 = vld [vmem:[%s851_s11 + $0x108] sm:$0xff]  ;;  %v685_v0 = vld [vmem:[%s851_s11 + $0xf8] sm:$0xff]  ;;  %v237_v8 = vmax.f32 %v231_v46, %v235_v58 }
  0x1e   : > { %622 = vst [vmem:[%s868_s15 + $0x14] sm:$0x1] %v174_v44  ;;  %623 = vst [vmem:[%s868_s15 + $0x13] sm:$0x4] %v174_v44  ;;  %v252_v3 = vrot.slane %v233_v54, 1  ;;  %v688_v5 = vld [vmem:[%s851_s11 + $0x110] sm:$0xff]  ;;  %v246_v9 = vmax.f32 %v232_v47, %v244_v59  ;;  %v303_v17 = vmax.f32 %v684_v62, %v687_v63 }
  0x1f   : > { %624 = vst [vmem:[%s868_s15 + $0x12] sm:$0x10] %v174_v44  ;;  %625 = vst [vmem:[%s868_s15 + $0x11] sm:$0x40] %v174_v44  ;;  %v686_v6 = vld [vmem:[%s851_s11 + $0x100] sm:$0xff]  ;;  %v689_v7 = vld [vmem:[%s851_s11 + $0x118] sm:$0xff]  ;;  %v304_v18 = vmax.f32 %v685_v0, %v688_v5 }
  0x20   : > { %626 = vst [vmem:[%s868_s15 + $0x18] sm:$0x1] %v182_v45  ;;  %627 = vst [vmem:[%s868_s15 + $0x17] sm:$0x4] %v182_v45  ;;  %v271_v10 = vrot.slane %v267_v60, 1  ;;  %v280_v11 = vrot.slane %v268_v61, 1  ;;  %v254_v15 = vmax.f32 %v233_v54, %v252_v3  ;;  %v305_v24 = vmax.f32 %v686_v6, %v689_v7 }
  0x21   : > { %628 = vst [vmem:[%s868_s15 + $0x16] sm:$0x10] %v182_v45  ;;  %629 = vst [vmem:[%s868_s15 + $0x15] sm:$0x40] %v182_v45  ;;  %v702_v12 = vld [vmem:[%s851_s11 + $0x120] sm:$0xff]  ;;  %v705_v13 = vld [vmem:[%s851_s11 + $0x138] sm:$0xff] }
  0x22   : > { %636 = vst [vmem:[%s868_s15 + $0x20] sm:$0x1] %v201_v51  ;;  %637 = vst [vmem:[%s868_s15 + $0x1f] sm:$0x4] %v201_v51  ;;  %v703_v14 = vld [vmem:[%s851_s11 + $0x128] sm:$0xff]  ;;  %v288_v16 = vrot.slane %v269_v4, 1  ;;  %v273_v22 = vmax.f32 %v267_v60, %v271_v10  ;;  %v282_v23 = vmax.f32 %v268_v61, %v280_v11  ;;  %v339_v25 = vmax.f32 %v702_v12, %v705_v13 }
  0x23   : > { %638 = vst [vmem:[%s868_s15 + $0x1e] sm:$0x10] %v201_v51  ;;  %639 = vst [vmem:[%s868_s15 + $0x1d] sm:$0x40] %v201_v51  ;;  %v706_v19 = vld [vmem:[%s851_s11 + $0x140] sm:$0xff]  ;;  %v704_v20 = vld [vmem:[%s851_s11 + $0x130] sm:$0xff] }
  0x24   : > { %640 = vst [vmem:[%s868_s15 + $0x24] sm:$0x1] %v210_v1  ;;  %641 = vst [vmem:[%s868_s15 + $0x23] sm:$0x4] %v210_v1  ;;  %v707_v21 = vld [vmem:[%s851_s11 + $0x148] sm:$0xff]  ;;  %v720_v26 = vld [vmem:[%s851_s11 + $0x150] sm:$0xff]  ;;  %v290_v29 = vmax.f32 %v269_v4, %v288_v16  ;;  %v340_v32 = vmax.f32 %v703_v14, %v706_v19 }
  0x25   : > { %642 = vst [vmem:[%s868_s15 + $0x22] sm:$0x10] %v210_v1  ;;  %643 = vst [vmem:[%s868_s15 + $0x21] sm:$0x40] %v210_v1  ;;  %v723_v27 = vld [vmem:[%s851_s11 + $0x168] sm:$0xff]  ;;  %v721_v28 = vld [vmem:[%s851_s11 + $0x158] sm:$0xff]  ;;  %v341_v38 = vmax.f32 %v704_v20, %v707_v21 }
  0x26   : > { %644 = vst [vmem:[%s868_s15 + $0x28] sm:$0x1] %v218_v2  ;;  %645 = vst [vmem:[%s868_s15 + $0x27] sm:$0x4] %v218_v2  ;;  %v307_v30 = vrot.slane %v303_v17, 1  ;;  %v316_v31 = vrot.slane %v304_v18, 1  ;;  %v375_v39 = vmax.f32 %v720_v26, %v723_v27 }
  0x27   : > { %646 = vst [vmem:[%s868_s15 + $0x26] sm:$0x10] %v218_v2  ;;  %647 = vst [vmem:[%s868_s15 + $0x25] sm:$0x40] %v218_v2  ;;  %v724_v33 = vld [vmem:[%s851_s11 + $0x170] sm:$0xff]  ;;  %v722_v34 = vld [vmem:[%s851_s11 + $0x160] sm:$0xff] }
  0x28   : > { %654 = vst [vmem:[%s868_s15 + $0x30] sm:$0x1] %v237_v8  ;;  %655 = vst [vmem:[%s868_s15 + $0x2f] sm:$0x4] %v237_v8  ;;  %v725_v35 = vld [vmem:[%s851_s11 + $0x178] sm:$0xff]  ;;  %v324_v36 = vrot.slane %v305_v24, 1  ;;  %v309_v43 = vmax.f32 %v303_v17, %v307_v30  ;;  %v318_v44 = vmax.f32 %v304_v18, %v316_v31  ;;  %v376_v46 = vmax.f32 %v721_v28, %v724_v33 }
  0x29   : > { %656 = vst [vmem:[%s868_s15 + $0x2e] sm:$0x10] %v237_v8  ;;  %657 = vst [vmem:[%s868_s15 + $0x2d] sm:$0x40] %v237_v8  ;;  %v343_v37 = vrot.slane %v339_v25, 1  ;;  %v738_v40 = vld [vmem:[%s851_s11 + $0x180] sm:$0xff]  ;;  %v377_v59 = vmax.f32 %v722_v34, %v725_v35 }
  0x2a   : > { %658 = vst [vmem:[%s868_s15 + $0x34] sm:$0x1] %v246_v9  ;;  %659 = vst [vmem:[%s868_s15 + $0x33] sm:$0x4] %v246_v9  ;;  %v741_v41 = vld [vmem:[%s851_s11 + $0x198] sm:$0xff]  ;;  %v739_v42 = vld [vmem:[%s851_s11 + $0x188] sm:$0xff]  ;;  %v326_v50 = vmax.f32 %v305_v24, %v324_v36 }
  0x2b   : > { %660 = vst [vmem:[%s868_s15 + $0x32] sm:$0x10] %v246_v9  ;;  %661 = vst [vmem:[%s868_s15 + $0x31] sm:$0x40] %v246_v9  ;;  %v352_v45 = vrot.slane %v340_v32, 1  ;;  %v742_v47 = vld [vmem:[%s851_s11 + $0x1a0] sm:$0xff]  ;;  %v345_v51 = vmax.f32 %v339_v25, %v343_v37  ;;  %v411_v60 = vmax.f32 %v738_v40, %v741_v41 }
  0x2c   : > { %662 = vst [vmem:[%s868_s15 + $0x38] sm:$0x1] %v254_v15  ;;  %663 = vst [vmem:[%s868_s15 + $0x37] sm:$0x4] %v254_v15  ;;  %v740_v48 = vld [vmem:[%s851_s11 + $0x190] sm:$0xff]  ;;  %v743_v49 = vld [vmem:[%s851_s11 + $0x1a8] sm:$0xff]  ;;  %v412_v2 = vmax.f32 %v739_v42, %v742_v47 }
  0x2d   : > { %664 = vst [vmem:[%s868_s15 + $0x36] sm:$0x10] %v254_v15  ;;  %665 = vst [vmem:[%s868_s15 + $0x35] sm:$0x40] %v254_v15  ;;  %v360_v52 = vrot.slane %v341_v38, 1  ;;  %v379_v53 = vrot.slane %v375_v39, 1  ;;  %v354_v57 = vmax.f32 %v340_v32, %v352_v45  ;;  %v413_v3 = vmax.f32 %v740_v48, %v743_v49 }
  0x2e   : > { %672 = vst [vmem:[%s868_s15 + $0x40] sm:$0x1] %v273_v22  ;;  %673 = vst [vmem:[%s868_s15 + $0x3f] sm:$0x4] %v273_v22  ;;  %v756_v54 = vld [vmem:[%s851_s11 + $0x1b0] sm:$0xff]  ;;  %v759_v55 = vld [vmem:[%s851_s11 + $0x1c8] sm:$0xff] }
  0x2f   : > { %674 = vst [vmem:[%s868_s15 + $0x3e] sm:$0x10] %v273_v22  ;;  %675 = vst [vmem:[%s868_s15 + $0x3d] sm:$0x40] %v273_v22  ;;  %v757_v56 = vld [vmem:[%s851_s11 + $0x1b8] sm:$0xff]  ;;  %v388_v58 = vrot.slane %v376_v46, 1  ;;  %v362_v0 = vmax.f32 %v341_v38, %v360_v52  ;;  %v381_v1 = vmax.f32 %v375_v39, %v379_v53  ;;  %v447_v9 = vmax.f32 %v756_v54, %v759_v55 }
  0x30   : > { %676 = vst [vmem:[%s868_s15 + $0x44] sm:$0x1] %v282_v23  ;;  %677 = vst [vmem:[%s868_s15 + $0x43] sm:$0x4] %v282_v23  ;;  %v760_v61 = vld [vmem:[%s851_s11 + $0x1d0] sm:$0xff]  ;;  %v758_v62 = vld [vmem:[%s851_s11 + $0x1c0] sm:$0xff] }
  0x31   : > { %678 = vst [vmem:[%s868_s15 + $0x42] sm:$0x10] %v282_v23  ;;  %679 = vst [vmem:[%s868_s15 + $0x41] sm:$0x40] %v282_v23  ;;  %v761_v63 = vld [vmem:[%s851_s11 + $0x1d8] sm:$0xff]  ;;  %v774_v4 = vld [vmem:[%s851_s11 + $0x1e0] sm:$0xff]  ;;  %v390_v6 = vmax.f32 %v376_v46, %v388_v58  ;;  %v448_v14 = vmax.f32 %v757_v56, %v760_v61 }
  0x32   : > { %680 = vst [vmem:[%s868_s15 + $0x48] sm:$0x1] %v290_v29  ;;  %681 = vst [vmem:[%s868_s15 + $0x47] sm:$0x4] %v290_v29  ;;  %v777_v5 = vld [vmem:[%s851_s11 + $0x1f8] sm:$0xff]  ;;  %v396_v7 = vrot.slane %v377_v59, 1  ;;  %v449_v15 = vmax.f32 %v758_v62, %v761_v63 }
  0x33   : > { %682 = vst [vmem:[%s868_s15 + $0x46] sm:$0x10] %v290_v29  ;;  %683 = vst [vmem:[%s868_s15 + $0x45] sm:$0x40] %v290_v29  ;;  %v415_v8 = vrot.slane %v411_v60, 1  ;;  %v775_v10 = vld [vmem:[%s851_s11 + $0x1e8] sm:$0xff]  ;;  %v483_v22 = vmax.f32 %v774_v4, %v777_v5 }
  0x34   : > { %690 = vst [vmem:[%s868_s15 + $0x50] sm:$0x1] %v309_v43  ;;  %691 = vst [vmem:[%s868_s15 + $0x4f] sm:$0x4] %v309_v43  ;;  %v778_v11 = vld [vmem:[%s851_s11 + $0x200] sm:$0xff]  ;;  %v424_v12 = vrot.slane %v412_v2, 1  ;;  %v398_v19 = vmax.f32 %v377_v59, %v396_v7 }
  0x35   : > { %692 = vst [vmem:[%s868_s15 + $0x4e] sm:$0x10] %v309_v43  ;;  %693 = vst [vmem:[%s868_s15 + $0x4d] sm:$0x40] %v309_v43  ;;  %v432_v13 = vrot.slane %v413_v3, 1  ;;  %v776_v16 = vld [vmem:[%s851_s11 + $0x1f0] sm:$0xff]  ;;  %v417_v20 = vmax.f32 %v411_v60, %v415_v8  ;;  %v484_v34 = vmax.f32 %v775_v10, %v778_v11 }
  0x36   : > { %694 = vst [vmem:[%s868_s15 + $0x54] sm:$0x1] %v318_v44  ;;  %695 = vst [vmem:[%s868_s15 + $0x53] sm:$0x4] %v318_v44  ;;  %v779_v17 = vld [vmem:[%s851_s11 + $0x208] sm:$0xff]  ;;  %v792_v18 = vld [vmem:[%s851_s11 + $0x210] sm:$0xff]  ;;  %v426_v26 = vmax.f32 %v412_v2, %v424_v12 }
  0x37   : > { %696 = vst [vmem:[%s868_s15 + $0x52] sm:$0x10] %v318_v44  ;;  %697 = vst [vmem:[%s868_s15 + $0x51] sm:$0x40] %v318_v44  ;;  %v451_v21 = vrot.slane %v447_v9, 1  ;;  %v795_v23 = vld [vmem:[%s851_s11 + $0x228] sm:$0xff]  ;;  %v434_v27 = vmax.f32 %v413_v3, %v432_v13  ;;  %v485_v35 = vmax.f32 %v776_v16, %v779_v17 }
  0x38   : > { %698 = vst [vmem:[%s868_s15 + $0x58] sm:$0x1] %v326_v50  ;;  %699 = vst [vmem:[%s868_s15 + $0x57] sm:$0x4] %v326_v50  ;;  %v793_v24 = vld [vmem:[%s851_s11 + $0x218] sm:$0xff]  ;;  %v796_v25 = vld [vmem:[%s851_s11 + $0x230] sm:$0xff]  ;;  %v519_v38 = vmax.f32 %v792_v18, %v795_v23 }
  0x39   : > { %700 = vst [vmem:[%s868_s15 + $0x56] sm:$0x10] %v326_v50  ;;  %701 = vst [vmem:[%s868_s15 + $0x55] sm:$0x40] %v326_v50  ;;  %v460_v28 = vrot.slane %v448_v14, 1  ;;  %v468_v29 = vrot.slane %v449_v15, 1  ;;  %v453_v32 = vmax.f32 %v447_v9, %v451_v21  ;;  %v520_v39 = vmax.f32 %v793_v24, %v796_v25 }
  0x3a   : > { %708 = vst [vmem:[%s868_s15 + $0x60] sm:$0x1] %v345_v51  ;;  %709 = vst [vmem:[%s868_s15 + $0x5f] sm:$0x4] %v345_v51  ;;  %v794_v30 = vld [vmem:[%s851_s11 + $0x220] sm:$0xff]  ;;  %v797_v31 = vld [vmem:[%s851_s11 + $0x238] sm:$0xff] }
  0x3b   : > { %710 = vst [vmem:[%s868_s15 + $0x5e] sm:$0x10] %v345_v51  ;;  %711 = vst [vmem:[%s868_s15 + $0x5d] sm:$0x40] %v345_v51  ;;  %v487_v33 = vrot.slane %v483_v22, 1  ;;  %v462_v36 = vmax.f32 %v448_v14, %v460_v28  ;;  %v470_v37 = vmax.f32 %v449_v15, %v468_v29  ;;  %v496_v41 = vrot.slane %v484_v34, 1 }
  0x3c   : > { %712 = vst [vmem:[%s868_s15 + $0x64] sm:$0x1] %v354_v57  ;;  %713 = vst [vmem:[%s868_s15 + $0x63] sm:$0x4] %v354_v57  ;;  %v504_v42 = vrot.slane %v485_v35, 1  ;;  %v521_v43 = vmax.f32 %v794_v30, %v797_v31  ;;  %v523_v44 = vrot.slane %v519_v38, 1 }
  0x3d   : > { %714 = vst [vmem:[%s868_s15 + $0x62] sm:$0x10] %v354_v57  ;;  %715 = vst [vmem:[%s868_s15 + $0x61] sm:$0x40] %v354_v57  ;;  %v489_v40 = vmax.f32 %v483_v22, %v487_v33  ;;  %v532_v45 = vrot.slane %v520_v39, 1  ;;  %v498_v46 = vmax.f32 %v484_v34, %v496_v41 }
  0x3e   : > { %716 = vst [vmem:[%s868_s15 + $0x68] sm:$0x1] %v362_v0  ;;  %717 = vst [vmem:[%s868_s15 + $0x67] sm:$0x4] %v362_v0  ;;  %v506_v47 = vmax.f32 %v485_v35, %v504_v42  ;;  %v540_v48 = vrot.slane %v521_v43, 1  ;;  %v525_v49 = vmax.f32 %v519_v38, %v523_v44 }
  0x3f   : > { %718 = vst [vmem:[%s868_s15 + $0x66] sm:$0x10] %v362_v0  ;;  %719 = vst [vmem:[%s868_s15 + $0x65] sm:$0x40] %v362_v0  ;;  %v534_v50 = vmax.f32 %v520_v39, %v532_v45 }
  0x40   : > { %726 = vst [vmem:[%s868_s15 + $0x70] sm:$0x1] %v381_v1  ;;  %727 = vst [vmem:[%s868_s15 + $0x6f] sm:$0x4] %v381_v1  ;;  %v542_v51 = vmax.f32 %v521_v43, %v540_v48 }
  0x41   : > { %728 = vst [vmem:[%s868_s15 + $0x6e] sm:$0x10] %v381_v1  ;;  %729 = vst [vmem:[%s868_s15 + $0x6d] sm:$0x40] %v381_v1 }
  0x42   : > { %730 = vst [vmem:[%s868_s15 + $0x74] sm:$0x1] %v390_v6  ;;  %731 = vst [vmem:[%s868_s15 + $0x73] sm:$0x4] %v390_v6 }
  0x43   : > { %732 = vst [vmem:[%s868_s15 + $0x72] sm:$0x10] %v390_v6  ;;  %733 = vst [vmem:[%s868_s15 + $0x71] sm:$0x40] %v390_v6 }
  0x44   : > { %734 = vst [vmem:[%s868_s15 + $0x78] sm:$0x1] %v398_v19  ;;  %735 = vst [vmem:[%s868_s15 + $0x77] sm:$0x4] %v398_v19 }
  0x45   : > { %736 = vst [vmem:[%s868_s15 + $0x76] sm:$0x10] %v398_v19  ;;  %737 = vst [vmem:[%s868_s15 + $0x75] sm:$0x40] %v398_v19 }
  0x46   : > { %744 = vst [vmem:[%s868_s15 + $0x80] sm:$0x1] %v417_v20  ;;  %745 = vst [vmem:[%s868_s15 + $0x7f] sm:$0x4] %v417_v20 }
  0x47   : > { %746 = vst [vmem:[%s868_s15 + $0x7e] sm:$0x10] %v417_v20  ;;  %747 = vst [vmem:[%s868_s15 + $0x7d] sm:$0x40] %v417_v20 }
  0x48   : > { %748 = vst [vmem:[%s868_s15 + $0x84] sm:$0x1] %v426_v26  ;;  %749 = vst [vmem:[%s868_s15 + $0x83] sm:$0x4] %v426_v26 }
  0x49   : > { %750 = vst [vmem:[%s868_s15 + $0x82] sm:$0x10] %v426_v26  ;;  %751 = vst [vmem:[%s868_s15 + $0x81] sm:$0x40] %v426_v26 }
  0x4a   : > { %752 = vst [vmem:[%s868_s15 + $0x88] sm:$0x1] %v434_v27  ;;  %753 = vst [vmem:[%s868_s15 + $0x87] sm:$0x4] %v434_v27 }
  0x4b   : > { %754 = vst [vmem:[%s868_s15 + $0x86] sm:$0x10] %v434_v27  ;;  %755 = vst [vmem:[%s868_s15 + $0x85] sm:$0x40] %v434_v27 }
  0x4c   : > { %762 = vst [vmem:[%s868_s15 + $0x90] sm:$0x1] %v453_v32  ;;  %763 = vst [vmem:[%s868_s15 + $0x8f] sm:$0x4] %v453_v32 }
  0x4d   : > { %764 = vst [vmem:[%s868_s15 + $0x8e] sm:$0x10] %v453_v32  ;;  %765 = vst [vmem:[%s868_s15 + $0x8d] sm:$0x40] %v453_v32 }
  0x4e   : > { %766 = vst [vmem:[%s868_s15 + $0x94] sm:$0x1] %v462_v36  ;;  %767 = vst [vmem:[%s868_s15 + $0x93] sm:$0x4] %v462_v36 }
  0x4f   : > { %768 = vst [vmem:[%s868_s15 + $0x92] sm:$0x10] %v462_v36  ;;  %769 = vst [vmem:[%s868_s15 + $0x91] sm:$0x40] %v462_v36 }
  0x50   : > { %770 = vst [vmem:[%s868_s15 + $0x98] sm:$0x1] %v470_v37  ;;  %771 = vst [vmem:[%s868_s15 + $0x97] sm:$0x4] %v470_v37 }
  0x51   : > { %772 = vst [vmem:[%s868_s15 + $0x96] sm:$0x10] %v470_v37  ;;  %773 = vst [vmem:[%s868_s15 + $0x95] sm:$0x40] %v470_v37 }
  0x52   : > { %780 = vst [vmem:[%s868_s15 + $0xa0] sm:$0x1] %v489_v40  ;;  %781 = vst [vmem:[%s868_s15 + $0x9f] sm:$0x4] %v489_v40 }
  0x53   : > { %782 = vst [vmem:[%s868_s15 + $0x9e] sm:$0x10] %v489_v40  ;;  %783 = vst [vmem:[%s868_s15 + $0x9d] sm:$0x40] %v489_v40 }
  0x54   : > { %784 = vst [vmem:[%s868_s15 + $0xa4] sm:$0x1] %v498_v46  ;;  %785 = vst [vmem:[%s868_s15 + $0xa3] sm:$0x4] %v498_v46 }
  0x55   : > { %786 = vst [vmem:[%s868_s15 + $0xa2] sm:$0x10] %v498_v46  ;;  %787 = vst [vmem:[%s868_s15 + $0xa1] sm:$0x40] %v498_v46 }
  0x56   : > { %788 = vst [vmem:[%s868_s15 + $0xa8] sm:$0x1] %v506_v47  ;;  %789 = vst [vmem:[%s868_s15 + $0xa7] sm:$0x4] %v506_v47 }
  0x57   : > { %790 = vst [vmem:[%s868_s15 + $0xa6] sm:$0x10] %v506_v47  ;;  %791 = vst [vmem:[%s868_s15 + $0xa5] sm:$0x40] %v506_v47 }
  0x58   : > { %798 = vst [vmem:[%s868_s15 + $0xb0] sm:$0x1] %v525_v49  ;;  %799 = vst [vmem:[%s868_s15 + $0xaf] sm:$0x4] %v525_v49 }
  0x59   : > { %800 = vst [vmem:[%s868_s15 + $0xae] sm:$0x10] %v525_v49  ;;  %801 = vst [vmem:[%s868_s15 + $0xad] sm:$0x40] %v525_v49 }
  0x5a   : > { %802 = vst [vmem:[%s868_s15 + $0xb4] sm:$0x1] %v534_v50  ;;  %803 = vst [vmem:[%s868_s15 + $0xb3] sm:$0x4] %v534_v50 }
  0x5b   : > { %804 = vst [vmem:[%s868_s15 + $0xb2] sm:$0x10] %v534_v50  ;;  %805 = vst [vmem:[%s868_s15 + $0xb1] sm:$0x40] %v534_v50 }
  0x5c   : > { %806 = vst [vmem:[%s868_s15 + $0xb8] sm:$0x1] %v542_v51  ;;  %807 = vst [vmem:[%s868_s15 + $0xb7] sm:$0x4] %v542_v51 }
  0x5d   : > { %808 = vst [vmem:[%s868_s15 + $0xb6] sm:$0x10] %v542_v51  ;;  %809 = vst [vmem:[%s868_s15 + $0xb5] sm:$0x40] %v542_v51 }
  0x5e PF: > { %s11_s6 = sadd.s32 1, %s828_s6  }
  0x5f   : > { %p8_p4 = scmp.ge.s32.totalorder %s11_s6, 4  }
  0x61   :  { %10 = sbr.rel (!%p8_p4) target bundleno = 1 (0x1), region = 88 }

// kernel: _lambda_.8
= control target key start
LH: loop header
LB: loop body
LE: loop exit
PB: predicated region body
PF: predicated region fallthrough
CT: control target
= control target key end

     0   :  { %vm483_vm0 = vcmask 1041408   ;;  %vm458_vm1 = vcmask 949248   ;;  %s1288_s1 = inlined_call_operand.vmem [shape: bf16[500,128], index: 1, kind: input, shape index: {}]   ;;  %s1289_s0 = inlined_call_operand.vmem [shape: bf16[128,500], index: 0, kind: input, shape index: {}]   ;;  %s1290_s2 = inlined_call_operand.vmem [shape: f32[1,128], index: 2, kind: input, shape index: {}]   ;;  %s1291_s3 = inlined_call_operand.vmem [shape: f32[128,128], index: 3, kind: output, shape index: {}]  }
   0x1   :  { %v919_v0 = vld [vmem:[%s1288_s1 + $0x78] sm:$0xff]   ;;  %v923_v4 = vld [vmem:[%s1288_s1 + $0x70] sm:$0xff]   ;;  %v927_v8 = vld [vmem:[%s1288_s1 + $0x68] sm:$0xff]  }
   0x2   :  { %v920_v1 = vld [vmem:[%s1288_s1 + $0xf8] ss:$0 sps:$4 sm:$0x33]   ;;  %790 = vmatprep.subr.bf16.mxu0 %v919_v0  ;;  %v924_v5 = vld [vmem:[%s1288_s1 + $0xf0] sm:$0xff]   ;;  %v928_v9 = vld [vmem:[%s1288_s1 + $0xe8] sm:$0xff]  }
   0x3   :  { %v921_v2 = vld [vmem:[%s1288_s1 + $0x38] sm:$0xff]   ;;  %918 = vmatprep.subr.msk.bf16.mxu1 %vm483_vm0, %v920_v1  ;;  %v925_v6 = vld [vmem:[%s1288_s1 + $0x30] sm:$0xff]   ;;  %v929_v10 = vld [vmem:[%s1288_s1 + $0x28] sm:$0xff]  }
   0x4   :  { %791 = vmatpush3.bf16.msra.mxu0 %v921_v2  ;;  %v922_v3 = vld [vmem:[%s1288_s1 + $0xb8] sm:$0xff]   ;;  %v926_v7 = vld [vmem:[%s1288_s1 + $0xb0] sm:$0xff]   ;;  %v930_v11 = vld [vmem:[%s1288_s1 + $0xa8] sm:$0xff]  }
   0x5   :  { %855 = vmatpush3.bf16.msra.mxu1 %v922_v3  ;;  %792 = vmatprep.subr.bf16.mxu0 %v923_v4  ;;  %v931_v12 = vld [vmem:[%s1288_s1 + $0x60] sm:$0xff]   ;;  %v935_v16 = vld [vmem:[%s1288_s1 + $0x58] sm:$0xff]   ;;  %v939_v20 = vld [vmem:[%s1288_s1 + $0x50] sm:$0xff]  }
   0x6   :  { %856 = vmatprep.subr.bf16.mxu1 %v924_v5  ;;  %v932_v13 = vld [vmem:[%s1288_s1 + $0xe0] sm:$0xff]   ;;  %v936_v17 = vld [vmem:[%s1288_s1 + $0xd8] sm:$0xff]   ;;  %v940_v21 = vld [vmem:[%s1288_s1 + $0xd0] sm:$0xff]  }
   0x7   :  { %v933_v14 = vld [vmem:[%s1288_s1 + $0x20] sm:$0xff]   ;;  %v937_v18 = vld [vmem:[%s1288_s1 + $0x18] sm:$0xff]   ;;  %v941_v22 = vld [vmem:[%s1288_s1 + $0x10] sm:$0xff]  }
   0x8   :  { %793 = vmatpush3.bf16.msra.mxu0 %v925_v6  ;;  %v934_v15 = vld [vmem:[%s1288_s1 + $0xa0] sm:$0xff]   ;;  %v938_v19 = vld [vmem:[%s1288_s1 + $0x98] sm:$0xff]   ;;  %v942_v23 = vld [vmem:[%s1288_s1 + $0x90] sm:$0xff]  }
   0x9   :  { %857 = vmatpush3.bf16.msra.mxu1 %v926_v7  ;;  %794 = vmatprep.subr.bf16.mxu0 %v927_v8  ;;  %v943_v24 = vld [vmem:[%s1288_s1 + $0x48] sm:$0xff]   ;;  %v947_v28 = vld [vmem:[%s1288_s1 + $0x40] sm:$0xff]  }
   0xa   :  { %858 = vmatprep.subr.bf16.mxu1 %v928_v9  ;;  %v944_v25 = vld [vmem:[%s1288_s1 + $0xc8] sm:$0xff]   ;;  %v948_v29 = vld [vmem:[%s1288_s1 + $0xc0] sm:$0xff]  }
   0xb   :  { %v945_v26 = vld [vmem:[%s1288_s1 + $0x8] sm:$0xff]   ;;  %v949_v30 = vld [vmem:[%s1288_s1] sm:$0xff]  }
   0xc   :  { %795 = vmatpush3.bf16.msra.mxu0 %v929_v10  ;;  %v946_v27 = vld [vmem:[%s1288_s1 + $0x88] sm:$0xff]   ;;  %v950_v31 = vld [vmem:[%s1288_s1 + $0x80] sm:$0xff]  }
   0xd   :  { %859 = vmatpush3.bf16.msra.mxu1 %v930_v11  ;;  %796 = vmatprep.subr.bf16.mxu0 %v931_v12  ;;  %v951_v32 = vld [vmem:[%s1289_s0] ss:$16 sps:$4 sm:$0xff]   ;;  %v953_v33 = vld [vmem:[%s1289_s0 + $0x4] ss:$16 sps:$4 sm:$0xff]   ;;  %v954_v34 = vld [vmem:[%s1289_s0 + $0x8] ss:$16 sps:$4 sm:$0xff]  }
   0xe   :  { %860 = vmatprep.subr.bf16.mxu1 %v932_v13  ;;  %519 = vmatprep.mubr.bf16.mxu0 %v953_v33  ;;  %v956_v35 = vld [vmem:[%s1289_s0 + $0xc] ss:$16 sps:$4 sm:$0xff]   ;;  %v957_v36 = vld [vmem:[%s1289_s0 + $0x24] ss:$16 sps:$4 sm:$0xff]   ;;  %v961_v38 = vld [vmem:[%s1289_s0 + $0x20] ss:$16 sps:$4 sm:$0xff]  }
   0xf   :  { %782 = vmatprep.mubr.msk.bf16.mxu1 %vm458_vm1, %v956_v35  ;;  %v959_v37 = vld [vmem:[%s1289_s0 + $0x2c] ss:$16 sps:$4 sm:$0xff]   ;;  %v963_v39 = vld [vmem:[%s1289_s0 + $0x44] ss:$16 sps:$4 sm:$0xff]   ;;  %v962_v40 = vld [vmem:[%s1289_s0 + $0x28] ss:$16 sps:$4 sm:$0xff]  }
  0x10   :  { %797 = vmatpush3.bf16.msra.mxu0 %v933_v14  ;;  %v965_v41 = vld [vmem:[%s1289_s0 + $0x4c] ss:$16 sps:$4 sm:$0xff]   ;;  %v967_v42 = vld [vmem:[%s1289_s0 + $0x40] ss:$16 sps:$4 sm:$0xff]   ;;  %v969_v43 = vld [vmem:[%s1289_s0 + $0x64] ss:$16 sps:$4 sm:$0xff]  }
  0x11   :  { %861 = vmatpush3.bf16.msra.mxu1 %v934_v15  ;;  %798 = vmatprep.subr.bf16.mxu0 %v935_v16  ;;  %v968_v44 = vld [vmem:[%s1289_s0 + $0x48] ss:$16 sps:$4 sm:$0xff]   ;;  %v971_v45 = vld [vmem:[%s1289_s0 + $0x6c] ss:$16 sps:$4 sm:$0xff]   ;;  %v973_v46 = vld [vmem:[%s1289_s0 + $0x60] ss:$16 sps:$4 sm:$0xff]  }
  0x12   :  { %862 = vmatprep.subr.bf16.mxu1 %v936_v17  ;;  %v975_v47 = vld [vmem:[%s1289_s0 + $0x84] ss:$16 sps:$4 sm:$0xff]   ;;  %v974_v48 = vld [vmem:[%s1289_s0 + $0x68] ss:$16 sps:$4 sm:$0xff]   ;;  %v977_v49 = vld [vmem:[%s1289_s0 + $0x8c] ss:$16 sps:$4 sm:$0xff]  }
  0x13   :  { %v979_v50 = vld [vmem:[%s1289_s0 + $0x80] ss:$16 sps:$4 sm:$0xff]   ;;  %v981_v51 = vld [vmem:[%s1289_s0 + $0xa4] ss:$16 sps:$4 sm:$0xff]   ;;  %v980_v52 = vld [vmem:[%s1289_s0 + $0x88] ss:$16 sps:$4 sm:$0xff]  }
  0x14   :  { %799 = vmatpush3.bf16.msra.mxu0 %v937_v18  ;;  %v983_v53 = vld [vmem:[%s1289_s0 + $0xac] ss:$16 sps:$4 sm:$0xff]   ;;  %v985_v54 = vld [vmem:[%s1289_s0 + $0xa0] ss:$16 sps:$4 sm:$0xff]   ;;  %v987_v55 = vld [vmem:[%s1289_s0 + $0xc4] ss:$16 sps:$4 sm:$0xff]  }
  0x15   :  { %863 = vmatpush3.bf16.msra.mxu1 %v938_v19  ;;  %800 = vmatprep.subr.bf16.mxu0 %v939_v20  ;;  %v986_v56 = vld [vmem:[%s1289_s0 + $0xa8] ss:$16 sps:$4 sm:$0xff]   ;;  %v989_v57 = vld [vmem:[%s1289_s0 + $0xcc] ss:$16 sps:$4 sm:$0xff]   ;;  %v991_v58 = vld [vmem:[%s1289_s0 + $0xc0] ss:$16 sps:$4 sm:$0xff]  }
  0x16   :  { %864 = vmatprep.subr.bf16.mxu1 %v940_v21  ;;  %v993_v59 = vld [vmem:[%s1289_s0 + $0xe4] ss:$16 sps:$4 sm:$0xff]   ;;  %v992_v60 = vld [vmem:[%s1289_s0 + $0xc8] ss:$16 sps:$4 sm:$0xff]   ;;  %v995_v61 = vld [vmem:[%s1289_s0 + $0xec] ss:$16 sps:$4 sm:$0xff]  }
  0x17   :  { %v997_v62 = vld [vmem:[%s1289_s0 + $0xe0] ss:$16 sps:$4 sm:$0xff]   ;;  %v998_v63 = vld [vmem:[%s1289_s0 + $0xe8] ss:$16 sps:$4 sm:$0xff]  }
  0x18   :  { %801 = vmatpush3.bf16.msra.mxu0 %v941_v22  ;;  %v1222_v2 = vld [vmem:[%s1290_s2] ss:$0 sm:$0xff] }
  0x19   :  { %865 = vmatpush3.bf16.msra.mxu1 %v942_v23  ;;  %802 = vmatprep.subr.bf16.mxu0 %v943_v24 }
  0x1a   :  { %866 = vmatprep.subr.bf16.mxu1 %v944_v25 }
  0x1c   :  { %803 = vmatpush3.bf16.msra.mxu0 %v945_v26 }
  0x1d   :  { %867 = vmatpush3.bf16.msra.mxu1 %v946_v27  ;;  %804 = vmatprep.subr.bf16.mxu0 %v947_v28 }
  0x1e   :  { %868 = vmatprep.subr.bf16.mxu1 %v948_v29 }
  0x20   :  { %805 = vmatpush3.bf16.msra.mxu0 %v949_v30 }
  0x21   :  { %869 = vmatpush3.bf16.msra.mxu1 %v950_v31 }
  0x23   :  { %520 = vmatmul.mubr.bf16.vlgmr.msra.gmra.mxu0 %v951_v32 }
  0x24   :  { %617 = vmatmul.mubr.bf16.vlgmr.msra.gmra.mxu1 %v954_v34  ;;  %527 = vmatprep.mubr.bf16.mxu0 %v957_v36 }
  0x25   :  { %783 = vmatprep.mubr.msk.bf16.mxu1 %vm458_vm1, %v959_v37 }
  0x2b   :  { %528 = vmatmul.mubr.bf16.gmra.mxu0 %v961_v38 }
  0x2c   :  { %535 = vmatprep.mubr.bf16.mxu0 %v963_v39  ;;  %625 = vmatmul.mubr.bf16.gmra.mxu1 %v962_v40 }
  0x2d   :  { %784 = vmatprep.mubr.msk.bf16.mxu1 %vm458_vm1, %v965_v41 }
  0x33   :  { %536 = vmatmul.mubr.bf16.gmra.mxu0 %v967_v42 }
  0x34   :  { %543 = vmatprep.mubr.bf16.mxu0 %v969_v43  ;;  %633 = vmatmul.mubr.bf16.gmra.mxu1 %v968_v44 }
  0x35   :  { %785 = vmatprep.mubr.msk.bf16.mxu1 %vm458_vm1, %v971_v45 }
  0x3b   :  { %544 = vmatmul.mubr.bf16.gmra.mxu0 %v973_v46 }
  0x3c   :  { %551 = vmatprep.mubr.bf16.mxu0 %v975_v47  ;;  %641 = vmatmul.mubr.bf16.gmra.mxu1 %v974_v48 }
  0x3d   :  { %786 = vmatprep.mubr.msk.bf16.mxu1 %vm458_vm1, %v977_v49 }
  0x43   :  { %552 = vmatmul.mubr.bf16.gmra.mxu0 %v979_v50 }
  0x44   :  { %559 = vmatprep.mubr.bf16.mxu0 %v981_v51  ;;  %649 = vmatmul.mubr.bf16.gmra.mxu1 %v980_v52 }
  0x45   :  { %787 = vmatprep.mubr.msk.bf16.mxu1 %vm458_vm1, %v983_v53 }
  0x4b   :  { %560 = vmatmul.mubr.bf16.gmra.mxu0 %v985_v54 }
  0x4c   :  { %567 = vmatprep.mubr.bf16.mxu0 %v987_v55  ;;  %657 = vmatmul.mubr.bf16.gmra.mxu1 %v986_v56 }
  0x4d   :  { %788 = vmatprep.mubr.msk.bf16.mxu1 %vm458_vm1, %v989_v57 }
  0x53   :  { %568 = vmatmul.mubr.bf16.gmra.mxu0 %v991_v58 }
  0x54   :  { %575 = vmatprep.mubr.bf16.mxu0 %v993_v59  ;;  %665 = vmatmul.mubr.bf16.gmra.mxu1 %v992_v60 }
  0x55   :  { %789 = vmatprep.mubr.msk.bf16.mxu1 %vm458_vm1, %v995_v61 }
  0x5b   :  { %576 = vmatmul.mubr.bf16.gmra.mxu0 %v997_v62 }
  0x5c   :  { %673 = vmatmul.mubr.bf16.gmra.mxu1 %v998_v63 }
  0xe3   :  { %v806_v0 = vpop.f32.mrf.mxu0 }
  0xe4   :  { %v870_v1 = vpop.f32.mrf.mxu1 }
  0xe5   :  { %v807_v3 = vpop.f32.mrf.mxu0 }
  0xe6   :  { %v808_v4 = vadd.f32 %v807_v3, %v806_v0  ;;  %v871_v5 = vpop.f32.mrf.mxu1 }
  0xe7   :  { %v809_v6 = vpop.f32.mrf.mxu0  ;;  %v872_v8 = vadd.f32 %v871_v5, %v870_v1 }
  0xe8   :  { %v522_v7 = vadd.f32 %v808_v4, %v1222_v2  ;;  %v873_v9 = vpop.f32.mrf.mxu1 }
  0xe9   :  { %v810_v10 = vpop.f32.mrf.mxu0 }
  0xea   :  { %v619_v11 = vadd.f32 %v872_v8, %v522_v7  ;;  %v811_v12 = vadd.f32 %v810_v10, %v809_v6  ;;  %v874_v13 = vpop.f32.mrf.mxu1 }
  0xeb   :  { %v812_v14 = vpop.f32.mrf.mxu0  ;;  %v875_v17 = vadd.f32 %v874_v13, %v873_v9 }
  0xec   :  { %v681_v15 = vmax.f32 %v619_v11, 0.0  ;;  %v525_v16 = vadd.f32 %v811_v12, %v1222_v2  ;;  %v876_v18 = vpop.f32.mrf.mxu1 }
  0xed   :  { %v813_v19 = vpop.f32.mrf.mxu0 }
  0xee   :  { %697 = vst [vmem:[%s1291_s3] sm:$0xff] %v681_v15  ;;  %v622_v20 = vadd.f32 %v875_v17, %v525_v16  ;;  %v814_v21 = vadd.f32 %v813_v19, %v812_v14  ;;  %v877_v22 = vpop.f32.mrf.mxu1 }
  0xef   :  { %v815_v23 = vpop.f32.mrf.mxu0  ;;  %v878_v26 = vadd.f32 %v877_v22, %v876_v18 }
  0xf0   :  { %v682_v24 = vmax.f32 %v622_v20, 0.0  ;;  %v530_v25 = vadd.f32 %v814_v21, %v1222_v2  ;;  %v879_v27 = vpop.f32.mrf.mxu1 }
  0xf1   :  { %v816_v28 = vpop.f32.mrf.mxu0 }
  0xf2   :  { %698 = vst [vmem:[%s1291_s3 + $0x8] sm:$0xff] %v682_v24  ;;  %v627_v29 = vadd.f32 %v878_v26, %v530_v25  ;;  %v817_v30 = vadd.f32 %v816_v28, %v815_v23  ;;  %v880_v31 = vpop.f32.mrf.mxu1 }
  0xf3   :  { %v818_v32 = vpop.f32.mrf.mxu0  ;;  %v881_v35 = vadd.f32 %v880_v31, %v879_v27 }
  0xf4   :  { %v683_v33 = vmax.f32 %v627_v29, 0.0  ;;  %v533_v34 = vadd.f32 %v817_v30, %v1222_v2  ;;  %v882_v36 = vpop.f32.mrf.mxu1 }
  0xf5   :  { %v819_v37 = vpop.f32.mrf.mxu0 }
  0xf6   :  { %699 = vst [vmem:[%s1291_s3 + $0x10] sm:$0xff] %v683_v33  ;;  %v630_v38 = vadd.f32 %v881_v35, %v533_v34  ;;  %v820_v39 = vadd.f32 %v819_v37, %v818_v32  ;;  %v883_v40 = vpop.f32.mrf.mxu1 }
  0xf7   :  { %v821_v41 = vpop.f32.mrf.mxu0  ;;  %v884_v44 = vadd.f32 %v883_v40, %v882_v36 }
  0xf8   :  { %v684_v42 = vmax.f32 %v630_v38, 0.0  ;;  %v538_v43 = vadd.f32 %v820_v39, %v1222_v2  ;;  %v885_v45 = vpop.f32.mrf.mxu1 }
  0xf9   :  { %v822_v46 = vpop.f32.mrf.mxu0 }
  0xfa   :  { %700 = vst [vmem:[%s1291_s3 + $0x18] sm:$0xff] %v684_v42  ;;  %v635_v47 = vadd.f32 %v884_v44, %v538_v43  ;;  %v823_v48 = vadd.f32 %v822_v46, %v821_v41  ;;  %v886_v49 = vpop.f32.mrf.mxu1 }
  0xfb   :  { %v824_v50 = vpop.f32.mrf.mxu0  ;;  %v887_v53 = vadd.f32 %v886_v49, %v885_v45 }
  0xfc   :  { %v685_v51 = vmax.f32 %v635_v47, 0.0  ;;  %v541_v52 = vadd.f32 %v823_v48, %v1222_v2  ;;  %v888_v54 = vpop.f32.mrf.mxu1 }
  0xfd   :  { %v825_v55 = vpop.f32.mrf.mxu0 }
  0xfe   :  { %701 = vst [vmem:[%s1291_s3 + $0x20] sm:$0xff] %v685_v51  ;;  %v638_v56 = vadd.f32 %v887_v53, %v541_v52  ;;  %v826_v57 = vadd.f32 %v825_v55, %v824_v50  ;;  %v889_v58 = vpop.f32.mrf.mxu1 }
  0xff   :  { %v827_v59 = vpop.f32.mrf.mxu0  ;;  %v890_v62 = vadd.f32 %v889_v58, %v888_v54 }
 0x100   :  { %v686_v60 = vmax.f32 %v638_v56, 0.0  ;;  %v546_v61 = vadd.f32 %v826_v57, %v1222_v2  ;;  %v891_v63 = vpop.f32.mrf.mxu1 }
 0x101   :  { %v828_v0 = vpop.f32.mrf.mxu0 }
 0x102   :  { %702 = vst [vmem:[%s1291_s3 + $0x28] sm:$0xff] %v686_v60  ;;  %v643_v1 = vadd.f32 %v890_v62, %v546_v61  ;;  %v829_v3 = vadd.f32 %v828_v0, %v827_v59  ;;  %v892_v4 = vpop.f32.mrf.mxu1 }
 0x103   :  { %v830_v5 = vpop.f32.mrf.mxu0  ;;  %v893_v8 = vadd.f32 %v892_v4, %v891_v63 }
 0x104   :  { %v687_v6 = vmax.f32 %v643_v1, 0.0  ;;  %v549_v7 = vadd.f32 %v829_v3, %v1222_v2  ;;  %v894_v9 = vpop.f32.mrf.mxu1 }
 0x105   :  { %v831_v10 = vpop.f32.mrf.mxu0 }
 0x106   :  { %703 = vst [vmem:[%s1291_s3 + $0x30] sm:$0xff] %v687_v6  ;;  %v646_v11 = vadd.f32 %v893_v8, %v549_v7  ;;  %v832_v12 = vadd.f32 %v831_v10, %v830_v5  ;;  %v895_v13 = vpop.f32.mrf.mxu1 }
 0x107   :  { %v833_v14 = vpop.f32.mrf.mxu0  ;;  %v896_v17 = vadd.f32 %v895_v13, %v894_v9 }
 0x108   :  { %v688_v15 = vmax.f32 %v646_v11, 0.0  ;;  %v554_v16 = vadd.f32 %v832_v12, %v1222_v2  ;;  %v897_v18 = vpop.f32.mrf.mxu1 }
 0x109   :  { %v834_v19 = vpop.f32.mrf.mxu0 }
 0x10a   :  { %704 = vst [vmem:[%s1291_s3 + $0x38] sm:$0xff] %v688_v15  ;;  %v651_v20 = vadd.f32 %v896_v17, %v554_v16  ;;  %v835_v21 = vadd.f32 %v834_v19, %v833_v14  ;;  %v898_v22 = vpop.f32.mrf.mxu1 }
 0x10b   :  { %v836_v23 = vpop.f32.mrf.mxu0  ;;  %v899_v26 = vadd.f32 %v898_v22, %v897_v18 }
 0x10c   :  { %v689_v24 = vmax.f32 %v651_v20, 0.0  ;;  %v557_v25 = vadd.f32 %v835_v21, %v1222_v2  ;;  %v900_v27 = vpop.f32.mrf.mxu1 }
 0x10d   :  { %v837_v28 = vpop.f32.mrf.mxu0 }
 0x10e   :  { %705 = vst [vmem:[%s1291_s3 + $0x40] sm:$0xff] %v689_v24  ;;  %v654_v29 = vadd.f32 %v899_v26, %v557_v25  ;;  %v838_v30 = vadd.f32 %v837_v28, %v836_v23  ;;  %v901_v31 = vpop.f32.mrf.mxu1 }
 0x10f   :  { %v839_v32 = vpop.f32.mrf.mxu0  ;;  %v902_v35 = vadd.f32 %v901_v31, %v900_v27 }
 0x110   :  { %v690_v33 = vmax.f32 %v654_v29, 0.0  ;;  %v562_v34 = vadd.f32 %v838_v30, %v1222_v2  ;;  %v903_v36 = vpop.f32.mrf.mxu1 }
 0x111   :  { %v840_v37 = vpop.f32.mrf.mxu0 }
 0x112   :  { %706 = vst [vmem:[%s1291_s3 + $0x48] sm:$0xff] %v690_v33  ;;  %v659_v38 = vadd.f32 %v902_v35, %v562_v34  ;;  %v841_v39 = vadd.f32 %v840_v37, %v839_v32  ;;  %v904_v40 = vpop.f32.mrf.mxu1 }
 0x113   :  { %v842_v41 = vpop.f32.mrf.mxu0  ;;  %v905_v44 = vadd.f32 %v904_v40, %v903_v36 }
 0x114   :  { %v691_v42 = vmax.f32 %v659_v38, 0.0  ;;  %v565_v43 = vadd.f32 %v841_v39, %v1222_v2  ;;  %v906_v45 = vpop.f32.mrf.mxu1 }
 0x115   :  { %v843_v46 = vpop.f32.mrf.mxu0 }
 0x116   :  { %707 = vst [vmem:[%s1291_s3 + $0x50] sm:$0xff] %v691_v42  ;;  %v662_v47 = vadd.f32 %v905_v44, %v565_v43  ;;  %v844_v48 = vadd.f32 %v843_v46, %v842_v41  ;;  %v907_v49 = vpop.f32.mrf.mxu1 }
 0x117   :  { %v845_v50 = vpop.f32.mrf.mxu0  ;;  %v908_v53 = vadd.f32 %v907_v49, %v906_v45 }
 0x118   :  { %v692_v51 = vmax.f32 %v662_v47, 0.0  ;;  %v570_v52 = vadd.f32 %v844_v48, %v1222_v2  ;;  %v909_v54 = vpop.f32.mrf.mxu1 }
 0x119   :  { %v846_v55 = vpop.f32.mrf.mxu0 }
 0x11a   :  { %708 = vst [vmem:[%s1291_s3 + $0x58] sm:$0xff] %v692_v51  ;;  %v667_v56 = vadd.f32 %v908_v53, %v570_v52  ;;  %v847_v57 = vadd.f32 %v846_v55, %v845_v50  ;;  %v910_v58 = vpop.f32.mrf.mxu1 }
 0x11b   :  { %v848_v59 = vpop.f32.mrf.mxu0  ;;  %v911_v62 = vadd.f32 %v910_v58, %v909_v54 }
 0x11c   :  { %v693_v60 = vmax.f32 %v667_v56, 0.0  ;;  %v573_v61 = vadd.f32 %v847_v57, %v1222_v2  ;;  %v912_v63 = vpop.f32.mrf.mxu1 }
 0x11d   :  { %v849_v0 = vpop.f32.mrf.mxu0 }
 0x11e   :  { %709 = vst [vmem:[%s1291_s3 + $0x60] sm:$0xff] %v693_v60  ;;  %v670_v1 = vadd.f32 %v911_v62, %v573_v61  ;;  %v850_v3 = vadd.f32 %v849_v0, %v848_v59  ;;  %v913_v4 = vpop.f32.mrf.mxu1 }
 0x11f   :  { %v851_v5 = vpop.f32.mrf.mxu0  ;;  %v914_v8 = vadd.f32 %v913_v4, %v912_v63 }
 0x120   :  { %v694_v6 = vmax.f32 %v670_v1, 0.0  ;;  %v578_v7 = vadd.f32 %v850_v3, %v1222_v2  ;;  %v915_v9 = vpop.f32.mrf.mxu1 }
 0x121   :  { %v852_v10 = vpop.f32.mrf.mxu0 }
 0x122   :  { %710 = vst [vmem:[%s1291_s3 + $0x68] sm:$0xff] %v694_v6  ;;  %v675_v11 = vadd.f32 %v914_v8, %v578_v7  ;;  %v853_v12 = vadd.f32 %v852_v10, %v851_v5  ;;  %v916_v13 = vpop.f32.mrf.mxu1 }
 0x123   :  { %v917_v16 = vadd.f32 %v916_v13, %v915_v9 }
 0x124   :  { %v695_v14 = vmax.f32 %v675_v11, 0.0  ;;  %v581_v15 = vadd.f32 %v853_v12, %v1222_v2 }
 0x126   :  { %711 = vst [vmem:[%s1291_s3 + $0x70] sm:$0xff] %v695_v14  ;;  %v678_v17 = vadd.f32 %v917_v16, %v581_v15 }
 0x128   :  { %v696_v18 = vmax.f32 %v678_v17, 0.0 }
 0x12a   :  { %712 = vst [vmem:[%s1291_s3 + $0x78] sm:$0xff] %v696_v18 }

// kernel: _lambda_.9
= control target key start
LH: loop header
LB: loop body
LE: loop exit
PB: predicated region body
PF: predicated region fallthrough
CT: control target
= control target key end

     0   :  { %s284_s6 = smov 0   ;;  %s301_s0 = inlined_call_operand.vmem [shape: f32[2,8,8,128], index: 0, kind: input, shape index: {}]   ;;  %s302_s1 = inlined_call_operand.vmem [shape: f32[2,4,4,128], index: 1, kind: output, shape index: {}]  }
   0x1 LB: > { %s226_s7 = sadd.s32 4294967295, %s272_s6   ;;  %p230_p0 = scmp.ge.s32.totalorder %s272_s6, 1  ;;  %s272_s6 = sphi %s284_s6, %s11_s6  }
   0x2   : > { %p87_p1 = scmp.lt.s32.totalorder %s272_s6, 3 }
   0x4   : > { %p88_p2 = pnand %p230_p0, %p87_p1 }
   0x5   : > { %p107_p3 = scmp.lt.s32.totalorder (!%p88_p2), %s226_s7, 1 }
   0x6   : > { %91 = sbr.rel (%p88_p2) target bundleno = 29 (0x1d), region = 24 }
   0xb   : > { %s304_s7 = smov (!%p107_p3, %s226_s7), 1 }
   0xc   : > { %s256_s8 = sshll.u32 %s304_s7, 6  ;;  %s257_s12 = sshll.u32 %s304_s7, 4 }
   0xd   : > { %s111_s11 = scalar_lea.vmem %s301_s0, %s256_s8  ;;  %s116_s15 = scalar_lea.vmem %s302_s1, %s257_s12 }
   0xe   : > { %v117_v0 = vld [vmem:[%s111_s11] sm:$0xff]  ;;  %v235_v1 = vld [vmem:[%s111_s11 + $0x8] sm:$0xff]  ;;  %v236_v2 = vld [vmem:[%s111_s11 + $0x10] sm:$0xff] }
   0xf   : > { %v120_v3 = vmax.f32 %v117_v0, %v235_v1  ;;  %v237_v4 = vld [vmem:[%s111_s11 + $0x18] sm:$0xff]  ;;  %v242_v5 = vld [vmem:[%s111_s11 + $0x20] sm:$0xff]  ;;  %v243_v6 = vld [vmem:[%s111_s11 + $0x28] sm:$0xff] }
  0x10   : > { %v133_v7 = vmax.f32 %v236_v2, %v237_v4  ;;  %v147_v8 = vmax.f32 %v242_v5, %v243_v6  ;;  %v248_v9 = vld [vmem:[%s111_s11 + $0x30] sm:$0xff]  ;;  %v249_v10 = vld [vmem:[%s111_s11 + $0x38] sm:$0xff] }
  0x11   : > { %v122_v11 = vrot.slane %v120_v3, 1  ;;  %v161_v12 = vmax.f32 %v248_v9, %v249_v10 }
  0x12   : > { %v135_v13 = vrot.slane %v133_v7, 1  ;;  %v149_v14 = vrot.slane %v147_v8, 1 }
  0x13   : > { %v124_v15 = vmax.f32 %v120_v3, %v122_v11  ;;  %v163_v16 = vrot.slane %v161_v12, 1 }
  0x14   : > { %v137_v17 = vmax.f32 %v133_v7, %v135_v13  ;;  %v151_v18 = vmax.f32 %v147_v8, %v149_v14 }
  0x15   : > { %125 = vst [vmem:[%s116_s15] sm:$0x1] %v124_v15  ;;  %126 = vst [vmem:[%s116_s15 - $0x1] sm:$0x4] %v124_v15  ;;  %v165_v19 = vmax.f32 %v161_v12, %v163_v16 }
  0x16   : > { %127 = vst [vmem:[%s116_s15 - $0x2] sm:$0x10] %v124_v15  ;;  %128 = vst [vmem:[%s116_s15 - $0x3] sm:$0x40] %v124_v15 }
  0x17   : > { %238 = vst [vmem:[%s116_s15 + $0x4] sm:$0x1] %v137_v17  ;;  %239 = vst [vmem:[%s116_s15 + $0x3] sm:$0x4] %v137_v17 }
  0x18   : > { %240 = vst [vmem:[%s116_s15 + $0x2] sm:$0x10] %v137_v17  ;;  %241 = vst [vmem:[%s116_s15 + $0x1] sm:$0x40] %v137_v17 }
  0x19   : > { %244 = vst [vmem:[%s116_s15 + $0x8] sm:$0x1] %v151_v18  ;;  %245 = vst [vmem:[%s116_s15 + $0x7] sm:$0x4] %v151_v18 }
  0x1a   : > { %246 = vst [vmem:[%s116_s15 + $0x6] sm:$0x10] %v151_v18  ;;  %247 = vst [vmem:[%s116_s15 + $0x5] sm:$0x40] %v151_v18 }
  0x1b   : > { %250 = vst [vmem:[%s116_s15 + $0xc] sm:$0x1] %v165_v19  ;;  %251 = vst [vmem:[%s116_s15 + $0xb] sm:$0x4] %v165_v19 }
  0x1c   : > { %252 = vst [vmem:[%s116_s15 + $0xa] sm:$0x10] %v165_v19  ;;  %253 = vst [vmem:[%s116_s15 + $0x9] sm:$0x40] %v165_v19 }
  0x1d PF: > { %s11_s6 = sadd.s32 1, %s272_s6  }
  0x1e   : > { %p8_p4 = scmp.ge.s32.totalorder %s11_s6, 4  }
  0x20   :  { %10 = sbr.rel (!%p8_p4) target bundleno = 1 (0x1), region = 64 }

// kernel: _lambda_.11
= control target key start
LH: loop header
LB: loop body
LE: loop exit
PB: predicated region body
PF: predicated region fallthrough
CT: control target
= control target key end

     0   :  { %s646_s1 = inlined_call_operand.vmem [shape: bf16[512,128], index: 1, kind: input, shape index: {}]   ;;  %s647_s0 = inlined_call_operand.vmem [shape: bf16[16,512], index: 0, kind: input, shape index: {}]   ;;  %s648_s2 = inlined_call_operand.vmem [shape: f32[1,128], index: 2, kind: input, shape index: {}]   ;;  %s649_s3 = inlined_call_operand.vmem [shape: f32[16,128], index: 3, kind: output, shape index: {}]  }
   0x1   :  { %v471_v0 = vld [vmem:[%s646_s1 + $0x78] sm:$0xff]   ;;  %v475_v4 = vld [vmem:[%s646_s1 + $0x70] sm:$0xff]   ;;  %v479_v8 = vld [vmem:[%s646_s1 + $0x68] sm:$0xff]  }
   0x2   :  { %v472_v1 = vld [vmem:[%s646_s1 + $0xf8] sm:$0xff]   ;;  %427 = vmatprep.subr.bf16.mxu0 %v471_v0  ;;  %v476_v5 = vld [vmem:[%s646_s1 + $0xf0] sm:$0xff]   ;;  %v480_v9 = vld [vmem:[%s646_s1 + $0xe8] sm:$0xff]  }
   0x3   :  { %v473_v2 = vld [vmem:[%s646_s1 + $0x38] sm:$0xff]   ;;  %449 = vmatprep.subr.bf16.mxu1 %v472_v1  ;;  %v477_v6 = vld [vmem:[%s646_s1 + $0x30] sm:$0xff]   ;;  %v481_v10 = vld [vmem:[%s646_s1 + $0x28] sm:$0xff]  }
   0x4   :  { %v474_v3 = vld [vmem:[%s646_s1 + $0xb8] sm:$0xff]   ;;  %428 = vmatpush3.bf16.msra.mxu0 %v473_v2  ;;  %v478_v7 = vld [vmem:[%s646_s1 + $0xb0] sm:$0xff]   ;;  %v482_v11 = vld [vmem:[%s646_s1 + $0xa8] sm:$0xff]  }
   0x5   :  { %450 = vmatpush3.bf16.msra.mxu1 %v474_v3  ;;  %429 = vmatprep.subr.bf16.mxu0 %v475_v4  ;;  %v483_v12 = vld [vmem:[%s646_s1 + $0x60] sm:$0xff]   ;;  %v487_v16 = vld [vmem:[%s646_s1 + $0x58] sm:$0xff]   ;;  %v491_v20 = vld [vmem:[%s646_s1 + $0x50] sm:$0xff]  }
   0x6   :  { %451 = vmatprep.subr.bf16.mxu1 %v476_v5  ;;  %v484_v13 = vld [vmem:[%s646_s1 + $0xe0] sm:$0xff]   ;;  %v488_v17 = vld [vmem:[%s646_s1 + $0xd8] sm:$0xff]   ;;  %v492_v21 = vld [vmem:[%s646_s1 + $0xd0] sm:$0xff]  }
   0x7   :  { %v485_v14 = vld [vmem:[%s646_s1 + $0x20] sm:$0xff]   ;;  %v489_v18 = vld [vmem:[%s646_s1 + $0x18] sm:$0xff]   ;;  %v493_v22 = vld [vmem:[%s646_s1 + $0x10] sm:$0xff]  }
   0x8   :  { %430 = vmatpush3.bf16.msra.mxu0 %v477_v6  ;;  %v486_v15 = vld [vmem:[%s646_s1 + $0xa0] sm:$0xff]   ;;  %v490_v19 = vld [vmem:[%s646_s1 + $0x98] sm:$0xff]   ;;  %v494_v23 = vld [vmem:[%s646_s1 + $0x90] sm:$0xff]  }
   0x9   :  { %452 = vmatpush3.bf16.msra.mxu1 %v478_v7  ;;  %431 = vmatprep.subr.bf16.mxu0 %v479_v8  ;;  %v495_v24 = vld [vmem:[%s646_s1 + $0x48] sm:$0xff]   ;;  %v499_v28 = vld [vmem:[%s646_s1 + $0x40] sm:$0xff]  }
   0xa   :  { %453 = vmatprep.subr.bf16.mxu1 %v480_v9  ;;  %v496_v25 = vld [vmem:[%s646_s1 + $0xc8] sm:$0xff]   ;;  %v500_v29 = vld [vmem:[%s646_s1 + $0xc0] sm:$0xff]  }
   0xb   :  { %v497_v26 = vld [vmem:[%s646_s1 + $0x8] sm:$0xff]   ;;  %v501_v30 = vld [vmem:[%s646_s1] sm:$0xff]  }
   0xc   :  { %432 = vmatpush3.bf16.msra.mxu0 %v481_v10  ;;  %v498_v27 = vld [vmem:[%s646_s1 + $0x88] sm:$0xff]   ;;  %v502_v31 = vld [vmem:[%s646_s1 + $0x80] sm:$0xff]  }
   0xd   :  { %454 = vmatpush3.bf16.msra.mxu1 %v482_v11  ;;  %433 = vmatprep.subr.bf16.mxu0 %v483_v12  ;;  %v503_v32 = vld [vmem:[%s647_s0] ss:$16 sps:$4 sm:$0xff]   ;;  %v505_v33 = vld [vmem:[%s647_s0 + $0x4] ss:$16 sps:$4 sm:$0xff]   ;;  %v506_v34 = vld [vmem:[%s647_s0 + $0x8] ss:$16 sps:$4 sm:$0xff]  }
   0xe   :  { %455 = vmatprep.subr.bf16.mxu1 %v484_v13  ;;  %v508_v35 = vld [vmem:[%s647_s0 + $0xc] ss:$16 sps:$4 sm:$0xff]   ;;  %334 = vmatprep.mubr.bf16.mxu0 %v505_v33  ;;  %v390_v38 = vld [vmem:[%s648_s2] ss:$0 sm:$0xff] }
   0xf   :  { %375 = vmatprep.mubr.bf16.mxu1 %v508_v35 }
  0x10   :  { %434 = vmatpush3.bf16.msra.mxu0 %v485_v14 }
  0x11   :  { %456 = vmatpush3.bf16.msra.mxu1 %v486_v15  ;;  %435 = vmatprep.subr.bf16.mxu0 %v487_v16 }
  0x12   :  { %457 = vmatprep.subr.bf16.mxu1 %v488_v17 }
  0x14   :  { %436 = vmatpush3.bf16.msra.mxu0 %v489_v18 }
  0x15   :  { %458 = vmatpush3.bf16.msra.mxu1 %v490_v19  ;;  %437 = vmatprep.subr.bf16.mxu0 %v491_v20 }
  0x16   :  { %459 = vmatprep.subr.bf16.mxu1 %v492_v21 }
  0x18   :  { %438 = vmatpush3.bf16.msra.mxu0 %v493_v22 }
  0x19   :  { %460 = vmatpush3.bf16.msra.mxu1 %v494_v23  ;;  %439 = vmatprep.subr.bf16.mxu0 %v495_v24 }
  0x1a   :  { %461 = vmatprep.subr.bf16.mxu1 %v496_v25 }
  0x1c   :  { %440 = vmatpush3.bf16.msra.mxu0 %v497_v26 }
  0x1d   :  { %462 = vmatpush3.bf16.msra.mxu1 %v498_v27  ;;  %441 = vmatprep.subr.bf16.mxu0 %v499_v28 }
  0x1e   :  { %463 = vmatprep.subr.bf16.mxu1 %v500_v29 }
  0x20   :  { %442 = vmatpush3.bf16.msra.mxu0 %v501_v30 }
  0x21   :  { %464 = vmatpush3.bf16.msra.mxu1 %v502_v31 }
  0x23   :  { %335 = vmatmul.mubr.bf16.vlgmr.msra.gmra.mxu0 %v503_v32 }
  0x24   :  { %376 = vmatmul.mubr.bf16.vlgmr.msra.gmra.mxu1 %v506_v34 }
  0xe3   :  { %v443_v36 = vpop.f32.mrf.mxu0 }
  0xe4   :  { %v465_v37 = vpop.f32.mrf.mxu1 }
  0xe5   :  { %v444_v39 = vpop.f32.mrf.mxu0 }
  0xe6   :  { %v445_v40 = vadd.f32 %v444_v39, %v443_v36  ;;  %v466_v41 = vpop.f32.mrf.mxu1 }
  0xe7   :  { %v446_v42 = vpop.f32.mrf.mxu0  ;;  %v467_v44 = vadd.f32 %v466_v41, %v465_v37 }
  0xe8   :  { %v337_v43 = vadd.f32 %v445_v40, %v390_v38  ;;  %v468_v45 = vpop.f32.mrf.mxu1 }
  0xe9   :  { %v447_v46 = vpop.f32.mrf.mxu0 }
  0xea   :  { %v378_v47 = vadd.f32 %v467_v44, %v337_v43  ;;  %v448_v48 = vadd.f32 %v447_v46, %v446_v42  ;;  %v469_v49 = vpop.f32.mrf.mxu1 }
  0xeb   :  { %v470_v51 = vadd.f32 %v469_v49, %v468_v45 }
  0xec   :  { %384 = vst [vmem:[%s649_s3] sm:$0xff] %v378_v47  ;;  %v340_v50 = vadd.f32 %v448_v48, %v390_v38 }
  0xee   :  { %v381_v52 = vadd.f32 %v470_v51, %v340_v50 }
  0xf0   :  { %385 = vst [vmem:[%s649_s3 + $0x8] sm:$0xff] %v381_v52 }

// kernel: _lambda_.10
= control target key start
LH: loop header
LB: loop body
LE: loop exit
PB: predicated region body
PF: predicated region fallthrough
CT: control target
= control target key end

     0   :  { %s6990_s1 = inlined_call_operand.vmem [shape: bf16[2048,512], index: 1, kind: input, shape index: {}]   ;;  %s6991_s0 = inlined_call_operand.vmem [shape: bf16[16,2048], index: 0, kind: input, shape index: {}]   ;;  %s6992_s2 = inlined_call_operand.vmem [shape: f32[1,512], index: 2, kind: input, shape index: {}]   ;;  %s6993_s3 = inlined_call_operand.vmem [shape: f32[16,512], index: 3, kind: output, shape index: {}]  }
   0x1   :  { %v4440_v0 = vld [vmem:[%s6990_s1 + $0xe4] ss:$16 sps:$4 sm:$0xff]   ;;  %v4444_v2 = vld [vmem:[%s6990_s1 + $0xe0] ss:$16 sps:$4 sm:$0xff]   ;;  %v15_v50 = vld [vmem:[%s6991_s0 + $0x8] sm:$0xff] }
   0x2   :  { %v4442_v1 = vld [vmem:[%s6990_s1 + $0x2e4] ss:$16 sps:$4 sm:$0xff]   ;;  %3204 = vmatprep.subr.bf16.mxu0 %v4440_v0  ;;  %v4445_v3 = vld [vmem:[%s6990_s1 + $0x2e0] ss:$16 sps:$4 sm:$0xff]   ;;  %v23_v51 = vld [vmem:[%s6991_s0 + $0x48] sm:$0xff] }
   0x3   :  { %3247 = vmatprep.subr.bf16.mxu1 %v4442_v1  ;;  %v4446_v4 = vld [vmem:[%s6990_s1 + $0xc4] ss:$16 sps:$4 sm:$0xff]   ;;  %3205 = vmatpush1.bf16.msra.mxu0 %v4444_v2  ;;  %v4450_v6 = vld [vmem:[%s6990_s1 + $0xc0] ss:$16 sps:$4 sm:$0xff]   ;;  %v5392_v55 = vcombine.high %v15_v50, %v23_v51 }
   0x4   :  { %3248 = vmatpush1.bf16.msra.mxu1 %v4445_v3  ;;  %v4448_v5 = vld [vmem:[%s6990_s1 + $0x2c4] ss:$16 sps:$4 sm:$0xff]   ;;  %3206 = vmatprep.subr.bf16.mxu0 %v4446_v4  ;;  %v4451_v7 = vld [vmem:[%s6990_s1 + $0x2c0] ss:$16 sps:$4 sm:$0xff]  }
   0x5   :  { %3249 = vmatprep.subr.bf16.mxu1 %v4448_v5  ;;  %v4452_v8 = vld [vmem:[%s6990_s1 + $0xa4] ss:$16 sps:$4 sm:$0xff]   ;;  %v4456_v10 = vld [vmem:[%s6990_s1 + $0xa0] ss:$16 sps:$4 sm:$0xff]   ;;  %3279 = vmatprep.mubr.bf16.mxu1 %v5392_v55 }
   0x6   :  { %v4454_v9 = vld [vmem:[%s6990_s1 + $0x2a4] ss:$16 sps:$4 sm:$0xff]   ;;  %v4457_v11 = vld [vmem:[%s6990_s1 + $0x2a0] ss:$16 sps:$4 sm:$0xff]  }
   0x7   :  { %3207 = vmatpush1.bf16.msra.mxu0 %v4450_v6  ;;  %v4458_v12 = vld [vmem:[%s6990_s1 + $0x84] ss:$16 sps:$4 sm:$0xff]   ;;  %v4462_v14 = vld [vmem:[%s6990_s1 + $0x80] ss:$16 sps:$4 sm:$0xff]  }
   0x8   :  { %3250 = vmatpush1.bf16.msra.mxu1 %v4451_v7  ;;  %3208 = vmatprep.subr.bf16.mxu0 %v4452_v8  ;;  %v4460_v13 = vld [vmem:[%s6990_s1 + $0x284] ss:$16 sps:$4 sm:$0xff]   ;;  %v4463_v15 = vld [vmem:[%s6990_s1 + $0x280] ss:$16 sps:$4 sm:$0xff]  }
   0x9   :  { %3251 = vmatprep.subr.bf16.mxu1 %v4454_v9  ;;  %v4464_v16 = vld [vmem:[%s6990_s1 + $0x64] ss:$16 sps:$4 sm:$0xff]   ;;  %v4468_v18 = vld [vmem:[%s6990_s1 + $0x60] ss:$16 sps:$4 sm:$0xff]   ;;  %v5446_v9 = vcombine.low %v15_v50, %v23_v51 }
   0xa   :  { %v4466_v17 = vld [vmem:[%s6990_s1 + $0x264] ss:$16 sps:$4 sm:$0xff]   ;;  %v4469_v19 = vld [vmem:[%s6990_s1 + $0x260] ss:$16 sps:$4 sm:$0xff]  }
   0xb   :  { %3209 = vmatpush1.bf16.msra.mxu0 %v4456_v10  ;;  %v4470_v20 = vld [vmem:[%s6990_s1 + $0x44] ss:$16 sps:$4 sm:$0xff]   ;;  %v4474_v22 = vld [vmem:[%s6990_s1 + $0x40] ss:$16 sps:$4 sm:$0xff]  }
   0xc   :  { %3252 = vmatpush1.bf16.msra.mxu1 %v4457_v11  ;;  %3210 = vmatprep.subr.bf16.mxu0 %v4458_v12  ;;  %v4472_v21 = vld [vmem:[%s6990_s1 + $0x244] ss:$16 sps:$4 sm:$0xff]   ;;  %v4475_v23 = vld [vmem:[%s6990_s1 + $0x240] ss:$16 sps:$4 sm:$0xff]  }
   0xd   :  { %3253 = vmatprep.subr.bf16.mxu1 %v4460_v13  ;;  %v4476_v24 = vld [vmem:[%s6990_s1 + $0x24] ss:$16 sps:$4 sm:$0xff]   ;;  %v4480_v26 = vld [vmem:[%s6990_s1 + $0x20] ss:$16 sps:$4 sm:$0xff]  }
   0xe   :  { %v4478_v25 = vld [vmem:[%s6990_s1 + $0x224] ss:$16 sps:$4 sm:$0xff]   ;;  %v4481_v27 = vld [vmem:[%s6990_s1 + $0x220] ss:$16 sps:$4 sm:$0xff]  }
   0xf   :  { %3211 = vmatpush1.bf16.msra.mxu0 %v4462_v14  ;;  %v4482_v28 = vld [vmem:[%s6990_s1 + $0x4] ss:$16 sps:$4 sm:$0xff]   ;;  %v4486_v30 = vld [vmem:[%s6990_s1] ss:$16 sps:$4 sm:$0xff]  }
  0x10   :  { %3254 = vmatpush1.bf16.msra.mxu1 %v4463_v15  ;;  %3212 = vmatprep.subr.bf16.mxu0 %v4464_v16  ;;  %v4484_v29 = vld [vmem:[%s6990_s1 + $0x204] ss:$16 sps:$4 sm:$0xff]   ;;  %v4487_v31 = vld [vmem:[%s6990_s1 + $0x200] ss:$16 sps:$4 sm:$0xff]  }
  0x11   :  { %3255 = vmatprep.subr.bf16.mxu1 %v4466_v17  ;;  %v4488_v32 = vld [vmem:[%s6990_s1 + $0x1e4] ss:$16 sps:$4 sm:$0xff]   ;;  %v4492_v34 = vld [vmem:[%s6990_s1 + $0x1e0] ss:$16 sps:$4 sm:$0xff]  }
  0x12   :  { %v4490_v33 = vld [vmem:[%s6990_s1 + $0x3e4] ss:$16 sps:$4 sm:$0xff]   ;;  %v4493_v35 = vld [vmem:[%s6990_s1 + $0x3e0] ss:$16 sps:$4 sm:$0xff]  }
  0x13   :  { %3213 = vmatpush1.bf16.msra.mxu0 %v4468_v18  ;;  %v4494_v36 = vld [vmem:[%s6990_s1 + $0x1c4] ss:$16 sps:$4 sm:$0xff]   ;;  %v4498_v38 = vld [vmem:[%s6990_s1 + $0x1c0] ss:$16 sps:$4 sm:$0xff]  }
  0x14   :  { %3256 = vmatpush1.bf16.msra.mxu1 %v4469_v19  ;;  %3214 = vmatprep.subr.bf16.mxu0 %v4470_v20  ;;  %v4496_v37 = vld [vmem:[%s6990_s1 + $0x3c4] ss:$16 sps:$4 sm:$0xff]   ;;  %v4499_v39 = vld [vmem:[%s6990_s1 + $0x3c0] ss:$16 sps:$4 sm:$0xff]  }
  0x15   :  { %3257 = vmatprep.subr.bf16.mxu1 %v4472_v21  ;;  %v4500_v40 = vld [vmem:[%s6990_s1 + $0x1a4] ss:$16 sps:$4 sm:$0xff]   ;;  %v4504_v42 = vld [vmem:[%s6990_s1 + $0x1a0] ss:$16 sps:$4 sm:$0xff]  }
  0x16   :  { %v4502_v41 = vld [vmem:[%s6990_s1 + $0x3a4] ss:$16 sps:$4 sm:$0xff]   ;;  %v4505_v43 = vld [vmem:[%s6990_s1 + $0x3a0] ss:$16 sps:$4 sm:$0xff]  }
  0x17   :  { %3215 = vmatpush1.bf16.msra.mxu0 %v4474_v22  ;;  %v4506_v44 = vld [vmem:[%s6990_s1 + $0x184] ss:$16 sps:$4 sm:$0xff]   ;;  %v4510_v46 = vld [vmem:[%s6990_s1 + $0x180] ss:$16 sps:$4 sm:$0xff]  }
  0x18   :  { %3258 = vmatpush1.bf16.msra.mxu1 %v4475_v23  ;;  %3216 = vmatprep.subr.bf16.mxu0 %v4476_v24  ;;  %v4508_v45 = vld [vmem:[%s6990_s1 + $0x384] ss:$16 sps:$4 sm:$0xff]   ;;  %v4511_v47 = vld [vmem:[%s6990_s1 + $0x380] ss:$16 sps:$4 sm:$0xff]  }
  0x19   :  { %3259 = vmatprep.subr.bf16.mxu1 %v4478_v25  ;;  %v14_v48 = vld [vmem:[%s6991_s0] sm:$0xff] }
  0x1a   :  { %v22_v49 = vld [vmem:[%s6991_s0 + $0x40] sm:$0xff] }
  0x1b   :  { %3217 = vmatpush1.bf16.msra.mxu0 %v4480_v26  ;;  %v4512_v52 = vld [vmem:[%s6990_s1 + $0x164] ss:$16 sps:$4 sm:$0xff]   ;;  %v5387_v53 = vcombine.high %v14_v48, %v22_v49  ;;  %v4516_v56 = vld [vmem:[%s6990_s1 + $0x160] ss:$16 sps:$4 sm:$0xff]   ;;  %v5444_v8 = vcombine.low %v14_v48, %v22_v49 }
  0x1c   :  { %3260 = vmatpush1.bf16.msra.mxu1 %v4481_v27  ;;  %3218 = vmatprep.subr.bf16.mxu0 %v4482_v28  ;;  %v4514_v54 = vld [vmem:[%s6990_s1 + $0x364] ss:$16 sps:$4 sm:$0xff]   ;;  %v4517_v57 = vld [vmem:[%s6990_s1 + $0x360] ss:$16 sps:$4 sm:$0xff]  }
  0x1d   :  { %3261 = vmatprep.subr.bf16.mxu1 %v4484_v29  ;;  %3236 = vmatprep.mubr.bf16.mxu0 %v5387_v53  ;;  %v4518_v58 = vld [vmem:[%s6990_s1 + $0x144] ss:$16 sps:$4 sm:$0xff]   ;;  %v4522_v60 = vld [vmem:[%s6990_s1 + $0x140] ss:$16 sps:$4 sm:$0xff]  }
  0x1e   :  { %v4520_v59 = vld [vmem:[%s6990_s1 + $0x344] ss:$16 sps:$4 sm:$0xff]   ;;  %v4523_v61 = vld [vmem:[%s6990_s1 + $0x340] ss:$16 sps:$4 sm:$0xff]  }
  0x1f   :  { %3219 = vmatpush1.bf16.msra.mxu0 %v4486_v30  ;;  %v4524_v62 = vld [vmem:[%s6990_s1 + $0x124] ss:$16 sps:$4 sm:$0xff]   ;;  %v4528_v0 = vld [vmem:[%s6990_s1 + $0x120] ss:$16 sps:$4 sm:$0xff]  }
  0x20   :  { %3262 = vmatpush1.bf16.msra.mxu1 %v4487_v31  ;;  %3220 = vmatprep.subr.bf16.mxu0 %v4488_v32  ;;  %v4526_v63 = vld [vmem:[%s6990_s1 + $0x324] ss:$16 sps:$4 sm:$0xff]   ;;  %v4529_v1 = vld [vmem:[%s6990_s1 + $0x320] ss:$16 sps:$4 sm:$0xff]  }
  0x21   :  { %3263 = vmatprep.subr.bf16.mxu1 %v4490_v33  ;;  %v4530_v2 = vld [vmem:[%s6990_s1 + $0x104] ss:$16 sps:$4 sm:$0xff]   ;;  %v4534_v4 = vld [vmem:[%s6990_s1 + $0x100] ss:$16 sps:$4 sm:$0xff]  }
  0x22   :  { %v4532_v3 = vld [vmem:[%s6990_s1 + $0x304] ss:$16 sps:$4 sm:$0xff]   ;;  %v4535_v5 = vld [vmem:[%s6990_s1 + $0x300] ss:$16 sps:$4 sm:$0xff]  }
  0x23   :  { %3221 = vmatpush2.bf16.msra.mxu0 %v4492_v34  ;;  %v4538_v6 = vld [vmem:[%s6990_s1 + $0x4e4] ss:$16 sps:$4 sm:$0xff]   ;;  %v4536_v10 = vld [vmem:[%s6990_s1 + $0x4e0] ss:$16 sps:$4 sm:$0xff]  }
  0x24   :  { %3264 = vmatpush2.bf16.msra.mxu1 %v4493_v35  ;;  %3222 = vmatprep.subr.bf16.mxu0 %v4494_v36  ;;  %v4541_v7 = vld [vmem:[%s6990_s1 + $0x6e4] ss:$16 sps:$4 sm:$0xff]   ;;  %v4539_v11 = vld [vmem:[%s6990_s1 + $0x6e0] ss:$16 sps:$4 sm:$0xff]  }
  0x25   :  { %3265 = vmatprep.subr.bf16.mxu1 %v4496_v37  ;;  %v4544_v12 = vld [vmem:[%s6990_s1 + $0x4c4] ss:$16 sps:$4 sm:$0xff]   ;;  %v4542_v14 = vld [vmem:[%s6990_s1 + $0x4c0] ss:$16 sps:$4 sm:$0xff]  }
  0x26   :  { %v4547_v13 = vld [vmem:[%s6990_s1 + $0x6c4] ss:$16 sps:$4 sm:$0xff]   ;;  %v4545_v15 = vld [vmem:[%s6990_s1 + $0x6c0] ss:$16 sps:$4 sm:$0xff]  }
  0x27   :  { %3223 = vmatpush2.bf16.msra.mxu0 %v4498_v38  ;;  %v4550_v16 = vld [vmem:[%s6990_s1 + $0x4a4] ss:$16 sps:$4 sm:$0xff]   ;;  %v4548_v18 = vld [vmem:[%s6990_s1 + $0x4a0] ss:$16 sps:$4 sm:$0xff]   ;;  %v5541_v38 = vld [vmem:[%s6991_s0 + $0x18] sm:$0xff] }
  0x28   :  { %3266 = vmatpush2.bf16.msra.mxu1 %v4499_v39  ;;  %3224 = vmatprep.subr.bf16.mxu0 %v4500_v40  ;;  %v4553_v17 = vld [vmem:[%s6990_s1 + $0x6a4] ss:$16 sps:$4 sm:$0xff]   ;;  %v4551_v19 = vld [vmem:[%s6990_s1 + $0x6a0] ss:$16 sps:$4 sm:$0xff]   ;;  %v5546_v39 = vld [vmem:[%s6991_s0 + $0x58] sm:$0xff] }
  0x29   :  { %3267 = vmatprep.subr.bf16.mxu1 %v4502_v41  ;;  %v4556_v20 = vld [vmem:[%s6990_s1 + $0x484] ss:$16 sps:$4 sm:$0xff]   ;;  %v4554_v22 = vld [vmem:[%s6990_s1 + $0x480] ss:$16 sps:$4 sm:$0xff]  }
  0x2a   :  { %v4559_v21 = vld [vmem:[%s6990_s1 + $0x684] ss:$16 sps:$4 sm:$0xff]   ;;  %v4557_v23 = vld [vmem:[%s6990_s1 + $0x680] ss:$16 sps:$4 sm:$0xff]  }
  0x2b   :  { %3225 = vmatpush2.bf16.msra.mxu0 %v4504_v42  ;;  %v4562_v24 = vld [vmem:[%s6990_s1 + $0x464] ss:$16 sps:$4 sm:$0xff]   ;;  %v4560_v26 = vld [vmem:[%s6990_s1 + $0x460] ss:$16 sps:$4 sm:$0xff]  }
  0x2c   :  { %3268 = vmatpush2.bf16.msra.mxu1 %v4505_v43  ;;  %3226 = vmatprep.subr.bf16.mxu0 %v4506_v44  ;;  %v4565_v25 = vld [vmem:[%s6990_s1 + $0x664] ss:$16 sps:$4 sm:$0xff]   ;;  %v4563_v27 = vld [vmem:[%s6990_s1 + $0x660] ss:$16 sps:$4 sm:$0xff]   ;;  %v5560_v43 = vcombine.high %v5541_v38, %v5546_v39 }
  0x2d   :  { %3269 = vmatprep.subr.bf16.mxu1 %v4508_v45  ;;  %v4568_v28 = vld [vmem:[%s6990_s1 + $0x444] ss:$16 sps:$4 sm:$0xff]   ;;  %v4566_v30 = vld [vmem:[%s6990_s1 + $0x440] ss:$16 sps:$4 sm:$0xff]  }
  0x2e   :  { %v4571_v29 = vld [vmem:[%s6990_s1 + $0x644] ss:$16 sps:$4 sm:$0xff]   ;;  %v4569_v31 = vld [vmem:[%s6990_s1 + $0x640] ss:$16 sps:$4 sm:$0xff]  }
  0x2f   :  { %3227 = vmatpush2.bf16.msra.mxu0 %v4510_v46  ;;  %v4574_v32 = vld [vmem:[%s6990_s1 + $0x424] ss:$16 sps:$4 sm:$0xff]   ;;  %v4572_v34 = vld [vmem:[%s6990_s1 + $0x420] ss:$16 sps:$4 sm:$0xff]  }
  0x30   :  { %3270 = vmatpush2.bf16.msra.mxu1 %v4511_v47  ;;  %3228 = vmatprep.subr.bf16.mxu0 %v4512_v52  ;;  %v4577_v33 = vld [vmem:[%s6990_s1 + $0x624] ss:$16 sps:$4 sm:$0xff]   ;;  %v4575_v35 = vld [vmem:[%s6990_s1 + $0x620] ss:$16 sps:$4 sm:$0xff]  }
  0x31   :  { %3271 = vmatprep.subr.bf16.mxu1 %v4514_v54  ;;  %v5531_v36 = vld [vmem:[%s6991_s0 + $0x10] sm:$0xff] }
  0x32   :  { %v5536_v37 = vld [vmem:[%s6991_s0 + $0x50] sm:$0xff] }
  0x33   :  { %3229 = vmatpush2.bf16.msra.mxu0 %v4516_v56  ;;  %v4580_v40 = vld [vmem:[%s6990_s1 + $0x404] ss:$16 sps:$4 sm:$0xff]   ;;  %v5553_v41 = vcombine.high %v5531_v36, %v5536_v37  ;;  %v4578_v44 = vld [vmem:[%s6990_s1 + $0x400] ss:$16 sps:$4 sm:$0xff]  }
  0x34   :  { %3272 = vmatpush2.bf16.msra.mxu1 %v4517_v57  ;;  %3230 = vmatprep.subr.bf16.mxu0 %v4518_v58  ;;  %v4583_v42 = vld [vmem:[%s6990_s1 + $0x604] ss:$16 sps:$4 sm:$0xff]   ;;  %v4581_v45 = vld [vmem:[%s6990_s1 + $0x600] ss:$16 sps:$4 sm:$0xff]  }
  0x35   :  { %3273 = vmatprep.subr.bf16.mxu1 %v4520_v59  ;;  %v4586_v46 = vld [vmem:[%s6990_s1 + $0x5e4] ss:$16 sps:$4 sm:$0xff]   ;;  %v4584_v48 = vld [vmem:[%s6990_s1 + $0x5e0] ss:$16 sps:$4 sm:$0xff]  }
  0x36   :  { %v4589_v47 = vld [vmem:[%s6990_s1 + $0x7e4] ss:$16 sps:$4 sm:$0xff]   ;;  %v4587_v49 = vld [vmem:[%s6990_s1 + $0x7e0] ss:$16 sps:$4 sm:$0xff]  }
  0x37   :  { %3231 = vmatpush2.bf16.msra.mxu0 %v4522_v60  ;;  %v4592_v50 = vld [vmem:[%s6990_s1 + $0x5c4] ss:$16 sps:$4 sm:$0xff]   ;;  %v4590_v52 = vld [vmem:[%s6990_s1 + $0x5c0] ss:$16 sps:$4 sm:$0xff]  }
  0x38   :  { %3274 = vmatpush2.bf16.msra.mxu1 %v4523_v61  ;;  %3232 = vmatprep.subr.bf16.mxu0 %v4524_v62  ;;  %v4595_v51 = vld [vmem:[%s6990_s1 + $0x7c4] ss:$16 sps:$4 sm:$0xff]   ;;  %v4593_v54 = vld [vmem:[%s6990_s1 + $0x7c0] ss:$16 sps:$4 sm:$0xff]  }
  0x39   :  { %3275 = vmatprep.subr.bf16.mxu1 %v4526_v63  ;;  %v4598_v56 = vld [vmem:[%s6990_s1 + $0x5a4] ss:$16 sps:$4 sm:$0xff]   ;;  %v4596_v58 = vld [vmem:[%s6990_s1 + $0x5a0] ss:$16 sps:$4 sm:$0xff]  }
  0x3a   :  { %v4601_v57 = vld [vmem:[%s6990_s1 + $0x7a4] ss:$16 sps:$4 sm:$0xff]   ;;  %v4599_v59 = vld [vmem:[%s6990_s1 + $0x7a0] ss:$16 sps:$4 sm:$0xff]  }
  0x3b   :  { %3233 = vmatpush2.bf16.msra.mxu0 %v4528_v0  ;;  %v4604_v60 = vld [vmem:[%s6990_s1 + $0x584] ss:$16 sps:$4 sm:$0xff]   ;;  %v4602_v62 = vld [vmem:[%s6990_s1 + $0x580] ss:$16 sps:$4 sm:$0xff]  }
  0x3c   :  { %3276 = vmatpush2.bf16.msra.mxu1 %v4529_v1  ;;  %3234 = vmatprep.subr.bf16.mxu0 %v4530_v2  ;;  %v4607_v61 = vld [vmem:[%s6990_s1 + $0x784] ss:$16 sps:$4 sm:$0xff]   ;;  %v4605_v63 = vld [vmem:[%s6990_s1 + $0x780] ss:$16 sps:$4 sm:$0xff]  }
  0x3d   :  { %3277 = vmatprep.subr.bf16.mxu1 %v4532_v3  ;;  %v4610_v0 = vld [vmem:[%s6990_s1 + $0x564] ss:$16 sps:$4 sm:$0xff]   ;;  %v4608_v2 = vld [vmem:[%s6990_s1 + $0x560] ss:$16 sps:$4 sm:$0xff]  }
  0x3e   :  { %v4613_v1 = vld [vmem:[%s6990_s1 + $0x764] ss:$16 sps:$4 sm:$0xff]   ;;  %v4611_v3 = vld [vmem:[%s6990_s1 + $0x760] ss:$16 sps:$4 sm:$0xff]  }
  0x3f   :  { %3235 = vmatpush2.bf16.msra.mxu0 %v4534_v4  ;;  %v4616_v4 = vld [vmem:[%s6990_s1 + $0x544] ss:$16 sps:$4 sm:$0xff]  }
  0x40   :  { %3278 = vmatpush2.bf16.msra.mxu1 %v4535_v5  ;;  %3290 = vmatprep.subr.bf16.mxu0 %v4538_v6  ;;  %v4619_v5 = vld [vmem:[%s6990_s1 + $0x744] ss:$16 sps:$4 sm:$0xff]   ;;  %v4614_v6 = vld [vmem:[%s6990_s1 + $0x540] ss:$16 sps:$4 sm:$0xff]  }
  0x41   :  { %3333 = vmatprep.subr.bf16.mxu1 %v4541_v7  ;;  %v4617_v7 = vld [vmem:[%s6990_s1 + $0x740] ss:$16 sps:$4 sm:$0xff]  }
  0x42   :  { %3237 = vmatmul.mubr.bf16.vlgmr.msra.gmra.mxu0 %v5444_v8 }
  0x43   :  { %3280 = vmatmul.mubr.bf16.vlgmr.msra.gmra.mxu1 %v5446_v9  ;;  %3291 = vmatpush1.bf16.msra.mxu0 %v4536_v10  ;;  %v4622_v10 = vld [vmem:[%s6990_s1 + $0x524] ss:$16 sps:$4 sm:$0xff]  }
  0x44   :  { %3334 = vmatpush1.bf16.msra.mxu1 %v4539_v11  ;;  %3292 = vmatprep.subr.bf16.mxu0 %v4544_v12  ;;  %v4625_v11 = vld [vmem:[%s6990_s1 + $0x724] ss:$16 sps:$4 sm:$0xff]   ;;  %v4620_v12 = vld [vmem:[%s6990_s1 + $0x520] ss:$16 sps:$4 sm:$0xff]  }
  0x45   :  { %3335 = vmatprep.subr.bf16.mxu1 %v4547_v13  ;;  %3322 = vmatprep.mubr.bf16.mxu0 %v5553_v41  ;;  %v4623_v13 = vld [vmem:[%s6990_s1 + $0x720] ss:$16 sps:$4 sm:$0xff]  }
  0x46   :  { %3365 = vmatprep.mubr.bf16.mxu1 %v5560_v43 }
  0x47   :  { %3293 = vmatpush1.bf16.msra.mxu0 %v4542_v14  ;;  %v4628_v14 = vld [vmem:[%s6990_s1 + $0x504] ss:$16 sps:$4 sm:$0xff]  }
  0x48   :  { %3336 = vmatpush1.bf16.msra.mxu1 %v4545_v15  ;;  %3294 = vmatprep.subr.bf16.mxu0 %v4550_v16  ;;  %v4631_v15 = vld [vmem:[%s6990_s1 + $0x704] ss:$16 sps:$4 sm:$0xff]   ;;  %v4626_v16 = vld [vmem:[%s6990_s1 + $0x500] ss:$16 sps:$4 sm:$0xff]  }
  0x49   :  { %3337 = vmatprep.subr.bf16.mxu1 %v4553_v17  ;;  %v4629_v17 = vld [vmem:[%s6990_s1 + $0x700] ss:$16 sps:$4 sm:$0xff]  }
  0x4b   :  { %3295 = vmatpush1.bf16.msra.mxu0 %v4548_v18  ;;  %v4634_v18 = vld [vmem:[%s6990_s1 + $0x8e4] ss:$16 sps:$4 sm:$0xff]  }
  0x4c   :  { %3338 = vmatpush1.bf16.msra.mxu1 %v4551_v19  ;;  %3296 = vmatprep.subr.bf16.mxu0 %v4556_v20  ;;  %v4637_v19 = vld [vmem:[%s6990_s1 + $0xae4] ss:$16 sps:$4 sm:$0xff]   ;;  %v5674_v20 = vcombine.low %v5531_v36, %v5536_v37  ;;  %v4644_v36 = vld [vmem:[%s6990_s1 + $0x8a0] ss:$16 sps:$4 sm:$0xff]  }
  0x4d   :  { %3339 = vmatprep.subr.bf16.mxu1 %v4559_v21  ;;  %v5678_v21 = vcombine.low %v5541_v38, %v5546_v39  ;;  %v4647_v37 = vld [vmem:[%s6990_s1 + $0xaa0] ss:$16 sps:$4 sm:$0xff]   ;;  %v4652_v38 = vld [vmem:[%s6990_s1 + $0x884] ss:$16 sps:$4 sm:$0xff]  }
  0x4e   :  { %v4655_v39 = vld [vmem:[%s6990_s1 + $0xa84] ss:$16 sps:$4 sm:$0xff]  }
  0x4f   :  { %3297 = vmatpush1.bf16.msra.mxu0 %v4554_v22  ;;  %v4632_v22 = vld [vmem:[%s6990_s1 + $0x8e0] ss:$16 sps:$4 sm:$0xff]  }
  0x50   :  { %3340 = vmatpush1.bf16.msra.mxu1 %v4557_v23  ;;  %3298 = vmatprep.subr.bf16.mxu0 %v4562_v24  ;;  %v4635_v23 = vld [vmem:[%s6990_s1 + $0xae0] ss:$16 sps:$4 sm:$0xff]   ;;  %v4640_v24 = vld [vmem:[%s6990_s1 + $0x8c4] ss:$16 sps:$4 sm:$0xff]  }
  0x51   :  { %3341 = vmatprep.subr.bf16.mxu1 %v4565_v25  ;;  %v4643_v25 = vld [vmem:[%s6990_s1 + $0xac4] ss:$16 sps:$4 sm:$0xff]  }
  0x53   :  { %3299 = vmatpush1.bf16.msra.mxu0 %v4560_v26  ;;  %v4638_v26 = vld [vmem:[%s6990_s1 + $0x8c0] ss:$16 sps:$4 sm:$0xff]  }
  0x54   :  { %3342 = vmatpush1.bf16.msra.mxu1 %v4563_v27  ;;  %3300 = vmatprep.subr.bf16.mxu0 %v4568_v28  ;;  %v4641_v27 = vld [vmem:[%s6990_s1 + $0xac0] ss:$16 sps:$4 sm:$0xff]  }
  0x55   :  { %3343 = vmatprep.subr.bf16.mxu1 %v4571_v29  ;;  %v5701_v28 = vld [vmem:[%s6991_s0 + $0x20] sm:$0xff] }
  0x56   :  { %v5708_v29 = vld [vmem:[%s6991_s0 + $0x60] sm:$0xff] }
  0x57   :  { %3301 = vmatpush1.bf16.msra.mxu0 %v4566_v30  ;;  %v5713_v30 = vld [vmem:[%s6991_s0 + $0x28] sm:$0xff] }
  0x58   :  { %3344 = vmatpush1.bf16.msra.mxu1 %v4569_v31  ;;  %3302 = vmatprep.subr.bf16.mxu0 %v4574_v32  ;;  %v5718_v31 = vld [vmem:[%s6991_s0 + $0x68] sm:$0xff]  ;;  %v4646_v32 = vld [vmem:[%s6990_s1 + $0x8a4] ss:$16 sps:$4 sm:$0xff]  }
  0x59   :  { %3345 = vmatprep.subr.bf16.mxu1 %v4577_v33  ;;  %v5725_v33 = vcombine.high %v5701_v28, %v5708_v29 }
  0x5b   :  { %3303 = vmatpush1.bf16.msra.mxu0 %v4572_v34  ;;  %v4649_v34 = vld [vmem:[%s6990_s1 + $0xaa4] ss:$16 sps:$4 sm:$0xff]  }
  0x5c   :  { %3346 = vmatpush1.bf16.msra.mxu1 %v4575_v35  ;;  %3304 = vmatprep.subr.bf16.mxu0 %v4580_v40  ;;  %v5732_v35 = vcombine.high %v5713_v30, %v5718_v31  ;;  %v4650_v40 = vld [vmem:[%s6990_s1 + $0x880] ss:$16 sps:$4 sm:$0xff]  }
  0x5d   :  { %3347 = vmatprep.subr.bf16.mxu1 %v4583_v42  ;;  %v4653_v42 = vld [vmem:[%s6990_s1 + $0xa80] ss:$16 sps:$4 sm:$0xff]  }
  0x5f   :  { %3305 = vmatpush1.bf16.msra.mxu0 %v4578_v44  ;;  %v4658_v44 = vld [vmem:[%s6990_s1 + $0x864] ss:$16 sps:$4 sm:$0xff]  }
  0x60   :  { %3348 = vmatpush1.bf16.msra.mxu1 %v4581_v45  ;;  %3306 = vmatprep.subr.bf16.mxu0 %v4586_v46  ;;  %v4661_v45 = vld [vmem:[%s6990_s1 + $0xa64] ss:$16 sps:$4 sm:$0xff]   ;;  %v4656_v46 = vld [vmem:[%s6990_s1 + $0x860] ss:$16 sps:$4 sm:$0xff]  }
  0x61   :  { %3349 = vmatprep.subr.bf16.mxu1 %v4589_v47  ;;  %v4659_v47 = vld [vmem:[%s6990_s1 + $0xa60] ss:$16 sps:$4 sm:$0xff]  }
  0x63   :  { %3307 = vmatpush2.bf16.msra.mxu0 %v4584_v48  ;;  %v4664_v48 = vld [vmem:[%s6990_s1 + $0x844] ss:$16 sps:$4 sm:$0xff]  }
  0x64   :  { %3350 = vmatpush2.bf16.msra.mxu1 %v4587_v49  ;;  %3308 = vmatprep.subr.bf16.mxu0 %v4592_v50  ;;  %v4667_v49 = vld [vmem:[%s6990_s1 + $0xa44] ss:$16 sps:$4 sm:$0xff]   ;;  %v4662_v50 = vld [vmem:[%s6990_s1 + $0x840] ss:$16 sps:$4 sm:$0xff]  }
  0x65   :  { %3351 = vmatprep.subr.bf16.mxu1 %v4595_v51  ;;  %v4665_v51 = vld [vmem:[%s6990_s1 + $0xa40] ss:$16 sps:$4 sm:$0xff]  }
  0x67   :  { %3309 = vmatpush2.bf16.msra.mxu0 %v4590_v52  ;;  %v4670_v52 = vld [vmem:[%s6990_s1 + $0x824] ss:$16 sps:$4 sm:$0xff]  }
  0x68   :  { %3352 = vmatpush2.bf16.msra.mxu1 %v4593_v54  ;;  %3310 = vmatprep.subr.bf16.mxu0 %v4598_v56  ;;  %v4673_v54 = vld [vmem:[%s6990_s1 + $0xa24] ss:$16 sps:$4 sm:$0xff]   ;;  %v4668_v56 = vld [vmem:[%s6990_s1 + $0x820] ss:$16 sps:$4 sm:$0xff]  }
  0x69   :  { %3353 = vmatprep.subr.bf16.mxu1 %v4601_v57  ;;  %v4671_v57 = vld [vmem:[%s6990_s1 + $0xa20] ss:$16 sps:$4 sm:$0xff]  }
  0x6b   :  { %3311 = vmatpush2.bf16.msra.mxu0 %v4596_v58  ;;  %v4676_v58 = vld [vmem:[%s6990_s1 + $0x804] ss:$16 sps:$4 sm:$0xff]  }
  0x6c   :  { %3354 = vmatpush2.bf16.msra.mxu1 %v4599_v59  ;;  %3312 = vmatprep.subr.bf16.mxu0 %v4604_v60  ;;  %v4679_v59 = vld [vmem:[%s6990_s1 + $0xa04] ss:$16 sps:$4 sm:$0xff]   ;;  %v4674_v60 = vld [vmem:[%s6990_s1 + $0x800] ss:$16 sps:$4 sm:$0xff]  }
  0x6d   :  { %3355 = vmatprep.subr.bf16.mxu1 %v4607_v61  ;;  %v4677_v61 = vld [vmem:[%s6990_s1 + $0xa00] ss:$16 sps:$4 sm:$0xff]  }
  0x6f   :  { %3313 = vmatpush2.bf16.msra.mxu0 %v4602_v62  ;;  %v4682_v62 = vld [vmem:[%s6990_s1 + $0x9e4] ss:$16 sps:$4 sm:$0xff]  }
  0x70   :  { %3356 = vmatpush2.bf16.msra.mxu1 %v4605_v63  ;;  %3314 = vmatprep.subr.bf16.mxu0 %v4610_v0  ;;  %v4685_v63 = vld [vmem:[%s6990_s1 + $0xbe4] ss:$16 sps:$4 sm:$0xff]   ;;  %v4680_v0 = vld [vmem:[%s6990_s1 + $0x9e0] ss:$16 sps:$4 sm:$0xff]  }
  0x71   :  { %3357 = vmatprep.subr.bf16.mxu1 %v4613_v1  ;;  %v4683_v1 = vld [vmem:[%s6990_s1 + $0xbe0] ss:$16 sps:$4 sm:$0xff]  }
  0x73   :  { %3315 = vmatpush2.bf16.msra.mxu0 %v4608_v2  ;;  %v4688_v2 = vld [vmem:[%s6990_s1 + $0x9c4] ss:$16 sps:$4 sm:$0xff]  }
  0x74   :  { %3358 = vmatpush2.bf16.msra.mxu1 %v4611_v3  ;;  %3316 = vmatprep.subr.bf16.mxu0 %v4616_v4  ;;  %v4691_v3 = vld [vmem:[%s6990_s1 + $0xbc4] ss:$16 sps:$4 sm:$0xff]   ;;  %v4686_v4 = vld [vmem:[%s6990_s1 + $0x9c0] ss:$16 sps:$4 sm:$0xff]  }
  0x75   :  { %3359 = vmatprep.subr.bf16.mxu1 %v4619_v5  ;;  %v4689_v5 = vld [vmem:[%s6990_s1 + $0xbc0] ss:$16 sps:$4 sm:$0xff]  }
  0x77   :  { %3317 = vmatpush2.bf16.msra.mxu0 %v4614_v6  ;;  %v4694_v6 = vld [vmem:[%s6990_s1 + $0x9a4] ss:$16 sps:$4 sm:$0xff]  }
  0x78   :  { %3360 = vmatpush2.bf16.msra.mxu1 %v4617_v7  ;;  %3318 = vmatprep.subr.bf16.mxu0 %v4622_v10  ;;  %v4697_v7 = vld [vmem:[%s6990_s1 + $0xba4] ss:$16 sps:$4 sm:$0xff]   ;;  %v4692_v10 = vld [vmem:[%s6990_s1 + $0x9a0] ss:$16 sps:$4 sm:$0xff]  }
  0x79   :  { %3361 = vmatprep.subr.bf16.mxu1 %v4625_v11  ;;  %v4695_v11 = vld [vmem:[%s6990_s1 + $0xba0] ss:$16 sps:$4 sm:$0xff]  }
  0x7b   :  { %3319 = vmatpush2.bf16.msra.mxu0 %v4620_v12  ;;  %v4700_v12 = vld [vmem:[%s6990_s1 + $0x984] ss:$16 sps:$4 sm:$0xff]  }
  0x7c   :  { %3362 = vmatpush2.bf16.msra.mxu1 %v4623_v13  ;;  %3320 = vmatprep.subr.bf16.mxu0 %v4628_v14  ;;  %v4703_v13 = vld [vmem:[%s6990_s1 + $0xb84] ss:$16 sps:$4 sm:$0xff]   ;;  %v4698_v14 = vld [vmem:[%s6990_s1 + $0x980] ss:$16 sps:$4 sm:$0xff]  }
  0x7d   :  { %3363 = vmatprep.subr.bf16.mxu1 %v4631_v15  ;;  %v4701_v15 = vld [vmem:[%s6990_s1 + $0xb80] ss:$16 sps:$4 sm:$0xff]  }
  0x7f   :  { %3321 = vmatpush2.bf16.msra.mxu0 %v4626_v16  ;;  %v4706_v16 = vld [vmem:[%s6990_s1 + $0x964] ss:$16 sps:$4 sm:$0xff]  }
  0x80   :  { %3364 = vmatpush2.bf16.msra.mxu1 %v4629_v17  ;;  %3376 = vmatprep.subr.bf16.mxu0 %v4634_v18  ;;  %v4709_v17 = vld [vmem:[%s6990_s1 + $0xb64] ss:$16 sps:$4 sm:$0xff]   ;;  %v4704_v18 = vld [vmem:[%s6990_s1 + $0x960] ss:$16 sps:$4 sm:$0xff]  }
  0x81   :  { %3419 = vmatprep.subr.bf16.mxu1 %v4637_v19  ;;  %v4707_v19 = vld [vmem:[%s6990_s1 + $0xb60] ss:$16 sps:$4 sm:$0xff]  }
  0x82   :  { %3323 = vmatmul.mubr.bf16.vlgmr.msra.gmra.mxu0 %v5674_v20 }
  0x83   :  { %3366 = vmatmul.mubr.bf16.vlgmr.msra.gmra.mxu1 %v5678_v21  ;;  %3377 = vmatpush1.bf16.msra.mxu0 %v4632_v22  ;;  %v4712_v22 = vld [vmem:[%s6990_s1 + $0x944] ss:$16 sps:$4 sm:$0xff]  }
  0x84   :  { %3420 = vmatpush1.bf16.msra.mxu1 %v4635_v23  ;;  %3378 = vmatprep.subr.bf16.mxu0 %v4640_v24  ;;  %v4715_v23 = vld [vmem:[%s6990_s1 + $0xb44] ss:$16 sps:$4 sm:$0xff]   ;;  %v4710_v24 = vld [vmem:[%s6990_s1 + $0x940] ss:$16 sps:$4 sm:$0xff]  }
  0x85   :  { %3421 = vmatprep.subr.bf16.mxu1 %v4643_v25  ;;  %3408 = vmatprep.mubr.bf16.mxu0 %v5725_v33  ;;  %v4713_v25 = vld [vmem:[%s6990_s1 + $0xb40] ss:$16 sps:$4 sm:$0xff]  }
  0x86   :  { %3451 = vmatprep.mubr.bf16.mxu1 %v5732_v35 }
  0x87   :  { %3379 = vmatpush1.bf16.msra.mxu0 %v4638_v26  ;;  %v4718_v26 = vld [vmem:[%s6990_s1 + $0x924] ss:$16 sps:$4 sm:$0xff]  }
  0x88   :  { %3422 = vmatpush1.bf16.msra.mxu1 %v4641_v27  ;;  %3380 = vmatprep.subr.bf16.mxu0 %v4646_v32  ;;  %v4721_v27 = vld [vmem:[%s6990_s1 + $0xb24] ss:$16 sps:$4 sm:$0xff]   ;;  %v4716_v32 = vld [vmem:[%s6990_s1 + $0x920] ss:$16 sps:$4 sm:$0xff]  }
  0x89   :  { %3423 = vmatprep.subr.bf16.mxu1 %v4649_v34  ;;  %v4719_v34 = vld [vmem:[%s6990_s1 + $0xb20] ss:$16 sps:$4 sm:$0xff]  }
  0x8b   :  { %3381 = vmatpush1.bf16.msra.mxu0 %v4644_v36  ;;  %v4724_v36 = vld [vmem:[%s6990_s1 + $0x904] ss:$16 sps:$4 sm:$0xff]  }
  0x8c   :  { %3424 = vmatpush1.bf16.msra.mxu1 %v4647_v37  ;;  %3382 = vmatprep.subr.bf16.mxu0 %v4652_v38  ;;  %v4727_v37 = vld [vmem:[%s6990_s1 + $0xb04] ss:$16 sps:$4 sm:$0xff]   ;;  %v4722_v38 = vld [vmem:[%s6990_s1 + $0x900] ss:$16 sps:$4 sm:$0xff]  }
  0x8d   :  { %3425 = vmatprep.subr.bf16.mxu1 %v4655_v39  ;;  %v4725_v39 = vld [vmem:[%s6990_s1 + $0xb00] ss:$16 sps:$4 sm:$0xff]  }
  0x8f   :  { %3383 = vmatpush1.bf16.msra.mxu0 %v4650_v40  ;;  %v4730_v40 = vld [vmem:[%s6990_s1 + $0xce4] ss:$16 sps:$4 sm:$0xff]  }
  0x90   :  { %3426 = vmatpush1.bf16.msra.mxu1 %v4653_v42  ;;  %3384 = vmatprep.subr.bf16.mxu0 %v4658_v44  ;;  %v4733_v42 = vld [vmem:[%s6990_s1 + $0xee4] ss:$16 sps:$4 sm:$0xff]  }
  0x91   :  { %3427 = vmatprep.subr.bf16.mxu1 %v4661_v45  ;;  %v5907_v44 = vld [vmem:[%s6991_s0 + $0x30] sm:$0xff] }
  0x92   :  { %v4728_v45 = vld [vmem:[%s6990_s1 + $0xce0] ss:$16 sps:$4 sm:$0xff]  }
  0x93   :  { %3385 = vmatpush1.bf16.msra.mxu0 %v4656_v46  ;;  %v5915_v46 = vld [vmem:[%s6991_s0 + $0x70] sm:$0xff] }
  0x94   :  { %3428 = vmatpush1.bf16.msra.mxu1 %v4659_v47  ;;  %3386 = vmatprep.subr.bf16.mxu0 %v4664_v48  ;;  %v5920_v47 = vld [vmem:[%s6991_s0 + $0x38] sm:$0xff]  ;;  %v5924_v48 = vcombine.low %v5701_v28, %v5708_v29  ;;  %v4736_v28 = vld [vmem:[%s6990_s1 + $0xcc4] ss:$16 sps:$4 sm:$0xff]  }
  0x95   :  { %3429 = vmatprep.subr.bf16.mxu1 %v4667_v49  ;;  %v5928_v49 = vcombine.low %v5713_v30, %v5718_v31  ;;  %v4739_v29 = vld [vmem:[%s6990_s1 + $0xec4] ss:$16 sps:$4 sm:$0xff]   ;;  %v5946_v30 = vcombine.high %v5907_v44, %v5915_v46 }
  0x97   :  { %3387 = vmatpush1.bf16.msra.mxu0 %v4662_v50  ;;  %v5933_v50 = vld [vmem:[%s6991_s0 + $0x78] sm:$0xff] }
  0x98   :  { %3430 = vmatpush1.bf16.msra.mxu1 %v4665_v51  ;;  %3388 = vmatprep.subr.bf16.mxu0 %v4670_v52  ;;  %v4731_v51 = vld [vmem:[%s6990_s1 + $0xee0] ss:$16 sps:$4 sm:$0xff]   ;;  %v5950_v31 = vcombine.high %v5920_v47, %v5933_v50 }
  0x99   :  { %3431 = vmatprep.subr.bf16.mxu1 %v4673_v54  ;;  %v4734_v52 = vld [vmem:[%s6990_s1 + $0xcc0] ss:$16 sps:$4 sm:$0xff]  }
  0x9a   :  { %v4737_v54 = vld [vmem:[%s6990_s1 + $0xec0] ss:$16 sps:$4 sm:$0xff]  }
  0x9b   :  { %3389 = vmatpush1.bf16.msra.mxu0 %v4668_v56  ;;  %v4742_v56 = vld [vmem:[%s6990_s1 + $0xca4] ss:$16 sps:$4 sm:$0xff]  }
  0x9c   :  { %3432 = vmatpush1.bf16.msra.mxu1 %v4671_v57  ;;  %3390 = vmatprep.subr.bf16.mxu0 %v4676_v58  ;;  %v4745_v57 = vld [vmem:[%s6990_s1 + $0xea4] ss:$16 sps:$4 sm:$0xff]   ;;  %v4740_v58 = vld [vmem:[%s6990_s1 + $0xca0] ss:$16 sps:$4 sm:$0xff]  }
  0x9d   :  { %3433 = vmatprep.subr.bf16.mxu1 %v4679_v59  ;;  %v4743_v59 = vld [vmem:[%s6990_s1 + $0xea0] ss:$16 sps:$4 sm:$0xff]  }
  0x9f   :  { %3391 = vmatpush1.bf16.msra.mxu0 %v4674_v60  ;;  %v4748_v60 = vld [vmem:[%s6990_s1 + $0xc84] ss:$16 sps:$4 sm:$0xff]  }
  0xa0   :  { %3434 = vmatpush1.bf16.msra.mxu1 %v4677_v61  ;;  %3392 = vmatprep.subr.bf16.mxu0 %v4682_v62  ;;  %v4751_v61 = vld [vmem:[%s6990_s1 + $0xe84] ss:$16 sps:$4 sm:$0xff]   ;;  %v4746_v62 = vld [vmem:[%s6990_s1 + $0xc80] ss:$16 sps:$4 sm:$0xff]  }
  0xa1   :  { %3435 = vmatprep.subr.bf16.mxu1 %v4685_v63  ;;  %v4749_v63 = vld [vmem:[%s6990_s1 + $0xe80] ss:$16 sps:$4 sm:$0xff]  }
  0xa3   :  { %3393 = vmatpush2.bf16.msra.mxu0 %v4680_v0  ;;  %v4754_v0 = vld [vmem:[%s6990_s1 + $0xc64] ss:$16 sps:$4 sm:$0xff]  }
  0xa4   :  { %3436 = vmatpush2.bf16.msra.mxu1 %v4683_v1  ;;  %3394 = vmatprep.subr.bf16.mxu0 %v4688_v2  ;;  %v4757_v1 = vld [vmem:[%s6990_s1 + $0xe64] ss:$16 sps:$4 sm:$0xff]   ;;  %v4752_v2 = vld [vmem:[%s6990_s1 + $0xc60] ss:$16 sps:$4 sm:$0xff]  }
  0xa5   :  { %3437 = vmatprep.subr.bf16.mxu1 %v4691_v3  ;;  %v4755_v3 = vld [vmem:[%s6990_s1 + $0xe60] ss:$16 sps:$4 sm:$0xff]  }
  0xa7   :  { %3395 = vmatpush2.bf16.msra.mxu0 %v4686_v4  ;;  %v4760_v4 = vld [vmem:[%s6990_s1 + $0xc44] ss:$16 sps:$4 sm:$0xff]  }
  0xa8   :  { %3438 = vmatpush2.bf16.msra.mxu1 %v4689_v5  ;;  %3396 = vmatprep.subr.bf16.mxu0 %v4694_v6  ;;  %v4763_v5 = vld [vmem:[%s6990_s1 + $0xe44] ss:$16 sps:$4 sm:$0xff]   ;;  %v4758_v6 = vld [vmem:[%s6990_s1 + $0xc40] ss:$16 sps:$4 sm:$0xff]  }
  0xa9   :  { %3439 = vmatprep.subr.bf16.mxu1 %v4697_v7  ;;  %v4761_v7 = vld [vmem:[%s6990_s1 + $0xe40] ss:$16 sps:$4 sm:$0xff]  }
  0xab   :  { %3397 = vmatpush2.bf16.msra.mxu0 %v4692_v10  ;;  %v4766_v10 = vld [vmem:[%s6990_s1 + $0xc24] ss:$16 sps:$4 sm:$0xff]  }
  0xac   :  { %3440 = vmatpush2.bf16.msra.mxu1 %v4695_v11  ;;  %3398 = vmatprep.subr.bf16.mxu0 %v4700_v12  ;;  %v4769_v11 = vld [vmem:[%s6990_s1 + $0xe24] ss:$16 sps:$4 sm:$0xff]   ;;  %v4764_v12 = vld [vmem:[%s6990_s1 + $0xc20] ss:$16 sps:$4 sm:$0xff]  }
  0xad   :  { %3441 = vmatprep.subr.bf16.mxu1 %v4703_v13  ;;  %v4767_v13 = vld [vmem:[%s6990_s1 + $0xe20] ss:$16 sps:$4 sm:$0xff]  }
  0xaf   :  { %3399 = vmatpush2.bf16.msra.mxu0 %v4698_v14  ;;  %v4772_v14 = vld [vmem:[%s6990_s1 + $0xc04] ss:$16 sps:$4 sm:$0xff]  }
  0xb0   :  { %3442 = vmatpush2.bf16.msra.mxu1 %v4701_v15  ;;  %3400 = vmatprep.subr.bf16.mxu0 %v4706_v16  ;;  %v4775_v15 = vld [vmem:[%s6990_s1 + $0xe04] ss:$16 sps:$4 sm:$0xff]   ;;  %v4770_v16 = vld [vmem:[%s6990_s1 + $0xc00] ss:$16 sps:$4 sm:$0xff]  }
  0xb1   :  { %3443 = vmatprep.subr.bf16.mxu1 %v4709_v17  ;;  %v4773_v17 = vld [vmem:[%s6990_s1 + $0xe00] ss:$16 sps:$4 sm:$0xff]  }
  0xb3   :  { %3401 = vmatpush2.bf16.msra.mxu0 %v4704_v18  ;;  %v4778_v18 = vld [vmem:[%s6990_s1 + $0xde4] ss:$16 sps:$4 sm:$0xff]  }
  0xb4   :  { %3444 = vmatpush2.bf16.msra.mxu1 %v4707_v19  ;;  %3402 = vmatprep.subr.bf16.mxu0 %v4712_v22  ;;  %v4781_v19 = vld [vmem:[%s6990_s1 + $0xfe4] ss:$16 sps:$4 sm:$0xff]   ;;  %v4776_v22 = vld [vmem:[%s6990_s1 + $0xde0] ss:$16 sps:$4 sm:$0xff]  }
  0xb5   :  { %3445 = vmatprep.subr.bf16.mxu1 %v4715_v23  ;;  %v4779_v23 = vld [vmem:[%s6990_s1 + $0xfe0] ss:$16 sps:$4 sm:$0xff]  }
  0xb7   :  { %3403 = vmatpush2.bf16.msra.mxu0 %v4710_v24  ;;  %v4784_v24 = vld [vmem:[%s6990_s1 + $0xdc4] ss:$16 sps:$4 sm:$0xff]  }
  0xb8   :  { %3446 = vmatpush2.bf16.msra.mxu1 %v4713_v25  ;;  %3404 = vmatprep.subr.bf16.mxu0 %v4718_v26  ;;  %v4787_v25 = vld [vmem:[%s6990_s1 + $0xfc4] ss:$16 sps:$4 sm:$0xff]   ;;  %v4782_v26 = vld [vmem:[%s6990_s1 + $0xdc0] ss:$16 sps:$4 sm:$0xff]  }
  0xb9   :  { %3447 = vmatprep.subr.bf16.mxu1 %v4721_v27  ;;  %v4785_v27 = vld [vmem:[%s6990_s1 + $0xfc0] ss:$16 sps:$4 sm:$0xff]  }
  0xbb   :  { %3405 = vmatpush2.bf16.msra.mxu0 %v4716_v32  ;;  %v4790_v32 = vld [vmem:[%s6990_s1 + $0xda4] ss:$16 sps:$4 sm:$0xff]  }
  0xbc   :  { %3448 = vmatpush2.bf16.msra.mxu1 %v4719_v34  ;;  %3406 = vmatprep.subr.bf16.mxu0 %v4724_v36  ;;  %v4793_v34 = vld [vmem:[%s6990_s1 + $0xfa4] ss:$16 sps:$4 sm:$0xff]   ;;  %v4788_v36 = vld [vmem:[%s6990_s1 + $0xda0] ss:$16 sps:$4 sm:$0xff]  }
  0xbd   :  { %3449 = vmatprep.subr.bf16.mxu1 %v4727_v37  ;;  %v4791_v37 = vld [vmem:[%s6990_s1 + $0xfa0] ss:$16 sps:$4 sm:$0xff]  }
  0xbf   :  { %3407 = vmatpush2.bf16.msra.mxu0 %v4722_v38  ;;  %v4796_v38 = vld [vmem:[%s6990_s1 + $0xd84] ss:$16 sps:$4 sm:$0xff]  }
  0xc0   :  { %3450 = vmatpush2.bf16.msra.mxu1 %v4725_v39  ;;  %3462 = vmatprep.subr.bf16.mxu0 %v4730_v40  ;;  %v4799_v39 = vld [vmem:[%s6990_s1 + $0xf84] ss:$16 sps:$4 sm:$0xff]   ;;  %v4794_v40 = vld [vmem:[%s6990_s1 + $0xd80] ss:$16 sps:$4 sm:$0xff]  }
  0xc1   :  { %3505 = vmatprep.subr.bf16.mxu1 %v4733_v42  ;;  %v4797_v42 = vld [vmem:[%s6990_s1 + $0xf80] ss:$16 sps:$4 sm:$0xff]  }
  0xc2   :  { %3409 = vmatmul.mubr.bf16.vlgmr.msra.gmra.mxu0 %v5924_v48 }
  0xc3   :  { %3452 = vmatmul.mubr.bf16.vlgmr.msra.gmra.mxu1 %v5928_v49  ;;  %3463 = vmatpush1.bf16.msra.mxu0 %v4728_v45  ;;  %v4802_v45 = vld [vmem:[%s6990_s1 + $0xd64] ss:$16 sps:$4 sm:$0xff]  }
  0xc4   :  { %3506 = vmatpush1.bf16.msra.mxu1 %v4731_v51  ;;  %3464 = vmatprep.subr.bf16.mxu0 %v4736_v28  ;;  %v4805_v51 = vld [vmem:[%s6990_s1 + $0xf64] ss:$16 sps:$4 sm:$0xff]   ;;  %v4800_v28 = vld [vmem:[%s6990_s1 + $0xd60] ss:$16 sps:$4 sm:$0xff]  }
  0xc5   :  { %3507 = vmatprep.subr.bf16.mxu1 %v4739_v29  ;;  %3494 = vmatprep.mubr.bf16.mxu0 %v5946_v30  ;;  %v4803_v29 = vld [vmem:[%s6990_s1 + $0xf60] ss:$16 sps:$4 sm:$0xff]  }
  0xc6   :  { %3537 = vmatprep.mubr.bf16.mxu1 %v5950_v31 }
  0xc7   :  { %3465 = vmatpush1.bf16.msra.mxu0 %v4734_v52  ;;  %v4808_v52 = vld [vmem:[%s6990_s1 + $0xd44] ss:$16 sps:$4 sm:$0xff]  }
  0xc8   :  { %3508 = vmatpush1.bf16.msra.mxu1 %v4737_v54  ;;  %3466 = vmatprep.subr.bf16.mxu0 %v4742_v56  ;;  %v4811_v54 = vld [vmem:[%s6990_s1 + $0xf44] ss:$16 sps:$4 sm:$0xff]   ;;  %v4806_v56 = vld [vmem:[%s6990_s1 + $0xd40] ss:$16 sps:$4 sm:$0xff]  }
  0xc9   :  { %3509 = vmatprep.subr.bf16.mxu1 %v4745_v57  ;;  %v4809_v57 = vld [vmem:[%s6990_s1 + $0xf40] ss:$16 sps:$4 sm:$0xff]  }
  0xcb   :  { %3467 = vmatpush1.bf16.msra.mxu0 %v4740_v58  ;;  %v4814_v58 = vld [vmem:[%s6990_s1 + $0xd24] ss:$16 sps:$4 sm:$0xff]  }
  0xcc   :  { %3510 = vmatpush1.bf16.msra.mxu1 %v4743_v59  ;;  %3468 = vmatprep.subr.bf16.mxu0 %v4748_v60  ;;  %v4817_v59 = vld [vmem:[%s6990_s1 + $0xf24] ss:$16 sps:$4 sm:$0xff]   ;;  %v4812_v60 = vld [vmem:[%s6990_s1 + $0xd20] ss:$16 sps:$4 sm:$0xff]  }
  0xcd   :  { %3511 = vmatprep.subr.bf16.mxu1 %v4751_v61  ;;  %v4815_v61 = vld [vmem:[%s6990_s1 + $0xf20] ss:$16 sps:$4 sm:$0xff]  }
  0xcf   :  { %3469 = vmatpush1.bf16.msra.mxu0 %v4746_v62  ;;  %v4820_v62 = vld [vmem:[%s6990_s1 + $0xd04] ss:$16 sps:$4 sm:$0xff]  }
  0xd0   :  { %3512 = vmatpush1.bf16.msra.mxu1 %v4749_v63  ;;  %3470 = vmatprep.subr.bf16.mxu0 %v4754_v0  ;;  %v4823_v63 = vld [vmem:[%s6990_s1 + $0xf04] ss:$16 sps:$4 sm:$0xff]   ;;  %v4818_v0 = vld [vmem:[%s6990_s1 + $0xd00] ss:$16 sps:$4 sm:$0xff]  }
  0xd1   :  { %3513 = vmatprep.subr.bf16.mxu1 %v4757_v1  ;;  %v4821_v1 = vld [vmem:[%s6990_s1 + $0xf00] ss:$16 sps:$4 sm:$0xff]  }
  0xd3   :  { %3471 = vmatpush1.bf16.msra.mxu0 %v4752_v2  ;;  %v4826_v2 = vld [vmem:[%s6990_s1 + $0xec] ss:$16 sps:$4 sm:$0xff]  }
  0xd4   :  { %3514 = vmatpush1.bf16.msra.mxu1 %v4755_v3  ;;  %3472 = vmatprep.subr.bf16.mxu0 %v4760_v4  ;;  %v4829_v3 = vld [vmem:[%s6990_s1 + $0x2ec] ss:$16 sps:$4 sm:$0xff]   ;;  %v6138_v4 = vcombine.low %v5907_v44, %v5915_v46 }
  0xd5   :  { %3515 = vmatprep.subr.bf16.mxu1 %v4763_v5  ;;  %v6142_v5 = vcombine.low %v5920_v47, %v5933_v50  ;;  %v4832_v44 = vld [vmem:[%s6990_s1 + $0xcc] ss:$16 sps:$4 sm:$0xff]   ;;  %v4830_v47 = vld [vmem:[%s6990_s1 + $0xc8] ss:$16 sps:$4 sm:$0xff]  }
  0xd6   :  { %v4835_v46 = vld [vmem:[%s6990_s1 + $0x2cc] ss:$16 sps:$4 sm:$0xff]   ;;  %v4833_v50 = vld [vmem:[%s6990_s1 + $0x2c8] ss:$16 sps:$4 sm:$0xff]  }
  0xd7   :  { %3473 = vmatpush1.bf16.msra.mxu0 %v4758_v6  ;;  %v4824_v6 = vld [vmem:[%s6990_s1 + $0xe8] ss:$16 sps:$4 sm:$0xff]  }
  0xd8   :  { %3516 = vmatpush1.bf16.msra.mxu1 %v4761_v7  ;;  %3474 = vmatprep.subr.bf16.mxu0 %v4766_v10  ;;  %v4827_v7 = vld [vmem:[%s6990_s1 + $0x2e8] ss:$16 sps:$4 sm:$0xff]   ;;  %v4838_v10 = vld [vmem:[%s6990_s1 + $0xac] ss:$16 sps:$4 sm:$0xff]  }
  0xd9   :  { %3517 = vmatprep.subr.bf16.mxu1 %v4769_v11  ;;  %v4841_v11 = vld [vmem:[%s6990_s1 + $0x2ac] ss:$16 sps:$4 sm:$0xff]  }
  0xdb   :  { %3475 = vmatpush1.bf16.msra.mxu0 %v4764_v12  ;;  %v4836_v12 = vld [vmem:[%s6990_s1 + $0xa8] ss:$16 sps:$4 sm:$0xff]  }
  0xdc   :  { %3518 = vmatpush1.bf16.msra.mxu1 %v4767_v13  ;;  %3476 = vmatprep.subr.bf16.mxu0 %v4772_v14  ;;  %v4839_v13 = vld [vmem:[%s6990_s1 + $0x2a8] ss:$16 sps:$4 sm:$0xff]   ;;  %v4844_v14 = vld [vmem:[%s6990_s1 + $0x8c] ss:$16 sps:$4 sm:$0xff]  }
  0xdd   :  { %3519 = vmatprep.subr.bf16.mxu1 %v4775_v15  ;;  %v4845_v15 = vld [vmem:[%s6990_s1 + $0x288] ss:$16 sps:$4 sm:$0xff]  }
  0xdf   :  { %3477 = vmatpush1.bf16.msra.mxu0 %v4770_v16  ;;  %v4850_v16 = vld [vmem:[%s6990_s1 + $0x6c] ss:$16 sps:$4 sm:$0xff]  }
  0xe0   :  { %3520 = vmatpush1.bf16.msra.mxu1 %v4773_v17  ;;  %3478 = vmatprep.subr.bf16.mxu0 %v4778_v18  ;;  %v4853_v17 = vld [vmem:[%s6990_s1 + $0x26c] ss:$16 sps:$4 sm:$0xff]   ;;  %v4848_v18 = vld [vmem:[%s6990_s1 + $0x68] ss:$16 sps:$4 sm:$0xff]  }
  0xe1   :  { %3521 = vmatprep.subr.bf16.mxu1 %v4781_v19  ;;  %v4851_v19 = vld [vmem:[%s6990_s1 + $0x268] ss:$16 sps:$4 sm:$0xff]  }
  0xe3   :  { %3479 = vmatpush2.bf16.msra.mxu0 %v4776_v22  ;;  %v4856_v22 = vld [vmem:[%s6990_s1 + $0x4c] ss:$16 sps:$4 sm:$0xff]  }
  0xe4   :  { %3522 = vmatpush2.bf16.msra.mxu1 %v4779_v23  ;;  %3480 = vmatprep.subr.bf16.mxu0 %v4784_v24  ;;  %v4859_v23 = vld [vmem:[%s6990_s1 + $0x24c] ss:$16 sps:$4 sm:$0xff]   ;;  %v4854_v24 = vld [vmem:[%s6990_s1 + $0x48] ss:$16 sps:$4 sm:$0xff]  }
  0xe5   :  { %3523 = vmatprep.subr.bf16.mxu1 %v4787_v25  ;;  %v4857_v25 = vld [vmem:[%s6990_s1 + $0x248] ss:$16 sps:$4 sm:$0xff]  }
  0xe7   :  { %3481 = vmatpush2.bf16.msra.mxu0 %v4782_v26  ;;  %v4862_v26 = vld [vmem:[%s6990_s1 + $0x2c] ss:$16 sps:$4 sm:$0xff]  }
  0xe8   :  { %3524 = vmatpush2.bf16.msra.mxu1 %v4785_v27  ;;  %3482 = vmatprep.subr.bf16.mxu0 %v4790_v32  ;;  %v4865_v27 = vld [vmem:[%s6990_s1 + $0x22c] ss:$16 sps:$4 sm:$0xff]   ;;  %v4860_v32 = vld [vmem:[%s6990_s1 + $0x28] ss:$16 sps:$4 sm:$0xff]  }
  0xe9   :  { %3525 = vmatprep.subr.bf16.mxu1 %v4793_v34  ;;  %v4863_v34 = vld [vmem:[%s6990_s1 + $0x228] ss:$16 sps:$4 sm:$0xff]  }
  0xeb   :  { %3483 = vmatpush2.bf16.msra.mxu0 %v4788_v36  ;;  %v4868_v36 = vld [vmem:[%s6990_s1 + $0xc] ss:$16 sps:$4 sm:$0xff]  }
  0xec   :  { %3526 = vmatpush2.bf16.msra.mxu1 %v4791_v37  ;;  %3484 = vmatprep.subr.bf16.mxu0 %v4796_v38  ;;  %v4871_v37 = vld [vmem:[%s6990_s1 + $0x20c] ss:$16 sps:$4 sm:$0xff]   ;;  %v4866_v38 = vld [vmem:[%s6990_s1 + $0x8] ss:$16 sps:$4 sm:$0xff]  }
  0xed   :  { %3527 = vmatprep.subr.bf16.mxu1 %v4799_v39  ;;  %v4869_v39 = vld [vmem:[%s6990_s1 + $0x208] ss:$16 sps:$4 sm:$0xff]  }
  0xef   :  { %3485 = vmatpush2.bf16.msra.mxu0 %v4794_v40  ;;  %v4874_v40 = vld [vmem:[%s6990_s1 + $0x1ec] ss:$16 sps:$4 sm:$0xff]  }
  0xf0   :  { %3528 = vmatpush2.bf16.msra.mxu1 %v4797_v42  ;;  %3486 = vmatprep.subr.bf16.mxu0 %v4802_v45  ;;  %v4877_v42 = vld [vmem:[%s6990_s1 + $0x3ec] ss:$16 sps:$4 sm:$0xff]   ;;  %v4872_v45 = vld [vmem:[%s6990_s1 + $0x1e8] ss:$16 sps:$4 sm:$0xff]  }
  0xf1   :  { %3529 = vmatprep.subr.bf16.mxu1 %v4805_v51  ;;  %v4875_v51 = vld [vmem:[%s6990_s1 + $0x3e8] ss:$16 sps:$4 sm:$0xff]  }
  0xf3   :  { %3487 = vmatpush2.bf16.msra.mxu0 %v4800_v28  ;;  %v4880_v28 = vld [vmem:[%s6990_s1 + $0x1cc] ss:$16 sps:$4 sm:$0xff]  }
  0xf4   :  { %3530 = vmatpush2.bf16.msra.mxu1 %v4803_v29  ;;  %3488 = vmatprep.subr.bf16.mxu0 %v4808_v52  ;;  %v4883_v29 = vld [vmem:[%s6990_s1 + $0x3cc] ss:$16 sps:$4 sm:$0xff]   ;;  %v4878_v52 = vld [vmem:[%s6990_s1 + $0x1c8] ss:$16 sps:$4 sm:$0xff]  }
  0xf5   :  { %3531 = vmatprep.subr.bf16.mxu1 %v4811_v54  ;;  %v4881_v54 = vld [vmem:[%s6990_s1 + $0x3c8] ss:$16 sps:$4 sm:$0xff]  }
  0xf7   :  { %3489 = vmatpush2.bf16.msra.mxu0 %v4806_v56  ;;  %v4886_v56 = vld [vmem:[%s6990_s1 + $0x1ac] ss:$16 sps:$4 sm:$0xff]  }
  0xf8   :  { %3532 = vmatpush2.bf16.msra.mxu1 %v4809_v57  ;;  %3490 = vmatprep.subr.bf16.mxu0 %v4814_v58  ;;  %v4889_v57 = vld [vmem:[%s6990_s1 + $0x3ac] ss:$16 sps:$4 sm:$0xff]   ;;  %v4884_v58 = vld [vmem:[%s6990_s1 + $0x1a8] ss:$16 sps:$4 sm:$0xff]  }
  0xf9   :  { %3533 = vmatprep.subr.bf16.mxu1 %v4817_v59  ;;  %v4887_v59 = vld [vmem:[%s6990_s1 + $0x3a8] ss:$16 sps:$4 sm:$0xff]  }
  0xfb   :  { %3491 = vmatpush2.bf16.msra.mxu0 %v4812_v60  ;;  %v4892_v60 = vld [vmem:[%s6990_s1 + $0x18c] ss:$16 sps:$4 sm:$0xff]  }
  0xfc   :  { %3534 = vmatpush2.bf16.msra.mxu1 %v4815_v61  ;;  %3492 = vmatprep.subr.bf16.mxu0 %v4820_v62  ;;  %v4895_v61 = vld [vmem:[%s6990_s1 + $0x38c] ss:$16 sps:$4 sm:$0xff]   ;;  %v4890_v62 = vld [vmem:[%s6990_s1 + $0x188] ss:$16 sps:$4 sm:$0xff]  }
  0xfd   :  { %3535 = vmatprep.subr.bf16.mxu1 %v4823_v63  ;;  %v4893_v63 = vld [vmem:[%s6990_s1 + $0x388] ss:$16 sps:$4 sm:$0xff]  }
  0xff   :  { %3493 = vmatpush2.bf16.msra.mxu0 %v4818_v0  ;;  %v4898_v0 = vld [vmem:[%s6990_s1 + $0x16c] ss:$16 sps:$4 sm:$0xff]  }
 0x100   :  { %3536 = vmatpush2.bf16.msra.mxu1 %v4821_v1  ;;  %3548 = vmatprep.subr.bf16.mxu0 %v4826_v2  ;;  %v4901_v1 = vld [vmem:[%s6990_s1 + $0x36c] ss:$16 sps:$4 sm:$0xff]   ;;  %v4896_v2 = vld [vmem:[%s6990_s1 + $0x168] ss:$16 sps:$4 sm:$0xff]  }
 0x101   :  { %3591 = vmatprep.subr.bf16.mxu1 %v4829_v3  ;;  %v4899_v3 = vld [vmem:[%s6990_s1 + $0x368] ss:$16 sps:$4 sm:$0xff]  }
 0x102   :  { %3495 = vmatmul.mubr.bf16.vlgmr.msra.gmra.mxu0 %v6138_v4 }
 0x103   :  { %3538 = vmatmul.mubr.bf16.vlgmr.msra.gmra.mxu1 %v6142_v5  ;;  %3549 = vmatpush1.bf16.msra.mxu0 %v4824_v6  ;;  %v4904_v6 = vld [vmem:[%s6990_s1 + $0x14c] ss:$16 sps:$4 sm:$0xff]  }
 0x104   :  { %3592 = vmatpush1.bf16.msra.mxu1 %v4827_v7  ;;  %3550 = vmatprep.subr.bf16.mxu0 %v4832_v44  ;;  %v4907_v7 = vld [vmem:[%s6990_s1 + $0x34c] ss:$16 sps:$4 sm:$0xff]   ;;  %v4902_v44 = vld [vmem:[%s6990_s1 + $0x148] ss:$16 sps:$4 sm:$0xff]  }
 0x105   :  { %3593 = vmatprep.subr.bf16.mxu1 %v4835_v46  ;;  %3580 = vmatprep.mubr.bf16.mxu0 %v5387_v53  ;;  %v4847_v53 = vld [vmem:[%s6990_s1 + $0x28c] ss:$16 sps:$4 sm:$0xff]   ;;  %v4905_v46 = vld [vmem:[%s6990_s1 + $0x348] ss:$16 sps:$4 sm:$0xff]  }
 0x106   :  { %3623 = vmatprep.mubr.bf16.mxu1 %v5392_v55  ;;  %v4842_v55 = vld [vmem:[%s6990_s1 + $0x88] ss:$16 sps:$4 sm:$0xff]  }
 0x107   :  { %3551 = vmatpush1.bf16.msra.mxu0 %v4830_v47  ;;  %v4910_v47 = vld [vmem:[%s6990_s1 + $0x12c] ss:$16 sps:$4 sm:$0xff]  }
 0x108   :  { %3594 = vmatpush1.bf16.msra.mxu1 %v4833_v50  ;;  %3552 = vmatprep.subr.bf16.mxu0 %v4838_v10  ;;  %v4913_v50 = vld [vmem:[%s6990_s1 + $0x32c] ss:$16 sps:$4 sm:$0xff]   ;;  %v4908_v10 = vld [vmem:[%s6990_s1 + $0x128] ss:$16 sps:$4 sm:$0xff]  }
 0x109   :  { %3595 = vmatprep.subr.bf16.mxu1 %v4841_v11  ;;  %v4911_v11 = vld [vmem:[%s6990_s1 + $0x328] ss:$16 sps:$4 sm:$0xff]  }
 0x10b   :  { %3553 = vmatpush1.bf16.msra.mxu0 %v4836_v12  ;;  %v4916_v12 = vld [vmem:[%s6990_s1 + $0x10c] ss:$16 sps:$4 sm:$0xff]  }
 0x10c   :  { %3596 = vmatpush1.bf16.msra.mxu1 %v4839_v13  ;;  %3554 = vmatprep.subr.bf16.mxu0 %v4844_v14  ;;  %v4919_v13 = vld [vmem:[%s6990_s1 + $0x30c] ss:$16 sps:$4 sm:$0xff]   ;;  %v4914_v14 = vld [vmem:[%s6990_s1 + $0x108] ss:$16 sps:$4 sm:$0xff]  }
 0x10d   :  { %3597 = vmatprep.subr.bf16.mxu1 %v4847_v53  ;;  %v4917_v53 = vld [vmem:[%s6990_s1 + $0x308] ss:$16 sps:$4 sm:$0xff]  }
 0x10f   :  { %3555 = vmatpush1.bf16.msra.mxu0 %v4842_v55  ;;  %v4922_v55 = vld [vmem:[%s6990_s1 + $0x4ec] ss:$16 sps:$4 sm:$0xff]  }
 0x110   :  { %3598 = vmatpush1.bf16.msra.mxu1 %v4845_v15  ;;  %3556 = vmatprep.subr.bf16.mxu0 %v4850_v16  ;;  %v4925_v15 = vld [vmem:[%s6990_s1 + $0x6ec] ss:$16 sps:$4 sm:$0xff]   ;;  %v4920_v16 = vld [vmem:[%s6990_s1 + $0x4e8] ss:$16 sps:$4 sm:$0xff]  }
 0x111   :  { %3599 = vmatprep.subr.bf16.mxu1 %v4853_v17  ;;  %v4923_v17 = vld [vmem:[%s6990_s1 + $0x6e8] ss:$16 sps:$4 sm:$0xff]  }
 0x113   :  { %3557 = vmatpush1.bf16.msra.mxu0 %v4848_v18  ;;  %v4928_v18 = vld [vmem:[%s6990_s1 + $0x4cc] ss:$16 sps:$4 sm:$0xff]  }
 0x114   :  { %3600 = vmatpush1.bf16.msra.mxu1 %v4851_v19  ;;  %3558 = vmatprep.subr.bf16.mxu0 %v4856_v22  ;;  %v4931_v19 = vld [vmem:[%s6990_s1 + $0x6cc] ss:$16 sps:$4 sm:$0xff]   ;;  %v4926_v22 = vld [vmem:[%s6990_s1 + $0x4c8] ss:$16 sps:$4 sm:$0xff]  }
 0x115   :  { %3601 = vmatprep.subr.bf16.mxu1 %v4859_v23  ;;  %v4929_v23 = vld [vmem:[%s6990_s1 + $0x6c8] ss:$16 sps:$4 sm:$0xff]  }
 0x117   :  { %3559 = vmatpush1.bf16.msra.mxu0 %v4854_v24  ;;  %v4934_v24 = vld [vmem:[%s6990_s1 + $0x4ac] ss:$16 sps:$4 sm:$0xff]  }
 0x118   :  { %3602 = vmatpush1.bf16.msra.mxu1 %v4857_v25  ;;  %3560 = vmatprep.subr.bf16.mxu0 %v4862_v26  ;;  %v4937_v25 = vld [vmem:[%s6990_s1 + $0x6ac] ss:$16 sps:$4 sm:$0xff]  }
 0x119   :  { %3603 = vmatprep.subr.bf16.mxu1 %v4865_v27  ;;  %v4940_v26 = vld [vmem:[%s6990_s1 + $0x48c] ss:$16 sps:$4 sm:$0xff]   ;;  %v4941_v27 = vld [vmem:[%s6990_s1 + $0x688] ss:$16 sps:$4 sm:$0xff]  }
 0x11b   :  { %3561 = vmatpush1.bf16.msra.mxu0 %v4860_v32  ;;  %v4946_v32 = vld [vmem:[%s6990_s1 + $0x46c] ss:$16 sps:$4 sm:$0xff]  }
 0x11c   :  { %3604 = vmatpush1.bf16.msra.mxu1 %v4863_v34  ;;  %3562 = vmatprep.subr.bf16.mxu0 %v4868_v36  ;;  %v4949_v34 = vld [vmem:[%s6990_s1 + $0x66c] ss:$16 sps:$4 sm:$0xff]   ;;  %v4944_v36 = vld [vmem:[%s6990_s1 + $0x468] ss:$16 sps:$4 sm:$0xff]  }
 0x11d   :  { %3605 = vmatprep.subr.bf16.mxu1 %v4871_v37  ;;  %v4947_v37 = vld [vmem:[%s6990_s1 + $0x668] ss:$16 sps:$4 sm:$0xff]  }
 0x11f   :  { %3563 = vmatpush1.bf16.msra.mxu0 %v4866_v38  ;;  %v4952_v38 = vld [vmem:[%s6990_s1 + $0x44c] ss:$16 sps:$4 sm:$0xff]  }
 0x120   :  { %3606 = vmatpush1.bf16.msra.mxu1 %v4869_v39  ;;  %3564 = vmatprep.subr.bf16.mxu0 %v4874_v40  ;;  %v4955_v39 = vld [vmem:[%s6990_s1 + $0x64c] ss:$16 sps:$4 sm:$0xff]   ;;  %v4950_v40 = vld [vmem:[%s6990_s1 + $0x448] ss:$16 sps:$4 sm:$0xff]  }
 0x121   :  { %3607 = vmatprep.subr.bf16.mxu1 %v4877_v42  ;;  %v4953_v42 = vld [vmem:[%s6990_s1 + $0x648] ss:$16 sps:$4 sm:$0xff]  }
 0x123   :  { %3565 = vmatpush2.bf16.msra.mxu0 %v4872_v45  ;;  %v4958_v45 = vld [vmem:[%s6990_s1 + $0x42c] ss:$16 sps:$4 sm:$0xff]  }
 0x124   :  { %3608 = vmatpush2.bf16.msra.mxu1 %v4875_v51  ;;  %3566 = vmatprep.subr.bf16.mxu0 %v4880_v28  ;;  %v4961_v51 = vld [vmem:[%s6990_s1 + $0x62c] ss:$16 sps:$4 sm:$0xff]   ;;  %v4956_v28 = vld [vmem:[%s6990_s1 + $0x428] ss:$16 sps:$4 sm:$0xff]  }
 0x125   :  { %3609 = vmatprep.subr.bf16.mxu1 %v4883_v29  ;;  %v4959_v29 = vld [vmem:[%s6990_s1 + $0x628] ss:$16 sps:$4 sm:$0xff]  }
 0x127   :  { %3567 = vmatpush2.bf16.msra.mxu0 %v4878_v52  ;;  %v4964_v52 = vld [vmem:[%s6990_s1 + $0x40c] ss:$16 sps:$4 sm:$0xff]  }
 0x128   :  { %3610 = vmatpush2.bf16.msra.mxu1 %v4881_v54  ;;  %3568 = vmatprep.subr.bf16.mxu0 %v4886_v56  ;;  %v4967_v54 = vld [vmem:[%s6990_s1 + $0x60c] ss:$16 sps:$4 sm:$0xff]   ;;  %v4962_v56 = vld [vmem:[%s6990_s1 + $0x408] ss:$16 sps:$4 sm:$0xff]  }
 0x129   :  { %3611 = vmatprep.subr.bf16.mxu1 %v4889_v57  ;;  %v4965_v57 = vld [vmem:[%s6990_s1 + $0x608] ss:$16 sps:$4 sm:$0xff]  }
 0x12b   :  { %3569 = vmatpush2.bf16.msra.mxu0 %v4884_v58  ;;  %v4970_v58 = vld [vmem:[%s6990_s1 + $0x5ec] ss:$16 sps:$4 sm:$0xff]  }
 0x12c   :  { %3612 = vmatpush2.bf16.msra.mxu1 %v4887_v59  ;;  %3570 = vmatprep.subr.bf16.mxu0 %v4892_v60  ;;  %v4973_v59 = vld [vmem:[%s6990_s1 + $0x7ec] ss:$16 sps:$4 sm:$0xff]   ;;  %v4968_v60 = vld [vmem:[%s6990_s1 + $0x5e8] ss:$16 sps:$4 sm:$0xff]  }
 0x12d   :  { %3613 = vmatprep.subr.bf16.mxu1 %v4895_v61  ;;  %v4971_v61 = vld [vmem:[%s6990_s1 + $0x7e8] ss:$16 sps:$4 sm:$0xff]  }
 0x12f   :  { %3571 = vmatpush2.bf16.msra.mxu0 %v4890_v62  ;;  %v4976_v62 = vld [vmem:[%s6990_s1 + $0x5cc] ss:$16 sps:$4 sm:$0xff]  }
 0x130   :  { %3614 = vmatpush2.bf16.msra.mxu1 %v4893_v63  ;;  %3572 = vmatprep.subr.bf16.mxu0 %v4898_v0  ;;  %v4979_v63 = vld [vmem:[%s6990_s1 + $0x7cc] ss:$16 sps:$4 sm:$0xff]   ;;  %v4974_v0 = vld [vmem:[%s6990_s1 + $0x5c8] ss:$16 sps:$4 sm:$0xff]  }
 0x131   :  { %3615 = vmatprep.subr.bf16.mxu1 %v4901_v1  ;;  %v4977_v1 = vld [vmem:[%s6990_s1 + $0x7c8] ss:$16 sps:$4 sm:$0xff]  }
 0x133   :  { %3573 = vmatpush2.bf16.msra.mxu0 %v4896_v2  ;;  %v4982_v2 = vld [vmem:[%s6990_s1 + $0x5ac] ss:$16 sps:$4 sm:$0xff]  }
 0x134   :  { %3616 = vmatpush2.bf16.msra.mxu1 %v4899_v3  ;;  %3574 = vmatprep.subr.bf16.mxu0 %v4904_v6  ;;  %v4985_v3 = vld [vmem:[%s6990_s1 + $0x7ac] ss:$16 sps:$4 sm:$0xff]   ;;  %v4980_v6 = vld [vmem:[%s6990_s1 + $0x5a8] ss:$16 sps:$4 sm:$0xff]  }
 0x135   :  { %3617 = vmatprep.subr.bf16.mxu1 %v4907_v7  ;;  %v4983_v7 = vld [vmem:[%s6990_s1 + $0x7a8] ss:$16 sps:$4 sm:$0xff]  }
 0x137   :  { %3575 = vmatpush2.bf16.msra.mxu0 %v4902_v44  ;;  %v4988_v44 = vld [vmem:[%s6990_s1 + $0x58c] ss:$16 sps:$4 sm:$0xff]  }
 0x138   :  { %3618 = vmatpush2.bf16.msra.mxu1 %v4905_v46  ;;  %3576 = vmatprep.subr.bf16.mxu0 %v4910_v47  ;;  %v4991_v46 = vld [vmem:[%s6990_s1 + $0x78c] ss:$16 sps:$4 sm:$0xff]   ;;  %v4986_v47 = vld [vmem:[%s6990_s1 + $0x588] ss:$16 sps:$4 sm:$0xff]  }
 0x139   :  { %3619 = vmatprep.subr.bf16.mxu1 %v4913_v50  ;;  %v4989_v50 = vld [vmem:[%s6990_s1 + $0x788] ss:$16 sps:$4 sm:$0xff]  }
 0x13b   :  { %3577 = vmatpush2.bf16.msra.mxu0 %v4908_v10  ;;  %v4994_v10 = vld [vmem:[%s6990_s1 + $0x56c] ss:$16 sps:$4 sm:$0xff]  }
 0x13c   :  { %3620 = vmatpush2.bf16.msra.mxu1 %v4911_v11  ;;  %3578 = vmatprep.subr.bf16.mxu0 %v4916_v12  ;;  %v4997_v11 = vld [vmem:[%s6990_s1 + $0x76c] ss:$16 sps:$4 sm:$0xff]   ;;  %v4992_v12 = vld [vmem:[%s6990_s1 + $0x568] ss:$16 sps:$4 sm:$0xff]  }
 0x13d   :  { %3621 = vmatprep.subr.bf16.mxu1 %v4919_v13  ;;  %v4995_v13 = vld [vmem:[%s6990_s1 + $0x768] ss:$16 sps:$4 sm:$0xff]  }
 0x13f   :  { %3579 = vmatpush2.bf16.msra.mxu0 %v4914_v14  ;;  %v5000_v14 = vld [vmem:[%s6990_s1 + $0x54c] ss:$16 sps:$4 sm:$0xff]  }
 0x140   :  { %3622 = vmatpush2.bf16.msra.mxu1 %v4917_v53  ;;  %3634 = vmatprep.subr.bf16.mxu0 %v4922_v55  ;;  %v5003_v53 = vld [vmem:[%s6990_s1 + $0x74c] ss:$16 sps:$4 sm:$0xff]   ;;  %v4998_v55 = vld [vmem:[%s6990_s1 + $0x548] ss:$16 sps:$4 sm:$0xff]  }
 0x141   :  { %3677 = vmatprep.subr.bf16.mxu1 %v4925_v15  ;;  %v5001_v15 = vld [vmem:[%s6990_s1 + $0x748] ss:$16 sps:$4 sm:$0xff]  }
 0x142   :  { %3581 = vmatmul.mubr.bf16.vlgmr.msra.gmra.mxu0 %v5444_v8  ;;  %v4932_v8 = vld [vmem:[%s6990_s1 + $0x4a8] ss:$16 sps:$4 sm:$0xff]  }
 0x143   :  { %3624 = vmatmul.mubr.bf16.vlgmr.msra.gmra.mxu1 %v5446_v9  ;;  %3635 = vmatpush1.bf16.msra.mxu0 %v4920_v16  ;;  %v4935_v9 = vld [vmem:[%s6990_s1 + $0x6a8] ss:$16 sps:$4 sm:$0xff]   ;;  %v5006_v16 = vld [vmem:[%s6990_s1 + $0x52c] ss:$16 sps:$4 sm:$0xff]  }
 0x144   :  { %3678 = vmatpush1.bf16.msra.mxu1 %v4923_v17  ;;  %3636 = vmatprep.subr.bf16.mxu0 %v4928_v18  ;;  %v5009_v17 = vld [vmem:[%s6990_s1 + $0x72c] ss:$16 sps:$4 sm:$0xff]   ;;  %v5004_v18 = vld [vmem:[%s6990_s1 + $0x528] ss:$16 sps:$4 sm:$0xff]  }
 0x145   :  { %3679 = vmatprep.subr.bf16.mxu1 %v4931_v19  ;;  %3666 = vmatprep.mubr.bf16.mxu0 %v5553_v41  ;;  %v4943_v41 = vld [vmem:[%s6990_s1 + $0x68c] ss:$16 sps:$4 sm:$0xff]   ;;  %v5007_v19 = vld [vmem:[%s6990_s1 + $0x728] ss:$16 sps:$4 sm:$0xff]  }
 0x146   :  { %3709 = vmatprep.mubr.bf16.mxu1 %v5560_v43  ;;  %v4938_v43 = vld [vmem:[%s6990_s1 + $0x488] ss:$16 sps:$4 sm:$0xff]  }
 0x147   :  { %3637 = vmatpush1.bf16.msra.mxu0 %v4926_v22  ;;  %v5012_v22 = vld [vmem:[%s6990_s1 + $0x50c] ss:$16 sps:$4 sm:$0xff]  }
 0x148   :  { %3680 = vmatpush1.bf16.msra.mxu1 %v4929_v23  ;;  %3638 = vmatprep.subr.bf16.mxu0 %v4934_v24  ;;  %v5015_v23 = vld [vmem:[%s6990_s1 + $0x70c] ss:$16 sps:$4 sm:$0xff]   ;;  %v5010_v24 = vld [vmem:[%s6990_s1 + $0x508] ss:$16 sps:$4 sm:$0xff]  }
 0x149   :  { %3681 = vmatprep.subr.bf16.mxu1 %v4937_v25  ;;  %v5013_v25 = vld [vmem:[%s6990_s1 + $0x708] ss:$16 sps:$4 sm:$0xff]  }
 0x14b   :  { %3639 = vmatpush1.bf16.msra.mxu0 %v4932_v8  ;;  %v5018_v8 = vld [vmem:[%s6990_s1 + $0x8ec] ss:$16 sps:$4 sm:$0xff]  }
 0x14c   :  { %3682 = vmatpush1.bf16.msra.mxu1 %v4935_v9  ;;  %3640 = vmatprep.subr.bf16.mxu0 %v4940_v26  ;;  %v5021_v9 = vld [vmem:[%s6990_s1 + $0xaec] ss:$16 sps:$4 sm:$0xff]   ;;  %v5016_v26 = vld [vmem:[%s6990_s1 + $0x8e8] ss:$16 sps:$4 sm:$0xff]  }
 0x14d   :  { %3683 = vmatprep.subr.bf16.mxu1 %v4943_v41  ;;  %v5019_v41 = vld [vmem:[%s6990_s1 + $0xae8] ss:$16 sps:$4 sm:$0xff]  }
 0x14f   :  { %3641 = vmatpush1.bf16.msra.mxu0 %v4938_v43  ;;  %v5024_v43 = vld [vmem:[%s6990_s1 + $0x8cc] ss:$16 sps:$4 sm:$0xff]  }
 0x150   :  { %3684 = vmatpush1.bf16.msra.mxu1 %v4941_v27  ;;  %3642 = vmatprep.subr.bf16.mxu0 %v4946_v32  ;;  %v5027_v27 = vld [vmem:[%s6990_s1 + $0xacc] ss:$16 sps:$4 sm:$0xff]   ;;  %v5022_v32 = vld [vmem:[%s6990_s1 + $0x8c8] ss:$16 sps:$4 sm:$0xff]  }
 0x151   :  { %3685 = vmatprep.subr.bf16.mxu1 %v4949_v34  ;;  %v5025_v34 = vld [vmem:[%s6990_s1 + $0xac8] ss:$16 sps:$4 sm:$0xff]  }
 0x153   :  { %3643 = vmatpush1.bf16.msra.mxu0 %v4944_v36  ;;  %v5030_v36 = vld [vmem:[%s6990_s1 + $0x8ac] ss:$16 sps:$4 sm:$0xff]  }
 0x154   :  { %3686 = vmatpush1.bf16.msra.mxu1 %v4947_v37  ;;  %3644 = vmatprep.subr.bf16.mxu0 %v4952_v38  ;;  %v5031_v37 = vld [vmem:[%s6990_s1 + $0xaa8] ss:$16 sps:$4 sm:$0xff]   ;;  %v5036_v38 = vld [vmem:[%s6990_s1 + $0x88c] ss:$16 sps:$4 sm:$0xff]  }
 0x155   :  { %3687 = vmatprep.subr.bf16.mxu1 %v4955_v39  ;;  %v5037_v39 = vld [vmem:[%s6990_s1 + $0xa88] ss:$16 sps:$4 sm:$0xff]  }
 0x157   :  { %3645 = vmatpush1.bf16.msra.mxu0 %v4950_v40  ;;  %v5042_v40 = vld [vmem:[%s6990_s1 + $0x86c] ss:$16 sps:$4 sm:$0xff]  }
 0x158   :  { %3688 = vmatpush1.bf16.msra.mxu1 %v4953_v42  ;;  %3646 = vmatprep.subr.bf16.mxu0 %v4958_v45  ;;  %v5045_v42 = vld [vmem:[%s6990_s1 + $0xa6c] ss:$16 sps:$4 sm:$0xff]   ;;  %v5040_v45 = vld [vmem:[%s6990_s1 + $0x868] ss:$16 sps:$4 sm:$0xff]  }
 0x159   :  { %3689 = vmatprep.subr.bf16.mxu1 %v4961_v51  ;;  %v5043_v51 = vld [vmem:[%s6990_s1 + $0xa68] ss:$16 sps:$4 sm:$0xff]  }
 0x15b   :  { %3647 = vmatpush1.bf16.msra.mxu0 %v4956_v28  ;;  %v5048_v28 = vld [vmem:[%s6990_s1 + $0x84c] ss:$16 sps:$4 sm:$0xff]  }
 0x15c   :  { %3690 = vmatpush1.bf16.msra.mxu1 %v4959_v29  ;;  %3648 = vmatprep.subr.bf16.mxu0 %v4964_v52  ;;  %v5051_v29 = vld [vmem:[%s6990_s1 + $0xa4c] ss:$16 sps:$4 sm:$0xff]   ;;  %v5046_v52 = vld [vmem:[%s6990_s1 + $0x848] ss:$16 sps:$4 sm:$0xff]  }
 0x15d   :  { %3691 = vmatprep.subr.bf16.mxu1 %v4967_v54  ;;  %v5049_v54 = vld [vmem:[%s6990_s1 + $0xa48] ss:$16 sps:$4 sm:$0xff]  }
 0x15f   :  { %3649 = vmatpush1.bf16.msra.mxu0 %v4962_v56  ;;  %v5054_v56 = vld [vmem:[%s6990_s1 + $0x82c] ss:$16 sps:$4 sm:$0xff]  }
 0x160   :  { %3692 = vmatpush1.bf16.msra.mxu1 %v4965_v57  ;;  %3650 = vmatprep.subr.bf16.mxu0 %v4970_v58  ;;  %v5057_v57 = vld [vmem:[%s6990_s1 + $0xa2c] ss:$16 sps:$4 sm:$0xff]   ;;  %v5052_v58 = vld [vmem:[%s6990_s1 + $0x828] ss:$16 sps:$4 sm:$0xff]  }
 0x161   :  { %3693 = vmatprep.subr.bf16.mxu1 %v4973_v59  ;;  %v5055_v59 = vld [vmem:[%s6990_s1 + $0xa28] ss:$16 sps:$4 sm:$0xff]  }
 0x163   :  { %3651 = vmatpush2.bf16.msra.mxu0 %v4968_v60  ;;  %v6618_v60 = vpop.f32.mrf.mxu0 }
 0x164   :  { %3694 = vmatpush2.bf16.msra.mxu1 %v4971_v61  ;;  %3652 = vmatprep.subr.bf16.mxu0 %v4976_v62  ;;  %v6620_v61 = vpop.f32.mrf.mxu1  ;;  %v5060_v62 = vld [vmem:[%s6990_s1 + $0x80c] ss:$16 sps:$4 sm:$0xff]  }
 0x165   :  { %3695 = vmatprep.subr.bf16.mxu1 %v4979_v63  ;;  %v5063_v63 = vld [vmem:[%s6990_s1 + $0xa0c] ss:$16 sps:$4 sm:$0xff]  }
 0x167   :  { %3653 = vmatpush2.bf16.msra.mxu0 %v4974_v0  ;;  %v5058_v0 = vld [vmem:[%s6990_s1 + $0x808] ss:$16 sps:$4 sm:$0xff]  }
 0x168   :  { %3696 = vmatpush2.bf16.msra.mxu1 %v4977_v1  ;;  %3654 = vmatprep.subr.bf16.mxu0 %v4982_v2  ;;  %v5061_v1 = vld [vmem:[%s6990_s1 + $0xa08] ss:$16 sps:$4 sm:$0xff]   ;;  %v6634_v2 = vpop.f32.mrf.mxu0 }
 0x169   :  { %3697 = vmatprep.subr.bf16.mxu1 %v4985_v3  ;;  %v6636_v3 = vpop.f32.mrf.mxu1 }
 0x16b   :  { %3655 = vmatpush2.bf16.msra.mxu0 %v4980_v6  ;;  %v5066_v6 = vld [vmem:[%s6990_s1 + $0x9ec] ss:$16 sps:$4 sm:$0xff]  }
 0x16c   :  { %3698 = vmatpush2.bf16.msra.mxu1 %v4983_v7  ;;  %3656 = vmatprep.subr.bf16.mxu0 %v4988_v44  ;;  %v5069_v7 = vld [vmem:[%s6990_s1 + $0xbec] ss:$16 sps:$4 sm:$0xff]   ;;  %v5064_v44 = vld [vmem:[%s6990_s1 + $0x9e8] ss:$16 sps:$4 sm:$0xff]  }
 0x16d   :  { %3699 = vmatprep.subr.bf16.mxu1 %v4991_v46  ;;  %v5067_v46 = vld [vmem:[%s6990_s1 + $0xbe8] ss:$16 sps:$4 sm:$0xff]  }
 0x16f   :  { %3657 = vmatpush2.bf16.msra.mxu0 %v4986_v47  ;;  %v6650_v47 = vpop.f32.mrf.mxu0 }
 0x170   :  { %3700 = vmatpush2.bf16.msra.mxu1 %v4989_v50  ;;  %3658 = vmatprep.subr.bf16.mxu0 %v4994_v10  ;;  %v6652_v50 = vpop.f32.mrf.mxu1  ;;  %v5072_v10 = vld [vmem:[%s6990_s1 + $0x9cc] ss:$16 sps:$4 sm:$0xff]  }
 0x171   :  { %3701 = vmatprep.subr.bf16.mxu1 %v4997_v11  ;;  %v5075_v11 = vld [vmem:[%s6990_s1 + $0xbcc] ss:$16 sps:$4 sm:$0xff]  }
 0x173   :  { %3659 = vmatpush2.bf16.msra.mxu0 %v4992_v12  ;;  %v544_v12 = vlaneseq }
 0x174   :  { %3702 = vmatpush2.bf16.msra.mxu1 %v4995_v13  ;;  %3660 = vmatprep.subr.bf16.mxu0 %v5000_v14  ;;  %v5070_v13 = vld [vmem:[%s6990_s1 + $0x9c8] ss:$16 sps:$4 sm:$0xff]  }
 0x175   :  { %3703 = vmatprep.subr.bf16.mxu1 %v5003_v53  ;;  %v5073_v14 = vld [vmem:[%s6990_s1 + $0xbc8] ss:$16 sps:$4 sm:$0xff]   ;;  %v3244_v53 = vpop.f32.mrf.mxu0 }
 0x177   :  { %3661 = vmatpush2.bf16.msra.mxu0 %v4998_v55  ;;  %v6666_v55 = vpop.f32.mrf.mxu1 }
 0x178   :  { %3704 = vmatpush2.bf16.msra.mxu1 %v5001_v15  ;;  %3662 = vmatprep.subr.bf16.mxu0 %v5006_v16  ;;  %v5078_v15 = vld [vmem:[%s6990_s1 + $0x9ac] ss:$16 sps:$4 sm:$0xff]  }
 0x179   :  { %3705 = vmatprep.subr.bf16.mxu1 %v5009_v17  ;;  %v5081_v16 = vld [vmem:[%s6990_s1 + $0xbac] ss:$16 sps:$4 sm:$0xff]   ;;  %v6674_v17 = vshrl.u32 %v544_v12, 7  ;;  %v5106_v12 = vld [vmem:[%s6990_s1 + $0x908] ss:$16 sps:$4 sm:$0xff]  }
 0x17b   :  { %3663 = vmatpush2.bf16.msra.mxu0 %v5004_v18  ;;  %v3324_v18 = vpop.f32.mrf.mxu0 }
 0x17c   :  { %3706 = vmatpush2.bf16.msra.mxu1 %v5007_v19  ;;  %3664 = vmatprep.subr.bf16.mxu0 %v5012_v22  ;;  %v6676_v19 = vpop.f32.mrf.mxu1  ;;  %v5076_v22 = vld [vmem:[%s6990_s1 + $0x9a8] ss:$16 sps:$4 sm:$0xff]  }
 0x17d   :  { %3707 = vmatprep.subr.bf16.mxu1 %v5015_v23  ;;  %v5079_v23 = vld [vmem:[%s6990_s1 + $0xba8] ss:$16 sps:$4 sm:$0xff]  }
 0x17f   :  { %3665 = vmatpush2.bf16.msra.mxu0 %v5010_v24  ;;  %v5084_v24 = vld [vmem:[%s6990_s1 + $0x98c] ss:$16 sps:$4 sm:$0xff]  }
 0x180   :  { %3708 = vmatpush2.bf16.msra.mxu1 %v5013_v25  ;;  %3720 = vmatprep.subr.bf16.mxu0 %v5018_v8  ;;  %v5087_v25 = vld [vmem:[%s6990_s1 + $0xb8c] ss:$16 sps:$4 sm:$0xff]   ;;  %v546_v8 = vsub.s32 0, %v6674_v17 }
 0x181   :  { %3763 = vmatprep.subr.bf16.mxu1 %v5021_v9  ;;  %v6694_v9 = vld [vmem:[%s6992_s2] sm:$0xf] }
 0x182   :  { %3667 = vmatmul.mubr.bf16.vlgmr.msra.gmra.mxu0 %v5674_v20  ;;  %v5033_v20 = vld [vmem:[%s6990_s1 + $0xaac] ss:$16 sps:$4 sm:$0xff]  }
 0x183   :  { %3710 = vmatmul.mubr.bf16.vlgmr.msra.gmra.mxu1 %v5678_v21  ;;  %3721 = vmatpush1.bf16.msra.mxu0 %v5016_v26  ;;  %v5028_v21 = vld [vmem:[%s6990_s1 + $0x8a8] ss:$16 sps:$4 sm:$0xff]   ;;  %v3326_v26 = vpop.f32.mrf.mxu0 }
 0x184   :  { %3764 = vmatpush1.bf16.msra.mxu1 %v5019_v41  ;;  %3722 = vmatprep.subr.bf16.mxu0 %v5024_v43  ;;  %v6696_v41 = vpop.f32.mrf.mxu1  ;;  %v550_v43 = vsub.s32 1, %v6674_v17 }
 0x185   :  { %3765 = vmatprep.subr.bf16.mxu1 %v5027_v27  ;;  %3752 = vmatprep.mubr.bf16.mxu0 %v5725_v33  ;;  %v5039_v33 = vld [vmem:[%s6990_s1 + $0xa8c] ss:$16 sps:$4 sm:$0xff]   ;;  %v5082_v27 = vld [vmem:[%s6990_s1 + $0x988] ss:$16 sps:$4 sm:$0xff]  }
 0x186   :  { %3795 = vmatprep.mubr.bf16.mxu1 %v5732_v35  ;;  %v5034_v35 = vld [vmem:[%s6990_s1 + $0x888] ss:$16 sps:$4 sm:$0xff]  }
 0x187   :  { %3723 = vmatpush1.bf16.msra.mxu0 %v5022_v32  ;;  %v5085_v32 = vld [vmem:[%s6990_s1 + $0xb88] ss:$16 sps:$4 sm:$0xff]  }
 0x188   :  { %3766 = vmatpush1.bf16.msra.mxu1 %v5025_v34  ;;  %3724 = vmatprep.subr.bf16.mxu0 %v5030_v36  ;;  %v5090_v34 = vld [vmem:[%s6990_s1 + $0x96c] ss:$16 sps:$4 sm:$0xff]  }
 0x189   :  { %3767 = vmatprep.subr.bf16.mxu1 %v5033_v20  ;;  %v5093_v36 = vld [vmem:[%s6990_s1 + $0xb6c] ss:$16 sps:$4 sm:$0xff]   ;;  %v547_v20 = vrot.slane %v6694_v9, %v546_v8 }
 0x18b   :  { %3725 = vmatpush1.bf16.msra.mxu0 %v5028_v21  ;;  %v3328_v21 = vpop.f32.mrf.mxu0 }
 0x18c   :  { %3768 = vmatpush1.bf16.msra.mxu1 %v5031_v37  ;;  %3726 = vmatprep.subr.bf16.mxu0 %v5036_v38  ;;  %v3371_v37 = vpop.f32.mrf.mxu1  ;;  %v551_v38 = vrot.slane %v6694_v9, %v550_v43 }
 0x18d   :  { %3769 = vmatprep.subr.bf16.mxu1 %v5039_v33  ;;  %v5088_v33 = vld [vmem:[%s6990_s1 + $0x968] ss:$16 sps:$4 sm:$0xff]  }
 0x18f   :  { %3727 = vmatpush1.bf16.msra.mxu0 %v5034_v35  ;;  %v5091_v35 = vld [vmem:[%s6990_s1 + $0xb68] ss:$16 sps:$4 sm:$0xff]  }
 0x190   :  { %3770 = vmatpush1.bf16.msra.mxu1 %v5037_v39  ;;  %3728 = vmatprep.subr.bf16.mxu0 %v5042_v40  ;;  %v5096_v39 = vld [vmem:[%s6990_s1 + $0x94c] ss:$16 sps:$4 sm:$0xff]  }
 0x191   :  { %3771 = vmatprep.subr.bf16.mxu1 %v5045_v42  ;;  %v5099_v40 = vld [vmem:[%s6990_s1 + $0xb4c] ss:$16 sps:$4 sm:$0xff]   ;;  %v3239_v42 = vadd.f32 %v6618_v60, %v547_v20  ;;  %v3243_v60 = vadd.f32 %v6650_v47, %v547_v20 }
 0x193   :  { %3729 = vmatpush1.bf16.msra.mxu0 %v5040_v45  ;;  %v3330_v45 = vpop.f32.mrf.mxu0 }
 0x194   :  { %3772 = vmatpush1.bf16.msra.mxu1 %v5043_v51  ;;  %3730 = vmatprep.subr.bf16.mxu0 %v5048_v28  ;;  %v3373_v51 = vpop.f32.mrf.mxu1  ;;  %v3241_v28 = vadd.f32 %v6634_v2, %v551_v38  ;;  %v5103_v2 = vld [vmem:[%s6990_s1 + $0xb28] ss:$16 sps:$4 sm:$0xff]  }
 0x195   :  { %3773 = vmatprep.subr.bf16.mxu1 %v5051_v29  ;;  %v5094_v29 = vld [vmem:[%s6990_s1 + $0x948] ss:$16 sps:$4 sm:$0xff]  }
 0x197   :  { %3731 = vmatpush1.bf16.msra.mxu0 %v5046_v52  ;;  %v5097_v52 = vld [vmem:[%s6990_s1 + $0xb48] ss:$16 sps:$4 sm:$0xff]  }
 0x198   :  { %3774 = vmatpush1.bf16.msra.mxu1 %v5049_v54  ;;  %3732 = vmatprep.subr.bf16.mxu0 %v5054_v56  ;;  %v3410_v54 = vpop.f32.mrf.mxu0  ;;  %v3453_v56 = vpop.f32.mrf.mxu1 }
 0x199   :  { %3775 = vmatprep.subr.bf16.mxu1 %v5057_v57  ;;  %v5102_v57 = vld [vmem:[%s6990_s1 + $0x92c] ss:$16 sps:$4 sm:$0xff]  }
 0x19b   :  { %3733 = vmatpush1.bf16.msra.mxu0 %v5052_v58  ;;  %v5105_v58 = vld [vmem:[%s6990_s1 + $0xb2c] ss:$16 sps:$4 sm:$0xff]  }
 0x19c   :  { %3776 = vmatpush1.bf16.msra.mxu1 %v5055_v59  ;;  %3734 = vmatprep.subr.bf16.mxu0 %v5060_v62  ;;  %v3282_v59 = vadd.f32 %v6620_v61, %v3239_v42  ;;  %v3284_v62 = vadd.f32 %v6636_v3, %v3241_v28  ;;  %v5108_v61 = vld [vmem:[%s6990_s1 + $0x90c] ss:$16 sps:$4 sm:$0xff]  }
 0x19d   :  { %3777 = vmatprep.subr.bf16.mxu1 %v5063_v63  ;;  %v3245_v63 = vadd.f32 %v3244_v53, %v551_v38  ;;  %v5111_v3 = vld [vmem:[%s6990_s1 + $0xb0c] ss:$16 sps:$4 sm:$0xff]   ;;  %v5118_v38 = vld [vmem:[%s6990_s1 + $0xcc8] ss:$16 sps:$4 sm:$0xff]  }
 0x19f   :  { %3735 = vmatpush1.bf16.msra.mxu0 %v5058_v0  ;;  %v3325_v0 = vadd.f32 %v3324_v18, %v3282_v59  ;;  %v3288_v47 = vadd.f32 %v6666_v55, %v3245_v63  ;;  %v5117_v55 = vld [vmem:[%s6990_s1 + $0xeec] ss:$16 sps:$4 sm:$0xff]  }
 0x1a0   :  { %3778 = vmatpush1.bf16.msra.mxu1 %v5061_v1  ;;  %3736 = vmatprep.subr.bf16.mxu0 %v5066_v6  ;;  %v5100_v1 = vld [vmem:[%s6990_s1 + $0x928] ss:$16 sps:$4 sm:$0xff]   ;;  %v3412_v6 = vpop.f32.mrf.mxu0 }
 0x1a1   :  { %3779 = vmatprep.subr.bf16.mxu1 %v5069_v7  ;;  %v3455_v7 = vpop.f32.mrf.mxu1 }
 0x1a3   :  { %3737 = vmatpush2.bf16.msra.mxu0 %v5064_v44  ;;  %v3286_v44 = vadd.f32 %v6652_v50, %v3243_v60  ;;  %v3457_v53 = vpop.f32.mrf.mxu1  ;;  %v5114_v50 = vld [vmem:[%s6990_s1 + $0xcec] ss:$16 sps:$4 sm:$0xff]  }
 0x1a4   :  { %3780 = vmatpush2.bf16.msra.mxu1 %v5067_v46  ;;  %3738 = vmatprep.subr.bf16.mxu0 %v5072_v10  ;;  %v3327_v46 = vadd.f32 %v3326_v26, %v3284_v62  ;;  %v3368_v10 = vadd.f32 %v6676_v19, %v3325_v0  ;;  %v5120_v26 = vld [vmem:[%s6990_s1 + $0xccc] ss:$16 sps:$4 sm:$0xff]  }
 0x1a5   :  { %3781 = vmatprep.subr.bf16.mxu1 %v5075_v11  ;;  %v3329_v11 = vadd.f32 %v3328_v21, %v3286_v44  ;;  %v3459_v8 = vpop.f32.mrf.mxu1 }
 0x1a6   :  { %v3411_v18 = vadd.f32 %v3410_v54, %v3368_v10  ;;  %v5144_v10 = vld [vmem:[%s6990_s1 + $0xc4c] ss:$16 sps:$4 sm:$0xff]  }
 0x1a7   :  { %3739 = vmatpush2.bf16.msra.mxu0 %v5070_v13  ;;  %v5109_v13 = vld [vmem:[%s6990_s1 + $0xb08] ss:$16 sps:$4 sm:$0xff]   ;;  %v3372_v19 = vadd.f32 %v3371_v37, %v3329_v11  ;;  %v5147_v11 = vld [vmem:[%s6990_s1 + $0xe4c] ss:$16 sps:$4 sm:$0xff]  }
 0x1a8   :  { %3782 = vmatpush2.bf16.msra.mxu1 %v5073_v14  ;;  %3740 = vmatprep.subr.bf16.mxu0 %v5078_v15  ;;  %v3414_v14 = vpop.f32.mrf.mxu0  ;;  %v3370_v15 = vadd.f32 %v6696_v41, %v3327_v46  ;;  %v5123_v41 = vld [vmem:[%s6990_s1 + $0xecc] ss:$16 sps:$4 sm:$0xff]   ;;  %v5136_v46 = vld [vmem:[%s6990_s1 + $0xc68] ss:$16 sps:$4 sm:$0xff]  }
 0x1a9   :  { %3783 = vmatprep.subr.bf16.mxu1 %v5081_v16  ;;  %v3331_v16 = vadd.f32 %v3330_v45, %v3288_v47  ;;  %v5139_v47 = vld [vmem:[%s6990_s1 + $0xe68] ss:$16 sps:$4 sm:$0xff]  }
 0x1ab   :  { %3741 = vmatpush2.bf16.msra.mxu0 %v5076_v22  ;;  %v3413_v22 = vadd.f32 %v3412_v6, %v3370_v15  ;;  %v3374_v43 = vadd.f32 %v3373_v51, %v3331_v16  ;;  %v5130_v6 = vld [vmem:[%s6990_s1 + $0xc88] ss:$16 sps:$4 sm:$0xff]   ;;  %v5156_v15 = vld [vmem:[%s6990_s1 + $0xc0c] ss:$16 sps:$4 sm:$0xff]  }
 0x1ac   :  { %3784 = vmatpush2.bf16.msra.mxu1 %v5079_v23  ;;  %3742 = vmatprep.subr.bf16.mxu0 %v5084_v24  ;;  %v5112_v23 = vld [vmem:[%s6990_s1 + $0xce8] ss:$16 sps:$4 sm:$0xff]   ;;  %v5159_v16 = vld [vmem:[%s6990_s1 + $0xe0c] ss:$16 sps:$4 sm:$0xff]  }
 0x1ad   :  { %3785 = vmatprep.subr.bf16.mxu1 %v5087_v25  ;;  %v5115_v24 = vld [vmem:[%s6990_s1 + $0xee8] ss:$16 sps:$4 sm:$0xff]   ;;  %v3416_v25 = vpop.f32.mrf.mxu0  ;;  %v3456_v20 = vadd.f32 %v3455_v7, %v3413_v22  ;;  %v5162_v22 = vld [vmem:[%s6990_s1 + $0xdec] ss:$16 sps:$4 sm:$0xff]  }
 0x1ae   :  { %v3417_v21 = vadd.f32 %v3416_v25, %v3374_v43  ;;  %v5133_v7 = vld [vmem:[%s6990_s1 + $0xe88] ss:$16 sps:$4 sm:$0xff]  }
 0x1af   :  { %3743 = vmatpush2.bf16.msra.mxu0 %v5082_v27  ;;  %v3454_v27 = vadd.f32 %v3453_v56, %v3411_v18  ;;  %v5154_v18 = vld [vmem:[%s6990_s1 + $0xc08] ss:$16 sps:$4 sm:$0xff]  }
 0x1b0   :  { %3786 = vmatpush2.bf16.msra.mxu1 %v5085_v32  ;;  %3744 = vmatprep.subr.bf16.mxu0 %v5090_v34  ;;  %v3415_v32 = vadd.f32 %v3414_v14, %v3372_v19  ;;  %v5150_v14 = vld [vmem:[%s6990_s1 + $0xc2c] ss:$16 sps:$4 sm:$0xff]   ;;  %v5157_v19 = vld [vmem:[%s6990_s1 + $0xe08] ss:$16 sps:$4 sm:$0xff]  }
 0x1b1   :  { %3787 = vmatprep.subr.bf16.mxu1 %v5093_v36  ;;  %v5163_v25 = vld [vmem:[%s6990_s1 + $0xfe8] ss:$16 sps:$4 sm:$0xff]  }
 0x1b2   :  { %v5169_v43 = vld [vmem:[%s6990_s1 + $0xfc8] ss:$16 sps:$4 sm:$0xff]  }
 0x1b3   :  { %3745 = vmatpush2.bf16.msra.mxu0 %v5088_v33  ;;  %v5121_v33 = vld [vmem:[%s6990_s1 + $0xec8] ss:$16 sps:$4 sm:$0xff]  }
 0x1b4   :  { %3788 = vmatpush2.bf16.msra.mxu1 %v5091_v35  ;;  %3746 = vmatprep.subr.bf16.mxu0 %v5096_v39 }
 0x1b5   :  { %3789 = vmatprep.subr.bf16.mxu1 %v5099_v40  ;;  %v3458_v40 = vadd.f32 %v3457_v53, %v3415_v32  ;;  %v5153_v53 = vld [vmem:[%s6990_s1 + $0xe2c] ss:$16 sps:$4 sm:$0xff]  }
 0x1b6   :  { %v5177_v32 = vld [vmem:[%s6990_s1 + $0xfac] ss:$16 sps:$4 sm:$0xff]  }
 0x1b7   :  { %3747 = vmatpush2.bf16.msra.mxu0 %v5094_v29  ;;  %v3460_v29 = vadd.f32 %v3459_v8, %v3417_v21  ;;  %v5168_v8 = vld [vmem:[%s6990_s1 + $0xdcc] ss:$16 sps:$4 sm:$0xff]  }
 0x1b8   :  { %3790 = vmatpush2.bf16.msra.mxu1 %v5097_v52  ;;  %3748 = vmatprep.subr.bf16.mxu0 %v5102_v57  ;;  %v5124_v57 = vld [vmem:[%s6990_s1 + $0xca8] ss:$16 sps:$4 sm:$0xff]   ;;  %v5183_v21 = vld [vmem:[%s6990_s1 + $0xf8c] ss:$16 sps:$4 sm:$0xff]  }
 0x1b9   :  { %3791 = vmatprep.subr.bf16.mxu1 %v5105_v58  ;;  %v5127_v58 = vld [vmem:[%s6990_s1 + $0xea8] ss:$16 sps:$4 sm:$0xff]  }
 0x1bb   :  { %3749 = vmatpush2.bf16.msra.mxu0 %v5100_v1 }
 0x1bc   :  { %3792 = vmatpush2.bf16.msra.mxu1 %v5103_v2  ;;  %3750 = vmatprep.subr.bf16.mxu0 %v5108_v61  ;;  %v5138_v61 = vld [vmem:[%s6990_s1 + $0xc6c] ss:$16 sps:$4 sm:$0xff]  }
 0x1bd   :  { %3793 = vmatprep.subr.bf16.mxu1 %v5111_v3  ;;  %v5141_v3 = vld [vmem:[%s6990_s1 + $0xe6c] ss:$16 sps:$4 sm:$0xff]  }
 0x1bf   :  { %3751 = vmatpush2.bf16.msra.mxu0 %v5106_v12  ;;  %v5142_v12 = vld [vmem:[%s6990_s1 + $0xc48] ss:$16 sps:$4 sm:$0xff]  }
 0x1c0   :  { %3794 = vmatpush2.bf16.msra.mxu1 %v5109_v13  ;;  %3806 = vmatprep.subr.bf16.mxu0 %v5114_v50  ;;  %v5145_v13 = vld [vmem:[%s6990_s1 + $0xe48] ss:$16 sps:$4 sm:$0xff]  }
 0x1c1   :  { %3849 = vmatprep.subr.bf16.mxu1 %v5117_v55  ;;  %v5148_v50 = vld [vmem:[%s6990_s1 + $0xc28] ss:$16 sps:$4 sm:$0xff]  }
 0x1c2   :  { %v3496_v34 = vpop.f32.mrf.mxu0  ;;  %3753 = vmatmul.mubr.bf16.vlgmr.msra.gmra.mxu0 %v5924_v48  ;;  %v5126_v48 = vld [vmem:[%s6990_s1 + $0xcac] ss:$16 sps:$4 sm:$0xff]   ;;  %v5151_v55 = vld [vmem:[%s6990_s1 + $0xe28] ss:$16 sps:$4 sm:$0xff]  }
 0x1c3   :  { %v3539_v36 = vpop.f32.mrf.mxu1  ;;  %3796 = vmatmul.mubr.bf16.vlgmr.msra.gmra.mxu1 %v5928_v49  ;;  %v3497_v37 = vadd.f32 %v3496_v34, %v3454_v27  ;;  %3807 = vmatpush1.bf16.msra.mxu0 %v5112_v23  ;;  %v5129_v49 = vld [vmem:[%s6990_s1 + $0xeac] ss:$16 sps:$4 sm:$0xff]   ;;  %v5172_v34 = vld [vmem:[%s6990_s1 + $0xda8] ss:$16 sps:$4 sm:$0xff]  }
 0x1c4   :  { %3850 = vmatpush1.bf16.msra.mxu1 %v5115_v24  ;;  %v3498_v35 = vpop.f32.mrf.mxu0  ;;  %3808 = vmatprep.subr.bf16.mxu0 %v5120_v26  ;;  %v5165_v23 = vld [vmem:[%s6990_s1 + $0xfec] ss:$16 sps:$4 sm:$0xff]   ;;  %v5160_v24 = vld [vmem:[%s6990_s1 + $0xde8] ss:$16 sps:$4 sm:$0xff]  }
 0x1c5   :  { %v3541_v39 = vpop.f32.mrf.mxu1  ;;  %3851 = vmatprep.subr.bf16.mxu1 %v5123_v41  ;;  %v3540_v42 = vadd.f32 %v3539_v36, %v3497_v37  ;;  %v3499_v45 = vadd.f32 %v3498_v35, %v3456_v20  ;;  %3838 = vmatprep.mubr.bf16.mxu0 %v5946_v30  ;;  %v5132_v30 = vld [vmem:[%s6990_s1 + $0xc8c] ss:$16 sps:$4 sm:$0xff]   ;;  %v5166_v41 = vld [vmem:[%s6990_s1 + $0xdc8] ss:$16 sps:$4 sm:$0xff]  }
 0x1c6   :  { %3881 = vmatprep.mubr.bf16.mxu1 %v5950_v31  ;;  %v3500_v51 = vpop.f32.mrf.mxu0  ;;  %v5135_v31 = vld [vmem:[%s6990_s1 + $0xe8c] ss:$16 sps:$4 sm:$0xff]   ;;  %v5175_v36 = vld [vmem:[%s6990_s1 + $0xfa8] ss:$16 sps:$4 sm:$0xff]  }
 0x1c7   :  { %v3543_v28 = vpop.f32.mrf.mxu1  ;;  %v3892_v52 = vmax.f32 %v3540_v42, 0.0  ;;  %v3542_v54 = vadd.f32 %v3541_v39, %v3499_v45  ;;  %v3501_v56 = vadd.f32 %v3500_v51, %v3458_v40  ;;  %3809 = vmatpush1.bf16.msra.mxu0 %v5118_v38  ;;  %v5171_v26 = vld [vmem:[%s6990_s1 + $0xfcc] ss:$16 sps:$4 sm:$0xff]   ;;  %v5178_v37 = vld [vmem:[%s6990_s1 + $0xd88] ss:$16 sps:$4 sm:$0xff]  }
 0x1c8   :  { %3852 = vmatpush1.bf16.msra.mxu1 %v5121_v33  ;;  %v3502_v59 = vpop.f32.mrf.mxu0  ;;  %3810 = vmatprep.subr.bf16.mxu0 %v5126_v48  ;;  %v5174_v27 = vld [vmem:[%s6990_s1 + $0xdac] ss:$16 sps:$4 sm:$0xff]   ;;  %v5181_v38 = vld [vmem:[%s6990_s1 + $0xf88] ss:$16 sps:$4 sm:$0xff]  }
 0x1c9   :  { %3853 = vmatprep.subr.bf16.mxu1 %v5129_v49  ;;  %3900 = vst [vmem:[%s6993_s3] sm:$0xff] %v3892_v52  ;;  %v3893_v60 = vmax.f32 %v3542_v54, 0.0  ;;  %v3544_v62 = vadd.f32 %v3543_v28, %v3501_v56  ;;  %v3503_v63 = vadd.f32 %v3502_v59, %v3460_v29  ;;  %v3545_v0 = vpop.f32.mrf.mxu1  ;;  %v5180_v20 = vld [vmem:[%s6990_s1 + $0xd8c] ss:$16 sps:$4 sm:$0xff]   ;;  %v5184_v39 = vld [vmem:[%s6990_s1 + $0xd68] ss:$16 sps:$4 sm:$0xff]  }
 0x1ca   :  { %v5186_v33 = vld [vmem:[%s6990_s1 + $0xd6c] ss:$16 sps:$4 sm:$0xff]   ;;  %v5187_v48 = vld [vmem:[%s6990_s1 + $0xf68] ss:$16 sps:$4 sm:$0xff]  }
 0x1cb   :  { %3901 = vst [vmem:[%s6993_s3 + $0x8] sm:$0xff] %v3893_v60  ;;  %v3896_v1 = vmax.f32 %v3544_v62, 0.0  ;;  %v3546_v2 = vadd.f32 %v3545_v0, %v3503_v63  ;;  %3811 = vmatpush1.bf16.msra.mxu0 %v5124_v57  ;;  %v5189_v35 = vld [vmem:[%s6990_s1 + $0xf6c] ss:$16 sps:$4 sm:$0xff]   ;;  %v5190_v42 = vld [vmem:[%s6990_s1 + $0xd48] ss:$16 sps:$4 sm:$0xff]  }
 0x1cc   :  { %3854 = vmatpush1.bf16.msra.mxu1 %v5127_v58  ;;  %3812 = vmatprep.subr.bf16.mxu0 %v5132_v30  ;;  %v5192_v49 = vld [vmem:[%s6990_s1 + $0xd4c] ss:$16 sps:$4 sm:$0xff]   ;;  %v5193_v45 = vld [vmem:[%s6990_s1 + $0xf48] ss:$16 sps:$4 sm:$0xff]  }
 0x1cd   :  { %3855 = vmatprep.subr.bf16.mxu1 %v5135_v31  ;;  %3904 = vst [vmem:[%s6993_s3 + $0x20] sm:$0xff] %v3896_v1  ;;  %v3897_v44 = vmax.f32 %v3546_v2, 0.0  ;;  %v5195_v40 = vld [vmem:[%s6990_s1 + $0xf4c] ss:$16 sps:$4 sm:$0xff]   ;;  %v5196_v29 = vld [vmem:[%s6990_s1 + $0xd28] ss:$16 sps:$4 sm:$0xff]  }
 0x1ce   :  { %v5198_v51 = vld [vmem:[%s6990_s1 + $0xd2c] ss:$16 sps:$4 sm:$0xff]   ;;  %v5199_v52 = vld [vmem:[%s6990_s1 + $0xf28] ss:$16 sps:$4 sm:$0xff]  }
 0x1cf   :  { %3905 = vst [vmem:[%s6993_s3 + $0x28] sm:$0xff] %v3897_v44  ;;  %3813 = vmatpush1.bf16.msra.mxu0 %v5130_v6  ;;  %v5201_v28 = vld [vmem:[%s6990_s1 + $0xf2c] ss:$16 sps:$4 sm:$0xff]   ;;  %v5202_v57 = vld [vmem:[%s6990_s1 + $0xd08] ss:$16 sps:$4 sm:$0xff]   ;;  %v558_v44 = vsub.s32 3, %v6674_v17 }
 0x1d0   :  { %3856 = vmatpush1.bf16.msra.mxu1 %v5133_v7  ;;  %3814 = vmatprep.subr.bf16.mxu0 %v5138_v61  ;;  %v5204_v54 = vld [vmem:[%s6990_s1 + $0xd0c] ss:$16 sps:$4 sm:$0xff]   ;;  %v5205_v58 = vld [vmem:[%s6990_s1 + $0xf08] ss:$16 sps:$4 sm:$0xff]   ;;  %v554_v7 = vsub.s32 2, %v6674_v17 }
 0x1d1   :  { %3857 = vmatprep.subr.bf16.mxu1 %v5141_v3  ;;  %v5207_v56 = vld [vmem:[%s6990_s1 + $0xf0c] ss:$16 sps:$4 sm:$0xff]  }
 0x1d3   :  { %3815 = vmatpush1.bf16.msra.mxu0 %v5136_v46 }
 0x1d4   :  { %3858 = vmatpush1.bf16.msra.mxu1 %v5139_v47  ;;  %3816 = vmatprep.subr.bf16.mxu0 %v5144_v10  ;;  %v559_v47 = vrot.slane %v6694_v9, %v558_v44 }
 0x1d5   :  { %3859 = vmatprep.subr.bf16.mxu1 %v5147_v11 }
 0x1d7   :  { %3817 = vmatpush1.bf16.msra.mxu0 %v5142_v12 }
 0x1d8   :  { %3860 = vmatpush1.bf16.msra.mxu1 %v5145_v13  ;;  %3818 = vmatprep.subr.bf16.mxu0 %v5150_v14 }
 0x1d9   :  { %3861 = vmatprep.subr.bf16.mxu1 %v5153_v53 }
 0x1db   :  { %3819 = vmatpush1.bf16.msra.mxu0 %v5148_v50 }
 0x1dc   :  { %3862 = vmatpush1.bf16.msra.mxu1 %v5151_v55  ;;  %3820 = vmatprep.subr.bf16.mxu0 %v5156_v15 }
 0x1dd   :  { %3863 = vmatprep.subr.bf16.mxu1 %v5159_v16 }
 0x1df   :  { %3821 = vmatpush1.bf16.msra.mxu0 %v5154_v18 }
 0x1e0   :  { %3864 = vmatpush1.bf16.msra.mxu1 %v5157_v19  ;;  %3822 = vmatprep.subr.bf16.mxu0 %v5162_v22 }
 0x1e1   :  { %3865 = vmatprep.subr.bf16.mxu1 %v5165_v23 }
 0x1e3   :  { %3823 = vmatpush2.bf16.msra.mxu0 %v5160_v24 }
 0x1e4   :  { %3866 = vmatpush2.bf16.msra.mxu1 %v5163_v25  ;;  %3824 = vmatprep.subr.bf16.mxu0 %v5168_v8 }
 0x1e5   :  { %3867 = vmatprep.subr.bf16.mxu1 %v5171_v26 }
 0x1e7   :  { %3825 = vmatpush2.bf16.msra.mxu0 %v5166_v41 }
 0x1e8   :  { %3868 = vmatpush2.bf16.msra.mxu1 %v5169_v43  ;;  %3826 = vmatprep.subr.bf16.mxu0 %v5174_v27 }
 0x1e9   :  { %3869 = vmatprep.subr.bf16.mxu1 %v5177_v32 }
 0x1eb   :  { %3827 = vmatpush2.bf16.msra.mxu0 %v5172_v34 }
 0x1ec   :  { %3870 = vmatpush2.bf16.msra.mxu1 %v5175_v36  ;;  %3828 = vmatprep.subr.bf16.mxu0 %v5180_v20 }
 0x1ed   :  { %3871 = vmatprep.subr.bf16.mxu1 %v5183_v21 }
 0x1ef   :  { %3829 = vmatpush2.bf16.msra.mxu0 %v5178_v37 }
 0x1f0   :  { %3872 = vmatpush2.bf16.msra.mxu1 %v5181_v38  ;;  %3830 = vmatprep.subr.bf16.mxu0 %v5186_v33 }
 0x1f1   :  { %3873 = vmatprep.subr.bf16.mxu1 %v5189_v35 }
 0x1f3   :  { %3831 = vmatpush2.bf16.msra.mxu0 %v5184_v39 }
 0x1f4   :  { %3874 = vmatpush2.bf16.msra.mxu1 %v5187_v48  ;;  %3832 = vmatprep.subr.bf16.mxu0 %v5192_v49 }
 0x1f5   :  { %3875 = vmatprep.subr.bf16.mxu1 %v5195_v40 }
 0x1f7   :  { %3833 = vmatpush2.bf16.msra.mxu0 %v5190_v42 }
 0x1f8   :  { %3876 = vmatpush2.bf16.msra.mxu1 %v5193_v45  ;;  %3834 = vmatprep.subr.bf16.mxu0 %v5198_v51 }
 0x1f9   :  { %3877 = vmatprep.subr.bf16.mxu1 %v5201_v28 }
 0x1fb   :  { %3835 = vmatpush2.bf16.msra.mxu0 %v5196_v29 }
 0x1fc   :  { %3878 = vmatpush2.bf16.msra.mxu1 %v5199_v52  ;;  %3836 = vmatprep.subr.bf16.mxu0 %v5204_v54 }
 0x1fd   :  { %3879 = vmatprep.subr.bf16.mxu1 %v5207_v56 }
 0x1ff   :  { %3837 = vmatpush2.bf16.msra.mxu0 %v5202_v57 }
 0x200   :  { %3880 = vmatpush2.bf16.msra.mxu1 %v5205_v58 }
 0x202   :  { %3839 = vmatmul.mubr.bf16.vlgmr.msra.gmra.mxu0 %v6138_v4  ;;  %v3582_v59 = vpop.f32.mrf.mxu0  ;;  %v555_v4 = vrot.slane %v6694_v9, %v554_v7 }
 0x203   :  { %3882 = vmatmul.mubr.bf16.vlgmr.msra.gmra.mxu1 %v6142_v5  ;;  %v3625_v30 = vpop.f32.mrf.mxu1 }
 0x204   :  { %v3584_v31 = vpop.f32.mrf.mxu0  ;;  %v3583_v10 = vadd.f32 %v3582_v59, %v555_v4 }
 0x205   :  { %v3627_v60 = vpop.f32.mrf.mxu1  ;;  %v3585_v13 = vadd.f32 %v3584_v31, %v559_v47 }
 0x206   :  { %v3586_v62 = vpop.f32.mrf.mxu0  ;;  %v3626_v50 = vadd.f32 %v3625_v30, %v3583_v10 }
 0x207   :  { %v3629_v63 = vpop.f32.mrf.mxu1  ;;  %v3587_v55 = vadd.f32 %v3586_v62, %v555_v4  ;;  %v3628_v15 = vadd.f32 %v3627_v60, %v3585_v13 }
 0x208   :  { %v3588_v0 = vpop.f32.mrf.mxu0 }
 0x209   :  { %v3631_v1 = vpop.f32.mrf.mxu1  ;;  %v3589_v16 = vadd.f32 %v3588_v0, %v559_v47  ;;  %v3630_v17 = vadd.f32 %v3629_v63, %v3587_v55 }
 0x20b   :  { %v3632_v24 = vadd.f32 %v3631_v1, %v3589_v16 }
 0x242   :  { %v3668_v2 = vpop.f32.mrf.mxu0 }
 0x243   :  { %v3711_v6 = vpop.f32.mrf.mxu1  ;;  %v3669_v18 = vadd.f32 %v3668_v2, %v3626_v50 }
 0x244   :  { %v3670_v61 = vpop.f32.mrf.mxu0 }
 0x245   :  { %v3713_v3 = vpop.f32.mrf.mxu1  ;;  %v3671_v23 = vadd.f32 %v3670_v61, %v3628_v15  ;;  %v3712_v25 = vadd.f32 %v3711_v6, %v3669_v18 }
 0x246   :  { %v3672_v46 = vpop.f32.mrf.mxu0 }
 0x247   :  { %v3715_v5 = vpop.f32.mrf.mxu1  ;;  %v3673_v8 = vadd.f32 %v3672_v46, %v3630_v17  ;;  %v3714_v41 = vadd.f32 %v3713_v3, %v3671_v23 }
 0x248   :  { %v3674_v11 = vpop.f32.mrf.mxu0 }
 0x249   :  { %v3717_v12 = vpop.f32.mrf.mxu1  ;;  %v3675_v43 = vadd.f32 %v3674_v11, %v3632_v24  ;;  %v3716_v32 = vadd.f32 %v3715_v5, %v3673_v8 }
 0x24b   :  { %v3718_v21 = vadd.f32 %v3717_v12, %v3675_v43 }
 0x282   :  { %v3754_v14 = vpop.f32.mrf.mxu0 }
 0x283   :  { %v3797_v53 = vpop.f32.mrf.mxu1  ;;  %v3755_v27 = vadd.f32 %v3754_v14, %v3712_v25 }
 0x284   :  { %v3756_v19 = vpop.f32.mrf.mxu0 }
 0x285   :  { %v3799_v22 = vpop.f32.mrf.mxu1  ;;  %v3757_v34 = vadd.f32 %v3756_v19, %v3714_v41  ;;  %v3798_v37 = vadd.f32 %v3797_v53, %v3755_v27 }
 0x286   :  { %v3758_v26 = vpop.f32.mrf.mxu0 }
 0x287   :  { %v3801_v9 = vpop.f32.mrf.mxu1  ;;  %v3759_v38 = vadd.f32 %v3758_v26, %v3716_v32  ;;  %v3800_v39 = vadd.f32 %v3799_v22, %v3757_v34 }
 0x288   :  { %v3760_v36 = vpop.f32.mrf.mxu0 }
 0x289   :  { %v3803_v20 = vpop.f32.mrf.mxu1  ;;  %v3761_v48 = vadd.f32 %v3760_v36, %v3718_v21  ;;  %v3802_v45 = vadd.f32 %v3801_v9, %v3759_v38 }
 0x28b   :  { %v3804_v54 = vadd.f32 %v3803_v20, %v3761_v48 }
 0x2c2   :  { %v3840_v33 = vpop.f32.mrf.mxu0 }
 0x2c3   :  { %v3883_v35 = vpop.f32.mrf.mxu1  ;;  %v3841_v49 = vadd.f32 %v3840_v33, %v3798_v37 }
 0x2c4   :  { %v3842_v40 = vpop.f32.mrf.mxu0 }
 0x2c5   :  { %v3885_v42 = vpop.f32.mrf.mxu1  ;;  %v3884_v51 = vadd.f32 %v3883_v35, %v3841_v49  ;;  %v3843_v28 = vadd.f32 %v3842_v40, %v3800_v39 }
 0x2c6   :  { %v3844_v29 = vpop.f32.mrf.mxu0 }
 0x2c7   :  { %v3887_v52 = vpop.f32.mrf.mxu1  ;;  %v3894_v56 = vmax.f32 %v3884_v51, 0.0  ;;  %v3886_v57 = vadd.f32 %v3885_v42, %v3843_v28  ;;  %v3845_v58 = vadd.f32 %v3844_v29, %v3802_v45 }
 0x2c8   :  { %v3846_v59 = vpop.f32.mrf.mxu0 }
 0x2c9   :  { %3902 = vst [vmem:[%s6993_s3 + $0x10] sm:$0xff] %v3894_v56  ;;  %v3895_v30 = vmax.f32 %v3886_v57, 0.0  ;;  %v3888_v31 = vadd.f32 %v3887_v52, %v3845_v58  ;;  %v3847_v60 = vadd.f32 %v3846_v59, %v3804_v54  ;;  %v3889_v62 = vpop.f32.mrf.mxu1 }
 0x2cb   :  { %3903 = vst [vmem:[%s6993_s3 + $0x18] sm:$0xff] %v3895_v30  ;;  %v3898_v63 = vmax.f32 %v3888_v31, 0.0  ;;  %v3890_v0 = vadd.f32 %v3889_v62, %v3847_v60 }
 0x2cd   :  { %3906 = vst [vmem:[%s6993_s3 + $0x30] sm:$0xff] %v3898_v63  ;;  %v3899_v1 = vmax.f32 %v3890_v0, 0.0 }
 0x2cf   :  { %3907 = vst [vmem:[%s6993_s3 + $0x38] sm:$0xff] %v3899_v1 }

</bundles_post_ra>
